<compile_context>
chip_gen: v5e
topology: v5e:2x2
jax: 0.10.0
libtpu: 0.0.40
codegen_flags: <defaults>
</compile_context>

<pallas_src>
import jax
import jax.numpy as jnp
from jax.experimental import pallas as pl
from jax.experimental.pallas import tpu as pltpu

# --- model hyper-parameters (consistent with the module's usage at small scale) ---
D_MODEL  = 32
NHEAD    = 4
HEAD_DIM = D_MODEL // NHEAD
FF       = 64          # dim_feedforward
N_ENC    = 2           # num_encoder_layers
N_DEC    = 2           # num_decoder_layers
LN_EPS   = 1e-5        # torch LayerNorm default
LANES    = 128         # lane width; slabs are padded to this

ENC_W_ROWS = 3 * D_MODEL + FF   # 160: [w_qkv | wo | w1 | w2]
DEC_W_ROWS = 5 * D_MODEL + FF   # 224: [sa_wqkv | sa_wo | ca_wqkv | ca_wo | w1 | w2]
ENC_V_ROWS = 8                  # b_qkv, bo, b1, b2, ln1w, ln1b, ln2w, ln2b
DEC_V_ROWS = 16                 # 12 used rows + 4 zero pad


# ---------------------------------------------------------------------------
# shared math helpers (pure jnp; used inside the Pallas kernel AND in the
# plain-JAX reference so numerical parity is structural)
# ---------------------------------------------------------------------------
def _layernorm(x, w, b):
    mu  = jnp.mean(x, axis=-1, keepdims=True)
    var = jnp.mean((x - mu) ** 2, axis=-1, keepdims=True)
    return (x - mu) * jax.lax.rsqrt(var + LN_EPS) * w + b


def _mha(q_in, k_in, v_in, w_qkv, b_qkv, wo, bo):
    """Multi-head attention (dropout=0, no masks).

    q_in:(Lq,D) k_in:(Lk,D) v_in:(Lk,D); w_qkv:(D,3D); b_qkv:(1,3D);
    wo:(D,D) stored (in,out); bo:(1,D).
    Output projection is folded into the head loop so no concat of narrow
    (L, HEAD_DIM) pieces is needed; the 1/sqrt(head_dim) scale is folded into q.
    """
    d = D_MODEL
    scale = 1.0 / (HEAD_DIM ** 0.5)
    q = (jnp.dot(q_in, w_qkv[:, 0:d], preferred_element_type=jnp.float32) + b_qkv[:, 0:d]) * scale
    k = jnp.dot(k_in, w_qkv[:, d:2 * d], preferred_element_type=jnp.float32) + b_qkv[:, d:2 * d]
    v = jnp.dot(v_in, w_qkv[:, 2 * d:3 * d], preferred_element_type=jnp.float32) + b_qkv[:, 2 * d:3 * d]

    acc = None
    for h in range(NHEAD):                      # NHEAD=4, static unrolled
        s = h * HEAD_DIM
        qh = q[:, s:s + HEAD_DIM]
        kh = k[:, s:s + HEAD_DIM]
        vh = v[:, s:s + HEAD_DIM]
        scores = jnp.dot(qh, kh.T, preferred_element_type=jnp.float32)
        scores = scores - jnp.max(scores, axis=-1, keepdims=True)
        p = jnp.exp(scores)
        p = p * (1.0 / jnp.sum(p, axis=-1, keepdims=True))
        ctx = jnp.dot(p, vh, preferred_element_type=jnp.float32)             # (Lq, HEAD_DIM)
        part = jnp.dot(ctx, wo[s:s + HEAD_DIM, :], preferred_element_type=jnp.float32)  # (Lq, D)
        acc = part if acc is None else acc + part
    return acc + bo


def _ffn(x, w1, b1, w2, b2):
    h = jnp.maximum(jnp.dot(x, w1, preferred_element_type=jnp.float32) + b1, 0.0)   # relu
    return jnp.dot(h, w2, preferred_element_type=jnp.float32) + b2


# ---------------------------------------------------------------------------
# the single fused Pallas kernel: grid over batch only, everything else resident
# ---------------------------------------------------------------------------
def _fused_transformer_kernel(x_ref, lat_ref, encW_ref, encV_ref, decW_ref, decV_ref, out_ref):
    d = D_MODEL
    n_enc = encW_ref.shape[0]
    n_dec = decW_ref.shape[0]

    # ---------------- encoder stack ----------------
    x = x_ref[0]                                    # (S, D)
    for li in range(n_enc):
        w_qkv = encW_ref[li, 0 * d:1 * d, 0:3 * d]
        wo    = encW_ref[li, 1 * d:2 * d, 0:d]
        w1    = encW_ref[li, 2 * d:3 * d, 0:FF]
        w2    = encW_ref[li, 3 * d:3 * d + FF, 0:d]
        V = encV_ref[li]                            # (8, 128) — one vreg
        b_qkv = V[0:1, 0:3 * d]
        bo    = V[1:2, 0:d]
        b1    = V[2:3, 0:FF]
        b2    = V[3:4, 0:d]
        # reference module: key = embeded_input.transpose(1, 2) -> per-batch x.T
        attn = _mha(x, x.T, x, w_qkv, b_qkv, wo, bo)
        y = _layernorm(x + attn, V[4:5, 0:d], V[5:6, 0:d])
        ff = _ffn(y, w1, b1, w2, b2)
        x = _layernorm(y + ff, V[6:7, 0:d], V[7:8, 0:d])
    enc = x                                         # encoder output, stays in VMEM/vregs

    # ---------------- decoder stack ----------------
    y = lat_ref[0]                                  # (T, D)
    for li in range(n_dec):
        sa_wqkv = decW_ref[li, 0 * d:1 * d, 0:3 * d]
        sa_wo   = decW_ref[li, 1 * d:2 * d, 0:d]
        ca_wqkv = decW_ref[li, 2 * d:3 * d, 0:3 * d]
        ca_wo   = decW_ref[li, 3 * d:4 * d, 0:d]
        w1      = decW_ref[li, 4 * d:5 * d, 0:FF]
        w2      = decW_ref[li, 5 * d:5 * d + FF, 0:d]
        V = decV_ref[li]                            # (16, 128)
        sa_bqkv = V[0:1, 0:3 * d]
        sa_bo   = V[1:2, 0:d]
        ca_bqkv = V[2:3, 0:3 * d]
        ca_bo   = V[3:4, 0:d]
        b1      = V[4:5, 0:FF]
        b2      = V[5:6, 0:d]

        sa = _mha(y, y, y, sa_wqkv, sa_bqkv, sa_wo, sa_bo)
        z  = _layernorm(y + sa, V[6:7, 0:d], V[7:8, 0:d])
        ca = _mha(z, enc, enc, ca_wqkv, ca_bqkv, ca_wo, ca_bo)
        u  = _layernorm(z + ca, V[8:9, 0:d], V[9:10, 0:d])
        ff = _ffn(u, w1, b1, w2, b2)
        y  = _layernorm(u + ff, V[10:11, 0:d], V[11:12, 0:d])

    out_ref[0] = y.astype(out_ref.dtype)


# ---------------------------------------------------------------------------
# parameter packing: two lane-aligned slabs per layer type
# ---------------------------------------------------------------------------
def _pad_lane(a):
    return jnp.pad(a, ((0, 0), (0, LANES - a.shape[1])))


def pack_encoder_layer(p):
    w_qkv, b_qkv, wo, bo, w1, b1, w2, b2, lnw, lnb = p
    W = jnp.concatenate(
        [_pad_lane(w_qkv), _pad_lane(wo), _pad_lane(w1), _pad_lane(w2)], axis=0)     # (160,128)
    V = jnp.concatenate(
        [_pad_lane(b_qkv), _pad_lane(bo), _pad_lane(b1), _pad_lane(b2),
         _pad_lane(lnw[0:1]), _pad_lane(lnb[0:1]),
         _pad_lane(lnw[1:2]), _pad_lane(lnb[1:2])], axis=0)                           # (8,128)
    return W, V


def pack_decoder_layer(p):
    (sa_wqkv, sa_bqkv, sa_wo, sa_bo, ca_wqkv, ca_bqkv, ca_wo, ca_bo,
     w1, b1, w2, b2, lnw, lnb) = p
    W = jnp.concatenate(
        [_pad_lane(sa_wqkv), _pad_lane(sa_wo), _pad_lane(ca_wqkv), _pad_lane(ca_wo),
         _pad_lane(w1), _pad_lane(w2)], axis=0)                                       # (224,128)
    V = jnp.concatenate(
        [_pad_lane(sa_bqkv), _pad_lane(sa_bo), _pad_lane(ca_bqkv), _pad_lane(ca_bo),
         _pad_lane(b1), _pad_lane(b2),
         _pad_lane(lnw[0:1]), _pad_lane(lnb[0:1]),
         _pad_lane(lnw[1:2]), _pad_lane(lnb[1:2]),
         _pad_lane(lnw[2:3]), _pad_lane(lnb[2:3]),
         jnp.zeros((DEC_V_ROWS - 12, LANES), jnp.float32)], axis=0)                   # (16,128)
    return W, V


# ---------------------------------------------------------------------------
# forward wrapper: ONE pallas_call for the whole model
# ---------------------------------------------------------------------------
@jax.jit
def transformer_forward(embeded_input, embeded_latent, enc_params, dec_params):
    # masks / key_padding_masks are None in this configuration; dropout = 0
    B, S, D = embeded_input.shape
    _, T, _ = embeded_latent.shape

    enc_packed = [pack_encoder_layer(p) for p in enc_params]
    dec_packed = [pack_decoder_layer(p) for p in dec_params]
    enc_W = jnp.stack([w for w, _ in enc_packed])      # (N_ENC, 160, 128)
    enc_V = jnp.stack([v for _, v in enc_packed])      # (N_ENC,   8, 128)
    dec_W = jnp.stack([w for w, _ in dec_packed])      # (N_DEC, 224, 128)
    dec_V = jnp.stack([v for _, v in dec_packed])      # (N_DEC,  16, 128)

    return pl.pallas_call(
        _fused_transformer_kernel,
        out_shape=jax.ShapeDtypeStruct((B, T, D), embeded_input.dtype),
        grid=(B,),
        in_specs=[
            pl.BlockSpec((1, S, D), lambda b: (b, 0, 0)),
            pl.BlockSpec((1, T, D), lambda b: (b, 0, 0)),
            pl.BlockSpec(enc_W.shape, lambda b: (0, 0, 0)),   # weights: constant index_map,
            pl.BlockSpec(enc_V.shape, lambda b: (0, 0, 0)),   # fetched once, reused across grid
            pl.BlockSpec(dec_W.shape, lambda b: (0, 0, 0)),
            pl.BlockSpec(dec_V.shape, lambda b: (0, 0, 0)),
        ],
        out_specs=pl.BlockSpec((1, T, D), lambda b: (b, 0, 0)),
        compiler_params=pltpu.CompilerParams(dimension_semantics=("parallel",)),
    )(embeded_input, embeded_latent, enc_W, enc_V, dec_W, dec_V)


# ---------------------------------------------------------------------------
# deterministic parameter init (xavier-uniform for matrices, like _reset_parameters)
# ---------------------------------------------------------------------------
def _xavier(key, shape):
    lim = (6.0 / (shape[0] + shape[1])) ** 0.5
    return jax.random.uniform(key, shape, jnp.float32, -lim, lim)


def init_encoder_layer(key):
    ks = jax.random.split(key, 6)
    return (
        _xavier(ks[0], (D_MODEL, 3 * D_MODEL)),                             # w_qkv
        jnp.zeros((1, 3 * D_MODEL), jnp.float32),                           # b_qkv
        _xavier(ks[1], (D_MODEL, D_MODEL)),                                 # wo
        jnp.zeros((1, D_MODEL), jnp.float32),                               # bo
        _xavier(ks[2], (D_MODEL, FF)),                                      # w1
        jax.random.uniform(ks[3], (1, FF), jnp.float32, -0.05, 0.05),       # b1
        _xavier(ks[4], (FF, D_MODEL)),                                      # w2
        jax.random.uniform(ks[5], (1, D_MODEL), jnp.float32, -0.05, 0.05),  # b2
        jnp.ones((2, D_MODEL), jnp.float32),                                # ln weights
        jnp.zeros((2, D_MODEL), jnp.float32),                               # ln biases
    )


def init_decoder_layer(key):
    ks = jax.random.split(key, 8)
    return (
        _xavier(ks[0], (D_MODEL, 3 * D_MODEL)),                             # self-attn w_qkv
        jnp.zeros((1, 3 * D_MODEL), jnp.float32),
        _xavier(ks[1], (D_MODEL, D_MODEL)),                                 # self-attn wo
        jnp.zeros((1, D_MODEL), jnp.float32),
        _xavier(ks[2], (D_MODEL, 3 * D_MODEL)),                             # cross-attn w_qkv
        jnp.zeros((1, 3 * D_MODEL), jnp.float32),
        _xavier(ks[3], (D_MODEL, D_MODEL)),                                 # cross-attn wo
        jnp.zeros((1, D_MODEL), jnp.float32),
        _xavier(ks[4], (D_MODEL, FF)),                                      # w1
        jax.random.uniform(ks[5], (1, FF), jnp.float32, -0.05, 0.05),
        _xavier(ks[6], (FF, D_MODEL)),                                      # w2
        jax.random.uniform(ks[7], (1, D_MODEL), jnp.float32, -0.05, 0.05),
        jnp.ones((3, D_MODEL), jnp.float32),                                # ln weights (norm1..3)
        jnp.zeros((3, D_MODEL), jnp.float32),                               # ln biases
    )


# ---------------------------------------------------------------------------
# plain-JAX reference (same math, no Pallas) for a correctness check
# ---------------------------------------------------------------------------
def _ref_encoder_layer(x, p):
    w_qkv, b_qkv, wo, bo, w1, b1, w2, b2, lnw, lnb = p
    def one(xb):
        a = _mha(xb, xb.T, xb, w_qkv, b_qkv, wo, bo)
        y = _layernorm(xb + a, lnw[0:1], lnb[0:1])
        return _layernorm(y + _ffn(y, w1, b1, w2, b2), lnw[1:2], lnb[1:2])
    return jax.vmap(one)(x)


def _ref_decoder_layer(x, enc, p):
    (sa_wqkv, sa_bqkv, sa_wo, sa_bo, ca_wqkv, ca_bqkv, ca_wo, ca_bo,
     w1, b1, w2, b2, lnw, lnb) = p
    def one(xb, eb):
        sa = _mha(xb, xb, xb, sa_wqkv, sa_bqkv, sa_wo, sa_bo)
        y  = _layernorm(xb + sa, lnw[0:1], lnb[0:1])
        ca = _mha(y, eb, eb, ca_wqkv, ca_bqkv, ca_wo, ca_bo)
        z  = _layernorm(y + ca, lnw[1:2], lnb[1:2])
        return _layernorm(z + _ffn(z, w1, b1, w2, b2), lnw[2:3], lnb[2:3])
    return jax.vmap(one)(x, enc)


def _ref_forward(embeded_input, embeded_latent, enc_params, dec_params):
    out = embeded_input
    for p in enc_params:
        out = _ref_encoder_layer(out, p)
    dec = embeded_latent
    for p in dec_params:
        dec = _ref_decoder_layer(dec, out, p)
    return dec


# ---------------------------------------------------------------------------
if __name__ == "__main__":
    B, S_ENC, T_DEC = 2, D_MODEL, 8   # S_ENC must equal d_model (see note at top)

    root = jax.random.PRNGKey(0)
    k_in, k_lat, k_enc, k_dec = jax.random.split(root, 4)

    embeded_input  = jax.random.normal(k_in,  (B, S_ENC, D_MODEL), jnp.float32)
    embeded_latent = jax.random.normal(k_lat, (B, T_DEC, D_MODEL), jnp.float32)

    enc_params = [init_encoder_layer(k) for k in jax.random.split(k_enc, N_ENC)]
    dec_params = [init_decoder_layer(k) for k in jax.random.split(k_dec, N_DEC)]

    out = transformer_forward(embeded_input, embeded_latent, enc_params, dec_params)
    out = jax.block_until_ready(out)

    ref = jax.block_until_ready(_ref_forward(embeded_input, embeded_latent, enc_params, dec_params))
    assert out.shape == (B, T_DEC, D_MODEL)
    assert jnp.allclose(out, ref, atol=1e-4, rtol=1e-4), float(jnp.max(jnp.abs(out - ref)))

    # TODO(synk): attn_mask / key_padding_mask paths are not implemented (they are None
    # in this configuration, matching the reference call with dropout=0).
    print("KERNEL_OK")
</pallas_src>

<mosaic_0001>
module attributes {stable_mosaic.version = 11 : i64} {
  func.func @_fused_transformer_kernel(%arg0: i32, %arg1: memref<1x32x32xf32, #tpu.memory_space<vmem>>, %arg2: memref<1x8x32xf32, #tpu.memory_space<vmem>>, %arg3: memref<2x160x128xf32, #tpu.memory_space<vmem>>, %arg4: memref<2x8x128xf32, #tpu.memory_space<vmem>>, %arg5: memref<2x224x128xf32, #tpu.memory_space<vmem>>, %arg6: memref<2x16x128xf32, #tpu.memory_space<vmem>>, %arg7: memref<1x8x32xf32, #tpu.memory_space<vmem>>) attributes {dimension_semantics = [#tpu.dimension_semantics<parallel>], iteration_bounds = array<i64: 2>, scalar_prefetch = 0 : i64, scratch_operands = 0 : i64, tpu.core_type = #tpu.core_type<tc>, window_params = [{transform_indices = @transform_0, window_bounds = array<i64: 1, 32, 32>}, {transform_indices = @transform_1, window_bounds = array<i64: 1, 8, 32>}, {pipeline_mode = #tpu.pipeline_mode<synchronous>, transform_indices = @transform_2, window_bounds = array<i64: 2, 160, 128>}, {pipeline_mode = #tpu.pipeline_mode<synchronous>, transform_indices = @transform_3, window_bounds = array<i64: 2, 8, 128>}, {pipeline_mode = #tpu.pipeline_mode<synchronous>, transform_indices = @transform_4, window_bounds = array<i64: 2, 224, 128>}, {pipeline_mode = #tpu.pipeline_mode<synchronous>, transform_indices = @transform_5, window_bounds = array<i64: 2, 16, 128>}, {transform_indices = @transform_6, window_bounds = array<i64: 1, 8, 32>}]} {
    %c0 = arith.constant 0 : index
    %c0_0 = arith.constant 0 : index
    %c0_1 = arith.constant 0 : index
    %0 = vector.load %arg1[%c0, %c0_0, %c0_1] : memref<1x32x32xf32, #tpu.memory_space<vmem>>, vector<1x32x32xf32>
    %1 = vector.shape_cast %0 : vector<1x32x32xf32> to vector<32x32xf32>
    %c0_2 = arith.constant 0 : index
    %c0_3 = arith.constant 0 : index
    %c0_4 = arith.constant 0 : index
    %2 = vector.load %arg3[%c0_2, %c0_3, %c0_4] : memref<2x160x128xf32, #tpu.memory_space<vmem>>, vector<1x32x96xf32>
    %3 = vector.shape_cast %2 : vector<1x32x96xf32> to vector<32x96xf32>
    %c0_5 = arith.constant 0 : index
    %c32 = arith.constant 32 : index
    %c0_6 = arith.constant 0 : index
    %4 = vector.load %arg3[%c0_5, %c32, %c0_6] : memref<2x160x128xf32, #tpu.memory_space<vmem>>, vector<1x32x32xf32>
    %5 = vector.shape_cast %4 : vector<1x32x32xf32> to vector<32x32xf32>
    %c0_7 = arith.constant 0 : index
    %c64 = arith.constant 64 : index
    %c0_8 = arith.constant 0 : index
    %6 = vector.load %arg3[%c0_7, %c64, %c0_8] : memref<2x160x128xf32, #tpu.memory_space<vmem>>, vector<1x32x64xf32>
    %7 = vector.shape_cast %6 : vector<1x32x64xf32> to vector<32x64xf32>
    %c0_9 = arith.constant 0 : index
    %c96 = arith.constant 96 : index
    %c0_10 = arith.constant 0 : index
    %8 = vector.load %arg3[%c0_9, %c96, %c0_10] : memref<2x160x128xf32, #tpu.memory_space<vmem>>, vector<1x64x32xf32>
    %9 = vector.shape_cast %8 : vector<1x64x32xf32> to vector<64x32xf32>
    %c0_11 = arith.constant 0 : index
    %c0_12 = arith.constant 0 : index
    %c0_13 = arith.constant 0 : index
    %10 = vector.load %arg4[%c0_11, %c0_12, %c0_13] : memref<2x8x128xf32, #tpu.memory_space<vmem>>, vector<1x8x128xf32>
    %11 = vector.shape_cast %10 : vector<1x8x128xf32> to vector<8x128xf32>
    %12 = vector.extract_strided_slice %11 {offsets = [0, 0], sizes = [1, 96], strides = [1, 1]} : vector<8x128xf32> to vector<1x96xf32>
    %13 = vector.extract_strided_slice %11 {offsets = [1, 0], sizes = [1, 32], strides = [1, 1]} : vector<8x128xf32> to vector<1x32xf32>
    %14 = vector.extract_strided_slice %11 {offsets = [2, 0], sizes = [1, 64], strides = [1, 1]} : vector<8x128xf32> to vector<1x64xf32>
    %15 = vector.extract_strided_slice %11 {offsets = [3, 0], sizes = [1, 32], strides = [1, 1]} : vector<8x128xf32> to vector<1x32xf32>
    %16 = tpu.transpose %1, [1, 0] : vector<32x32xf32> -> vector<32x32xf32>
    %17 = vector.extract_strided_slice %3 {offsets = [0, 0], sizes = [32, 32], strides = [1, 1]} : vector<32x96xf32> to vector<32x32xf32>
    %cst = arith.constant dense<0.000000e+00> : vector<32x32xf32>
    %18 = tpu.matmul %1, %17, %cst {dimension_numbers = #tpu.dot_dimension_numbers<[1], [0], [0], [1], [0, 0, 1, 1], [], []>} : vector<32x32xf32>, vector<32x32xf32>, vector<32x32xf32> -> vector<32x32xf32>
    %19 = vector.extract_strided_slice %12 {offsets = [0, 0], sizes = [1, 32], strides = [1, 1]} : vector<1x96xf32> to vector<1x32xf32>
    %20 = vector.broadcast %19 : vector<1x32xf32> to vector<32x32xf32>
    %21 = arith.addf %18, %20 : vector<32x32xf32>
    %cst_14 = arith.constant 0.353553385 : f32
    %22 = vector.broadcast %cst_14 : f32 to vector<32x32xf32>
    %23 = arith.mulf %21, %22 : vector<32x32xf32>
    %24 = vector.extract_strided_slice %3 {offsets = [0, 32], sizes = [32, 32], strides = [1, 1]} : vector<32x96xf32> to vector<32x32xf32>
    %cst_15 = arith.constant dense<0.000000e+00> : vector<32x32xf32>
    %25 = tpu.matmul %16, %24, %cst_15 {dimension_numbers = #tpu.dot_dimension_numbers<[1], [0], [0], [1], [0, 0, 1, 1], [], []>} : vector<32x32xf32>, vector<32x32xf32>, vector<32x32xf32> -> vector<32x32xf32>
    %26 = vector.extract_strided_slice %12 {offsets = [0, 32], sizes = [1, 32], strides = [1, 1]} : vector<1x96xf32> to vector<1x32xf32>
    %27 = vector.broadcast %26 : vector<1x32xf32> to vector<32x32xf32>
    %28 = arith.addf %25, %27 : vector<32x32xf32>
    %29 = vector.extract_strided_slice %3 {offsets = [0, 64], sizes = [32, 32], strides = [1, 1]} : vector<32x96xf32> to vector<32x32xf32>
    %cst_16 = arith.constant dense<0.000000e+00> : vector<32x32xf32>
    %30 = tpu.matmul %1, %29, %cst_16 {dimension_numbers = #tpu.dot_dimension_numbers<[1], [0], [0], [1], [0, 0, 1, 1], [], []>} : vector<32x32xf32>, vector<32x32xf32>, vector<32x32xf32> -> vector<32x32xf32>
    %31 = vector.extract_strided_slice %12 {offsets = [0, 64], sizes = [1, 32], strides = [1, 1]} : vector<1x96xf32> to vector<1x32xf32>
    %32 = vector.broadcast %31 : vector<1x32xf32> to vector<32x32xf32>
    %33 = arith.addf %30, %32 : vector<32x32xf32>
    %34 = vector.extract_strided_slice %23 {offsets = [0, 0], sizes = [32, 8], strides = [1, 1]} : vector<32x32xf32> to vector<32x8xf32>
    %35 = vector.extract_strided_slice %28 {offsets = [0, 0], sizes = [32, 8], strides = [1, 1]} : vector<32x32xf32> to vector<32x8xf32>
    %36 = vector.extract_strided_slice %33 {offsets = [0, 0], sizes = [32, 8], strides = [1, 1]} : vector<32x32xf32> to vector<32x8xf32>
    %37 = tpu.transpose %35, [1, 0] : vector<32x8xf32> -> vector<8x32xf32>
    %cst_17 = arith.constant dense<0.000000e+00> : vector<32x32xf32>
    %38 = tpu.matmul %34, %37, %cst_17 {dimension_numbers = #tpu.dot_dimension_numbers<[1], [0], [0], [1], [0, 0, 1, 1], [], []>} : vector<32x8xf32>, vector<8x32xf32>, vector<32x32xf32> -> vector<32x32xf32>
    %cst_18 = arith.constant dense<0xFF800000> : vector<32xf32>
    %39 = vector.multi_reduction <maximumf>, %38, %cst_18 [1] : vector<32x32xf32> to vector<32xf32>
    %40 = vector.shape_cast %39 : vector<32xf32> to vector<32x1xf32>
    %41 = vector.broadcast %40 : vector<32x1xf32> to vector<32x32xf32>
    %42 = arith.subf %38, %41 : vector<32x32xf32>
    %43 = math.exp %42 : vector<32x32xf32>
    %cst_19 = arith.constant dense<0.000000e+00> : vector<32xf32>
    %44 = vector.multi_reduction <add>, %43, %cst_19 [1] : vector<32x32xf32> to vector<32xf32>
    %45 = vector.shape_cast %44 : vector<32xf32> to vector<32x1xf32>
    %cst_20 = arith.constant 1.000000e+00 : f32
    %46 = vector.broadcast %cst_20 : f32 to vector<32x1xf32>
    %47 = arith.divf %46, %45 : vector<32x1xf32>
    %48 = vector.broadcast %47 : vector<32x1xf32> to vector<32x32xf32>
    %49 = arith.mulf %43, %48 : vector<32x32xf32>
    %cst_21 = arith.constant dense<0.000000e+00> : vector<32x8xf32>
    %50 = tpu.matmul %49, %36, %cst_21 {dimension_numbers = #tpu.dot_dimension_numbers<[1], [0], [0], [1], [0, 0, 1, 1], [], []>} : vector<32x32xf32>, vector<32x8xf32>, vector<32x8xf32> -> vector<32x8xf32>
    %51 = vector.extract_strided_slice %5 {offsets = [0, 0], sizes = [8, 32], strides = [1, 1]} : vector<32x32xf32> to vector<8x32xf32>
    %cst_22 = arith.constant dense<0.000000e+00> : vector<32x32xf32>
    %52 = tpu.matmul %50, %51, %cst_22 {dimension_numbers = #tpu.dot_dimension_numbers<[1], [0], [0], [1], [0, 0, 1, 1], [], []>} : vector<32x8xf32>, vector<8x32xf32>, vector<32x32xf32> -> vector<32x32xf32>
    %53 = vector.extract_strided_slice %23 {offsets = [0, 8], sizes = [32, 8], strides = [1, 1]} : vector<32x32xf32> to vector<32x8xf32>
    %54 = vector.extract_strided_slice %28 {offsets = [0, 8], sizes = [32, 8], strides = [1, 1]} : vector<32x32xf32> to vector<32x8xf32>
    %55 = vector.extract_strided_slice %33 {offsets = [0, 8], sizes = [32, 8], strides = [1, 1]} : vector<32x32xf32> to vector<32x8xf32>
    %56 = tpu.transpose %54, [1, 0] : vector<32x8xf32> -> vector<8x32xf32>
    %cst_23 = arith.constant dense<0.000000e+00> : vector<32x32xf32>
    %57 = tpu.matmul %53, %56, %cst_23 {dimension_numbers = #tpu.dot_dimension_numbers<[1], [0], [0], [1], [0, 0, 1, 1], [], []>} : vector<32x8xf32>, vector<8x32xf32>, vector<32x32xf32> -> vector<32x32xf32>
    %cst_24 = arith.constant dense<0xFF800000> : vector<32xf32>
    %58 = vector.multi_reduction <maximumf>, %57, %cst_24 [1] : vector<32x32xf32> to vector<32xf32>
    %59 = vector.shape_cast %58 : vector<32xf32> to vector<32x1xf32>
    %60 = vector.broadcast %59 : vector<32x1xf32> to vector<32x32xf32>
    %61 = arith.subf %57, %60 : vector<32x32xf32>
    %62 = math.exp %61 : vector<32x32xf32>
    %cst_25 = arith.constant dense<0.000000e+00> : vector<32xf32>
    %63 = vector.multi_reduction <add>, %62, %cst_25 [1] : vector<32x32xf32> to vector<32xf32>
    %64 = vector.shape_cast %63 : vector<32xf32> to vector<32x1xf32>
    %cst_26 = arith.constant 1.000000e+00 : f32
    %65 = vector.broadcast %cst_26 : f32 to vector<32x1xf32>
    %66 = arith.divf %65, %64 : vector<32x1xf32>
    %67 = vector.broadcast %66 : vector<32x1xf32> to vector<32x32xf32>
    %68 = arith.mulf %62, %67 : vector<32x32xf32>
    %cst_27 = arith.constant dense<0.000000e+00> : vector<32x8xf32>
    %69 = tpu.matmul %68, %55, %cst_27 {dimension_numbers = #tpu.dot_dimension_numbers<[1], [0], [0], [1], [0, 0, 1, 1], [], []>} : vector<32x32xf32>, vector<32x8xf32>, vector<32x8xf32> -> vector<32x8xf32>
    %70 = vector.extract_strided_slice %5 {offsets = [8, 0], sizes = [8, 32], strides = [1, 1]} : vector<32x32xf32> to vector<8x32xf32>
    %cst_28 = arith.constant dense<0.000000e+00> : vector<32x32xf32>
    %71 = tpu.matmul %69, %70, %cst_28 {dimension_numbers = #tpu.dot_dimension_numbers<[1], [0], [0], [1], [0, 0, 1, 1], [], []>} : vector<32x8xf32>, vector<8x32xf32>, vector<32x32xf32> -> vector<32x32xf32>
    %72 = arith.addf %52, %71 : vector<32x32xf32>
    %73 = vector.extract_strided_slice %23 {offsets = [0, 16], sizes = [32, 8], strides = [1, 1]} : vector<32x32xf32> to vector<32x8xf32>
    %74 = vector.extract_strided_slice %28 {offsets = [0, 16], sizes = [32, 8], strides = [1, 1]} : vector<32x32xf32> to vector<32x8xf32>
    %75 = vector.extract_strided_slice %33 {offsets = [0, 16], sizes = [32, 8], strides = [1, 1]} : vector<32x32xf32> to vector<32x8xf32>
    %76 = tpu.transpose %74, [1, 0] : vector<32x8xf32> -> vector<8x32xf32>
    %cst_29 = arith.constant dense<0.000000e+00> : vector<32x32xf32>
    %77 = tpu.matmul %73, %76, %cst_29 {dimension_numbers = #tpu.dot_dimension_numbers<[1], [0], [0], [1], [0, 0, 1, 1], [], []>} : vector<32x8xf32>, vector<8x32xf32>, vector<32x32xf32> -> vector<32x32xf32>
    %cst_30 = arith.constant dense<0xFF800000> : vector<32xf32>
    %78 = vector.multi_reduction <maximumf>, %77, %cst_30 [1] : vector<32x32xf32> to vector<32xf32>
    %79 = vector.shape_cast %78 : vector<32xf32> to vector<32x1xf32>
    %80 = vector.broadcast %79 : vector<32x1xf32> to vector<32x32xf32>
    %81 = arith.subf %77, %80 : vector<32x32xf32>
    %82 = math.exp %81 : vector<32x32xf32>
    %cst_31 = arith.constant dense<0.000000e+00> : vector<32xf32>
    %83 = vector.multi_reduction <add>, %82, %cst_31 [1] : vector<32x32xf32> to vector<32xf32>
    %84 = vector.shape_cast %83 : vector<32xf32> to vector<32x1xf32>
    %cst_32 = arith.constant 1.000000e+00 : f32
    %85 = vector.broadcast %cst_32 : f32 to vector<32x1xf32>
    %86 = arith.divf %85, %84 : vector<32x1xf32>
    %87 = vector.broadcast %86 : vector<32x1xf32> to vector<32x32xf32>
    %88 = arith.mulf %82, %87 : vector<32x32xf32>
    %cst_33 = arith.constant dense<0.000000e+00> : vector<32x8xf32>
    %89 = tpu.matmul %88, %75, %cst_33 {dimension_numbers = #tpu.dot_dimension_numbers<[1], [0], [0], [1], [0, 0, 1, 1], [], []>} : vector<32x32xf32>, vector<32x8xf32>, vector<32x8xf32> -> vector<32x8xf32>
    %90 = vector.extract_strided_slice %5 {offsets = [16, 0], sizes = [8, 32], strides = [1, 1]} : vector<32x32xf32> to vector<8x32xf32>
    %cst_34 = arith.constant dense<0.000000e+00> : vector<32x32xf32>
    %91 = tpu.matmul %89, %90, %cst_34 {dimension_numbers = #tpu.dot_dimension_numbers<[1], [0], [0], [1], [0, 0, 1, 1], [], []>} : vector<32x8xf32>, vector<8x32xf32>, vector<32x32xf32> -> vector<32x32xf32>
    %92 = arith.addf %72, %91 : vector<32x32xf32>
    %93 = vector.extract_strided_slice %23 {offsets = [0, 24], sizes = [32, 8], strides = [1, 1]} : vector<32x32xf32> to vector<32x8xf32>
    %94 = vector.extract_strided_slice %28 {offsets = [0, 24], sizes = [32, 8], strides = [1, 1]} : vector<32x32xf32> to vector<32x8xf32>
    %95 = vector.extract_strided_slice %33 {offsets = [0, 24], sizes = [32, 8], strides = [1, 1]} : vector<32x32xf32> to vector<32x8xf32>
    %96 = tpu.transpose %94, [1, 0] : vector<32x8xf32> -> vector<8x32xf32>
    %cst_35 = arith.constant dense<0.000000e+00> : vector<32x32xf32>
    %97 = tpu.matmul %93, %96, %cst_35 {dimension_numbers = #tpu.dot_dimension_numbers<[1], [0], [0], [1], [0, 0, 1, 1], [], []>} : vector<32x8xf32>, vector<8x32xf32>, vector<32x32xf32> -> vector<32x32xf32>
    %cst_36 = arith.constant dense<0xFF800000> : vector<32xf32>
    %98 = vector.multi_reduction <maximumf>, %97, %cst_36 [1] : vector<32x32xf32> to vector<32xf32>
    %99 = vector.shape_cast %98 : vector<32xf32> to vector<32x1xf32>
    %100 = vector.broadcast %99 : vector<32x1xf32> to vector<32x32xf32>
    %101 = arith.subf %97, %100 : vector<32x32xf32>
    %102 = math.exp %101 : vector<32x32xf32>
    %cst_37 = arith.constant dense<0.000000e+00> : vector<32xf32>
    %103 = vector.multi_reduction <add>, %102, %cst_37 [1] : vector<32x32xf32> to vector<32xf32>
    %104 = vector.shape_cast %103 : vector<32xf32> to vector<32x1xf32>
    %cst_38 = arith.constant 1.000000e+00 : f32
    %105 = vector.broadcast %cst_38 : f32 to vector<32x1xf32>
    %106 = arith.divf %105, %104 : vector<32x1xf32>
    %107 = vector.broadcast %106 : vector<32x1xf32> to vector<32x32xf32>
    %108 = arith.mulf %102, %107 : vector<32x32xf32>
    %cst_39 = arith.constant dense<0.000000e+00> : vector<32x8xf32>
    %109 = tpu.matmul %108, %95, %cst_39 {dimension_numbers = #tpu.dot_dimension_numbers<[1], [0], [0], [1], [0, 0, 1, 1], [], []>} : vector<32x32xf32>, vector<32x8xf32>, vector<32x8xf32> -> vector<32x8xf32>
    %110 = vector.extract_strided_slice %5 {offsets = [24, 0], sizes = [8, 32], strides = [1, 1]} : vector<32x32xf32> to vector<8x32xf32>
    %cst_40 = arith.constant dense<0.000000e+00> : vector<32x32xf32>
    %111 = tpu.matmul %109, %110, %cst_40 {dimension_numbers = #tpu.dot_dimension_numbers<[1], [0], [0], [1], [0, 0, 1, 1], [], []>} : vector<32x8xf32>, vector<8x32xf32>, vector<32x32xf32> -> vector<32x32xf32>
    %112 = arith.addf %92, %111 : vector<32x32xf32>
    %113 = vector.broadcast %13 : vector<1x32xf32> to vector<32x32xf32>
    %114 = arith.addf %112, %113 : vector<32x32xf32>
    %115 = arith.addf %1, %114 : vector<32x32xf32>
    %116 = vector.extract_strided_slice %11 {offsets = [4, 0], sizes = [1, 32], strides = [1, 1]} : vector<8x128xf32> to vector<1x32xf32>
    %117 = vector.extract_strided_slice %11 {offsets = [5, 0], sizes = [1, 32], strides = [1, 1]} : vector<8x128xf32> to vector<1x32xf32>
    %cst_41 = arith.constant dense<0.000000e+00> : vector<32xf32>
    %118 = vector.multi_reduction <add>, %115, %cst_41 [1] : vector<32x32xf32> to vector<32xf32>
    %119 = vector.shape_cast %118 : vector<32xf32> to vector<32x1xf32>
    %cst_42 = arith.constant 3.200000e+01 : f32
    %120 = vector.broadcast %cst_42 : f32 to vector<32x1xf32>
    %121 = arith.divf %119, %120 : vector<32x1xf32>
    %122 = vector.broadcast %121 : vector<32x1xf32> to vector<32x32xf32>
    %123 = arith.subf %115, %122 : vector<32x32xf32>
    %124 = arith.mulf %123, %123 : vector<32x32xf32>
    %cst_43 = arith.constant dense<0.000000e+00> : vector<32xf32>
    %125 = vector.multi_reduction <add>, %124, %cst_43 [1] : vector<32x32xf32> to vector<32xf32>
    %126 = vector.shape_cast %125 : vector<32xf32> to vector<32x1xf32>
    %cst_44 = arith.constant 3.200000e+01 : f32
    %127 = vector.broadcast %cst_44 : f32 to vector<32x1xf32>
    %128 = arith.divf %126, %127 : vector<32x1xf32>
    %129 = vector.broadcast %121 : vector<32x1xf32> to vector<32x32xf32>
    %130 = arith.subf %115, %129 : vector<32x32xf32>
    %cst_45 = arith.constant 9.99999974E-6 : f32
    %131 = vector.broadcast %cst_45 : f32 to vector<32x1xf32>
    %132 = arith.addf %128, %131 : vector<32x1xf32>
    %133 = math.rsqrt %132 : vector<32x1xf32>
    %134 = vector.broadcast %133 : vector<32x1xf32> to vector<32x32xf32>
    %135 = arith.mulf %130, %134 : vector<32x32xf32>
    %136 = vector.broadcast %116 : vector<1x32xf32> to vector<32x32xf32>
    %137 = arith.mulf %135, %136 : vector<32x32xf32>
    %138 = vector.broadcast %117 : vector<1x32xf32> to vector<32x32xf32>
    %139 = arith.addf %137, %138 : vector<32x32xf32>
    %cst_46 = arith.constant dense<0.000000e+00> : vector<32x64xf32>
    %140 = tpu.matmul %139, %7, %cst_46 {dimension_numbers = #tpu.dot_dimension_numbers<[1], [0], [0], [1], [0, 0, 1, 1], [], []>} : vector<32x32xf32>, vector<32x64xf32>, vector<32x64xf32> -> vector<32x64xf32>
    %141 = vector.broadcast %14 : vector<1x64xf32> to vector<32x64xf32>
    %142 = arith.addf %140, %141 : vector<32x64xf32>
    %cst_47 = arith.constant 0.000000e+00 : f32
    %143 = vector.broadcast %cst_47 : f32 to vector<32x64xf32>
    %144 = arith.maximumf %142, %143 : vector<32x64xf32>
    %cst_48 = arith.constant dense<0.000000e+00> : vector<32x32xf32>
    %145 = tpu.matmul %144, %9, %cst_48 {dimension_numbers = #tpu.dot_dimension_numbers<[1], [0], [0], [1], [0, 0, 1, 1], [], []>} : vector<32x64xf32>, vector<64x32xf32>, vector<32x32xf32> -> vector<32x32xf32>
    %146 = vector.broadcast %15 : vector<1x32xf32> to vector<32x32xf32>
    %147 = arith.addf %145, %146 : vector<32x32xf32>
    %148 = arith.addf %139, %147 : vector<32x32xf32>
    %149 = vector.extract_strided_slice %11 {offsets = [6, 0], sizes = [1, 32], strides = [1, 1]} : vector<8x128xf32> to vector<1x32xf32>
    %150 = vector.extract_strided_slice %11 {offsets = [7, 0], sizes = [1, 32], strides = [1, 1]} : vector<8x128xf32> to vector<1x32xf32>
    %cst_49 = arith.constant dense<0.000000e+00> : vector<32xf32>
    %151 = vector.multi_reduction <add>, %148, %cst_49 [1] : vector<32x32xf32> to vector<32xf32>
    %152 = vector.shape_cast %151 : vector<32xf32> to vector<32x1xf32>
    %cst_50 = arith.constant 3.200000e+01 : f32
    %153 = vector.broadcast %cst_50 : f32 to vector<32x1xf32>
    %154 = arith.divf %152, %153 : vector<32x1xf32>
    %155 = vector.broadcast %154 : vector<32x1xf32> to vector<32x32xf32>
    %156 = arith.subf %148, %155 : vector<32x32xf32>
    %157 = arith.mulf %156, %156 : vector<32x32xf32>
    %cst_51 = arith.constant dense<0.000000e+00> : vector<32xf32>
    %158 = vector.multi_reduction <add>, %157, %cst_51 [1] : vector<32x32xf32> to vector<32xf32>
    %159 = vector.shape_cast %158 : vector<32xf32> to vector<32x1xf32>
    %cst_52 = arith.constant 3.200000e+01 : f32
    %160 = vector.broadcast %cst_52 : f32 to vector<32x1xf32>
    %161 = arith.divf %159, %160 : vector<32x1xf32>
    %162 = vector.broadcast %154 : vector<32x1xf32> to vector<32x32xf32>
    %163 = arith.subf %148, %162 : vector<32x32xf32>
    %cst_53 = arith.constant 9.99999974E-6 : f32
    %164 = vector.broadcast %cst_53 : f32 to vector<32x1xf32>
    %165 = arith.addf %161, %164 : vector<32x1xf32>
    %166 = math.rsqrt %165 : vector<32x1xf32>
    %167 = vector.broadcast %166 : vector<32x1xf32> to vector<32x32xf32>
    %168 = arith.mulf %163, %167 : vector<32x32xf32>
    %169 = vector.broadcast %149 : vector<1x32xf32> to vector<32x32xf32>
    %170 = arith.mulf %168, %169 : vector<32x32xf32>
    %171 = vector.broadcast %150 : vector<1x32xf32> to vector<32x32xf32>
    %172 = arith.addf %170, %171 : vector<32x32xf32>
    %c1 = arith.constant 1 : index
    %c0_54 = arith.constant 0 : index
    %c0_55 = arith.constant 0 : index
    %173 = vector.load %arg3[%c1, %c0_54, %c0_55] : memref<2x160x128xf32, #tpu.memory_space<vmem>>, vector<1x32x96xf32>
    %174 = vector.shape_cast %173 : vector<1x32x96xf32> to vector<32x96xf32>
    %c1_56 = arith.constant 1 : index
    %c32_57 = arith.constant 32 : index
    %c0_58 = arith.constant 0 : index
    %175 = vector.load %arg3[%c1_56, %c32_57, %c0_58] : memref<2x160x128xf32, #tpu.memory_space<vmem>>, vector<1x32x32xf32>
    %176 = vector.shape_cast %175 : vector<1x32x32xf32> to vector<32x32xf32>
    %c1_59 = arith.constant 1 : index
    %c64_60 = arith.constant 64 : index
    %c0_61 = arith.constant 0 : index
    %177 = vector.load %arg3[%c1_59, %c64_60, %c0_61] : memref<2x160x128xf32, #tpu.memory_space<vmem>>, vector<1x32x64xf32>
    %178 = vector.shape_cast %177 : vector<1x32x64xf32> to vector<32x64xf32>
    %c1_62 = arith.constant 1 : index
    %c96_63 = arith.constant 96 : index
    %c0_64 = arith.constant 0 : index
    %179 = vector.load %arg3[%c1_62, %c96_63, %c0_64] : memref<2x160x128xf32, #tpu.memory_space<vmem>>, vector<1x64x32xf32>
    %180 = vector.shape_cast %179 : vector<1x64x32xf32> to vector<64x32xf32>
    %c1_65 = arith.constant 1 : index
    %c0_66 = arith.constant 0 : index
    %c0_67 = arith.constant 0 : index
    %181 = vector.load %arg4[%c1_65, %c0_66, %c0_67] : memref<2x8x128xf32, #tpu.memory_space<vmem>>, vector<1x8x128xf32>
    %182 = vector.shape_cast %181 : vector<1x8x128xf32> to vector<8x128xf32>
    %183 = vector.extract_strided_slice %182 {offsets = [0, 0], sizes = [1, 96], strides = [1, 1]} : vector<8x128xf32> to vector<1x96xf32>
    %184 = vector.extract_strided_slice %182 {offsets = [1, 0], sizes = [1, 32], strides = [1, 1]} : vector<8x128xf32> to vector<1x32xf32>
    %185 = vector.extract_strided_slice %182 {offsets = [2, 0], sizes = [1, 64], strides = [1, 1]} : vector<8x128xf32> to vector<1x64xf32>
    %186 = vector.extract_strided_slice %182 {offsets = [3, 0], sizes = [1, 32], strides = [1, 1]} : vector<8x128xf32> to vector<1x32xf32>
    %187 = tpu.transpose %172, [1, 0] : vector<32x32xf32> -> vector<32x32xf32>
    %188 = vector.extract_strided_slice %174 {offsets = [0, 0], sizes = [32, 32], strides = [1, 1]} : vector<32x96xf32> to vector<32x32xf32>
    %cst_68 = arith.constant dense<0.000000e+00> : vector<32x32xf32>
    %189 = tpu.matmul %172, %188, %cst_68 {dimension_numbers = #tpu.dot_dimension_numbers<[1], [0], [0], [1], [0, 0, 1, 1], [], []>} : vector<32x32xf32>, vector<32x32xf32>, vector<32x32xf32> -> vector<32x32xf32>
    %190 = vector.extract_strided_slice %183 {offsets = [0, 0], sizes = [1, 32], strides = [1, 1]} : vector<1x96xf32> to vector<1x32xf32>
    %191 = vector.broadcast %190 : vector<1x32xf32> to vector<32x32xf32>
    %192 = arith.addf %189, %191 : vector<32x32xf32>
    %cst_69 = arith.constant 0.353553385 : f32
    %193 = vector.broadcast %cst_69 : f32 to vector<32x32xf32>
    %194 = arith.mulf %192, %193 : vector<32x32xf32>
    %195 = vector.extract_strided_slice %174 {offsets = [0, 32], sizes = [32, 32], strides = [1, 1]} : vector<32x96xf32> to vector<32x32xf32>
    %cst_70 = arith.constant dense<0.000000e+00> : vector<32x32xf32>
    %196 = tpu.matmul %187, %195, %cst_70 {dimension_numbers = #tpu.dot_dimension_numbers<[1], [0], [0], [1], [0, 0, 1, 1], [], []>} : vector<32x32xf32>, vector<32x32xf32>, vector<32x32xf32> -> vector<32x32xf32>
    %197 = vector.extract_strided_slice %183 {offsets = [0, 32], sizes = [1, 32], strides = [1, 1]} : vector<1x96xf32> to vector<1x32xf32>
    %198 = vector.broadcast %197 : vector<1x32xf32> to vector<32x32xf32>
    %199 = arith.addf %196, %198 : vector<32x32xf32>
    %200 = vector.extract_strided_slice %174 {offsets = [0, 64], sizes = [32, 32], strides = [1, 1]} : vector<32x96xf32> to vector<32x32xf32>
    %cst_71 = arith.constant dense<0.000000e+00> : vector<32x32xf32>
    %201 = tpu.matmul %172, %200, %cst_71 {dimension_numbers = #tpu.dot_dimension_numbers<[1], [0], [0], [1], [0, 0, 1, 1], [], []>} : vector<32x32xf32>, vector<32x32xf32>, vector<32x32xf32> -> vector<32x32xf32>
    %202 = vector.extract_strided_slice %183 {offsets = [0, 64], sizes = [1, 32], strides = [1, 1]} : vector<1x96xf32> to vector<1x32xf32>
    %203 = vector.broadcast %202 : vector<1x32xf32> to vector<32x32xf32>
    %204 = arith.addf %201, %203 : vector<32x32xf32>
    %205 = vector.extract_strided_slice %194 {offsets = [0, 0], sizes = [32, 8], strides = [1, 1]} : vector<32x32xf32> to vector<32x8xf32>
    %206 = vector.extract_strided_slice %199 {offsets = [0, 0], sizes = [32, 8], strides = [1, 1]} : vector<32x32xf32> to vector<32x8xf32>
    %207 = vector.extract_strided_slice %204 {offsets = [0, 0], sizes = [32, 8], strides = [1, 1]} : vector<32x32xf32> to vector<32x8xf32>
    %208 = tpu.transpose %206, [1, 0] : vector<32x8xf32> -> vector<8x32xf32>
    %cst_72 = arith.constant dense<0.000000e+00> : vector<32x32xf32>
    %209 = tpu.matmul %205, %208, %cst_72 {dimension_numbers = #tpu.dot_dimension_numbers<[1], [0], [0], [1], [0, 0, 1, 1], [], []>} : vector<32x8xf32>, vector<8x32xf32>, vector<32x32xf32> -> vector<32x32xf32>
    %cst_73 = arith.constant dense<0xFF800000> : vector<32xf32>
    %210 = vector.multi_reduction <maximumf>, %209, %cst_73 [1] : vector<32x32xf32> to vector<32xf32>
    %211 = vector.shape_cast %210 : vector<32xf32> to vector<32x1xf32>
    %212 = vector.broadcast %211 : vector<32x1xf32> to vector<32x32xf32>
    %213 = arith.subf %209, %212 : vector<32x32xf32>
    %214 = math.exp %213 : vector<32x32xf32>
    %cst_74 = arith.constant dense<0.000000e+00> : vector<32xf32>
    %215 = vector.multi_reduction <add>, %214, %cst_74 [1] : vector<32x32xf32> to vector<32xf32>
    %216 = vector.shape_cast %215 : vector<32xf32> to vector<32x1xf32>
    %cst_75 = arith.constant 1.000000e+00 : f32
    %217 = vector.broadcast %cst_75 : f32 to vector<32x1xf32>
    %218 = arith.divf %217, %216 : vector<32x1xf32>
    %219 = vector.broadcast %218 : vector<32x1xf32> to vector<32x32xf32>
    %220 = arith.mulf %214, %219 : vector<32x32xf32>
    %cst_76 = arith.constant dense<0.000000e+00> : vector<32x8xf32>
    %221 = tpu.matmul %220, %207, %cst_76 {dimension_numbers = #tpu.dot_dimension_numbers<[1], [0], [0], [1], [0, 0, 1, 1], [], []>} : vector<32x32xf32>, vector<32x8xf32>, vector<32x8xf32> -> vector<32x8xf32>
    %222 = vector.extract_strided_slice %176 {offsets = [0, 0], sizes = [8, 32], strides = [1, 1]} : vector<32x32xf32> to vector<8x32xf32>
    %cst_77 = arith.constant dense<0.000000e+00> : vector<32x32xf32>
    %223 = tpu.matmul %221, %222, %cst_77 {dimension_numbers = #tpu.dot_dimension_numbers<[1], [0], [0], [1], [0, 0, 1, 1], [], []>} : vector<32x8xf32>, vector<8x32xf32>, vector<32x32xf32> -> vector<32x32xf32>
    %224 = vector.extract_strided_slice %194 {offsets = [0, 8], sizes = [32, 8], strides = [1, 1]} : vector<32x32xf32> to vector<32x8xf32>
    %225 = vector.extract_strided_slice %199 {offsets = [0, 8], sizes = [32, 8], strides = [1, 1]} : vector<32x32xf32> to vector<32x8xf32>
    %226 = vector.extract_strided_slice %204 {offsets = [0, 8], sizes = [32, 8], strides = [1, 1]} : vector<32x32xf32> to vector<32x8xf32>
    %227 = tpu.transpose %225, [1, 0] : vector<32x8xf32> -> vector<8x32xf32>
    %cst_78 = arith.constant dense<0.000000e+00> : vector<32x32xf32>
    %228 = tpu.matmul %224, %227, %cst_78 {dimension_numbers = #tpu.dot_dimension_numbers<[1], [0], [0], [1], [0, 0, 1, 1], [], []>} : vector<32x8xf32>, vector<8x32xf32>, vector<32x32xf32> -> vector<32x32xf32>
    %cst_79 = arith.constant dense<0xFF800000> : vector<32xf32>
    %229 = vector.multi_reduction <maximumf>, %228, %cst_79 [1] : vector<32x32xf32> to vector<32xf32>
    %230 = vector.shape_cast %229 : vector<32xf32> to vector<32x1xf32>
    %231 = vector.broadcast %230 : vector<32x1xf32> to vector<32x32xf32>
    %232 = arith.subf %228, %231 : vector<32x32xf32>
    %233 = math.exp %232 : vector<32x32xf32>
    %cst_80 = arith.constant dense<0.000000e+00> : vector<32xf32>
    %234 = vector.multi_reduction <add>, %233, %cst_80 [1] : vector<32x32xf32> to vector<32xf32>
    %235 = vector.shape_cast %234 : vector<32xf32> to vector<32x1xf32>
    %cst_81 = arith.constant 1.000000e+00 : f32
    %236 = vector.broadcast %cst_81 : f32 to vector<32x1xf32>
    %237 = arith.divf %236, %235 : vector<32x1xf32>
    %238 = vector.broadcast %237 : vector<32x1xf32> to vector<32x32xf32>
    %239 = arith.mulf %233, %238 : vector<32x32xf32>
    %cst_82 = arith.constant dense<0.000000e+00> : vector<32x8xf32>
    %240 = tpu.matmul %239, %226, %cst_82 {dimension_numbers = #tpu.dot_dimension_numbers<[1], [0], [0], [1], [0, 0, 1, 1], [], []>} : vector<32x32xf32>, vector<32x8xf32>, vector<32x8xf32> -> vector<32x8xf32>
    %241 = vector.extract_strided_slice %176 {offsets = [8, 0], sizes = [8, 32], strides = [1, 1]} : vector<32x32xf32> to vector<8x32xf32>
    %cst_83 = arith.constant dense<0.000000e+00> : vector<32x32xf32>
    %242 = tpu.matmul %240, %241, %cst_83 {dimension_numbers = #tpu.dot_dimension_numbers<[1], [0], [0], [1], [0, 0, 1, 1], [], []>} : vector<32x8xf32>, vector<8x32xf32>, vector<32x32xf32> -> vector<32x32xf32>
    %243 = arith.addf %223, %242 : vector<32x32xf32>
    %244 = vector.extract_strided_slice %194 {offsets = [0, 16], sizes = [32, 8], strides = [1, 1]} : vector<32x32xf32> to vector<32x8xf32>
    %245 = vector.extract_strided_slice %199 {offsets = [0, 16], sizes = [32, 8], strides = [1, 1]} : vector<32x32xf32> to vector<32x8xf32>
    %246 = vector.extract_strided_slice %204 {offsets = [0, 16], sizes = [32, 8], strides = [1, 1]} : vector<32x32xf32> to vector<32x8xf32>
    %247 = tpu.transpose %245, [1, 0] : vector<32x8xf32> -> vector<8x32xf32>
    %cst_84 = arith.constant dense<0.000000e+00> : vector<32x32xf32>
    %248 = tpu.matmul %244, %247, %cst_84 {dimension_numbers = #tpu.dot_dimension_numbers<[1], [0], [0], [1], [0, 0, 1, 1], [], []>} : vector<32x8xf32>, vector<8x32xf32>, vector<32x32xf32> -> vector<32x32xf32>
    %cst_85 = arith.constant dense<0xFF800000> : vector<32xf32>
    %249 = vector.multi_reduction <maximumf>, %248, %cst_85 [1] : vector<32x32xf32> to vector<32xf32>
    %250 = vector.shape_cast %249 : vector<32xf32> to vector<32x1xf32>
    %251 = vector.broadcast %250 : vector<32x1xf32> to vector<32x32xf32>
    %252 = arith.subf %248, %251 : vector<32x32xf32>
    %253 = math.exp %252 : vector<32x32xf32>
    %cst_86 = arith.constant dense<0.000000e+00> : vector<32xf32>
    %254 = vector.multi_reduction <add>, %253, %cst_86 [1] : vector<32x32xf32> to vector<32xf32>
    %255 = vector.shape_cast %254 : vector<32xf32> to vector<32x1xf32>
    %cst_87 = arith.constant 1.000000e+00 : f32
    %256 = vector.broadcast %cst_87 : f32 to vector<32x1xf32>
    %257 = arith.divf %256, %255 : vector<32x1xf32>
    %258 = vector.broadcast %257 : vector<32x1xf32> to vector<32x32xf32>
    %259 = arith.mulf %253, %258 : vector<32x32xf32>
    %cst_88 = arith.constant dense<0.000000e+00> : vector<32x8xf32>
    %260 = tpu.matmul %259, %246, %cst_88 {dimension_numbers = #tpu.dot_dimension_numbers<[1], [0], [0], [1], [0, 0, 1, 1], [], []>} : vector<32x32xf32>, vector<32x8xf32>, vector<32x8xf32> -> vector<32x8xf32>
    %261 = vector.extract_strided_slice %176 {offsets = [16, 0], sizes = [8, 32], strides = [1, 1]} : vector<32x32xf32> to vector<8x32xf32>
    %cst_89 = arith.constant dense<0.000000e+00> : vector<32x32xf32>
    %262 = tpu.matmul %260, %261, %cst_89 {dimension_numbers = #tpu.dot_dimension_numbers<[1], [0], [0], [1], [0, 0, 1, 1], [], []>} : vector<32x8xf32>, vector<8x32xf32>, vector<32x32xf32> -> vector<32x32xf32>
    %263 = arith.addf %243, %262 : vector<32x32xf32>
    %264 = vector.extract_strided_slice %194 {offsets = [0, 24], sizes = [32, 8], strides = [1, 1]} : vector<32x32xf32> to vector<32x8xf32>
    %265 = vector.extract_strided_slice %199 {offsets = [0, 24], sizes = [32, 8], strides = [1, 1]} : vector<32x32xf32> to vector<32x8xf32>
    %266 = vector.extract_strided_slice %204 {offsets = [0, 24], sizes = [32, 8], strides = [1, 1]} : vector<32x32xf32> to vector<32x8xf32>
    %267 = tpu.transpose %265, [1, 0] : vector<32x8xf32> -> vector<8x32xf32>
    %cst_90 = arith.constant dense<0.000000e+00> : vector<32x32xf32>
    %268 = tpu.matmul %264, %267, %cst_90 {dimension_numbers = #tpu.dot_dimension_numbers<[1], [0], [0], [1], [0, 0, 1, 1], [], []>} : vector<32x8xf32>, vector<8x32xf32>, vector<32x32xf32> -> vector<32x32xf32>
    %cst_91 = arith.constant dense<0xFF800000> : vector<32xf32>
    %269 = vector.multi_reduction <maximumf>, %268, %cst_91 [1] : vector<32x32xf32> to vector<32xf32>
    %270 = vector.shape_cast %269 : vector<32xf32> to vector<32x1xf32>
    %271 = vector.broadcast %270 : vector<32x1xf32> to vector<32x32xf32>
    %272 = arith.subf %268, %271 : vector<32x32xf32>
    %273 = math.exp %272 : vector<32x32xf32>
    %cst_92 = arith.constant dense<0.000000e+00> : vector<32xf32>
    %274 = vector.multi_reduction <add>, %273, %cst_92 [1] : vector<32x32xf32> to vector<32xf32>
    %275 = vector.shape_cast %274 : vector<32xf32> to vector<32x1xf32>
    %cst_93 = arith.constant 1.000000e+00 : f32
    %276 = vector.broadcast %cst_93 : f32 to vector<32x1xf32>
    %277 = arith.divf %276, %275 : vector<32x1xf32>
    %278 = vector.broadcast %277 : vector<32x1xf32> to vector<32x32xf32>
    %279 = arith.mulf %273, %278 : vector<32x32xf32>
    %cst_94 = arith.constant dense<0.000000e+00> : vector<32x8xf32>
    %280 = tpu.matmul %279, %266, %cst_94 {dimension_numbers = #tpu.dot_dimension_numbers<[1], [0], [0], [1], [0, 0, 1, 1], [], []>} : vector<32x32xf32>, vector<32x8xf32>, vector<32x8xf32> -> vector<32x8xf32>
    %281 = vector.extract_strided_slice %176 {offsets = [24, 0], sizes = [8, 32], strides = [1, 1]} : vector<32x32xf32> to vector<8x32xf32>
    %cst_95 = arith.constant dense<0.000000e+00> : vector<32x32xf32>
    %282 = tpu.matmul %280, %281, %cst_95 {dimension_numbers = #tpu.dot_dimension_numbers<[1], [0], [0], [1], [0, 0, 1, 1], [], []>} : vector<32x8xf32>, vector<8x32xf32>, vector<32x32xf32> -> vector<32x32xf32>
    %283 = arith.addf %263, %282 : vector<32x32xf32>
    %284 = vector.broadcast %184 : vector<1x32xf32> to vector<32x32xf32>
    %285 = arith.addf %283, %284 : vector<32x32xf32>
    %286 = arith.addf %172, %285 : vector<32x32xf32>
    %287 = vector.extract_strided_slice %182 {offsets = [4, 0], sizes = [1, 32], strides = [1, 1]} : vector<8x128xf32> to vector<1x32xf32>
    %288 = vector.extract_strided_slice %182 {offsets = [5, 0], sizes = [1, 32], strides = [1, 1]} : vector<8x128xf32> to vector<1x32xf32>
    %cst_96 = arith.constant dense<0.000000e+00> : vector<32xf32>
    %289 = vector.multi_reduction <add>, %286, %cst_96 [1] : vector<32x32xf32> to vector<32xf32>
    %290 = vector.shape_cast %289 : vector<32xf32> to vector<32x1xf32>
    %cst_97 = arith.constant 3.200000e+01 : f32
    %291 = vector.broadcast %cst_97 : f32 to vector<32x1xf32>
    %292 = arith.divf %290, %291 : vector<32x1xf32>
    %293 = vector.broadcast %292 : vector<32x1xf32> to vector<32x32xf32>
    %294 = arith.subf %286, %293 : vector<32x32xf32>
    %295 = arith.mulf %294, %294 : vector<32x32xf32>
    %cst_98 = arith.constant dense<0.000000e+00> : vector<32xf32>
    %296 = vector.multi_reduction <add>, %295, %cst_98 [1] : vector<32x32xf32> to vector<32xf32>
    %297 = vector.shape_cast %296 : vector<32xf32> to vector<32x1xf32>
    %cst_99 = arith.constant 3.200000e+01 : f32
    %298 = vector.broadcast %cst_99 : f32 to vector<32x1xf32>
    %299 = arith.divf %297, %298 : vector<32x1xf32>
    %300 = vector.broadcast %292 : vector<32x1xf32> to vector<32x32xf32>
    %301 = arith.subf %286, %300 : vector<32x32xf32>
    %cst_100 = arith.constant 9.99999974E-6 : f32
    %302 = vector.broadcast %cst_100 : f32 to vector<32x1xf32>
    %303 = arith.addf %299, %302 : vector<32x1xf32>
    %304 = math.rsqrt %303 : vector<32x1xf32>
    %305 = vector.broadcast %304 : vector<32x1xf32> to vector<32x32xf32>
    %306 = arith.mulf %301, %305 : vector<32x32xf32>
    %307 = vector.broadcast %287 : vector<1x32xf32> to vector<32x32xf32>
    %308 = arith.mulf %306, %307 : vector<32x32xf32>
    %309 = vector.broadcast %288 : vector<1x32xf32> to vector<32x32xf32>
    %310 = arith.addf %308, %309 : vector<32x32xf32>
    %cst_101 = arith.constant dense<0.000000e+00> : vector<32x64xf32>
    %311 = tpu.matmul %310, %178, %cst_101 {dimension_numbers = #tpu.dot_dimension_numbers<[1], [0], [0], [1], [0, 0, 1, 1], [], []>} : vector<32x32xf32>, vector<32x64xf32>, vector<32x64xf32> -> vector<32x64xf32>
    %312 = vector.broadcast %185 : vector<1x64xf32> to vector<32x64xf32>
    %313 = arith.addf %311, %312 : vector<32x64xf32>
    %cst_102 = arith.constant 0.000000e+00 : f32
    %314 = vector.broadcast %cst_102 : f32 to vector<32x64xf32>
    %315 = arith.maximumf %313, %314 : vector<32x64xf32>
    %cst_103 = arith.constant dense<0.000000e+00> : vector<32x32xf32>
    %316 = tpu.matmul %315, %180, %cst_103 {dimension_numbers = #tpu.dot_dimension_numbers<[1], [0], [0], [1], [0, 0, 1, 1], [], []>} : vector<32x64xf32>, vector<64x32xf32>, vector<32x32xf32> -> vector<32x32xf32>
    %317 = vector.broadcast %186 : vector<1x32xf32> to vector<32x32xf32>
    %318 = arith.addf %316, %317 : vector<32x32xf32>
    %319 = arith.addf %310, %318 : vector<32x32xf32>
    %320 = vector.extract_strided_slice %182 {offsets = [6, 0], sizes = [1, 32], strides = [1, 1]} : vector<8x128xf32> to vector<1x32xf32>
    %321 = vector.extract_strided_slice %182 {offsets = [7, 0], sizes = [1, 32], strides = [1, 1]} : vector<8x128xf32> to vector<1x32xf32>
    %cst_104 = arith.constant dense<0.000000e+00> : vector<32xf32>
    %322 = vector.multi_reduction <add>, %319, %cst_104 [1] : vector<32x32xf32> to vector<32xf32>
    %323 = vector.shape_cast %322 : vector<32xf32> to vector<32x1xf32>
    %cst_105 = arith.constant 3.200000e+01 : f32
    %324 = vector.broadcast %cst_105 : f32 to vector<32x1xf32>
    %325 = arith.divf %323, %324 : vector<32x1xf32>
    %326 = vector.broadcast %325 : vector<32x1xf32> to vector<32x32xf32>
    %327 = arith.subf %319, %326 : vector<32x32xf32>
    %328 = arith.mulf %327, %327 : vector<32x32xf32>
    %cst_106 = arith.constant dense<0.000000e+00> : vector<32xf32>
    %329 = vector.multi_reduction <add>, %328, %cst_106 [1] : vector<32x32xf32> to vector<32xf32>
    %330 = vector.shape_cast %329 : vector<32xf32> to vector<32x1xf32>
    %cst_107 = arith.constant 3.200000e+01 : f32
    %331 = vector.broadcast %cst_107 : f32 to vector<32x1xf32>
    %332 = arith.divf %330, %331 : vector<32x1xf32>
    %333 = vector.broadcast %325 : vector<32x1xf32> to vector<32x32xf32>
    %334 = arith.subf %319, %333 : vector<32x32xf32>
    %cst_108 = arith.constant 9.99999974E-6 : f32
    %335 = vector.broadcast %cst_108 : f32 to vector<32x1xf32>
    %336 = arith.addf %332, %335 : vector<32x1xf32>
    %337 = math.rsqrt %336 : vector<32x1xf32>
    %338 = vector.broadcast %337 : vector<32x1xf32> to vector<32x32xf32>
    %339 = arith.mulf %334, %338 : vector<32x32xf32>
    %340 = vector.broadcast %320 : vector<1x32xf32> to vector<32x32xf32>
    %341 = arith.mulf %339, %340 : vector<32x32xf32>
    %342 = vector.broadcast %321 : vector<1x32xf32> to vector<32x32xf32>
    %343 = arith.addf %341, %342 : vector<32x32xf32>
    %c0_109 = arith.constant 0 : index
    %c0_110 = arith.constant 0 : index
    %c0_111 = arith.constant 0 : index
    %344 = vector.load %arg2[%c0_109, %c0_110, %c0_111] : memref<1x8x32xf32, #tpu.memory_space<vmem>>, vector<1x8x32xf32>
    %345 = vector.shape_cast %344 : vector<1x8x32xf32> to vector<8x32xf32>
    %c0_112 = arith.constant 0 : index
    %c0_113 = arith.constant 0 : index
    %c0_114 = arith.constant 0 : index
    %346 = vector.load %arg5[%c0_112, %c0_113, %c0_114] : memref<2x224x128xf32, #tpu.memory_space<vmem>>, vector<1x32x96xf32>
    %347 = vector.shape_cast %346 : vector<1x32x96xf32> to vector<32x96xf32>
    %c0_115 = arith.constant 0 : index
    %c32_116 = arith.constant 32 : index
    %c0_117 = arith.constant 0 : index
    %348 = vector.load %arg5[%c0_115, %c32_116, %c0_117] : memref<2x224x128xf32, #tpu.memory_space<vmem>>, vector<1x32x32xf32>
    %349 = vector.shape_cast %348 : vector<1x32x32xf32> to vector<32x32xf32>
    %c0_118 = arith.constant 0 : index
    %c64_119 = arith.constant 64 : index
    %c0_120 = arith.constant 0 : index
    %350 = vector.load %arg5[%c0_118, %c64_119, %c0_120] : memref<2x224x128xf32, #tpu.memory_space<vmem>>, vector<1x32x96xf32>
    %351 = vector.shape_cast %350 : vector<1x32x96xf32> to vector<32x96xf32>
    %c0_121 = arith.constant 0 : index
    %c96_122 = arith.constant 96 : index
    %c0_123 = arith.constant 0 : index
    %352 = vector.load %arg5[%c0_121, %c96_122, %c0_123] : memref<2x224x128xf32, #tpu.memory_space<vmem>>, vector<1x32x32xf32>
    %353 = vector.shape_cast %352 : vector<1x32x32xf32> to vector<32x32xf32>
    %c0_124 = arith.constant 0 : index
    %c128 = arith.constant 128 : index
    %c0_125 = arith.constant 0 : index
    %354 = vector.load %arg5[%c0_124, %c128, %c0_125] : memref<2x224x128xf32, #tpu.memory_space<vmem>>, vector<1x32x64xf32>
    %355 = vector.shape_cast %354 : vector<1x32x64xf32> to vector<32x64xf32>
    %c0_126 = arith.constant 0 : index
    %c160 = arith.constant 160 : index
    %c0_127 = arith.constant 0 : index
    %356 = vector.load %arg5[%c0_126, %c160, %c0_127] : memref<2x224x128xf32, #tpu.memory_space<vmem>>, vector<1x64x32xf32>
    %357 = vector.shape_cast %356 : vector<1x64x32xf32> to vector<64x32xf32>
    %c0_128 = arith.constant 0 : index
    %c0_129 = arith.constant 0 : index
    %c0_130 = arith.constant 0 : index
    %358 = vector.load %arg6[%c0_128, %c0_129, %c0_130] : memref<2x16x128xf32, #tpu.memory_space<vmem>>, vector<1x16x128xf32>
    %359 = vector.shape_cast %358 : vector<1x16x128xf32> to vector<16x128xf32>
    %360 = vector.extract_strided_slice %359 {offsets = [0, 0], sizes = [1, 96], strides = [1, 1]} : vector<16x128xf32> to vector<1x96xf32>
    %361 = vector.extract_strided_slice %359 {offsets = [1, 0], sizes = [1, 32], strides = [1, 1]} : vector<16x128xf32> to vector<1x32xf32>
    %362 = vector.extract_strided_slice %359 {offsets = [2, 0], sizes = [1, 96], strides = [1, 1]} : vector<16x128xf32> to vector<1x96xf32>
    %363 = vector.extract_strided_slice %359 {offsets = [3, 0], sizes = [1, 32], strides = [1, 1]} : vector<16x128xf32> to vector<1x32xf32>
    %364 = vector.extract_strided_slice %359 {offsets = [4, 0], sizes = [1, 64], strides = [1, 1]} : vector<16x128xf32> to vector<1x64xf32>
    %365 = vector.extract_strided_slice %359 {offsets = [5, 0], sizes = [1, 32], strides = [1, 1]} : vector<16x128xf32> to vector<1x32xf32>
    %366 = vector.extract_strided_slice %347 {offsets = [0, 0], sizes = [32, 32], strides = [1, 1]} : vector<32x96xf32> to vector<32x32xf32>
    %cst_131 = arith.constant dense<0.000000e+00> : vector<8x32xf32>
    %367 = tpu.matmul %345, %366, %cst_131 {dimension_numbers = #tpu.dot_dimension_numbers<[1], [0], [0], [1], [0, 0, 1, 1], [], []>} : vector<8x32xf32>, vector<32x32xf32>, vector<8x32xf32> -> vector<8x32xf32>
    %368 = vector.extract_strided_slice %360 {offsets = [0, 0], sizes = [1, 32], strides = [1, 1]} : vector<1x96xf32> to vector<1x32xf32>
    %369 = vector.broadcast %368 : vector<1x32xf32> to vector<8x32xf32>
    %370 = arith.addf %367, %369 : vector<8x32xf32>
    %cst_132 = arith.constant 0.353553385 : f32
    %371 = vector.broadcast %cst_132 : f32 to vector<8x32xf32>
    %372 = arith.mulf %370, %371 : vector<8x32xf32>
    %373 = vector.extract_strided_slice %347 {offsets = [0, 32], sizes = [32, 32], strides = [1, 1]} : vector<32x96xf32> to vector<32x32xf32>
    %cst_133 = arith.constant dense<0.000000e+00> : vector<8x32xf32>
    %374 = tpu.matmul %345, %373, %cst_133 {dimension_numbers = #tpu.dot_dimension_numbers<[1], [0], [0], [1], [0, 0, 1, 1], [], []>} : vector<8x32xf32>, vector<32x32xf32>, vector<8x32xf32> -> vector<8x32xf32>
    %375 = vector.extract_strided_slice %360 {offsets = [0, 32], sizes = [1, 32], strides = [1, 1]} : vector<1x96xf32> to vector<1x32xf32>
    %376 = vector.broadcast %375 : vector<1x32xf32> to vector<8x32xf32>
    %377 = arith.addf %374, %376 : vector<8x32xf32>
    %378 = vector.extract_strided_slice %347 {offsets = [0, 64], sizes = [32, 32], strides = [1, 1]} : vector<32x96xf32> to vector<32x32xf32>
    %cst_134 = arith.constant dense<0.000000e+00> : vector<8x32xf32>
    %379 = tpu.matmul %345, %378, %cst_134 {dimension_numbers = #tpu.dot_dimension_numbers<[1], [0], [0], [1], [0, 0, 1, 1], [], []>} : vector<8x32xf32>, vector<32x32xf32>, vector<8x32xf32> -> vector<8x32xf32>
    %380 = vector.extract_strided_slice %360 {offsets = [0, 64], sizes = [1, 32], strides = [1, 1]} : vector<1x96xf32> to vector<1x32xf32>
    %381 = vector.broadcast %380 : vector<1x32xf32> to vector<8x32xf32>
    %382 = arith.addf %379, %381 : vector<8x32xf32>
    %383 = vector.extract_strided_slice %372 {offsets = [0, 0], sizes = [8, 8], strides = [1, 1]} : vector<8x32xf32> to vector<8x8xf32>
    %384 = vector.extract_strided_slice %377 {offsets = [0, 0], sizes = [8, 8], strides = [1, 1]} : vector<8x32xf32> to vector<8x8xf32>
    %385 = vector.extract_strided_slice %382 {offsets = [0, 0], sizes = [8, 8], strides = [1, 1]} : vector<8x32xf32> to vector<8x8xf32>
    %386 = tpu.transpose %384, [1, 0] : vector<8x8xf32> -> vector<8x8xf32>
    %cst_135 = arith.constant dense<0.000000e+00> : vector<8x8xf32>
    %387 = tpu.matmul %383, %386, %cst_135 {dimension_numbers = #tpu.dot_dimension_numbers<[1], [0], [0], [1], [0, 0, 1, 1], [], []>} : vector<8x8xf32>, vector<8x8xf32>, vector<8x8xf32> -> vector<8x8xf32>
    %cst_136 = arith.constant dense<0xFF800000> : vector<8xf32>
    %388 = vector.multi_reduction <maximumf>, %387, %cst_136 [1] : vector<8x8xf32> to vector<8xf32>
    %389 = vector.shape_cast %388 : vector<8xf32> to vector<8x1xf32>
    %390 = vector.broadcast %389 : vector<8x1xf32> to vector<8x8xf32>
    %391 = arith.subf %387, %390 : vector<8x8xf32>
    %392 = math.exp %391 : vector<8x8xf32>
    %cst_137 = arith.constant dense<0.000000e+00> : vector<8xf32>
    %393 = vector.multi_reduction <add>, %392, %cst_137 [1] : vector<8x8xf32> to vector<8xf32>
    %394 = vector.shape_cast %393 : vector<8xf32> to vector<8x1xf32>
    %cst_138 = arith.constant 1.000000e+00 : f32
    %395 = vector.broadcast %cst_138 : f32 to vector<8x1xf32>
    %396 = arith.divf %395, %394 : vector<8x1xf32>
    %397 = vector.broadcast %396 : vector<8x1xf32> to vector<8x8xf32>
    %398 = arith.mulf %392, %397 : vector<8x8xf32>
    %cst_139 = arith.constant dense<0.000000e+00> : vector<8x8xf32>
    %399 = tpu.matmul %398, %385, %cst_139 {dimension_numbers = #tpu.dot_dimension_numbers<[1], [0], [0], [1], [0, 0, 1, 1], [], []>} : vector<8x8xf32>, vector<8x8xf32>, vector<8x8xf32> -> vector<8x8xf32>
    %400 = vector.extract_strided_slice %349 {offsets = [0, 0], sizes = [8, 32], strides = [1, 1]} : vector<32x32xf32> to vector<8x32xf32>
    %cst_140 = arith.constant dense<0.000000e+00> : vector<8x32xf32>
    %401 = tpu.matmul %399, %400, %cst_140 {dimension_numbers = #tpu.dot_dimension_numbers<[1], [0], [0], [1], [0, 0, 1, 1], [], []>} : vector<8x8xf32>, vector<8x32xf32>, vector<8x32xf32> -> vector<8x32xf32>
    %402 = vector.extract_strided_slice %372 {offsets = [0, 8], sizes = [8, 8], strides = [1, 1]} : vector<8x32xf32> to vector<8x8xf32>
    %403 = vector.extract_strided_slice %377 {offsets = [0, 8], sizes = [8, 8], strides = [1, 1]} : vector<8x32xf32> to vector<8x8xf32>
    %404 = vector.extract_strided_slice %382 {offsets = [0, 8], sizes = [8, 8], strides = [1, 1]} : vector<8x32xf32> to vector<8x8xf32>
    %405 = tpu.transpose %403, [1, 0] : vector<8x8xf32> -> vector<8x8xf32>
    %cst_141 = arith.constant dense<0.000000e+00> : vector<8x8xf32>
    %406 = tpu.matmul %402, %405, %cst_141 {dimension_numbers = #tpu.dot_dimension_numbers<[1], [0], [0], [1], [0, 0, 1, 1], [], []>} : vector<8x8xf32>, vector<8x8xf32>, vector<8x8xf32> -> vector<8x8xf32>
    %cst_142 = arith.constant dense<0xFF800000> : vector<8xf32>
    %407 = vector.multi_reduction <maximumf>, %406, %cst_142 [1] : vector<8x8xf32> to vector<8xf32>
    %408 = vector.shape_cast %407 : vector<8xf32> to vector<8x1xf32>
    %409 = vector.broadcast %408 : vector<8x1xf32> to vector<8x8xf32>
    %410 = arith.subf %406, %409 : vector<8x8xf32>
    %411 = math.exp %410 : vector<8x8xf32>
    %cst_143 = arith.constant dense<0.000000e+00> : vector<8xf32>
    %412 = vector.multi_reduction <add>, %411, %cst_143 [1] : vector<8x8xf32> to vector<8xf32>
    %413 = vector.shape_cast %412 : vector<8xf32> to vector<8x1xf32>
    %cst_144 = arith.constant 1.000000e+00 : f32
    %414 = vector.broadcast %cst_144 : f32 to vector<8x1xf32>
    %415 = arith.divf %414, %413 : vector<8x1xf32>
    %416 = vector.broadcast %415 : vector<8x1xf32> to vector<8x8xf32>
    %417 = arith.mulf %411, %416 : vector<8x8xf32>
    %cst_145 = arith.constant dense<0.000000e+00> : vector<8x8xf32>
    %418 = tpu.matmul %417, %404, %cst_145 {dimension_numbers = #tpu.dot_dimension_numbers<[1], [0], [0], [1], [0, 0, 1, 1], [], []>} : vector<8x8xf32>, vector<8x8xf32>, vector<8x8xf32> -> vector<8x8xf32>
    %419 = vector.extract_strided_slice %349 {offsets = [8, 0], sizes = [8, 32], strides = [1, 1]} : vector<32x32xf32> to vector<8x32xf32>
    %cst_146 = arith.constant dense<0.000000e+00> : vector<8x32xf32>
    %420 = tpu.matmul %418, %419, %cst_146 {dimension_numbers = #tpu.dot_dimension_numbers<[1], [0], [0], [1], [0, 0, 1, 1], [], []>} : vector<8x8xf32>, vector<8x32xf32>, vector<8x32xf32> -> vector<8x32xf32>
    %421 = arith.addf %401, %420 : vector<8x32xf32>
    %422 = vector.extract_strided_slice %372 {offsets = [0, 16], sizes = [8, 8], strides = [1, 1]} : vector<8x32xf32> to vector<8x8xf32>
    %423 = vector.extract_strided_slice %377 {offsets = [0, 16], sizes = [8, 8], strides = [1, 1]} : vector<8x32xf32> to vector<8x8xf32>
    %424 = vector.extract_strided_slice %382 {offsets = [0, 16], sizes = [8, 8], strides = [1, 1]} : vector<8x32xf32> to vector<8x8xf32>
    %425 = tpu.transpose %423, [1, 0] : vector<8x8xf32> -> vector<8x8xf32>
    %cst_147 = arith.constant dense<0.000000e+00> : vector<8x8xf32>
    %426 = tpu.matmul %422, %425, %cst_147 {dimension_numbers = #tpu.dot_dimension_numbers<[1], [0], [0], [1], [0, 0, 1, 1], [], []>} : vector<8x8xf32>, vector<8x8xf32>, vector<8x8xf32> -> vector<8x8xf32>
    %cst_148 = arith.constant dense<0xFF800000> : vector<8xf32>
    %427 = vector.multi_reduction <maximumf>, %426, %cst_148 [1] : vector<8x8xf32> to vector<8xf32>
    %428 = vector.shape_cast %427 : vector<8xf32> to vector<8x1xf32>
    %429 = vector.broadcast %428 : vector<8x1xf32> to vector<8x8xf32>
    %430 = arith.subf %426, %429 : vector<8x8xf32>
    %431 = math.exp %430 : vector<8x8xf32>
    %cst_149 = arith.constant dense<0.000000e+00> : vector<8xf32>
    %432 = vector.multi_reduction <add>, %431, %cst_149 [1] : vector<8x8xf32> to vector<8xf32>
    %433 = vector.shape_cast %432 : vector<8xf32> to vector<8x1xf32>
    %cst_150 = arith.constant 1.000000e+00 : f32
    %434 = vector.broadcast %cst_150 : f32 to vector<8x1xf32>
    %435 = arith.divf %434, %433 : vector<8x1xf32>
    %436 = vector.broadcast %435 : vector<8x1xf32> to vector<8x8xf32>
    %437 = arith.mulf %431, %436 : vector<8x8xf32>
    %cst_151 = arith.constant dense<0.000000e+00> : vector<8x8xf32>
    %438 = tpu.matmul %437, %424, %cst_151 {dimension_numbers = #tpu.dot_dimension_numbers<[1], [0], [0], [1], [0, 0, 1, 1], [], []>} : vector<8x8xf32>, vector<8x8xf32>, vector<8x8xf32> -> vector<8x8xf32>
    %439 = vector.extract_strided_slice %349 {offsets = [16, 0], sizes = [8, 32], strides = [1, 1]} : vector<32x32xf32> to vector<8x32xf32>
    %cst_152 = arith.constant dense<0.000000e+00> : vector<8x32xf32>
    %440 = tpu.matmul %438, %439, %cst_152 {dimension_numbers = #tpu.dot_dimension_numbers<[1], [0], [0], [1], [0, 0, 1, 1], [], []>} : vector<8x8xf32>, vector<8x32xf32>, vector<8x32xf32> -> vector<8x32xf32>
    %441 = arith.addf %421, %440 : vector<8x32xf32>
    %442 = vector.extract_strided_slice %372 {offsets = [0, 24], sizes = [8, 8], strides = [1, 1]} : vector<8x32xf32> to vector<8x8xf32>
    %443 = vector.extract_strided_slice %377 {offsets = [0, 24], sizes = [8, 8], strides = [1, 1]} : vector<8x32xf32> to vector<8x8xf32>
    %444 = vector.extract_strided_slice %382 {offsets = [0, 24], sizes = [8, 8], strides = [1, 1]} : vector<8x32xf32> to vector<8x8xf32>
    %445 = tpu.transpose %443, [1, 0] : vector<8x8xf32> -> vector<8x8xf32>
    %cst_153 = arith.constant dense<0.000000e+00> : vector<8x8xf32>
    %446 = tpu.matmul %442, %445, %cst_153 {dimension_numbers = #tpu.dot_dimension_numbers<[1], [0], [0], [1], [0, 0, 1, 1], [], []>} : vector<8x8xf32>, vector<8x8xf32>, vector<8x8xf32> -> vector<8x8xf32>
    %cst_154 = arith.constant dense<0xFF800000> : vector<8xf32>
    %447 = vector.multi_reduction <maximumf>, %446, %cst_154 [1] : vector<8x8xf32> to vector<8xf32>
    %448 = vector.shape_cast %447 : vector<8xf32> to vector<8x1xf32>
    %449 = vector.broadcast %448 : vector<8x1xf32> to vector<8x8xf32>
    %450 = arith.subf %446, %449 : vector<8x8xf32>
    %451 = math.exp %450 : vector<8x8xf32>
    %cst_155 = arith.constant dense<0.000000e+00> : vector<8xf32>
    %452 = vector.multi_reduction <add>, %451, %cst_155 [1] : vector<8x8xf32> to vector<8xf32>
    %453 = vector.shape_cast %452 : vector<8xf32> to vector<8x1xf32>
    %cst_156 = arith.constant 1.000000e+00 : f32
    %454 = vector.broadcast %cst_156 : f32 to vector<8x1xf32>
    %455 = arith.divf %454, %453 : vector<8x1xf32>
    %456 = vector.broadcast %455 : vector<8x1xf32> to vector<8x8xf32>
    %457 = arith.mulf %451, %456 : vector<8x8xf32>
    %cst_157 = arith.constant dense<0.000000e+00> : vector<8x8xf32>
    %458 = tpu.matmul %457, %444, %cst_157 {dimension_numbers = #tpu.dot_dimension_numbers<[1], [0], [0], [1], [0, 0, 1, 1], [], []>} : vector<8x8xf32>, vector<8x8xf32>, vector<8x8xf32> -> vector<8x8xf32>
    %459 = vector.extract_strided_slice %349 {offsets = [24, 0], sizes = [8, 32], strides = [1, 1]} : vector<32x32xf32> to vector<8x32xf32>
    %cst_158 = arith.constant dense<0.000000e+00> : vector<8x32xf32>
    %460 = tpu.matmul %458, %459, %cst_158 {dimension_numbers = #tpu.dot_dimension_numbers<[1], [0], [0], [1], [0, 0, 1, 1], [], []>} : vector<8x8xf32>, vector<8x32xf32>, vector<8x32xf32> -> vector<8x32xf32>
    %461 = arith.addf %441, %460 : vector<8x32xf32>
    %462 = vector.broadcast %361 : vector<1x32xf32> to vector<8x32xf32>
    %463 = arith.addf %461, %462 : vector<8x32xf32>
    %464 = arith.addf %345, %463 : vector<8x32xf32>
    %465 = vector.extract_strided_slice %359 {offsets = [6, 0], sizes = [1, 32], strides = [1, 1]} : vector<16x128xf32> to vector<1x32xf32>
    %466 = vector.extract_strided_slice %359 {offsets = [7, 0], sizes = [1, 32], strides = [1, 1]} : vector<16x128xf32> to vector<1x32xf32>
    %cst_159 = arith.constant dense<0.000000e+00> : vector<8xf32>
    %467 = vector.multi_reduction <add>, %464, %cst_159 [1] : vector<8x32xf32> to vector<8xf32>
    %468 = vector.shape_cast %467 : vector<8xf32> to vector<8x1xf32>
    %cst_160 = arith.constant 3.200000e+01 : f32
    %469 = vector.broadcast %cst_160 : f32 to vector<8x1xf32>
    %470 = arith.divf %468, %469 : vector<8x1xf32>
    %471 = vector.broadcast %470 : vector<8x1xf32> to vector<8x32xf32>
    %472 = arith.subf %464, %471 : vector<8x32xf32>
    %473 = arith.mulf %472, %472 : vector<8x32xf32>
    %cst_161 = arith.constant dense<0.000000e+00> : vector<8xf32>
    %474 = vector.multi_reduction <add>, %473, %cst_161 [1] : vector<8x32xf32> to vector<8xf32>
    %475 = vector.shape_cast %474 : vector<8xf32> to vector<8x1xf32>
    %cst_162 = arith.constant 3.200000e+01 : f32
    %476 = vector.broadcast %cst_162 : f32 to vector<8x1xf32>
    %477 = arith.divf %475, %476 : vector<8x1xf32>
    %478 = vector.broadcast %470 : vector<8x1xf32> to vector<8x32xf32>
    %479 = arith.subf %464, %478 : vector<8x32xf32>
    %cst_163 = arith.constant 9.99999974E-6 : f32
    %480 = vector.broadcast %cst_163 : f32 to vector<8x1xf32>
    %481 = arith.addf %477, %480 : vector<8x1xf32>
    %482 = math.rsqrt %481 : vector<8x1xf32>
    %483 = vector.broadcast %482 : vector<8x1xf32> to vector<8x32xf32>
    %484 = arith.mulf %479, %483 : vector<8x32xf32>
    %485 = vector.broadcast %465 : vector<1x32xf32> to vector<8x32xf32>
    %486 = arith.mulf %484, %485 : vector<8x32xf32>
    %487 = vector.broadcast %466 : vector<1x32xf32> to vector<8x32xf32>
    %488 = arith.addf %486, %487 : vector<8x32xf32>
    %489 = vector.extract_strided_slice %351 {offsets = [0, 0], sizes = [32, 32], strides = [1, 1]} : vector<32x96xf32> to vector<32x32xf32>
    %cst_164 = arith.constant dense<0.000000e+00> : vector<8x32xf32>
    %490 = tpu.matmul %488, %489, %cst_164 {dimension_numbers = #tpu.dot_dimension_numbers<[1], [0], [0], [1], [0, 0, 1, 1], [], []>} : vector<8x32xf32>, vector<32x32xf32>, vector<8x32xf32> -> vector<8x32xf32>
    %491 = vector.extract_strided_slice %362 {offsets = [0, 0], sizes = [1, 32], strides = [1, 1]} : vector<1x96xf32> to vector<1x32xf32>
    %492 = vector.broadcast %491 : vector<1x32xf32> to vector<8x32xf32>
    %493 = arith.addf %490, %492 : vector<8x32xf32>
    %cst_165 = arith.constant 0.353553385 : f32
    %494 = vector.broadcast %cst_165 : f32 to vector<8x32xf32>
    %495 = arith.mulf %493, %494 : vector<8x32xf32>
    %496 = vector.extract_strided_slice %351 {offsets = [0, 32], sizes = [32, 32], strides = [1, 1]} : vector<32x96xf32> to vector<32x32xf32>
    %cst_166 = arith.constant dense<0.000000e+00> : vector<32x32xf32>
    %497 = tpu.matmul %343, %496, %cst_166 {dimension_numbers = #tpu.dot_dimension_numbers<[1], [0], [0], [1], [0, 0, 1, 1], [], []>} : vector<32x32xf32>, vector<32x32xf32>, vector<32x32xf32> -> vector<32x32xf32>
    %498 = vector.extract_strided_slice %362 {offsets = [0, 32], sizes = [1, 32], strides = [1, 1]} : vector<1x96xf32> to vector<1x32xf32>
    %499 = vector.broadcast %498 : vector<1x32xf32> to vector<32x32xf32>
    %500 = arith.addf %497, %499 : vector<32x32xf32>
    %501 = vector.extract_strided_slice %351 {offsets = [0, 64], sizes = [32, 32], strides = [1, 1]} : vector<32x96xf32> to vector<32x32xf32>
    %cst_167 = arith.constant dense<0.000000e+00> : vector<32x32xf32>
    %502 = tpu.matmul %343, %501, %cst_167 {dimension_numbers = #tpu.dot_dimension_numbers<[1], [0], [0], [1], [0, 0, 1, 1], [], []>} : vector<32x32xf32>, vector<32x32xf32>, vector<32x32xf32> -> vector<32x32xf32>
    %503 = vector.extract_strided_slice %362 {offsets = [0, 64], sizes = [1, 32], strides = [1, 1]} : vector<1x96xf32> to vector<1x32xf32>
    %504 = vector.broadcast %503 : vector<1x32xf32> to vector<32x32xf32>
    %505 = arith.addf %502, %504 : vector<32x32xf32>
    %506 = vector.extract_strided_slice %495 {offsets = [0, 0], sizes = [8, 8], strides = [1, 1]} : vector<8x32xf32> to vector<8x8xf32>
    %507 = vector.extract_strided_slice %500 {offsets = [0, 0], sizes = [32, 8], strides = [1, 1]} : vector<32x32xf32> to vector<32x8xf32>
    %508 = vector.extract_strided_slice %505 {offsets = [0, 0], sizes = [32, 8], strides = [1, 1]} : vector<32x32xf32> to vector<32x8xf32>
    %509 = tpu.transpose %507, [1, 0] : vector<32x8xf32> -> vector<8x32xf32>
    %cst_168 = arith.constant dense<0.000000e+00> : vector<8x32xf32>
    %510 = tpu.matmul %506, %509, %cst_168 {dimension_numbers = #tpu.dot_dimension_numbers<[1], [0], [0], [1], [0, 0, 1, 1], [], []>} : vector<8x8xf32>, vector<8x32xf32>, vector<8x32xf32> -> vector<8x32xf32>
    %cst_169 = arith.constant dense<0xFF800000> : vector<8xf32>
    %511 = vector.multi_reduction <maximumf>, %510, %cst_169 [1] : vector<8x32xf32> to vector<8xf32>
    %512 = vector.shape_cast %511 : vector<8xf32> to vector<8x1xf32>
    %513 = vector.broadcast %512 : vector<8x1xf32> to vector<8x32xf32>
    %514 = arith.subf %510, %513 : vector<8x32xf32>
    %515 = math.exp %514 : vector<8x32xf32>
    %cst_170 = arith.constant dense<0.000000e+00> : vector<8xf32>
    %516 = vector.multi_reduction <add>, %515, %cst_170 [1] : vector<8x32xf32> to vector<8xf32>
    %517 = vector.shape_cast %516 : vector<8xf32> to vector<8x1xf32>
    %cst_171 = arith.constant 1.000000e+00 : f32
    %518 = vector.broadcast %cst_171 : f32 to vector<8x1xf32>
    %519 = arith.divf %518, %517 : vector<8x1xf32>
    %520 = vector.broadcast %519 : vector<8x1xf32> to vector<8x32xf32>
    %521 = arith.mulf %515, %520 : vector<8x32xf32>
    %cst_172 = arith.constant dense<0.000000e+00> : vector<8x8xf32>
    %522 = tpu.matmul %521, %508, %cst_172 {dimension_numbers = #tpu.dot_dimension_numbers<[1], [0], [0], [1], [0, 0, 1, 1], [], []>} : vector<8x32xf32>, vector<32x8xf32>, vector<8x8xf32> -> vector<8x8xf32>
    %523 = vector.extract_strided_slice %353 {offsets = [0, 0], sizes = [8, 32], strides = [1, 1]} : vector<32x32xf32> to vector<8x32xf32>
    %cst_173 = arith.constant dense<0.000000e+00> : vector<8x32xf32>
    %524 = tpu.matmul %522, %523, %cst_173 {dimension_numbers = #tpu.dot_dimension_numbers<[1], [0], [0], [1], [0, 0, 1, 1], [], []>} : vector<8x8xf32>, vector<8x32xf32>, vector<8x32xf32> -> vector<8x32xf32>
    %525 = vector.extract_strided_slice %495 {offsets = [0, 8], sizes = [8, 8], strides = [1, 1]} : vector<8x32xf32> to vector<8x8xf32>
    %526 = vector.extract_strided_slice %500 {offsets = [0, 8], sizes = [32, 8], strides = [1, 1]} : vector<32x32xf32> to vector<32x8xf32>
    %527 = vector.extract_strided_slice %505 {offsets = [0, 8], sizes = [32, 8], strides = [1, 1]} : vector<32x32xf32> to vector<32x8xf32>
    %528 = tpu.transpose %526, [1, 0] : vector<32x8xf32> -> vector<8x32xf32>
    %cst_174 = arith.constant dense<0.000000e+00> : vector<8x32xf32>
    %529 = tpu.matmul %525, %528, %cst_174 {dimension_numbers = #tpu.dot_dimension_numbers<[1], [0], [0], [1], [0, 0, 1, 1], [], []>} : vector<8x8xf32>, vector<8x32xf32>, vector<8x32xf32> -> vector<8x32xf32>
    %cst_175 = arith.constant dense<0xFF800000> : vector<8xf32>
    %530 = vector.multi_reduction <maximumf>, %529, %cst_175 [1] : vector<8x32xf32> to vector<8xf32>
    %531 = vector.shape_cast %530 : vector<8xf32> to vector<8x1xf32>
    %532 = vector.broadcast %531 : vector<8x1xf32> to vector<8x32xf32>
    %533 = arith.subf %529, %532 : vector<8x32xf32>
    %534 = math.exp %533 : vector<8x32xf32>
    %cst_176 = arith.constant dense<0.000000e+00> : vector<8xf32>
    %535 = vector.multi_reduction <add>, %534, %cst_176 [1] : vector<8x32xf32> to vector<8xf32>
    %536 = vector.shape_cast %535 : vector<8xf32> to vector<8x1xf32>
    %cst_177 = arith.constant 1.000000e+00 : f32
    %537 = vector.broadcast %cst_177 : f32 to vector<8x1xf32>
    %538 = arith.divf %537, %536 : vector<8x1xf32>
    %539 = vector.broadcast %538 : vector<8x1xf32> to vector<8x32xf32>
    %540 = arith.mulf %534, %539 : vector<8x32xf32>
    %cst_178 = arith.constant dense<0.000000e+00> : vector<8x8xf32>
    %541 = tpu.matmul %540, %527, %cst_178 {dimension_numbers = #tpu.dot_dimension_numbers<[1], [0], [0], [1], [0, 0, 1, 1], [], []>} : vector<8x32xf32>, vector<32x8xf32>, vector<8x8xf32> -> vector<8x8xf32>
    %542 = vector.extract_strided_slice %353 {offsets = [8, 0], sizes = [8, 32], strides = [1, 1]} : vector<32x32xf32> to vector<8x32xf32>
    %cst_179 = arith.constant dense<0.000000e+00> : vector<8x32xf32>
    %543 = tpu.matmul %541, %542, %cst_179 {dimension_numbers = #tpu.dot_dimension_numbers<[1], [0], [0], [1], [0, 0, 1, 1], [], []>} : vector<8x8xf32>, vector<8x32xf32>, vector<8x32xf32> -> vector<8x32xf32>
    %544 = arith.addf %524, %543 : vector<8x32xf32>
    %545 = vector.extract_strided_slice %495 {offsets = [0, 16], sizes = [8, 8], strides = [1, 1]} : vector<8x32xf32> to vector<8x8xf32>
    %546 = vector.extract_strided_slice %500 {offsets = [0, 16], sizes = [32, 8], strides = [1, 1]} : vector<32x32xf32> to vector<32x8xf32>
    %547 = vector.extract_strided_slice %505 {offsets = [0, 16], sizes = [32, 8], strides = [1, 1]} : vector<32x32xf32> to vector<32x8xf32>
    %548 = tpu.transpose %546, [1, 0] : vector<32x8xf32> -> vector<8x32xf32>
    %cst_180 = arith.constant dense<0.000000e+00> : vector<8x32xf32>
    %549 = tpu.matmul %545, %548, %cst_180 {dimension_numbers = #tpu.dot_dimension_numbers<[1], [0], [0], [1], [0, 0, 1, 1], [], []>} : vector<8x8xf32>, vector<8x32xf32>, vector<8x32xf32> -> vector<8x32xf32>
    %cst_181 = arith.constant dense<0xFF800000> : vector<8xf32>
    %550 = vector.multi_reduction <maximumf>, %549, %cst_181 [1] : vector<8x32xf32> to vector<8xf32>
    %551 = vector.shape_cast %550 : vector<8xf32> to vector<8x1xf32>
    %552 = vector.broadcast %551 : vector<8x1xf32> to vector<8x32xf32>
    %553 = arith.subf %549, %552 : vector<8x32xf32>
    %554 = math.exp %553 : vector<8x32xf32>
    %cst_182 = arith.constant dense<0.000000e+00> : vector<8xf32>
    %555 = vector.multi_reduction <add>, %554, %cst_182 [1] : vector<8x32xf32> to vector<8xf32>
    %556 = vector.shape_cast %555 : vector<8xf32> to vector<8x1xf32>
    %cst_183 = arith.constant 1.000000e+00 : f32
    %557 = vector.broadcast %cst_183 : f32 to vector<8x1xf32>
    %558 = arith.divf %557, %556 : vector<8x1xf32>
    %559 = vector.broadcast %558 : vector<8x1xf32> to vector<8x32xf32>
    %560 = arith.mulf %554, %559 : vector<8x32xf32>
    %cst_184 = arith.constant dense<0.000000e+00> : vector<8x8xf32>
    %561 = tpu.matmul %560, %547, %cst_184 {dimension_numbers = #tpu.dot_dimension_numbers<[1], [0], [0], [1], [0, 0, 1, 1], [], []>} : vector<8x32xf32>, vector<32x8xf32>, vector<8x8xf32> -> vector<8x8xf32>
    %562 = vector.extract_strided_slice %353 {offsets = [16, 0], sizes = [8, 32], strides = [1, 1]} : vector<32x32xf32> to vector<8x32xf32>
    %cst_185 = arith.constant dense<0.000000e+00> : vector<8x32xf32>
    %563 = tpu.matmul %561, %562, %cst_185 {dimension_numbers = #tpu.dot_dimension_numbers<[1], [0], [0], [1], [0, 0, 1, 1], [], []>} : vector<8x8xf32>, vector<8x32xf32>, vector<8x32xf32> -> vector<8x32xf32>
    %564 = arith.addf %544, %563 : vector<8x32xf32>
    %565 = vector.extract_strided_slice %495 {offsets = [0, 24], sizes = [8, 8], strides = [1, 1]} : vector<8x32xf32> to vector<8x8xf32>
    %566 = vector.extract_strided_slice %500 {offsets = [0, 24], sizes = [32, 8], strides = [1, 1]} : vector<32x32xf32> to vector<32x8xf32>
    %567 = vector.extract_strided_slice %505 {offsets = [0, 24], sizes = [32, 8], strides = [1, 1]} : vector<32x32xf32> to vector<32x8xf32>
    %568 = tpu.transpose %566, [1, 0] : vector<32x8xf32> -> vector<8x32xf32>
    %cst_186 = arith.constant dense<0.000000e+00> : vector<8x32xf32>
    %569 = tpu.matmul %565, %568, %cst_186 {dimension_numbers = #tpu.dot_dimension_numbers<[1], [0], [0], [1], [0, 0, 1, 1], [], []>} : vector<8x8xf32>, vector<8x32xf32>, vector<8x32xf32> -> vector<8x32xf32>
    %cst_187 = arith.constant dense<0xFF800000> : vector<8xf32>
    %570 = vector.multi_reduction <maximumf>, %569, %cst_187 [1] : vector<8x32xf32> to vector<8xf32>
    %571 = vector.shape_cast %570 : vector<8xf32> to vector<8x1xf32>
    %572 = vector.broadcast %571 : vector<8x1xf32> to vector<8x32xf32>
    %573 = arith.subf %569, %572 : vector<8x32xf32>
    %574 = math.exp %573 : vector<8x32xf32>
    %cst_188 = arith.constant dense<0.000000e+00> : vector<8xf32>
    %575 = vector.multi_reduction <add>, %574, %cst_188 [1] : vector<8x32xf32> to vector<8xf32>
    %576 = vector.shape_cast %575 : vector<8xf32> to vector<8x1xf32>
    %cst_189 = arith.constant 1.000000e+00 : f32
    %577 = vector.broadcast %cst_189 : f32 to vector<8x1xf32>
    %578 = arith.divf %577, %576 : vector<8x1xf32>
    %579 = vector.broadcast %578 : vector<8x1xf32> to vector<8x32xf32>
    %580 = arith.mulf %574, %579 : vector<8x32xf32>
    %cst_190 = arith.constant dense<0.000000e+00> : vector<8x8xf32>
    %581 = tpu.matmul %580, %567, %cst_190 {dimension_numbers = #tpu.dot_dimension_numbers<[1], [0], [0], [1], [0, 0, 1, 1], [], []>} : vector<8x32xf32>, vector<32x8xf32>, vector<8x8xf32> -> vector<8x8xf32>
    %582 = vector.extract_strided_slice %353 {offsets = [24, 0], sizes = [8, 32], strides = [1, 1]} : vector<32x32xf32> to vector<8x32xf32>
    %cst_191 = arith.constant dense<0.000000e+00> : vector<8x32xf32>
    %583 = tpu.matmul %581, %582, %cst_191 {dimension_numbers = #tpu.dot_dimension_numbers<[1], [0], [0], [1], [0, 0, 1, 1], [], []>} : vector<8x8xf32>, vector<8x32xf32>, vector<8x32xf32> -> vector<8x32xf32>
    %584 = arith.addf %564, %583 : vector<8x32xf32>
    %585 = vector.broadcast %363 : vector<1x32xf32> to vector<8x32xf32>
    %586 = arith.addf %584, %585 : vector<8x32xf32>
    %587 = arith.addf %488, %586 : vector<8x32xf32>
    %588 = vector.extract_strided_slice %359 {offsets = [8, 0], sizes = [1, 32], strides = [1, 1]} : vector<16x128xf32> to vector<1x32xf32>
    %589 = vector.extract_strided_slice %359 {offsets = [9, 0], sizes = [1, 32], strides = [1, 1]} : vector<16x128xf32> to vector<1x32xf32>
    %cst_192 = arith.constant dense<0.000000e+00> : vector<8xf32>
    %590 = vector.multi_reduction <add>, %587, %cst_192 [1] : vector<8x32xf32> to vector<8xf32>
    %591 = vector.shape_cast %590 : vector<8xf32> to vector<8x1xf32>
    %cst_193 = arith.constant 3.200000e+01 : f32
    %592 = vector.broadcast %cst_193 : f32 to vector<8x1xf32>
    %593 = arith.divf %591, %592 : vector<8x1xf32>
    %594 = vector.broadcast %593 : vector<8x1xf32> to vector<8x32xf32>
    %595 = arith.subf %587, %594 : vector<8x32xf32>
    %596 = arith.mulf %595, %595 : vector<8x32xf32>
    %cst_194 = arith.constant dense<0.000000e+00> : vector<8xf32>
    %597 = vector.multi_reduction <add>, %596, %cst_194 [1] : vector<8x32xf32> to vector<8xf32>
    %598 = vector.shape_cast %597 : vector<8xf32> to vector<8x1xf32>
    %cst_195 = arith.constant 3.200000e+01 : f32
    %599 = vector.broadcast %cst_195 : f32 to vector<8x1xf32>
    %600 = arith.divf %598, %599 : vector<8x1xf32>
    %601 = vector.broadcast %593 : vector<8x1xf32> to vector<8x32xf32>
    %602 = arith.subf %587, %601 : vector<8x32xf32>
    %cst_196 = arith.constant 9.99999974E-6 : f32
    %603 = vector.broadcast %cst_196 : f32 to vector<8x1xf32>
    %604 = arith.addf %600, %603 : vector<8x1xf32>
    %605 = math.rsqrt %604 : vector<8x1xf32>
    %606 = vector.broadcast %605 : vector<8x1xf32> to vector<8x32xf32>
    %607 = arith.mulf %602, %606 : vector<8x32xf32>
    %608 = vector.broadcast %588 : vector<1x32xf32> to vector<8x32xf32>
    %609 = arith.mulf %607, %608 : vector<8x32xf32>
    %610 = vector.broadcast %589 : vector<1x32xf32> to vector<8x32xf32>
    %611 = arith.addf %609, %610 : vector<8x32xf32>
    %cst_197 = arith.constant dense<0.000000e+00> : vector<8x64xf32>
    %612 = tpu.matmul %611, %355, %cst_197 {dimension_numbers = #tpu.dot_dimension_numbers<[1], [0], [0], [1], [0, 0, 1, 1], [], []>} : vector<8x32xf32>, vector<32x64xf32>, vector<8x64xf32> -> vector<8x64xf32>
    %613 = vector.broadcast %364 : vector<1x64xf32> to vector<8x64xf32>
    %614 = arith.addf %612, %613 : vector<8x64xf32>
    %cst_198 = arith.constant 0.000000e+00 : f32
    %615 = vector.broadcast %cst_198 : f32 to vector<8x64xf32>
    %616 = arith.maximumf %614, %615 : vector<8x64xf32>
    %cst_199 = arith.constant dense<0.000000e+00> : vector<8x32xf32>
    %617 = tpu.matmul %616, %357, %cst_199 {dimension_numbers = #tpu.dot_dimension_numbers<[1], [0], [0], [1], [0, 0, 1, 1], [], []>} : vector<8x64xf32>, vector<64x32xf32>, vector<8x32xf32> -> vector<8x32xf32>
    %618 = vector.broadcast %365 : vector<1x32xf32> to vector<8x32xf32>
    %619 = arith.addf %617, %618 : vector<8x32xf32>
    %620 = arith.addf %611, %619 : vector<8x32xf32>
    %621 = vector.extract_strided_slice %359 {offsets = [10, 0], sizes = [1, 32], strides = [1, 1]} : vector<16x128xf32> to vector<1x32xf32>
    %622 = vector.extract_strided_slice %359 {offsets = [11, 0], sizes = [1, 32], strides = [1, 1]} : vector<16x128xf32> to vector<1x32xf32>
    %cst_200 = arith.constant dense<0.000000e+00> : vector<8xf32>
    %623 = vector.multi_reduction <add>, %620, %cst_200 [1] : vector<8x32xf32> to vector<8xf32>
    %624 = vector.shape_cast %623 : vector<8xf32> to vector<8x1xf32>
    %cst_201 = arith.constant 3.200000e+01 : f32
    %625 = vector.broadcast %cst_201 : f32 to vector<8x1xf32>
    %626 = arith.divf %624, %625 : vector<8x1xf32>
    %627 = vector.broadcast %626 : vector<8x1xf32> to vector<8x32xf32>
    %628 = arith.subf %620, %627 : vector<8x32xf32>
    %629 = arith.mulf %628, %628 : vector<8x32xf32>
    %cst_202 = arith.constant dense<0.000000e+00> : vector<8xf32>
    %630 = vector.multi_reduction <add>, %629, %cst_202 [1] : vector<8x32xf32> to vector<8xf32>
    %631 = vector.shape_cast %630 : vector<8xf32> to vector<8x1xf32>
    %cst_203 = arith.constant 3.200000e+01 : f32
    %632 = vector.broadcast %cst_203 : f32 to vector<8x1xf32>
    %633 = arith.divf %631, %632 : vector<8x1xf32>
    %634 = vector.broadcast %626 : vector<8x1xf32> to vector<8x32xf32>
    %635 = arith.subf %620, %634 : vector<8x32xf32>
    %cst_204 = arith.constant 9.99999974E-6 : f32
    %636 = vector.broadcast %cst_204 : f32 to vector<8x1xf32>
    %637 = arith.addf %633, %636 : vector<8x1xf32>
    %638 = math.rsqrt %637 : vector<8x1xf32>
    %639 = vector.broadcast %638 : vector<8x1xf32> to vector<8x32xf32>
    %640 = arith.mulf %635, %639 : vector<8x32xf32>
    %641 = vector.broadcast %621 : vector<1x32xf32> to vector<8x32xf32>
    %642 = arith.mulf %640, %641 : vector<8x32xf32>
    %643 = vector.broadcast %622 : vector<1x32xf32> to vector<8x32xf32>
    %644 = arith.addf %642, %643 : vector<8x32xf32>
    %c1_205 = arith.constant 1 : index
    %c0_206 = arith.constant 0 : index
    %c0_207 = arith.constant 0 : index
    %645 = vector.load %arg5[%c1_205, %c0_206, %c0_207] : memref<2x224x128xf32, #tpu.memory_space<vmem>>, vector<1x32x96xf32>
    %646 = vector.shape_cast %645 : vector<1x32x96xf32> to vector<32x96xf32>
    %c1_208 = arith.constant 1 : index
    %c32_209 = arith.constant 32 : index
    %c0_210 = arith.constant 0 : index
    %647 = vector.load %arg5[%c1_208, %c32_209, %c0_210] : memref<2x224x128xf32, #tpu.memory_space<vmem>>, vector<1x32x32xf32>
    %648 = vector.shape_cast %647 : vector<1x32x32xf32> to vector<32x32xf32>
    %c1_211 = arith.constant 1 : index
    %c64_212 = arith.constant 64 : index
    %c0_213 = arith.constant 0 : index
    %649 = vector.load %arg5[%c1_211, %c64_212, %c0_213] : memref<2x224x128xf32, #tpu.memory_space<vmem>>, vector<1x32x96xf32>
    %650 = vector.shape_cast %649 : vector<1x32x96xf32> to vector<32x96xf32>
    %c1_214 = arith.constant 1 : index
    %c96_215 = arith.constant 96 : index
    %c0_216 = arith.constant 0 : index
    %651 = vector.load %arg5[%c1_214, %c96_215, %c0_216] : memref<2x224x128xf32, #tpu.memory_space<vmem>>, vector<1x32x32xf32>
    %652 = vector.shape_cast %651 : vector<1x32x32xf32> to vector<32x32xf32>
    %c1_217 = arith.constant 1 : index
    %c128_218 = arith.constant 128 : index
    %c0_219 = arith.constant 0 : index
    %653 = vector.load %arg5[%c1_217, %c128_218, %c0_219] : memref<2x224x128xf32, #tpu.memory_space<vmem>>, vector<1x32x64xf32>
    %654 = vector.shape_cast %653 : vector<1x32x64xf32> to vector<32x64xf32>
    %c1_220 = arith.constant 1 : index
    %c160_221 = arith.constant 160 : index
    %c0_222 = arith.constant 0 : index
    %655 = vector.load %arg5[%c1_220, %c160_221, %c0_222] : memref<2x224x128xf32, #tpu.memory_space<vmem>>, vector<1x64x32xf32>
    %656 = vector.shape_cast %655 : vector<1x64x32xf32> to vector<64x32xf32>
    %c1_223 = arith.constant 1 : index
    %c0_224 = arith.constant 0 : index
    %c0_225 = arith.constant 0 : index
    %657 = vector.load %arg6[%c1_223, %c0_224, %c0_225] : memref<2x16x128xf32, #tpu.memory_space<vmem>>, vector<1x16x128xf32>
    %658 = vector.shape_cast %657 : vector<1x16x128xf32> to vector<16x128xf32>
    %659 = vector.extract_strided_slice %658 {offsets = [0, 0], sizes = [1, 96], strides = [1, 1]} : vector<16x128xf32> to vector<1x96xf32>
    %660 = vector.extract_strided_slice %658 {offsets = [1, 0], sizes = [1, 32], strides = [1, 1]} : vector<16x128xf32> to vector<1x32xf32>
    %661 = vector.extract_strided_slice %658 {offsets = [2, 0], sizes = [1, 96], strides = [1, 1]} : vector<16x128xf32> to vector<1x96xf32>
    %662 = vector.extract_strided_slice %658 {offsets = [3, 0], sizes = [1, 32], strides = [1, 1]} : vector<16x128xf32> to vector<1x32xf32>
    %663 = vector.extract_strided_slice %658 {offsets = [4, 0], sizes = [1, 64], strides = [1, 1]} : vector<16x128xf32> to vector<1x64xf32>
    %664 = vector.extract_strided_slice %658 {offsets = [5, 0], sizes = [1, 32], strides = [1, 1]} : vector<16x128xf32> to vector<1x32xf32>
    %665 = vector.extract_strided_slice %646 {offsets = [0, 0], sizes = [32, 32], strides = [1, 1]} : vector<32x96xf32> to vector<32x32xf32>
    %cst_226 = arith.constant dense<0.000000e+00> : vector<8x32xf32>
    %666 = tpu.matmul %644, %665, %cst_226 {dimension_numbers = #tpu.dot_dimension_numbers<[1], [0], [0], [1], [0, 0, 1, 1], [], []>} : vector<8x32xf32>, vector<32x32xf32>, vector<8x32xf32> -> vector<8x32xf32>
    %667 = vector.extract_strided_slice %659 {offsets = [0, 0], sizes = [1, 32], strides = [1, 1]} : vector<1x96xf32> to vector<1x32xf32>
    %668 = vector.broadcast %667 : vector<1x32xf32> to vector<8x32xf32>
    %669 = arith.addf %666, %668 : vector<8x32xf32>
    %cst_227 = arith.constant 0.353553385 : f32
    %670 = vector.broadcast %cst_227 : f32 to vector<8x32xf32>
    %671 = arith.mulf %669, %670 : vector<8x32xf32>
    %672 = vector.extract_strided_slice %646 {offsets = [0, 32], sizes = [32, 32], strides = [1, 1]} : vector<32x96xf32> to vector<32x32xf32>
    %cst_228 = arith.constant dense<0.000000e+00> : vector<8x32xf32>
    %673 = tpu.matmul %644, %672, %cst_228 {dimension_numbers = #tpu.dot_dimension_numbers<[1], [0], [0], [1], [0, 0, 1, 1], [], []>} : vector<8x32xf32>, vector<32x32xf32>, vector<8x32xf32> -> vector<8x32xf32>
    %674 = vector.extract_strided_slice %659 {offsets = [0, 32], sizes = [1, 32], strides = [1, 1]} : vector<1x96xf32> to vector<1x32xf32>
    %675 = vector.broadcast %674 : vector<1x32xf32> to vector<8x32xf32>
    %676 = arith.addf %673, %675 : vector<8x32xf32>
    %677 = vector.extract_strided_slice %646 {offsets = [0, 64], sizes = [32, 32], strides = [1, 1]} : vector<32x96xf32> to vector<32x32xf32>
    %cst_229 = arith.constant dense<0.000000e+00> : vector<8x32xf32>
    %678 = tpu.matmul %644, %677, %cst_229 {dimension_numbers = #tpu.dot_dimension_numbers<[1], [0], [0], [1], [0, 0, 1, 1], [], []>} : vector<8x32xf32>, vector<32x32xf32>, vector<8x32xf32> -> vector<8x32xf32>
    %679 = vector.extract_strided_slice %659 {offsets = [0, 64], sizes = [1, 32], strides = [1, 1]} : vector<1x96xf32> to vector<1x32xf32>
    %680 = vector.broadcast %679 : vector<1x32xf32> to vector<8x32xf32>
    %681 = arith.addf %678, %680 : vector<8x32xf32>
    %682 = vector.extract_strided_slice %671 {offsets = [0, 0], sizes = [8, 8], strides = [1, 1]} : vector<8x32xf32> to vector<8x8xf32>
    %683 = vector.extract_strided_slice %676 {offsets = [0, 0], sizes = [8, 8], strides = [1, 1]} : vector<8x32xf32> to vector<8x8xf32>
    %684 = vector.extract_strided_slice %681 {offsets = [0, 0], sizes = [8, 8], strides = [1, 1]} : vector<8x32xf32> to vector<8x8xf32>
    %685 = tpu.transpose %683, [1, 0] : vector<8x8xf32> -> vector<8x8xf32>
    %cst_230 = arith.constant dense<0.000000e+00> : vector<8x8xf32>
    %686 = tpu.matmul %682, %685, %cst_230 {dimension_numbers = #tpu.dot_dimension_numbers<[1], [0], [0], [1], [0, 0, 1, 1], [], []>} : vector<8x8xf32>, vector<8x8xf32>, vector<8x8xf32> -> vector<8x8xf32>
    %cst_231 = arith.constant dense<0xFF800000> : vector<8xf32>
    %687 = vector.multi_reduction <maximumf>, %686, %cst_231 [1] : vector<8x8xf32> to vector<8xf32>
    %688 = vector.shape_cast %687 : vector<8xf32> to vector<8x1xf32>
    %689 = vector.broadcast %688 : vector<8x1xf32> to vector<8x8xf32>
    %690 = arith.subf %686, %689 : vector<8x8xf32>
    %691 = math.exp %690 : vector<8x8xf32>
    %cst_232 = arith.constant dense<0.000000e+00> : vector<8xf32>
    %692 = vector.multi_reduction <add>, %691, %cst_232 [1] : vector<8x8xf32> to vector<8xf32>
    %693 = vector.shape_cast %692 : vector<8xf32> to vector<8x1xf32>
    %cst_233 = arith.constant 1.000000e+00 : f32
    %694 = vector.broadcast %cst_233 : f32 to vector<8x1xf32>
    %695 = arith.divf %694, %693 : vector<8x1xf32>
    %696 = vector.broadcast %695 : vector<8x1xf32> to vector<8x8xf32>
    %697 = arith.mulf %691, %696 : vector<8x8xf32>
    %cst_234 = arith.constant dense<0.000000e+00> : vector<8x8xf32>
    %698 = tpu.matmul %697, %684, %cst_234 {dimension_numbers = #tpu.dot_dimension_numbers<[1], [0], [0], [1], [0, 0, 1, 1], [], []>} : vector<8x8xf32>, vector<8x8xf32>, vector<8x8xf32> -> vector<8x8xf32>
    %699 = vector.extract_strided_slice %648 {offsets = [0, 0], sizes = [8, 32], strides = [1, 1]} : vector<32x32xf32> to vector<8x32xf32>
    %cst_235 = arith.constant dense<0.000000e+00> : vector<8x32xf32>
    %700 = tpu.matmul %698, %699, %cst_235 {dimension_numbers = #tpu.dot_dimension_numbers<[1], [0], [0], [1], [0, 0, 1, 1], [], []>} : vector<8x8xf32>, vector<8x32xf32>, vector<8x32xf32> -> vector<8x32xf32>
    %701 = vector.extract_strided_slice %671 {offsets = [0, 8], sizes = [8, 8], strides = [1, 1]} : vector<8x32xf32> to vector<8x8xf32>
    %702 = vector.extract_strided_slice %676 {offsets = [0, 8], sizes = [8, 8], strides = [1, 1]} : vector<8x32xf32> to vector<8x8xf32>
    %703 = vector.extract_strided_slice %681 {offsets = [0, 8], sizes = [8, 8], strides = [1, 1]} : vector<8x32xf32> to vector<8x8xf32>
    %704 = tpu.transpose %702, [1, 0] : vector<8x8xf32> -> vector<8x8xf32>
    %cst_236 = arith.constant dense<0.000000e+00> : vector<8x8xf32>
    %705 = tpu.matmul %701, %704, %cst_236 {dimension_numbers = #tpu.dot_dimension_numbers<[1], [0], [0], [1], [0, 0, 1, 1], [], []>} : vector<8x8xf32>, vector<8x8xf32>, vector<8x8xf32> -> vector<8x8xf32>
    %cst_237 = arith.constant dense<0xFF800000> : vector<8xf32>
    %706 = vector.multi_reduction <maximumf>, %705, %cst_237 [1] : vector<8x8xf32> to vector<8xf32>
    %707 = vector.shape_cast %706 : vector<8xf32> to vector<8x1xf32>
    %708 = vector.broadcast %707 : vector<8x1xf32> to vector<8x8xf32>
    %709 = arith.subf %705, %708 : vector<8x8xf32>
    %710 = math.exp %709 : vector<8x8xf32>
    %cst_238 = arith.constant dense<0.000000e+00> : vector<8xf32>
    %711 = vector.multi_reduction <add>, %710, %cst_238 [1] : vector<8x8xf32> to vector<8xf32>
    %712 = vector.shape_cast %711 : vector<8xf32> to vector<8x1xf32>
    %cst_239 = arith.constant 1.000000e+00 : f32
    %713 = vector.broadcast %cst_239 : f32 to vector<8x1xf32>
    %714 = arith.divf %713, %712 : vector<8x1xf32>
    %715 = vector.broadcast %714 : vector<8x1xf32> to vector<8x8xf32>
    %716 = arith.mulf %710, %715 : vector<8x8xf32>
    %cst_240 = arith.constant dense<0.000000e+00> : vector<8x8xf32>
    %717 = tpu.matmul %716, %703, %cst_240 {dimension_numbers = #tpu.dot_dimension_numbers<[1], [0], [0], [1], [0, 0, 1, 1], [], []>} : vector<8x8xf32>, vector<8x8xf32>, vector<8x8xf32> -> vector<8x8xf32>
    %718 = vector.extract_strided_slice %648 {offsets = [8, 0], sizes = [8, 32], strides = [1, 1]} : vector<32x32xf32> to vector<8x32xf32>
    %cst_241 = arith.constant dense<0.000000e+00> : vector<8x32xf32>
    %719 = tpu.matmul %717, %718, %cst_241 {dimension_numbers = #tpu.dot_dimension_numbers<[1], [0], [0], [1], [0, 0, 1, 1], [], []>} : vector<8x8xf32>, vector<8x32xf32>, vector<8x32xf32> -> vector<8x32xf32>
    %720 = arith.addf %700, %719 : vector<8x32xf32>
    %721 = vector.extract_strided_slice %671 {offsets = [0, 16], sizes = [8, 8], strides = [1, 1]} : vector<8x32xf32> to vector<8x8xf32>
    %722 = vector.extract_strided_slice %676 {offsets = [0, 16], sizes = [8, 8], strides = [1, 1]} : vector<8x32xf32> to vector<8x8xf32>
    %723 = vector.extract_strided_slice %681 {offsets = [0, 16], sizes = [8, 8], strides = [1, 1]} : vector<8x32xf32> to vector<8x8xf32>
    %724 = tpu.transpose %722, [1, 0] : vector<8x8xf32> -> vector<8x8xf32>
    %cst_242 = arith.constant dense<0.000000e+00> : vector<8x8xf32>
    %725 = tpu.matmul %721, %724, %cst_242 {dimension_numbers = #tpu.dot_dimension_numbers<[1], [0], [0], [1], [0, 0, 1, 1], [], []>} : vector<8x8xf32>, vector<8x8xf32>, vector<8x8xf32> -> vector<8x8xf32>
    %cst_243 = arith.constant dense<0xFF800000> : vector<8xf32>
    %726 = vector.multi_reduction <maximumf>, %725, %cst_243 [1] : vector<8x8xf32> to vector<8xf32>
    %727 = vector.shape_cast %726 : vector<8xf32> to vector<8x1xf32>
    %728 = vector.broadcast %727 : vector<8x1xf32> to vector<8x8xf32>
    %729 = arith.subf %725, %728 : vector<8x8xf32>
    %730 = math.exp %729 : vector<8x8xf32>
    %cst_244 = arith.constant dense<0.000000e+00> : vector<8xf32>
    %731 = vector.multi_reduction <add>, %730, %cst_244 [1] : vector<8x8xf32> to vector<8xf32>
    %732 = vector.shape_cast %731 : vector<8xf32> to vector<8x1xf32>
    %cst_245 = arith.constant 1.000000e+00 : f32
    %733 = vector.broadcast %cst_245 : f32 to vector<8x1xf32>
    %734 = arith.divf %733, %732 : vector<8x1xf32>
    %735 = vector.broadcast %734 : vector<8x1xf32> to vector<8x8xf32>
    %736 = arith.mulf %730, %735 : vector<8x8xf32>
    %cst_246 = arith.constant dense<0.000000e+00> : vector<8x8xf32>
    %737 = tpu.matmul %736, %723, %cst_246 {dimension_numbers = #tpu.dot_dimension_numbers<[1], [0], [0], [1], [0, 0, 1, 1], [], []>} : vector<8x8xf32>, vector<8x8xf32>, vector<8x8xf32> -> vector<8x8xf32>
    %738 = vector.extract_strided_slice %648 {offsets = [16, 0], sizes = [8, 32], strides = [1, 1]} : vector<32x32xf32> to vector<8x32xf32>
    %cst_247 = arith.constant dense<0.000000e+00> : vector<8x32xf32>
    %739 = tpu.matmul %737, %738, %cst_247 {dimension_numbers = #tpu.dot_dimension_numbers<[1], [0], [0], [1], [0, 0, 1, 1], [], []>} : vector<8x8xf32>, vector<8x32xf32>, vector<8x32xf32> -> vector<8x32xf32>
    %740 = arith.addf %720, %739 : vector<8x32xf32>
    %741 = vector.extract_strided_slice %671 {offsets = [0, 24], sizes = [8, 8], strides = [1, 1]} : vector<8x32xf32> to vector<8x8xf32>
    %742 = vector.extract_strided_slice %676 {offsets = [0, 24], sizes = [8, 8], strides = [1, 1]} : vector<8x32xf32> to vector<8x8xf32>
    %743 = vector.extract_strided_slice %681 {offsets = [0, 24], sizes = [8, 8], strides = [1, 1]} : vector<8x32xf32> to vector<8x8xf32>
    %744 = tpu.transpose %742, [1, 0] : vector<8x8xf32> -> vector<8x8xf32>
    %cst_248 = arith.constant dense<0.000000e+00> : vector<8x8xf32>
    %745 = tpu.matmul %741, %744, %cst_248 {dimension_numbers = #tpu.dot_dimension_numbers<[1], [0], [0], [1], [0, 0, 1, 1], [], []>} : vector<8x8xf32>, vector<8x8xf32>, vector<8x8xf32> -> vector<8x8xf32>
    %cst_249 = arith.constant dense<0xFF800000> : vector<8xf32>
    %746 = vector.multi_reduction <maximumf>, %745, %cst_249 [1] : vector<8x8xf32> to vector<8xf32>
    %747 = vector.shape_cast %746 : vector<8xf32> to vector<8x1xf32>
    %748 = vector.broadcast %747 : vector<8x1xf32> to vector<8x8xf32>
    %749 = arith.subf %745, %748 : vector<8x8xf32>
    %750 = math.exp %749 : vector<8x8xf32>
    %cst_250 = arith.constant dense<0.000000e+00> : vector<8xf32>
    %751 = vector.multi_reduction <add>, %750, %cst_250 [1] : vector<8x8xf32> to vector<8xf32>
    %752 = vector.shape_cast %751 : vector<8xf32> to vector<8x1xf32>
    %cst_251 = arith.constant 1.000000e+00 : f32
    %753 = vector.broadcast %cst_251 : f32 to vector<8x1xf32>
    %754 = arith.divf %753, %752 : vector<8x1xf32>
    %755 = vector.broadcast %754 : vector<8x1xf32> to vector<8x8xf32>
    %756 = arith.mulf %750, %755 : vector<8x8xf32>
    %cst_252 = arith.constant dense<0.000000e+00> : vector<8x8xf32>
    %757 = tpu.matmul %756, %743, %cst_252 {dimension_numbers = #tpu.dot_dimension_numbers<[1], [0], [0], [1], [0, 0, 1, 1], [], []>} : vector<8x8xf32>, vector<8x8xf32>, vector<8x8xf32> -> vector<8x8xf32>
    %758 = vector.extract_strided_slice %648 {offsets = [24, 0], sizes = [8, 32], strides = [1, 1]} : vector<32x32xf32> to vector<8x32xf32>
    %cst_253 = arith.constant dense<0.000000e+00> : vector<8x32xf32>
    %759 = tpu.matmul %757, %758, %cst_253 {dimension_numbers = #tpu.dot_dimension_numbers<[1], [0], [0], [1], [0, 0, 1, 1], [], []>} : vector<8x8xf32>, vector<8x32xf32>, vector<8x32xf32> -> vector<8x32xf32>
    %760 = arith.addf %740, %759 : vector<8x32xf32>
    %761 = vector.broadcast %660 : vector<1x32xf32> to vector<8x32xf32>
    %762 = arith.addf %760, %761 : vector<8x32xf32>
    %763 = arith.addf %644, %762 : vector<8x32xf32>
    %764 = vector.extract_strided_slice %658 {offsets = [6, 0], sizes = [1, 32], strides = [1, 1]} : vector<16x128xf32> to vector<1x32xf32>
    %765 = vector.extract_strided_slice %658 {offsets = [7, 0], sizes = [1, 32], strides = [1, 1]} : vector<16x128xf32> to vector<1x32xf32>
    %cst_254 = arith.constant dense<0.000000e+00> : vector<8xf32>
    %766 = vector.multi_reduction <add>, %763, %cst_254 [1] : vector<8x32xf32> to vector<8xf32>
    %767 = vector.shape_cast %766 : vector<8xf32> to vector<8x1xf32>
    %cst_255 = arith.constant 3.200000e+01 : f32
    %768 = vector.broadcast %cst_255 : f32 to vector<8x1xf32>
    %769 = arith.divf %767, %768 : vector<8x1xf32>
    %770 = vector.broadcast %769 : vector<8x1xf32> to vector<8x32xf32>
    %771 = arith.subf %763, %770 : vector<8x32xf32>
    %772 = arith.mulf %771, %771 : vector<8x32xf32>
    %cst_256 = arith.constant dense<0.000000e+00> : vector<8xf32>
    %773 = vector.multi_reduction <add>, %772, %cst_256 [1] : vector<8x32xf32> to vector<8xf32>
    %774 = vector.shape_cast %773 : vector<8xf32> to vector<8x1xf32>
    %cst_257 = arith.constant 3.200000e+01 : f32
    %775 = vector.broadcast %cst_257 : f32 to vector<8x1xf32>
    %776 = arith.divf %774, %775 : vector<8x1xf32>
    %777 = vector.broadcast %769 : vector<8x1xf32> to vector<8x32xf32>
    %778 = arith.subf %763, %777 : vector<8x32xf32>
    %cst_258 = arith.constant 9.99999974E-6 : f32
    %779 = vector.broadcast %cst_258 : f32 to vector<8x1xf32>
    %780 = arith.addf %776, %779 : vector<8x1xf32>
    %781 = math.rsqrt %780 : vector<8x1xf32>
    %782 = vector.broadcast %781 : vector<8x1xf32> to vector<8x32xf32>
    %783 = arith.mulf %778, %782 : vector<8x32xf32>
    %784 = vector.broadcast %764 : vector<1x32xf32> to vector<8x32xf32>
    %785 = arith.mulf %783, %784 : vector<8x32xf32>
    %786 = vector.broadcast %765 : vector<1x32xf32> to vector<8x32xf32>
    %787 = arith.addf %785, %786 : vector<8x32xf32>
    %788 = vector.extract_strided_slice %650 {offsets = [0, 0], sizes = [32, 32], strides = [1, 1]} : vector<32x96xf32> to vector<32x32xf32>
    %cst_259 = arith.constant dense<0.000000e+00> : vector<8x32xf32>
    %789 = tpu.matmul %787, %788, %cst_259 {dimension_numbers = #tpu.dot_dimension_numbers<[1], [0], [0], [1], [0, 0, 1, 1], [], []>} : vector<8x32xf32>, vector<32x32xf32>, vector<8x32xf32> -> vector<8x32xf32>
    %790 = vector.extract_strided_slice %661 {offsets = [0, 0], sizes = [1, 32], strides = [1, 1]} : vector<1x96xf32> to vector<1x32xf32>
    %791 = vector.broadcast %790 : vector<1x32xf32> to vector<8x32xf32>
    %792 = arith.addf %789, %791 : vector<8x32xf32>
    %cst_260 = arith.constant 0.353553385 : f32
    %793 = vector.broadcast %cst_260 : f32 to vector<8x32xf32>
    %794 = arith.mulf %792, %793 : vector<8x32xf32>
    %795 = vector.extract_strided_slice %650 {offsets = [0, 32], sizes = [32, 32], strides = [1, 1]} : vector<32x96xf32> to vector<32x32xf32>
    %cst_261 = arith.constant dense<0.000000e+00> : vector<32x32xf32>
    %796 = tpu.matmul %343, %795, %cst_261 {dimension_numbers = #tpu.dot_dimension_numbers<[1], [0], [0], [1], [0, 0, 1, 1], [], []>} : vector<32x32xf32>, vector<32x32xf32>, vector<32x32xf32> -> vector<32x32xf32>
    %797 = vector.extract_strided_slice %661 {offsets = [0, 32], sizes = [1, 32], strides = [1, 1]} : vector<1x96xf32> to vector<1x32xf32>
    %798 = vector.broadcast %797 : vector<1x32xf32> to vector<32x32xf32>
    %799 = arith.addf %796, %798 : vector<32x32xf32>
    %800 = vector.extract_strided_slice %650 {offsets = [0, 64], sizes = [32, 32], strides = [1, 1]} : vector<32x96xf32> to vector<32x32xf32>
    %cst_262 = arith.constant dense<0.000000e+00> : vector<32x32xf32>
    %801 = tpu.matmul %343, %800, %cst_262 {dimension_numbers = #tpu.dot_dimension_numbers<[1], [0], [0], [1], [0, 0, 1, 1], [], []>} : vector<32x32xf32>, vector<32x32xf32>, vector<32x32xf32> -> vector<32x32xf32>
    %802 = vector.extract_strided_slice %661 {offsets = [0, 64], sizes = [1, 32], strides = [1, 1]} : vector<1x96xf32> to vector<1x32xf32>
    %803 = vector.broadcast %802 : vector<1x32xf32> to vector<32x32xf32>
    %804 = arith.addf %801, %803 : vector<32x32xf32>
    %805 = vector.extract_strided_slice %794 {offsets = [0, 0], sizes = [8, 8], strides = [1, 1]} : vector<8x32xf32> to vector<8x8xf32>
    %806 = vector.extract_strided_slice %799 {offsets = [0, 0], sizes = [32, 8], strides = [1, 1]} : vector<32x32xf32> to vector<32x8xf32>
    %807 = vector.extract_strided_slice %804 {offsets = [0, 0], sizes = [32, 8], strides = [1, 1]} : vector<32x32xf32> to vector<32x8xf32>
    %808 = tpu.transpose %806, [1, 0] : vector<32x8xf32> -> vector<8x32xf32>
    %cst_263 = arith.constant dense<0.000000e+00> : vector<8x32xf32>
    %809 = tpu.matmul %805, %808, %cst_263 {dimension_numbers = #tpu.dot_dimension_numbers<[1], [0], [0], [1], [0, 0, 1, 1], [], []>} : vector<8x8xf32>, vector<8x32xf32>, vector<8x32xf32> -> vector<8x32xf32>
    %cst_264 = arith.constant dense<0xFF800000> : vector<8xf32>
    %810 = vector.multi_reduction <maximumf>, %809, %cst_264 [1] : vector<8x32xf32> to vector<8xf32>
    %811 = vector.shape_cast %810 : vector<8xf32> to vector<8x1xf32>
    %812 = vector.broadcast %811 : vector<8x1xf32> to vector<8x32xf32>
    %813 = arith.subf %809, %812 : vector<8x32xf32>
    %814 = math.exp %813 : vector<8x32xf32>
    %cst_265 = arith.constant dense<0.000000e+00> : vector<8xf32>
    %815 = vector.multi_reduction <add>, %814, %cst_265 [1] : vector<8x32xf32> to vector<8xf32>
    %816 = vector.shape_cast %815 : vector<8xf32> to vector<8x1xf32>
    %cst_266 = arith.constant 1.000000e+00 : f32
    %817 = vector.broadcast %cst_266 : f32 to vector<8x1xf32>
    %818 = arith.divf %817, %816 : vector<8x1xf32>
    %819 = vector.broadcast %818 : vector<8x1xf32> to vector<8x32xf32>
    %820 = arith.mulf %814, %819 : vector<8x32xf32>
    %cst_267 = arith.constant dense<0.000000e+00> : vector<8x8xf32>
    %821 = tpu.matmul %820, %807, %cst_267 {dimension_numbers = #tpu.dot_dimension_numbers<[1], [0], [0], [1], [0, 0, 1, 1], [], []>} : vector<8x32xf32>, vector<32x8xf32>, vector<8x8xf32> -> vector<8x8xf32>
    %822 = vector.extract_strided_slice %652 {offsets = [0, 0], sizes = [8, 32], strides = [1, 1]} : vector<32x32xf32> to vector<8x32xf32>
    %cst_268 = arith.constant dense<0.000000e+00> : vector<8x32xf32>
    %823 = tpu.matmul %821, %822, %cst_268 {dimension_numbers = #tpu.dot_dimension_numbers<[1], [0], [0], [1], [0, 0, 1, 1], [], []>} : vector<8x8xf32>, vector<8x32xf32>, vector<8x32xf32> -> vector<8x32xf32>
    %824 = vector.extract_strided_slice %794 {offsets = [0, 8], sizes = [8, 8], strides = [1, 1]} : vector<8x32xf32> to vector<8x8xf32>
    %825 = vector.extract_strided_slice %799 {offsets = [0, 8], sizes = [32, 8], strides = [1, 1]} : vector<32x32xf32> to vector<32x8xf32>
    %826 = vector.extract_strided_slice %804 {offsets = [0, 8], sizes = [32, 8], strides = [1, 1]} : vector<32x32xf32> to vector<32x8xf32>
    %827 = tpu.transpose %825, [1, 0] : vector<32x8xf32> -> vector<8x32xf32>
    %cst_269 = arith.constant dense<0.000000e+00> : vector<8x32xf32>
    %828 = tpu.matmul %824, %827, %cst_269 {dimension_numbers = #tpu.dot_dimension_numbers<[1], [0], [0], [1], [0, 0, 1, 1], [], []>} : vector<8x8xf32>, vector<8x32xf32>, vector<8x32xf32> -> vector<8x32xf32>
    %cst_270 = arith.constant dense<0xFF800000> : vector<8xf32>
    %829 = vector.multi_reduction <maximumf>, %828, %cst_270 [1] : vector<8x32xf32> to vector<8xf32>
    %830 = vector.shape_cast %829 : vector<8xf32> to vector<8x1xf32>
    %831 = vector.broadcast %830 : vector<8x1xf32> to vector<8x32xf32>
    %832 = arith.subf %828, %831 : vector<8x32xf32>
    %833 = math.exp %832 : vector<8x32xf32>
    %cst_271 = arith.constant dense<0.000000e+00> : vector<8xf32>
    %834 = vector.multi_reduction <add>, %833, %cst_271 [1] : vector<8x32xf32> to vector<8xf32>
    %835 = vector.shape_cast %834 : vector<8xf32> to vector<8x1xf32>
    %cst_272 = arith.constant 1.000000e+00 : f32
    %836 = vector.broadcast %cst_272 : f32 to vector<8x1xf32>
    %837 = arith.divf %836, %835 : vector<8x1xf32>
    %838 = vector.broadcast %837 : vector<8x1xf32> to vector<8x32xf32>
    %839 = arith.mulf %833, %838 : vector<8x32xf32>
    %cst_273 = arith.constant dense<0.000000e+00> : vector<8x8xf32>
    %840 = tpu.matmul %839, %826, %cst_273 {dimension_numbers = #tpu.dot_dimension_numbers<[1], [0], [0], [1], [0, 0, 1, 1], [], []>} : vector<8x32xf32>, vector<32x8xf32>, vector<8x8xf32> -> vector<8x8xf32>
    %841 = vector.extract_strided_slice %652 {offsets = [8, 0], sizes = [8, 32], strides = [1, 1]} : vector<32x32xf32> to vector<8x32xf32>
    %cst_274 = arith.constant dense<0.000000e+00> : vector<8x32xf32>
    %842 = tpu.matmul %840, %841, %cst_274 {dimension_numbers = #tpu.dot_dimension_numbers<[1], [0], [0], [1], [0, 0, 1, 1], [], []>} : vector<8x8xf32>, vector<8x32xf32>, vector<8x32xf32> -> vector<8x32xf32>
    %843 = arith.addf %823, %842 : vector<8x32xf32>
    %844 = vector.extract_strided_slice %794 {offsets = [0, 16], sizes = [8, 8], strides = [1, 1]} : vector<8x32xf32> to vector<8x8xf32>
    %845 = vector.extract_strided_slice %799 {offsets = [0, 16], sizes = [32, 8], strides = [1, 1]} : vector<32x32xf32> to vector<32x8xf32>
    %846 = vector.extract_strided_slice %804 {offsets = [0, 16], sizes = [32, 8], strides = [1, 1]} : vector<32x32xf32> to vector<32x8xf32>
    %847 = tpu.transpose %845, [1, 0] : vector<32x8xf32> -> vector<8x32xf32>
    %cst_275 = arith.constant dense<0.000000e+00> : vector<8x32xf32>
    %848 = tpu.matmul %844, %847, %cst_275 {dimension_numbers = #tpu.dot_dimension_numbers<[1], [0], [0], [1], [0, 0, 1, 1], [], []>} : vector<8x8xf32>, vector<8x32xf32>, vector<8x32xf32> -> vector<8x32xf32>
    %cst_276 = arith.constant dense<0xFF800000> : vector<8xf32>
    %849 = vector.multi_reduction <maximumf>, %848, %cst_276 [1] : vector<8x32xf32> to vector<8xf32>
    %850 = vector.shape_cast %849 : vector<8xf32> to vector<8x1xf32>
    %851 = vector.broadcast %850 : vector<8x1xf32> to vector<8x32xf32>
    %852 = arith.subf %848, %851 : vector<8x32xf32>
    %853 = math.exp %852 : vector<8x32xf32>
    %cst_277 = arith.constant dense<0.000000e+00> : vector<8xf32>
    %854 = vector.multi_reduction <add>, %853, %cst_277 [1] : vector<8x32xf32> to vector<8xf32>
    %855 = vector.shape_cast %854 : vector<8xf32> to vector<8x1xf32>
    %cst_278 = arith.constant 1.000000e+00 : f32
    %856 = vector.broadcast %cst_278 : f32 to vector<8x1xf32>
    %857 = arith.divf %856, %855 : vector<8x1xf32>
    %858 = vector.broadcast %857 : vector<8x1xf32> to vector<8x32xf32>
    %859 = arith.mulf %853, %858 : vector<8x32xf32>
    %cst_279 = arith.constant dense<0.000000e+00> : vector<8x8xf32>
    %860 = tpu.matmul %859, %846, %cst_279 {dimension_numbers = #tpu.dot_dimension_numbers<[1], [0], [0], [1], [0, 0, 1, 1], [], []>} : vector<8x32xf32>, vector<32x8xf32>, vector<8x8xf32> -> vector<8x8xf32>
    %861 = vector.extract_strided_slice %652 {offsets = [16, 0], sizes = [8, 32], strides = [1, 1]} : vector<32x32xf32> to vector<8x32xf32>
    %cst_280 = arith.constant dense<0.000000e+00> : vector<8x32xf32>
    %862 = tpu.matmul %860, %861, %cst_280 {dimension_numbers = #tpu.dot_dimension_numbers<[1], [0], [0], [1], [0, 0, 1, 1], [], []>} : vector<8x8xf32>, vector<8x32xf32>, vector<8x32xf32> -> vector<8x32xf32>
    %863 = arith.addf %843, %862 : vector<8x32xf32>
    %864 = vector.extract_strided_slice %794 {offsets = [0, 24], sizes = [8, 8], strides = [1, 1]} : vector<8x32xf32> to vector<8x8xf32>
    %865 = vector.extract_strided_slice %799 {offsets = [0, 24], sizes = [32, 8], strides = [1, 1]} : vector<32x32xf32> to vector<32x8xf32>
    %866 = vector.extract_strided_slice %804 {offsets = [0, 24], sizes = [32, 8], strides = [1, 1]} : vector<32x32xf32> to vector<32x8xf32>
    %867 = tpu.transpose %865, [1, 0] : vector<32x8xf32> -> vector<8x32xf32>
    %cst_281 = arith.constant dense<0.000000e+00> : vector<8x32xf32>
    %868 = tpu.matmul %864, %867, %cst_281 {dimension_numbers = #tpu.dot_dimension_numbers<[1], [0], [0], [1], [0, 0, 1, 1], [], []>} : vector<8x8xf32>, vector<8x32xf32>, vector<8x32xf32> -> vector<8x32xf32>
    %cst_282 = arith.constant dense<0xFF800000> : vector<8xf32>
    %869 = vector.multi_reduction <maximumf>, %868, %cst_282 [1] : vector<8x32xf32> to vector<8xf32>
    %870 = vector.shape_cast %869 : vector<8xf32> to vector<8x1xf32>
    %871 = vector.broadcast %870 : vector<8x1xf32> to vector<8x32xf32>
    %872 = arith.subf %868, %871 : vector<8x32xf32>
    %873 = math.exp %872 : vector<8x32xf32>
    %cst_283 = arith.constant dense<0.000000e+00> : vector<8xf32>
    %874 = vector.multi_reduction <add>, %873, %cst_283 [1] : vector<8x32xf32> to vector<8xf32>
    %875 = vector.shape_cast %874 : vector<8xf32> to vector<8x1xf32>
    %cst_284 = arith.constant 1.000000e+00 : f32
    %876 = vector.broadcast %cst_284 : f32 to vector<8x1xf32>
    %877 = arith.divf %876, %875 : vector<8x1xf32>
    %878 = vector.broadcast %877 : vector<8x1xf32> to vector<8x32xf32>
    %879 = arith.mulf %873, %878 : vector<8x32xf32>
    %cst_285 = arith.constant dense<0.000000e+00> : vector<8x8xf32>
    %880 = tpu.matmul %879, %866, %cst_285 {dimension_numbers = #tpu.dot_dimension_numbers<[1], [0], [0], [1], [0, 0, 1, 1], [], []>} : vector<8x32xf32>, vector<32x8xf32>, vector<8x8xf32> -> vector<8x8xf32>
    %881 = vector.extract_strided_slice %652 {offsets = [24, 0], sizes = [8, 32], strides = [1, 1]} : vector<32x32xf32> to vector<8x32xf32>
    %cst_286 = arith.constant dense<0.000000e+00> : vector<8x32xf32>
    %882 = tpu.matmul %880, %881, %cst_286 {dimension_numbers = #tpu.dot_dimension_numbers<[1], [0], [0], [1], [0, 0, 1, 1], [], []>} : vector<8x8xf32>, vector<8x32xf32>, vector<8x32xf32> -> vector<8x32xf32>
    %883 = arith.addf %863, %882 : vector<8x32xf32>
    %884 = vector.broadcast %662 : vector<1x32xf32> to vector<8x32xf32>
    %885 = arith.addf %883, %884 : vector<8x32xf32>
    %886 = arith.addf %787, %885 : vector<8x32xf32>
    %887 = vector.extract_strided_slice %658 {offsets = [8, 0], sizes = [1, 32], strides = [1, 1]} : vector<16x128xf32> to vector<1x32xf32>
    %888 = vector.extract_strided_slice %658 {offsets = [9, 0], sizes = [1, 32], strides = [1, 1]} : vector<16x128xf32> to vector<1x32xf32>
    %cst_287 = arith.constant dense<0.000000e+00> : vector<8xf32>
    %889 = vector.multi_reduction <add>, %886, %cst_287 [1] : vector<8x32xf32> to vector<8xf32>
    %890 = vector.shape_cast %889 : vector<8xf32> to vector<8x1xf32>
    %cst_288 = arith.constant 3.200000e+01 : f32
    %891 = vector.broadcast %cst_288 : f32 to vector<8x1xf32>
    %892 = arith.divf %890, %891 : vector<8x1xf32>
    %893 = vector.broadcast %892 : vector<8x1xf32> to vector<8x32xf32>
    %894 = arith.subf %886, %893 : vector<8x32xf32>
    %895 = arith.mulf %894, %894 : vector<8x32xf32>
    %cst_289 = arith.constant dense<0.000000e+00> : vector<8xf32>
    %896 = vector.multi_reduction <add>, %895, %cst_289 [1] : vector<8x32xf32> to vector<8xf32>
    %897 = vector.shape_cast %896 : vector<8xf32> to vector<8x1xf32>
    %cst_290 = arith.constant 3.200000e+01 : f32
    %898 = vector.broadcast %cst_290 : f32 to vector<8x1xf32>
    %899 = arith.divf %897, %898 : vector<8x1xf32>
    %900 = vector.broadcast %892 : vector<8x1xf32> to vector<8x32xf32>
    %901 = arith.subf %886, %900 : vector<8x32xf32>
    %cst_291 = arith.constant 9.99999974E-6 : f32
    %902 = vector.broadcast %cst_291 : f32 to vector<8x1xf32>
    %903 = arith.addf %899, %902 : vector<8x1xf32>
    %904 = math.rsqrt %903 : vector<8x1xf32>
    %905 = vector.broadcast %904 : vector<8x1xf32> to vector<8x32xf32>
    %906 = arith.mulf %901, %905 : vector<8x32xf32>
    %907 = vector.broadcast %887 : vector<1x32xf32> to vector<8x32xf32>
    %908 = arith.mulf %906, %907 : vector<8x32xf32>
    %909 = vector.broadcast %888 : vector<1x32xf32> to vector<8x32xf32>
    %910 = arith.addf %908, %909 : vector<8x32xf32>
    %cst_292 = arith.constant dense<0.000000e+00> : vector<8x64xf32>
    %911 = tpu.matmul %910, %654, %cst_292 {dimension_numbers = #tpu.dot_dimension_numbers<[1], [0], [0], [1], [0, 0, 1, 1], [], []>} : vector<8x32xf32>, vector<32x64xf32>, vector<8x64xf32> -> vector<8x64xf32>
    %912 = vector.broadcast %663 : vector<1x64xf32> to vector<8x64xf32>
    %913 = arith.addf %911, %912 : vector<8x64xf32>
    %cst_293 = arith.constant 0.000000e+00 : f32
    %914 = vector.broadcast %cst_293 : f32 to vector<8x64xf32>
    %915 = arith.maximumf %913, %914 : vector<8x64xf32>
    %cst_294 = arith.constant dense<0.000000e+00> : vector<8x32xf32>
    %916 = tpu.matmul %915, %656, %cst_294 {dimension_numbers = #tpu.dot_dimension_numbers<[1], [0], [0], [1], [0, 0, 1, 1], [], []>} : vector<8x64xf32>, vector<64x32xf32>, vector<8x32xf32> -> vector<8x32xf32>
    %917 = vector.broadcast %664 : vector<1x32xf32> to vector<8x32xf32>
    %918 = arith.addf %916, %917 : vector<8x32xf32>
    %919 = arith.addf %910, %918 : vector<8x32xf32>
    %920 = vector.extract_strided_slice %658 {offsets = [10, 0], sizes = [1, 32], strides = [1, 1]} : vector<16x128xf32> to vector<1x32xf32>
    %921 = vector.extract_strided_slice %658 {offsets = [11, 0], sizes = [1, 32], strides = [1, 1]} : vector<16x128xf32> to vector<1x32xf32>
    %cst_295 = arith.constant dense<0.000000e+00> : vector<8xf32>
    %922 = vector.multi_reduction <add>, %919, %cst_295 [1] : vector<8x32xf32> to vector<8xf32>
    %923 = vector.shape_cast %922 : vector<8xf32> to vector<8x1xf32>
    %cst_296 = arith.constant 3.200000e+01 : f32
    %924 = vector.broadcast %cst_296 : f32 to vector<8x1xf32>
    %925 = arith.divf %923, %924 : vector<8x1xf32>
    %926 = vector.broadcast %925 : vector<8x1xf32> to vector<8x32xf32>
    %927 = arith.subf %919, %926 : vector<8x32xf32>
    %928 = arith.mulf %927, %927 : vector<8x32xf32>
    %cst_297 = arith.constant dense<0.000000e+00> : vector<8xf32>
    %929 = vector.multi_reduction <add>, %928, %cst_297 [1] : vector<8x32xf32> to vector<8xf32>
    %930 = vector.shape_cast %929 : vector<8xf32> to vector<8x1xf32>
    %cst_298 = arith.constant 3.200000e+01 : f32
    %931 = vector.broadcast %cst_298 : f32 to vector<8x1xf32>
    %932 = arith.divf %930, %931 : vector<8x1xf32>
    %933 = vector.broadcast %925 : vector<8x1xf32> to vector<8x32xf32>
    %934 = arith.subf %919, %933 : vector<8x32xf32>
    %cst_299 = arith.constant 9.99999974E-6 : f32
    %935 = vector.broadcast %cst_299 : f32 to vector<8x1xf32>
    %936 = arith.addf %932, %935 : vector<8x1xf32>
    %937 = math.rsqrt %936 : vector<8x1xf32>
    %938 = vector.broadcast %937 : vector<8x1xf32> to vector<8x32xf32>
    %939 = arith.mulf %934, %938 : vector<8x32xf32>
    %940 = vector.broadcast %920 : vector<1x32xf32> to vector<8x32xf32>
    %941 = arith.mulf %939, %940 : vector<8x32xf32>
    %942 = vector.broadcast %921 : vector<1x32xf32> to vector<8x32xf32>
    %943 = arith.addf %941, %942 : vector<8x32xf32>
    %c0_300 = arith.constant 0 : index
    %c0_301 = arith.constant 0 : index
    %c0_302 = arith.constant 0 : index
    %944 = vector.load %arg7[%c0_300, %c0_301, %c0_302] : memref<1x8x32xf32, #tpu.memory_space<vmem>>, vector<1x8x32xf32>
    %945 = vector.shape_cast %944 : vector<1x8x32xf32> to vector<8x32xf32>
    %946 = vector.shape_cast %943 : vector<8x32xf32> to vector<1x8x32xf32>
    tpu.vector_store %arg7[%c0_300, %c0_301, %c0_302], %946 {strides = array<i32>} : memref<1x8x32xf32, #tpu.memory_space<vmem>>, vector<1x8x32xf32>,
    return
  }
  func.func @transform_0(%arg0: i32) -> (i32, i32, i32) {
    %c0_i32 = arith.constant 0 : i32
    %c0_i32_0 = arith.constant 0 : i32
    %c0_i32_1 = arith.constant 0 : i32
    return %arg0, %c0_i32, %c0_i32_0 : i32, i32, i32
  }
  func.func @transform_1(%arg0: i32) -> (i32, i32, i32) {
    %c0_i32 = arith.constant 0 : i32
    %c0_i32_0 = arith.constant 0 : i32
    %c0_i32_1 = arith.constant 0 : i32
    return %arg0, %c0_i32, %c0_i32_0 : i32, i32, i32
  }
  func.func @transform_2(%arg0: i32) -> (i32, i32, i32) {
    %c0_i32 = arith.constant 0 : i32
    %c0_i32_0 = arith.constant 0 : i32
    %c0_i32_1 = arith.constant 0 : i32
    %c0_i32_2 = arith.constant 0 : i32
    return %c0_i32, %c0_i32_0, %c0_i32_1 : i32, i32, i32
  }
  func.func @transform_3(%arg0: i32) -> (i32, i32, i32) {
    %c0_i32 = arith.constant 0 : i32
    %c0_i32_0 = arith.constant 0 : i32
    %c0_i32_1 = arith.constant 0 : i32
    %c0_i32_2 = arith.constant 0 : i32
    return %c0_i32, %c0_i32_0, %c0_i32_1 : i32, i32, i32
  }
  func.func @transform_4(%arg0: i32) -> (i32, i32, i32) {
    %c0_i32 = arith.constant 0 : i32
    %c0_i32_0 = arith.constant 0 : i32
    %c0_i32_1 = arith.constant 0 : i32
    %c0_i32_2 = arith.constant 0 : i32
    return %c0_i32, %c0_i32_0, %c0_i32_1 : i32, i32, i32
  }
  func.func @transform_5(%arg0: i32) -> (i32, i32, i32) {
    %c0_i32 = arith.constant 0 : i32
    %c0_i32_0 = arith.constant 0 : i32
    %c0_i32_1 = arith.constant 0 : i32
    %c0_i32_2 = arith.constant 0 : i32
    return %c0_i32, %c0_i32_0, %c0_i32_1 : i32, i32, i32
  }
  func.func @transform_6(%arg0: i32) -> (i32, i32, i32) {
    %c0_i32 = arith.constant 0 : i32
    %c0_i32_0 = arith.constant 0 : i32
    %c0_i32_1 = arith.constant 0 : i32
    return %arg0, %c0_i32, %c0_i32_0 : i32, i32, i32
  }
}

</mosaic_0001>

<bundles_post_ra>
// kernel: transformer_forward.1
= control target key start
LH: loop header
LB: loop body
LE: loop exit
PB: predicated region body
PF: predicated region fallthrough
CT: control target
= control target key end

     0   :  { %11 = vsyncpa [#allocation3], 0  ;;  %s8868_s0 = inlined_call_operand.vmem [shape: f32[2,32,32], index: 0, kind: input, shape index: {}]   ;;  %s8869_s1 = inlined_call_operand.vmem [shape: f32[2,8,32], index: 1, kind: input, shape index: {}]   ;;  %s8870_s2 = inlined_call_operand.vmem [shape: f32[2,160,128], index: 2, kind: input, shape index: {}]   ;;  %s8871_s3 = inlined_call_operand.vmem [shape: f32[2,8,128], index: 3, kind: input, shape index: {}]   ;;  %s8872_s4 = inlined_call_operand.vmem [shape: f32[2,224,128], index: 4, kind: input, shape index: {}]   ;;  %s8873_s5 = inlined_call_operand.vmem [shape: f32[2,16,128], index: 5, kind: input, shape index: {}]   ;;  %s8874_s6 = inlined_call_operand.hbm [shape: f32[2,8,32], index: 6, kind: output, shape index: {}]  }
   0x1   :  { %13 = vsyncpa [#allocation3 + $0x1], 0  ;;  %s6935_s21 = smov 0   ;;  %s6937_s22 = smov 0  }
   0x2   :  { %s6939_s23 = smov 0   ;;  %s6941_s24 = smov 0  }
   0x3 LB: > { %s6956_s25 = sadd.s32 4294967295, %s6892_s24   ;;  %s5950_s26 = sadd.s32 4294967294, %s6892_s24   ;;  %s6892_s24 = sphi %s6941_s24, %s8886_s24   ;;  %s6888_s23 = sphi %s6939_s23, %s8885_s23   ;;  %s6884_s22 = sphi %s6937_s22, %s8884_s22   ;;  %s6880_s21 = sphi %s6935_s21, %s8883_s21  }
   0x4   : > { %s6960_s27 = sadd.s32 1, %s6892_s24   ;;  %s162_s28 = sadd.s32 1, %s6888_s23 }
   0x5   : > { %s159_s29 = ssub.s32 %s6892_s24, %s6960_s27  ;;  %p172_p0 = scmp.ne.s32.totalorder %s6888_s23, %s6884_s22 }
   0x6   : > { %p160_p1 = scmp.eq.s32.totalorder %s159_s29, 0  ;;  %p173_p2 = scmp.eq.s32.totalorder %s6956_s25, 1 }
   0x7   : > { %p178_p3 = scmp.ne.s32.totalorder %s6884_s22, %s6880_s21  ;;  %p179_p4 = scmp.eq.s32.totalorder %s5950_s26, 1 }
   0x8   : > { %s6971_s30 = scalar_select %p160_p1, %s6888_s23, %s162_s28  }
   0x9   : > { %p6973_p5 = por %p173_p2, %p172_p0  ;;  %p6977_p6 = por %p179_p4, %p178_p3 }
   0xa   : > { %p5953_p7 = scmp.ge.s32.totalorder %s6892_s24, 1  ;;  %p224_p8 = scmp.lt.s32.totalorder %s6892_s24, 3 }
   0xc   : > { %p225_p9 = pnand %p5953_p7, %p224_p8 }
   0xd   : > { %p258_p10 = scmp.lt.s32.totalorder (!%p225_p9), %s6956_s25, 1  ;;  %s6894_s14 = smov (!%p225_p9), 96  }
   0xe   : > { %228 = sbr.rel (%p225_p9) target bundleno = 11310 (0x2c2e), region = 44  ;;  %s6895_s10 = smov (!%p225_p9), 64  }
   0xf   : > { %s6896_s11 = smov (!%p225_p9), 112   ;;  %s6897_s12 = smov (!%p225_p9), 104  }
  0x10   : > { %s255_s9 = sand.u32 (!%p225_p9), 1, %s6884_s22  }
  0x11   : > { %s5954_s16 = sshll.u32 (!%p225_p9), %s255_s9, 3 }
  0x12   : > { %s257_s19 = scalar_lea.vmem (!%p225_p9), [#allocation2], %s5954_s16 }
  0x13   : > { %v273_v0 = vld [vmem:[%s8870_s2 + $0x10] sm:$0xff]  ;;  %v274_v1 = vld [vmem:[%s8870_s2 + $0x18] sm:$0xff]  ;;  %s6993_s13 = scalar_select %p258_p10, %s6956_s25, 1  ;;  %v271_v3 = vld [vmem:[%s8870_s2] sm:$0xff]  ;;  %vm325_vm0 = vcmask 261120   ;;  %vm476_vm1 = vcmask 64512  }
  0x14   : > { %v6990_v2 = vpack.i.bf16 %v273_v0, %v274_v1  ;;  %350 = vmatpush.msra.mxu0 %v274_v1  ;;  %v272_v4 = vld [vmem:[%s8870_s2 + $0x8] sm:$0xff]  ;;  %v291_v16 = vld [vmem:[%s8871_s3] sm:$0xff]  ;;  %s5876_s20 = sshll.u32 %s257_s19, 4  ;;  %s5877_s20 = int_to_ptr.vmem [resolvable:$true] %s5876_s20 }
  0x15   : > { %s6297_s15 = sshll.u32 %s6993_s13, 5  ;;  %v6349_v6 = vpack.i.bf16 %v271_v3, %v272_v4  ;;  %v7037_v17 = vperm.slane %v291_v16, 0  ;;  %s5957_s29 = sshll.u32 %s6993_s13, 3 }
  0x16   : > { %6345 = vrot.lane.b32.xlu0 %v6990_v2, %s6894_s14  ;;  %351 = vmatpush.msra.mxu0 %v273_v0  ;;  %s7007_s28 = scalar_lea.vmem %s8868_s0, %s6297_s15  ;;  %s6898_s15 = smov 120  }
  0x17   : > { %v7010_v5 = vld [vmem:[%s7007_s28] sm:$0xff]  ;;  %v7015_v7 = vld [vmem:[%s7007_s28 + $0x8] sm:$0xff]  ;;  %v7019_v8 = vld [vmem:[%s7007_s28 + $0x10] sm:$0xff]  ;;  %388 = vrot.lane.b32.xlu2 %v7037_v17, %s6894_s14  ;;  %s266_s17 = scalar_lea.vmem %s8869_s1, %s5957_s29 }
  0x18   : > { %352 = vmatpush.msra.mxu0 %v272_v4  ;;  %292 = vxpose.xlu1.b32.start [1/4] (short) (narrow) %v7010_v5, 32  ;;  %v7023_v9 = vld [vmem:[%s7007_s28 + $0x18] sm:$0xff] }
  0x1a   : > { %353 = vmatpush.msra.mxu0 %v271_v3 }
  0x1b   : > { %5958 = vmatmul.msk.f32.vlgmr.msra.gmra.mxu0 %vm325_vm0, %v7010_v5 }
  0x1e   : > { %6350 = vrot.lane.b32.xlu0 %v6349_v6, %s6894_s14 }
  0x1f   : > { %6355 = vrot.lane.b32.xlu2 %v6990_v2, %s6895_s10 }
  0x20   : > { %293 = vxpose.xlu1.b32.cont [2/4] (short) (narrow) %v7015_v7, 32 }
  0x23   : > { %5959 = vmatmul.msk.f32.gmra.mxu0 %vm325_vm0, %v7015_v7 }
  0x26   : > { %6360 = vrot.lane.b32.xlu0 %v6349_v6, %s6895_s10 }
  0x28   : > { %294 = vxpose.xlu1.b32.cont [3/4] (short) (narrow) %v7019_v8, 32 }
  0x2b   : > { %5960 = vmatmul.msk.f32.gmra.mxu0 %vm325_vm0, %v7019_v8 }
  0x30   : > { %295 = vxpose.xlu1.b32.end [4/4] (short) (narrow) %v7023_v9, 32 }
  0x33   : > { %5961 = vmatmul.msk.f32.gmra.mxu0 %vm325_vm0, %v7023_v9 }
  0x71   : > { %v389_v25 = vpop.permute.xlu2 %388 }
  0x79   : > { %v6356_v51 = vpop.permute.xlu2 %6355 }
  0x7a   : > { %v6357_v52 = vunpack.i.l.bf16 %v6356_v51  ;;  %v6358_v53 = vunpack.i.h.bf16 %v6356_v51 }
  0x7c   : > { %459 = vmatpush.msra.mxu2 %v6357_v52  ;;  %v275_v52 = vld [vmem:[%s8870_s2 + $0x20] sm:$0xff] }
  0x7e   : > { %460 = vmatpush.msra.mxu2 %v6358_v53 }
  0x88   : > { %v6346_v10 = vpop.permute.xlu0 %6345 }
  0x89   : > { %v6347_v11 = vunpack.i.l.bf16 %v6346_v10  ;;  %v6348_v12 = vunpack.i.h.bf16 %v6346_v10 }
  0x8b   : > { %415 = vmatpush.msra.mxu1 %v6347_v11 }
  0x8d   : > { %416 = vmatpush.msra.mxu1 %v6348_v12 }
  0x90   : > { %v6351_v13 = vpop.permute.xlu0 %6350 }
  0x91   : > { %v6352_v14 = vunpack.i.l.bf16 %v6351_v13  ;;  %v6353_v15 = vunpack.i.h.bf16 %v6351_v13 }
  0x93   : > { %417 = vmatpush.msra.mxu1 %v6352_v14 }
  0x95   : > { %418 = vmatpush.msra.mxu1 %v6353_v15 }
  0x98   : > { %v355_v28 = vpop.f32.mrf.mxu0  ;;  %v6361_v54 = vpop.permute.xlu0 %6360 }
  0x99   : > { %v356_v31 = vadd.f32 %v355_v28, %v7037_v17  ;;  %v6362_v55 = vunpack.i.l.bf16 %v6361_v54  ;;  %v6363_v56 = vunpack.i.h.bf16 %v6361_v54 }
  0x9b   : > { %v7063_v34 = vmul.f32 0.35355338, %v356_v31  ;;  %461 = vmatpush.msra.mxu2 %v6362_v55 }
  0x9d   : > { %462 = vmatpush.msra.mxu2 %v6363_v56 }
  0x9e   : > { %5966 = vmatmul.msk.f32.vlgmr.msra.gmra.mxu2 %vm325_vm0, %v7010_v5 }
  0xa0   : > { %v358_v32 = vpop.f32.mrf.mxu0 }
  0xa1   : > { %v359_v35 = vadd.f32 %v358_v32, %v7037_v17 }
  0xa3   : > { %v7070_v37 = vmul.f32 0.35355338, %v359_v35 }
  0xa6   : > { %5967 = vmatmul.msk.f32.gmra.mxu2 %vm325_vm0, %v7015_v7 }
  0xa8   : > { %v361_v36 = vpop.f32.mrf.mxu0 }
  0xa9   : > { %v362_v38 = vadd.f32 %v361_v36, %v7037_v17 }
  0xab   : > { %v7075_v39 = vmul.f32 0.35355338, %v362_v38 }
  0xae   : > { %5968 = vmatmul.msk.f32.gmra.mxu2 %vm325_vm0, %v7019_v8 }
  0xb0   : > { %v364_v40 = vpop.f32.mrf.mxu0 }
  0xb1   : > { %v365_v41 = vadd.f32 %v364_v40, %v7037_v17 }
  0xb3   : > { %v7080_v42 = vmul.f32 0.35355338, %v365_v41 }
  0xb6   : > { %5969 = vmatmul.msk.f32.gmra.mxu2 %vm325_vm0, %v7023_v9 }
  0xbc   : > { %v308_v18 = vpop.trf.xlu1 }
  0xbd   : > { %5962 = vmatmul.msk.f32.vlgmr.msra.gmra.mxu1 %vm325_vm0, %v308_v18 }
  0xc4   : > { %v309_v19 = vpop.trf.xlu1 }
  0xc5   : > { %5963 = vmatmul.msk.f32.gmra.mxu1 %vm325_vm0, %v309_v19 }
  0xcc   : > { %v310_v20 = vpop.trf.xlu1 }
  0xcd   : > { %5964 = vmatmul.msk.f32.gmra.mxu1 %vm325_vm0, %v310_v20 }
  0xd4   : > { %v311_v21 = vpop.trf.xlu1 }
  0xd5   : > { %5965 = vmatmul.msk.f32.gmra.mxu1 %vm325_vm0, %v311_v21 }
 0x121   : > { %v464_v13 = vpop.f32.mrf.mxu2 }
 0x129   : > { %v467_v14 = vpop.f32.mrf.mxu2 }
 0x131   : > { %v470_v15 = vpop.f32.mrf.mxu2 }
 0x13a   : > { %v420_v22 = vpop.f32.mrf.mxu1 }
 0x13b   : > { %v7061_v33 = vadd.f32 %v420_v22, %v389_v25 }
 0x142   : > { %v423_v23 = vpop.f32.mrf.mxu1 }
 0x143   : > { %v7053_v30 = vadd.f32 %v423_v23, %v389_v25 }
 0x14a   : > { %v426_v24 = vpop.f32.mrf.mxu1 }
 0x14b   : > { %v7049_v29 = vadd.f32 %v426_v24, %v389_v25 }
 0x152   : > { %v429_v26 = vpop.f32.mrf.mxu1 }
 0x153   : > { %v7045_v27 = vadd.f32 %v429_v26, %v389_v25 }
 0x155   : > { %5970 = vmatpush.xpose.msk.msra.mxu3 %vm476_vm1, %v7045_v27 }
 0x159   : > { %5971 = vmatpush.xpose.msk.msra.mxu3 %vm476_vm1, %v7049_v29 }
 0x15d   : > { %5972 = vmatpush.xpose.msk.msra.mxu3 %vm476_vm1, %v7053_v30 }
 0x161   : > { %5973 = vmatpush.xpose.msk.msra.mxu3 %vm476_vm1, %v7061_v33 }
 0x164   : > { %5974 = vmatmul.msk.f32.vlgmr.msra.gmra.mxu3 %vm476_vm1, %v7063_v34 }
 0x16c   : > { %5975 = vmatmul.msk.f32.gmra.mxu3 %vm476_vm1, %v7070_v37 }
 0x174   : > { %5976 = vmatmul.msk.f32.gmra.mxu3 %vm476_vm1, %v7075_v39 }
 0x17c   : > { %5977 = vmatmul.msk.f32.gmra.mxu3 %vm476_vm1, %v7080_v42 }
 0x1e7   : > { %v518_v43 = vpop.f32.mrf.mxu3 }
 0x1e8   : > { %v530_v44 = vsel %vm325_vm0, %v518_v43, -inf }
 0x1e9   : > { %531 = vmax.xlane.f32.xlu2 %v530_v44 }
 0x1ef   : > { %v521_v45 = vpop.f32.mrf.mxu3 }
 0x1f0   : > { %v533_v46 = vsel %vm325_vm0, %v521_v45, -inf }
 0x1f1   : > { %534 = vmax.xlane.f32.xlu0 %v533_v46 }
 0x1f7   : > { %v524_v47 = vpop.f32.mrf.mxu3 }
 0x1f8   : > { %v536_v48 = vsel %vm325_vm0, %v524_v47, -inf }
 0x1f9   : > { %537 = vmax.xlane.f32.xlu1 %v536_v48 }
 0x1ff   : > { %v527_v49 = vpop.f32.mrf.mxu3 }
 0x200   : > { %v539_v50 = vsel %vm325_vm0, %v527_v49, -inf }
 0x201   : > { %540 = vmax.xlane.f32.xlu2 %v539_v50 }
 0x212   : > { %983 = vrot.lane.b32.xlu1 %v7049_v29, %s6896_s11 }
 0x21a   : > { %1240 = vrot.lane.b32.xlu1 %v7053_v30, %s6897_s12 }
 0x222   : > { %1230 = vrot.lane.b32.xlu1 %v7063_v34, %s6897_s12 }
 0x22a   : > { %977 = vrot.lane.b32.xlu1 %v7080_v42, %s6896_s11 }
 0x25c   : > { %v532_v57 = vpop.xlane.xlu2 %531 }
 0x25d   : > { %v542_v58 = vsub.f32 %v518_v43, %v532_v57 }
 0x25f   : > { %v546_v59 = vmul.f32 1.442695, %v542_v58 }
 0x261   : > { %6584 = vpow2.f32 %v546_v59 }
 0x264   : > { %v535_v60 = vpop.xlane.xlu0 %534 }
 0x265   : > { %v543_v61 = vsub.f32 %v521_v45, %v535_v60 }
 0x267   : > { %v7104_v62 = vpop.eup %6584  ;;  %v548_v63 = vmul.f32 1.442695, %v543_v61 }
 0x268   : > { %v554_v0 = vsel %vm325_vm0, %v7104_v62, 0.0 }
 0x269   : > { %6586 = vpow2.f32 %v548_v63  ;;  %555 = vadd.xlane.f32.xlu2 %v554_v0 }
 0x26c   : > { %v538_v1 = vpop.xlane.xlu1 %537 }
 0x26d   : > { %v544_v2 = vsub.f32 %v524_v47, %v538_v1 }
 0x26f   : > { %v7108_v3 = vpop.eup %6586  ;;  %v550_v4 = vmul.f32 1.442695, %v544_v2 }
 0x270   : > { %v557_v5 = vsel %vm325_vm0, %v7108_v3, 0.0 }
 0x271   : > { %6588 = vpow2.f32 %v550_v4  ;;  %558 = vadd.xlane.f32.xlu0 %v557_v5 }
 0x274   : > { %v541_v6 = vpop.xlane.xlu2 %540 }
 0x275   : > { %v545_v7 = vsub.f32 %v527_v49, %v541_v6 }
 0x277   : > { %v7112_v8 = vpop.eup %6588  ;;  %v552_v9 = vmul.f32 1.442695, %v545_v7 }
 0x278   : > { %v560_v10 = vsel %vm325_vm0, %v7112_v8, 0.0 }
 0x279   : > { %6590 = vpow2.f32 %v552_v9  ;;  %561 = vadd.xlane.f32.xlu0 %v560_v10 }
 0x27f   : > { %v7116_v11 = vpop.eup %6590 }
 0x280   : > { %v563_v12 = vsel %vm325_vm0, %v7116_v11, 0.0 }
 0x281   : > { %444 = vrot.lane.b32.xlu2 %v7037_v17, %s6895_s10  ;;  %564 = vadd.xlane.f32.xlu0 %v563_v12  ;;  %v473_v17 = vpop.f32.mrf.mxu2 }
 0x289   : > { %683 = vrot.lane.b32.xlu2 %v7049_v29, %s6898_s15 }
 0x291   : > { %681 = vrot.lane.b32.xlu2 %v7053_v30, %s6898_s15 }
 0x295   : > { %685 = vrot.lane.b32.xlu0 %v7045_v27, %s6898_s15 }
 0x299   : > { %671 = vrot.lane.b32.xlu2 %v7063_v34, %s6898_s15 }
 0x29d   : > { %679 = vrot.lane.b32.xlu0 %v7061_v33, %s6898_s15 }
 0x2a1   : > { %675 = vrot.lane.b32.xlu2 %v7075_v39, %s6898_s15 }
 0x2a5   : > { %673 = vrot.lane.b32.xlu0 %v7070_v37, %s6898_s15 }
 0x2a9   : > { %677 = vrot.lane.b32.xlu2 %v7080_v42, %s6898_s15 }
 0x2ad   : > { %985 = vrot.lane.b32.xlu0 %v7045_v27, %s6896_s11 }
 0x2b1   : > { %1244 = vrot.lane.b32.xlu2 %v7045_v27, %s6897_s12 }
 0x2b5   : > { %981 = vrot.lane.b32.xlu0 %v7053_v30, %s6896_s11 }
 0x2b9   : > { %1242 = vrot.lane.b32.xlu2 %v7049_v29, %s6897_s12 }
 0x2bd   : > { %979 = vrot.lane.b32.xlu0 %v7061_v33, %s6896_s11 }
 0x2c1   : > { %1238 = vrot.lane.b32.xlu2 %v7061_v33, %s6897_s12 }
 0x2c5   : > { %971 = vrot.lane.b32.xlu0 %v7063_v34, %s6896_s11 }
 0x2c9   : > { %975 = vrot.lane.b32.xlu2 %v7075_v39, %s6896_s11 }
 0x2cd   : > { %973 = vrot.lane.b32.xlu0 %v7070_v37, %s6896_s11 }
 0x2d1   : > { %1234 = vrot.lane.b32.xlu2 %v7075_v39, %s6897_s12 }
 0x2d5   : > { %1232 = vrot.lane.b32.xlu0 %v7070_v37, %s6897_s12 }
 0x2dc   : > { %v556_v16 = vpop.xlane.xlu2 %555 }
 0x2dd   : > { %6592 = vrcp.f32 %v556_v16  ;;  %1236 = vrot.lane.b32.xlu0 %v7080_v42, %s6897_s12  ;;  %v577_v25 = vand.u32 2147483648, %v556_v16  ;;  %v575_v28 = vand.u32 2147483647, %v556_v16  ;;  %vm571_vm3 = vweird.f32 %v556_v16 }
 0x2df   : > { %v578_v34 = vor.u32 1.1754944e-38, %v577_v25  ;;  %vm576_vm5 = vcmp.eq.f32.partialorder %v575_v28, 8.507059e+37 }
 0x2e3   : > { %v6593_v18 = vpop.eup %6592 }
 0x2e4   : > { %v567_v19 = vmul.f32 %v6593_v18, %v556_v16  ;;  %v559_v20 = vpop.xlane.xlu0 %558  ;;  %v445_v21 = vpop.permute.xlu2 %444  ;;  %vm572_vm2 = vweird.f32 %v6593_v18 }
 0x2e5   : > { %6594 = vrcp.f32 %v559_v20  ;;  %v474_v22 = vadd.f32 %v473_v17, %v445_v21  ;;  %v471_v23 = vadd.f32 %v470_v15, %v445_v21  ;;  %v468_v26 = vadd.f32 %v467_v14, %v445_v21  ;;  %vm573_vm4 = vmor %vm571_vm3, %vm572_vm2 }
 0x2e6   : > { %v568_v24 = vsub.f32 1.0, %v567_v19  ;;  %v465_v27 = vadd.f32 %v464_v13, %v445_v21  ;;  %v592_v42 = vand.u32 2147483648, %v559_v20  ;;  %v590_v44 = vand.u32 2147483647, %v559_v20 }
 0x2e7   : > { %654 = vmatpush.msrb.mxu0 %v474_v22  ;;  %v7162_v29 = vpack.i.bf16 %v471_v23, %v474_v22  ;;  %vm586_vm7 = vweird.f32 %v559_v20 }
 0x2e8   : > { %v569_v30 = vmul.f32 %v6593_v18, %v568_v24  ;;  %v7164_v31 = vpack.i.bf16 %v465_v27, %v468_v26  ;;  %v593_v47 = vor.u32 1.1754944e-38, %v592_v42  ;;  %vm591_vm9 = vcmp.eq.f32.partialorder %v590_v44, 8.507059e+37 }
 0x2e9   : > { %655 = vmatpush.msrb.mxu0 %v471_v23 }
 0x2ea   : > { %v570_v32 = vadd.f32 %v6593_v18, %v569_v30 }
 0x2eb   : > { %v6595_v33 = vpop.eup %6594  ;;  %656 = vmatpush.msrb.mxu0 %v468_v26 }
 0x2ec   : > { %v582_v35 = vmul.f32 %v6595_v33, %v559_v20  ;;  %v562_v36 = vpop.xlane.xlu0 %561  ;;  %v7166_v37 = vpop.permute.xlu2 %683  ;;  %v574_v38 = vsel %vm573_vm4, %v6593_v18, %v570_v32  ;;  %vm587_vm6 = vweird.f32 %v6595_v33 }
 0x2ed   : > { %6596 = vrcp.f32 %v562_v36  ;;  %657 = vmatpush.msrb.mxu0 %v465_v27  ;;  %v579_v39 = vsel %vm576_vm5, %v578_v34, %v574_v38  ;;  %vm588_vm8 = vmor %vm586_vm7, %vm587_vm6  ;;  %v607_v56 = vand.u32 2147483648, %v562_v36  ;;  %v605_v58 = vand.u32 2147483647, %v562_v36  ;;  %v984_v18 = vpop.permute.xlu1 %983 }
 0x2ee   : > { %v583_v40 = vsub.f32 1.0, %v582_v35  ;;  %v626_v41 = vmul.f32 %v7104_v62, %v579_v39  ;;  %vm601_vm11 = vweird.f32 %v562_v36 }
 0x2ef   : > { %957 = vmatpush.msra.mxu0 %v275_v52  ;;  %v608_v61 = vor.u32 1.1754944e-38, %v607_v56  ;;  %vm606_vm13 = vcmp.eq.f32.partialorder %v605_v58, 8.507059e+37 }
 0x2f0   : > { %5978 = vmatmul.msk.f32.vlgmr.msrb.gmra.mxu0 %vm325_vm0, %v626_v41  ;;  %v584_v43 = vmul.f32 %v6595_v33, %v583_v40 }
 0x2f2   : > { %v585_v45 = vadd.f32 %v6595_v33, %v584_v43 }
 0x2f3   : > { %v6597_v46 = vpop.eup %6596 }
 0x2f4   : > { %v597_v48 = vmul.f32 %v6597_v46, %v562_v36  ;;  %v565_v49 = vpop.xlane.xlu0 %564  ;;  %v682_v50 = vpop.permute.xlu2 %681  ;;  %v589_v51 = vsel %vm588_vm8, %v6595_v33, %v585_v45  ;;  %vm602_vm10 = vweird.f32 %v6597_v46 }
 0x2f5   : > { %6598 = vrcp.f32 %v565_v49  ;;  %v594_v53 = vsel %vm591_vm9, %v593_v47, %v589_v51  ;;  %vm603_vm12 = vmor %vm601_vm11, %vm602_vm10  ;;  %v620_v6 = vand.u32 2147483647, %v565_v49  ;;  %vm616_vm15 = vweird.f32 %v565_v49  ;;  %v1241_v21 = vpop.permute.xlu1 %1240 }
 0x2f6   : > { %v598_v54 = vsub.f32 1.0, %v597_v48  ;;  %v627_v55 = vmul.f32 %v7108_v3, %v594_v53  ;;  %v622_v3 = vand.u32 2147483648, %v565_v49 }
 0x2f7   : > { %vm621_vm3 = vcmp.eq.f32.partialorder %v620_v6, 8.507059e+37 }
 0x2f8   : > { %5979 = vmatmul.msk.f32.gmra.mxu0 %vm325_vm0, %v627_v55  ;;  %v599_v57 = vmul.f32 %v6597_v46, %v598_v54  ;;  %v623_v9 = vor.u32 1.1754944e-38, %v622_v3 }
 0x2fa   : > { %v600_v59 = vadd.f32 %v6597_v46, %v599_v57 }
 0x2fb   : > { %v6599_v60 = vpop.eup %6598 }
 0x2fc   : > { %v612_v62 = vmul.f32 %v6599_v60, %v565_v49  ;;  %v672_v63 = vpop.permute.xlu2 %671  ;;  %v604_v0 = vsel %vm603_vm12, %v6597_v46, %v600_v59  ;;  %vm617_vm14 = vweird.f32 %v6599_v60 }
 0x2fd   : > { %v609_v1 = vsel %vm606_vm13, %v608_v61, %v604_v0  ;;  %vm618_vm2 = vmor %vm616_vm15, %vm617_vm14  ;;  %v1231_v27 = vpop.permute.xlu1 %1230 }
 0x2fe   : > { %v613_v2 = vsub.f32 1.0, %v612_v62  ;;  %v628_v4 = vmul.f32 %v7112_v8, %v609_v1 }
 0x300   : > { %5980 = vmatmul.msk.f32.gmra.mxu0 %vm325_vm0, %v628_v4  ;;  %v614_v5 = vmul.f32 %v6599_v60, %v613_v2 }
 0x302   : > { %v615_v7 = vadd.f32 %v6599_v60, %v614_v5 }
 0x304   : > { %v676_v10 = vpop.permute.xlu2 %675  ;;  %v619_v12 = vsel %vm618_vm2, %v6599_v60, %v615_v7 }
 0x305   : > { %v624_v13 = vsel %vm621_vm3, %v623_v9, %v619_v12  ;;  %v978_v30 = vpop.permute.xlu1 %977 }
 0x306   : > { %v629_v14 = vmul.f32 %v7116_v11, %v624_v13 }
 0x307   : > { %v686_v15 = vpop.permute.xlu0 %685 }
 0x308   : > { %5981 = vmatmul.msk.f32.gmra.mxu0 %vm325_vm0, %v629_v14  ;;  %5982 = vmatpush.xpose.msk.msrb.mxu1 %vm476_vm1, %v686_v15 }
 0x30c   : > { %5983 = vmatpush.xpose.msk.msrb.mxu1 %vm476_vm1, %v7166_v37  ;;  %v678_v8 = vpop.permute.xlu2 %677 }
 0x30f   : > { %v680_v16 = vpop.permute.xlu0 %679 }
 0x310   : > { %5984 = vmatpush.xpose.msk.msrb.mxu1 %vm476_vm1, %v682_v50 }
 0x314   : > { %5985 = vmatpush.xpose.msk.msrb.mxu1 %vm476_vm1, %v680_v16  ;;  %v1245_v17 = vpop.permute.xlu2 %1244 }
 0x315   : > { %6018 = vmatpush.xpose.msk.msrb.mxu0 %vm476_vm1, %v1245_v17 }
 0x317   : > { %v674_v19 = vpop.permute.xlu0 %673  ;;  %5986 = vmatmul.msk.f32.vlgmr.msrb.gmra.mxu1 %vm476_vm1, %v672_v63 }
 0x31c   : > { %v1243_v11 = vpop.permute.xlu2 %1242 }
 0x31d   : > { %6019 = vmatpush.xpose.msk.msrb.mxu0 %vm476_vm1, %v1243_v11 }
 0x31f   : > { %v986_v20 = vpop.permute.xlu0 %985  ;;  %5987 = vmatmul.msk.f32.gmra.mxu1 %vm476_vm1, %v674_v19 }
 0x320   : > { %6002 = vmatpush.xpose.msk.msra.mxu1 %vm476_vm1, %v986_v20 }
 0x321   : > { %6020 = vmatpush.xpose.msk.msrb.mxu0 %vm476_vm1, %v1241_v21 }
 0x324   : > { %6003 = vmatpush.xpose.msk.msra.mxu1 %vm476_vm1, %v984_v18  ;;  %v1239_v22 = vpop.permute.xlu2 %1238 }
 0x325   : > { %6021 = vmatpush.xpose.msk.msrb.mxu0 %vm476_vm1, %v1239_v22 }
 0x327   : > { %v982_v23 = vpop.permute.xlu0 %981  ;;  %5988 = vmatmul.msk.f32.gmra.mxu1 %vm476_vm1, %v676_v10 }
 0x328   : > { %6004 = vmatpush.xpose.msk.msra.mxu1 %vm476_vm1, %v982_v23 }
 0x32c   : > { %v976_v28 = vpop.permute.xlu2 %975 }
 0x32f   : > { %v980_v24 = vpop.permute.xlu0 %979  ;;  %5989 = vmatmul.msk.f32.gmra.mxu1 %vm476_vm1, %v678_v8 }
 0x330   : > { %6005 = vmatpush.xpose.msk.msra.mxu1 %vm476_vm1, %v980_v24 }
 0x334   : > { %v1235_v40 = vpop.permute.xlu2 %1234 }
 0x337   : > { %v972_v25 = vpop.permute.xlu0 %971 }
 0x338   : > { %6006 = vmatmul.msk.f32.vlgmr.msra.gmra.mxu1 %vm476_vm1, %v972_v25 }
 0x33f   : > { %v974_v26 = vpop.permute.xlu0 %973 }
 0x340   : > { %6007 = vmatmul.msk.f32.gmra.mxu1 %vm476_vm1, %v974_v26 }
 0x347   : > { %v1233_v37 = vpop.permute.xlu0 %1232 }
 0x348   : > { %6008 = vmatmul.msk.f32.gmra.mxu1 %vm476_vm1, %v976_v28 }
 0x34f   : > { %v1237_v43 = vpop.permute.xlu0 %1236 }
 0x350   : > { %6009 = vmatmul.msk.f32.gmra.mxu1 %vm476_vm1, %v978_v30 }
 0x36d   : > { %v659_v32 = vpop.f32.mrf.mxu0 }
 0x36e   : > { %5998 = vmatmul.msk.f32.vlgmr.msra.gmra.mxu0 %vm476_vm1, %v659_v32 }
 0x375   : > { %v662_v33 = vpop.f32.mrf.mxu0 }
 0x376   : > { %5999 = vmatmul.msk.f32.gmra.mxu0 %vm476_vm1, %v662_v33 }
 0x37d   : > { %v665_v34 = vpop.f32.mrf.mxu0 }
 0x37e   : > { %6000 = vmatmul.msk.f32.gmra.mxu0 %vm476_vm1, %v665_v34 }
 0x385   : > { %v668_v35 = vpop.f32.mrf.mxu0 }
 0x386   : > { %6001 = vmatmul.msk.f32.gmra.mxu0 %vm476_vm1, %v668_v35 }
 0x38e   : > { %6022 = vmatmul.msk.f32.vlgmr.msrb.gmra.mxu0 %vm476_vm1, %v1231_v27 }
 0x394   : > { %v720_v36 = vpop.f32.mrf.mxu1 }
 0x395   : > { %v732_v38 = vsel %vm325_vm0, %v720_v36, -inf }
 0x396   : > { %733 = vmax.xlane.f32.xlu1 %v732_v38  ;;  %6023 = vmatmul.msk.f32.gmra.mxu0 %vm476_vm1, %v1233_v37 }
 0x39c   : > { %v723_v39 = vpop.f32.mrf.mxu1 }
 0x39d   : > { %v735_v41 = vsel %vm325_vm0, %v723_v39, -inf }
 0x39e   : > { %736 = vmax.xlane.f32.xlu2 %v735_v41  ;;  %6024 = vmatmul.msk.f32.gmra.mxu0 %vm476_vm1, %v1235_v40 }
 0x3a4   : > { %v726_v42 = vpop.f32.mrf.mxu1 }
 0x3a5   : > { %v738_v44 = vsel %vm325_vm0, %v726_v42, -inf }
 0x3a6   : > { %739 = vmax.xlane.f32.xlu0 %v738_v44  ;;  %6025 = vmatmul.msk.f32.gmra.mxu0 %vm476_vm1, %v1237_v43 }
 0x3ac   : > { %v729_v45 = vpop.f32.mrf.mxu1 }
 0x3ad   : > { %v741_v46 = vsel %vm325_vm0, %v729_v45, -inf }
 0x3ae   : > { %742 = vmax.xlane.f32.xlu2 %v741_v46 }
 0x3b5   : > { %v1020_v47 = vpop.f32.mrf.mxu1 }
 0x3b6   : > { %v1032_v48 = vsel %vm325_vm0, %v1020_v47, -inf }
 0x3b7   : > { %1033 = vmax.xlane.f32.xlu1 %v1032_v48 }
 0x3bd   : > { %v1023_v49 = vpop.f32.mrf.mxu1 }
 0x3be   : > { %v1035_v50 = vsel %vm325_vm0, %v1023_v49, -inf }
 0x3bf   : > { %1036 = vmax.xlane.f32.xlu0 %v1035_v50 }
 0x3c5   : > { %v7222_v53 = vpop.f32.mrf.mxu1 }
 0x3c6   : > { %v1038_v54 = vsel %vm325_vm0, %v7222_v53, -inf }
 0x3cd   : > { %v7228_v56 = vpop.f32.mrf.mxu1 }
 0x3ce   : > { %v1041_v57 = vsel %vm325_vm0, %v7228_v56, -inf }
 0x3d0   : > { %6370 = vrot.lane.b32.xlu1 %v7164_v31, %s6898_s15 }
 0x3d3   : > { %6365 = vrot.lane.b32.xlu0 %v7162_v29, %s6898_s15 }
 0x3eb   : > { %v7218_v51 = vpop.f32.mrf.mxu0 }
 0x3f3   : > { %v7220_v52 = vpop.f32.mrf.mxu0 }
 0x3fa   : > { %1039 = vmax.xlane.f32.xlu1 %v1038_v54 }
 0x3fb   : > { %v7226_v55 = vpop.f32.mrf.mxu0 }
 0x402   : > { %1042 = vmax.xlane.f32.xlu1 %v1041_v57 }
 0x403   : > { %v7232_v58 = vpop.f32.mrf.mxu0 }
 0x409   : > { %v734_v59 = vpop.xlane.xlu1 %733 }
 0x40a   : > { %v744_v60 = vsub.f32 %v720_v36, %v734_v59 }
 0x40b   : > { %v7234_v61 = vpop.f32.mrf.mxu0 }
 0x40c   : > { %v748_v62 = vmul.f32 1.442695, %v744_v60  ;;  %v1291_v34 = vsel %vm325_vm0, %v7234_v61, -inf }
 0x40e   : > { %6600 = vpow2.f32 %v748_v62 }
 0x411   : > { %v737_v63 = vpop.xlane.xlu2 %736 }
 0x412   : > { %v745_v0 = vsub.f32 %v723_v39, %v737_v63 }
 0x413   : > { %v7236_v1 = vpop.f32.mrf.mxu0 }
 0x414   : > { %v7238_v2 = vpop.eup %6600  ;;  %v750_v4 = vmul.f32 1.442695, %v745_v0  ;;  %v1294_v3 = vsel %vm325_vm0, %v7236_v1, -inf }
 0x415   : > { %1295 = vmax.xlane.f32.xlu0 %v1294_v3  ;;  %v756_v5 = vsel %vm325_vm0, %v7238_v2, 0.0 }
 0x416   : > { %6602 = vpow2.f32 %v750_v4  ;;  %757 = vadd.xlane.f32.xlu2 %v756_v5 }
 0x419   : > { %v740_v6 = vpop.xlane.xlu0 %739 }
 0x41a   : > { %v746_v7 = vsub.f32 %v726_v42, %v740_v6 }
 0x41b   : > { %v7244_v9 = vpop.f32.mrf.mxu0 }
 0x41c   : > { %v7246_v10 = vpop.eup %6602  ;;  %v752_v12 = vmul.f32 1.442695, %v746_v7  ;;  %v1297_v13 = vsel %vm325_vm0, %v7244_v9, -inf }
 0x41d   : > { %1298 = vmax.xlane.f32.xlu0 %v1297_v13  ;;  %v759_v14 = vsel %vm325_vm0, %v7246_v10, 0.0 }
 0x41e   : > { %6604 = vpow2.f32 %v752_v12  ;;  %760 = vadd.xlane.f32.xlu2 %v759_v14 }
 0x421   : > { %v743_v15 = vpop.xlane.xlu2 %742 }
 0x422   : > { %v747_v8 = vsub.f32 %v729_v45, %v743_v15 }
 0x423   : > { %v7252_v16 = vpop.f32.mrf.mxu0 }
 0x424   : > { %v7254_v17 = vpop.eup %6604  ;;  %v754_v18 = vmul.f32 1.442695, %v747_v8  ;;  %v1300_v19 = vsel %vm325_vm0, %v7252_v16, -inf }
 0x425   : > { %1301 = vmax.xlane.f32.xlu1 %v1300_v19  ;;  %v762_v11 = vsel %vm325_vm0, %v7254_v17, 0.0 }
 0x426   : > { %6606 = vpow2.f32 %v754_v18  ;;  %763 = vadd.xlane.f32.xlu2 %v762_v11 }
 0x42a   : > { %v1034_v20 = vpop.xlane.xlu1 %1033 }
 0x42b   : > { %v1044_v21 = vsub.f32 %v1020_v47, %v1034_v20 }
 0x42c   : > { %v7260_v22 = vpop.eup %6606 }
 0x42d   : > { %v1048_v23 = vmul.f32 1.442695, %v1044_v21  ;;  %v765_v24 = vsel %vm325_vm0, %v7260_v22, 0.0 }
 0x42e   : > { %766 = vadd.xlane.f32.xlu2 %v765_v24 }
 0x42f   : > { %6608 = vpow2.f32 %v1048_v23 }
 0x432   : > { %v1037_v25 = vpop.xlane.xlu0 %1036 }
 0x433   : > { %v1045_v26 = vsub.f32 %v1023_v49, %v1037_v25 }
 0x435   : > { %v7264_v27 = vpop.eup %6608  ;;  %v1050_v28 = vmul.f32 1.442695, %v1045_v26 }
 0x436   : > { %v1056_v30 = vsel %vm325_vm0, %v7264_v27, 0.0 }
 0x437   : > { %6610 = vpow2.f32 %v1050_v28  ;;  %1057 = vadd.xlane.f32.xlu2 %v1056_v30 }
 0x43d   : > { %v7268_v32 = vpop.eup %6610 }
 0x43e   : > { %6375 = vrot.lane.b32.xlu1 %v7162_v29, %s6896_s11  ;;  %v1059_v33 = vsel %vm325_vm0, %v7268_v32, 0.0 }
 0x43f   : > { %1060 = vadd.xlane.f32.xlu0 %v1059_v33  ;;  %1292 = vmax.xlane.f32.xlu2 %v1291_v34 }
 0x442   : > { %v6371_v37 = vpop.permute.xlu1 %6370 }
 0x443   : > { %v6372_v39 = vunpack.i.l.bf16 %v6371_v37  ;;  %v6373_v40 = vunpack.i.h.bf16 %v6371_v37 }
 0x445   : > { %v6366_v35 = vpop.permute.xlu0 %6365 }
 0x446   : > { %v6367_v36 = vunpack.i.l.bf16 %v6366_v35  ;;  %v6368_v38 = vunpack.i.h.bf16 %v6366_v35 }
 0x448   : > { %872 = vmatpush.msrb.mxu2 %v6367_v36 }
 0x44a   : > { %873 = vmatpush.msrb.mxu2 %v6368_v38 }
 0x44c   : > { %874 = vmatpush.msrb.mxu2 %v6372_v39 }
 0x44e   : > { %875 = vmatpush.msrb.mxu2 %v6373_v40 }
 0x453   : > { %6385 = vrot.lane.b32.xlu0 %v7162_v29, %s6897_s12 }
 0x45b   : > { %6390 = vrot.lane.b32.xlu0 %v7164_v31, %s6897_s12 }
 0x46d   : > { %v1040_v41 = vpop.xlane.xlu1 %1039 }
 0x46e   : > { %v1046_v42 = vsub.f32 %v7222_v53, %v1040_v41 }
 0x470   : > { %v1052_v43 = vmul.f32 1.442695, %v1046_v42 }
 0x472   : > { %6612 = vpow2.f32 %v1052_v43 }
 0x475   : > { %v7286_v50 = vpop.xlane.xlu1 %1042 }
 0x478   : > { %v7281_v44 = vpop.eup %6612 }
 0x479   : > { %v1062_v45 = vsel %vm325_vm0, %v7281_v44, 0.0 }
 0x47a   : > { %1063 = vadd.xlane.f32.xlu2 %v1062_v45 }
 0x488   : > { %v1296_v46 = vpop.xlane.xlu0 %1295 }
 0x489   : > { %v1304_v47 = vsub.f32 %v7236_v1, %v1296_v46  ;;  %v758_v48 = vpop.xlane.xlu2 %757 }
 0x48a   : > { %6614 = vrcp.f32 %v758_v48  ;;  %v779_v0 = vand.u32 2147483648, %v758_v48  ;;  %v777_v3 = vand.u32 2147483647, %v758_v48  ;;  %vm773_vm5 = vweird.f32 %v758_v48 }
 0x48b   : > { %v1309_v29 = vmul.f32 1.442695, %v1304_v47 }
 0x48c   : > { %v780_v7 = vor.u32 1.1754944e-38, %v779_v0  ;;  %vm778_vm7 = vcmp.eq.f32.partialorder %v777_v3, 8.507059e+37 }
 0x48d   : > { %6616 = vpow2.f32 %v1309_v29 }
 0x490   : > { %v6615_v49 = vpop.eup %6614  ;;  %v1299_v54 = vpop.xlane.xlu0 %1298 }
 0x491   : > { %v769_v53 = vmul.f32 %v6615_v49, %v758_v48  ;;  %v1305_v57 = vsub.f32 %v7244_v9, %v1299_v54  ;;  %v761_v59 = vpop.xlane.xlu2 %760  ;;  %vm774_vm4 = vweird.f32 %v6615_v49 }
 0x492   : > { %6618 = vrcp.f32 %v761_v59  ;;  %vm775_vm6 = vmor %vm773_vm5, %vm774_vm4  ;;  %v794_v23 = vand.u32 2147483648, %v761_v59  ;;  %v792_v24 = vand.u32 2147483647, %v761_v59  ;;  %vm788_vm9 = vweird.f32 %v761_v59 }
 0x493   : > { %v7289_v60 = vpop.eup %6616  ;;  %v770_v62 = vsub.f32 1.0, %v769_v53  ;;  %v1311_v63 = vmul.f32 1.442695, %v1305_v57 }
 0x494   : > { %v1318_v1 = vsel %vm325_vm0, %v7289_v60, 0.0  ;;  %v795_v28 = vor.u32 1.1754944e-38, %v794_v23  ;;  %vm793_vm11 = vcmp.eq.f32.partialorder %v792_v24, 8.507059e+37 }
 0x495   : > { %v771_v4 = vmul.f32 %v6615_v49, %v770_v62  ;;  %6620 = vpow2.f32 %v1311_v63  ;;  %1319 = vadd.xlane.f32.xlu1 %v1318_v1 }
 0x497   : > { %v772_v5 = vadd.f32 %v6615_v49, %v771_v4 }
 0x498   : > { %v6619_v6 = vpop.eup %6618  ;;  %v1302_v9 = vpop.xlane.xlu1 %1301 }
 0x499   : > { %v784_v12 = vmul.f32 %v6619_v6, %v761_v59  ;;  %v1306_v13 = vsub.f32 %v7252_v16, %v1302_v9  ;;  %v764_v14 = vpop.xlane.xlu2 %763  ;;  %v776_v15 = vsel %vm775_vm6, %v6615_v49, %v772_v5  ;;  %vm789_vm8 = vweird.f32 %v6619_v6 }
 0x49a   : > { %6622 = vrcp.f32 %v764_v14  ;;  %v781_v8 = vsel %vm778_vm7, %v780_v7, %v776_v15  ;;  %vm790_vm10 = vmor %vm788_vm9, %vm789_vm8  ;;  %v809_v39 = vand.u32 2147483648, %v764_v14  ;;  %v807_v41 = vand.u32 2147483647, %v764_v14 }
 0x49b   : > { %v7294_v18 = vpop.eup %6620  ;;  %v785_v19 = vsub.f32 1.0, %v784_v12  ;;  %v1313_v11 = vmul.f32 1.442695, %v1306_v13  ;;  %v828_v20 = vmul.f32 %v7238_v2, %v781_v8  ;;  %vm803_vm13 = vweird.f32 %v764_v14 }
 0x49c   : > { %v1321_v21 = vsel %vm325_vm0, %v7294_v18, 0.0  ;;  %v810_v45 = vor.u32 1.1754944e-38, %v809_v39  ;;  %vm808_vm15 = vcmp.eq.f32.partialorder %v807_v41, 8.507059e+37 }
 0x49d   : > { %6624 = vpow2.f32 %v1313_v11  ;;  %1322 = vadd.xlane.f32.xlu1 %v1321_v21  ;;  %5990 = vmatmul.msk.f32.vlgmr.msrb.gmra.mxu2 %vm325_vm0, %v828_v20  ;;  %v786_v16 = vmul.f32 %v6619_v6, %v785_v19  ;;  %v1047_v11 = vsub.f32 %v7228_v56, %v7286_v50 }
 0x49f   : > { %v787_v25 = vadd.f32 %v6619_v6, %v786_v16  ;;  %v1054_v20 = vmul.f32 1.442695, %v1047_v11  ;;  %v276_v16 = vld [vmem:[%s8870_s2 + $0x28] sm:$0xff] }
 0x4a0   : > { %v6623_v26 = vpop.eup %6622  ;;  %916 = vmatpush.msrb.mxu3 %v276_v16 }
 0x4a1   : > { %v799_v30 = vmul.f32 %v6623_v26, %v764_v14  ;;  %v767_v33 = vpop.xlane.xlu2 %766  ;;  %v791_v34 = vsel %vm790_vm10, %v6619_v6, %v787_v25  ;;  %vm804_vm12 = vweird.f32 %v6623_v26 }
 0x4a2   : > { %6626 = vrcp.f32 %v767_v33  ;;  %v796_v2 = vsel %vm793_vm11, %v795_v28, %v791_v34  ;;  %vm805_vm14 = vmor %vm803_vm13, %vm804_vm12  ;;  %v824_v54 = vand.u32 2147483648, %v767_v33  ;;  %v822_v57 = vand.u32 2147483647, %v767_v33 }
 0x4a3   : > { %v7300_v35 = vpop.eup %6624  ;;  %v800_v36 = vsub.f32 1.0, %v799_v30  ;;  %v829_v37 = vmul.f32 %v7246_v10, %v796_v2  ;;  %vm818_vm3 = vweird.f32 %v767_v33 }
 0x4a4   : > { %v1324_v38 = vsel %vm325_vm0, %v7300_v35, 0.0  ;;  %v825_v63 = vor.u32 1.1754944e-38, %v824_v54  ;;  %vm823_vm5 = vcmp.eq.f32.partialorder %v822_v57, 8.507059e+37 }
 0x4a5   : > { %1325 = vadd.xlane.f32.xlu1 %v1324_v38  ;;  %5991 = vmatmul.msk.f32.gmra.mxu2 %vm325_vm0, %v829_v37  ;;  %v801_v40 = vmul.f32 %v6623_v26, %v800_v36 }
 0x4a7   : > { %v802_v42 = vadd.f32 %v6623_v26, %v801_v40 }
 0x4a8   : > { %v6627_v43 = vpop.eup %6626 }
 0x4a9   : > { %v814_v46 = vmul.f32 %v6627_v43, %v767_v33  ;;  %v806_v47 = vsel %vm805_vm14, %v6623_v26, %v802_v42  ;;  %vm819_vm2 = vweird.f32 %v6627_v43 }
 0x4aa   : > { %v7306_v48 = vpop.xlane.xlu2 %1057  ;;  %v811_v10 = vsel %vm808_vm15, %v810_v45, %v806_v47  ;;  %vm820_vm4 = vmor %vm818_vm3, %vm819_vm2 }
 0x4ab   : > { %v815_v29 = vsub.f32 1.0, %v814_v46  ;;  %v830_v49 = vmul.f32 %v7254_v17, %v811_v10  ;;  %v1079_v41 = vand.u32 2147483648, %v7306_v48  ;;  %vm1073_vm7 = vweird.f32 %v7306_v48 }
 0x4ac   : > { %v1077_v42 = vand.u32 2147483647, %v7306_v48 }
 0x4ad   : > { %v816_v53 = vmul.f32 %v6627_v43, %v815_v29  ;;  %5992 = vmatmul.msk.f32.gmra.mxu2 %vm325_vm0, %v830_v49  ;;  %v1080_v10 = vor.u32 1.1754944e-38, %v1079_v41 }
 0x4ae   : > { %vm1078_vm9 = vcmp.eq.f32.partialorder %v1077_v42, 8.507059e+37 }
 0x4af   : > { %v817_v59 = vadd.f32 %v6627_v43, %v816_v53 }
 0x4b0   : > { %v6376_v62 = vpop.permute.xlu1 %6375 }
 0x4b1   : > { %v6377_v0 = vunpack.i.l.bf16 %v6376_v62  ;;  %v821_v1 = vsel %vm820_vm4, %v6627_v43, %v817_v59  ;;  %v6378_v5 = vunpack.i.h.bf16 %v6376_v62 }
 0x4b2   : > { %v1293_v4 = vpop.xlane.xlu2 %1292  ;;  %v826_v3 = vsel %vm823_vm5, %v825_v63, %v821_v1  ;;  %v7315_v12 = vpop.xlane.xlu0 %1060 }
 0x4b3   : > { %v1303_v6 = vsub.f32 %v7234_v61, %v1293_v4  ;;  %1168 = vmatpush.msra.mxu2 %v6377_v0  ;;  %v831_v17 = vmul.f32 %v7260_v22, %v826_v3  ;;  %vm1088_vm11 = vweird.f32 %v7315_v12  ;;  %v1092_v3 = vand.u32 2147483647, %v7315_v12 }
 0x4b5   : > { %v1307_v7 = vmul.f32 1.442695, %v1303_v6  ;;  %1169 = vmatpush.msra.mxu2 %v6378_v5  ;;  %v1094_v5 = vand.u32 2147483648, %v7315_v12  ;;  %vm1093_vm15 = vcmp.eq.f32.partialorder %v1092_v3, 8.507059e+37 }
 0x4b6   : > { %5993 = vmatmul.msk.f32.gmra.mxu2 %vm325_vm0, %v831_v17 }
 0x4b7   : > { %6628 = vpow2.f32 %v1307_v7 }
 0x4b8   : > { %6630 = vpow2.f32 %v1054_v20 }
 0x4b9   : > { %6632 = vrcp.f32 %v7306_v48 }
 0x4ba   : > { %6634 = vrcp.f32 %v7315_v12 }
 0x4bd   : > { %v7313_v9 = vpop.eup %6628 }
 0x4be   : > { %v1315_v13 = vsel %vm325_vm0, %v7313_v9, 0.0  ;;  %v7323_v21 = vpop.eup %6630 }
 0x4bf   : > { %1316 = vadd.xlane.f32.xlu2 %v1315_v13  ;;  %v1065_v23 = vsel %vm325_vm0, %v7323_v21, 0.0 }
 0x4c5   : > { %v6386_v14 = vpop.permute.xlu0 %6385 }
 0x4c6   : > { %v6387_v15 = vunpack.i.l.bf16 %v6386_v14  ;;  %v6388_v8 = vunpack.i.h.bf16 %v6386_v14 }
 0x4c8   : > { %1427 = vmatpush.msrb.mxu1 %v6387_v15 }
 0x4ca   : > { %1428 = vmatpush.msrb.mxu1 %v6388_v8 }
 0x4cd   : > { %v6391_v61 = vpop.permute.xlu0 %6390 }
 0x4ce   : > { %v6392_v22 = vunpack.i.l.bf16 %v6391_v61  ;;  %v6393_v19 = vunpack.i.h.bf16 %v6391_v61 }
 0x4d0   : > { %1429 = vmatpush.msrb.mxu1 %v6392_v22 }
 0x4d2   : > { %1430 = vmatpush.msrb.mxu1 %v6393_v19  ;;  %v1095_v19 = vor.u32 1.1754944e-38, %v1094_v5 }
 0x4d7   : > { %6380 = vrot.lane.b32.xlu2 %v7164_v31, %s6896_s11  ;;  %v6633_v31 = vpop.eup %6632 }
 0x4d8   : > { %v1069_v56 = vmul.f32 %v6633_v31, %v7306_v48  ;;  %v7336_v26 = vpop.eup %6634  ;;  %vm1074_vm6 = vweird.f32 %v6633_v31 }
 0x4d9   : > { %v1084_v33 = vmul.f32 %v7336_v26, %v7315_v12  ;;  %vm1075_vm8 = vmor %vm1073_vm7, %vm1074_vm6  ;;  %vm1089_vm10 = vweird.f32 %v7336_v26 }
 0x4da   : > { %v1070_v28 = vsub.f32 1.0, %v1069_v56  ;;  %vm7369_vm12 = vmor %vm1088_vm11, %vm1089_vm10 }
 0x4db   : > { %v1085_v2 = vsub.f32 1.0, %v1084_v33 }
 0x4dc   : > { %v1071_v34 = vmul.f32 %v6633_v31, %v1070_v28 }
 0x4dd   : > { %v1086_v43 = vmul.f32 %v7336_v26, %v1085_v2 }
 0x4de   : > { %v1072_v39 = vadd.f32 %v6633_v31, %v1071_v34 }
 0x4df   : > { %v1087_v49 = vadd.f32 %v7336_v26, %v1086_v43 }
 0x4e0   : > { %v1076_v47 = vsel %vm1075_vm8, %v6633_v31, %v1072_v39 }
 0x4e1   : > { %v1081_v57 = vsel %vm1078_vm9, %v1080_v10, %v1076_v47  ;;  %v1091_v13 = vsel %vm7369_vm12, %v7336_v26, %v1087_v49 }
 0x4e2   : > { %v1128_v7 = vmul.f32 %v7264_v27, %v1081_v57 }
 0x4ed   : > { %v7339_v30 = vpop.xlane.xlu2 %1063 }
 0x4ee   : > { %vm1103_vm8 = vweird.f32 %v7339_v30 }
 0x500   : > { %1066 = vadd.xlane.f32.xlu2 %v1065_v23  ;;  %v1096_v23 = vsel %vm1093_vm15, %v1095_v19, %v1091_v13 }
 0x501   : > { %v1129_v2 = vmul.f32 %v7268_v32, %v1096_v23 }
 0x508   : > { %v7334_v50 = vpop.xlane.xlu1 %1319 }
 0x509   : > { %6636 = vrcp.f32 %v7334_v50  ;;  %v1353_v26 = vand.u32 2147483648, %v7334_v50  ;;  %vm1347_vm6 = vweird.f32 %v7334_v50  ;;  %v1351_v33 = vand.u32 2147483647, %v7334_v50 }
 0x50a   : > { %6638 = vrcp.f32 %v7339_v30 }
 0x50b   : > { %vm1352_vm10 = vcmp.eq.f32.partialorder %v1351_v33, 8.507059e+37 }
 0x50f   : > { %v7347_v38 = vpop.eup %6636 }
 0x510   : > { %v7345_v36 = vpop.xlane.xlu1 %1322  ;;  %v7354_v45 = vpop.eup %6638  ;;  %v1343_v46 = vmul.f32 %v7347_v38, %v7334_v50  ;;  %vm1348_vm3 = vweird.f32 %v7347_v38  ;;  %v1354_v50 = vor.u32 1.1754944e-38, %v1353_v26 }
 0x511   : > { %v1099_v29 = vmul.f32 %v7354_v45, %v7339_v30  ;;  %vm1104_vm5 = vweird.f32 %v7354_v45  ;;  %vm1349_vm7 = vmor %vm1347_vm6, %vm1348_vm3 }
 0x512   : > { %v1344_v54 = vsub.f32 1.0, %v1343_v46  ;;  %vm1105_vm9 = vmor %vm1103_vm8, %vm1104_vm5 }
 0x513   : > { %v1100_v6 = vsub.f32 1.0, %v1099_v29  ;;  %v1366_v29 = vand.u32 2147483647, %v7345_v36 }
 0x514   : > { %v1345_v8 = vmul.f32 %v7347_v38, %v1344_v54 }
 0x515   : > { %v1101_v11 = vmul.f32 %v7354_v45, %v1100_v6  ;;  %vm1367_vm15 = vcmp.eq.f32.partialorder %v1366_v29, 8.507059e+37 }
 0x516   : > { %v1346_v31 = vadd.f32 %v7347_v38, %v1345_v8  ;;  %v277_v8 = vld [vmem:[%s8870_s2 + $0x30] sm:$0xff] }
 0x517   : > { %v1102_v34 = vadd.f32 %v7354_v45, %v1101_v11  ;;  %1212 = vmatpush.msra.mxu3 %v277_v8 }
 0x518   : > { %v7363_v59 = vpop.xlane.xlu1 %1325 }
 0x519   : > { %v1106_v32 = vsel %vm1105_vm9, %v7354_v45, %v1102_v34  ;;  %vm1377_vm3 = vweird.f32 %v7363_v59  ;;  %v7442_v34 = vld [vmem:[%s8871_s3] sm:$0xff] }
 0x520   : > { %v877_v24 = vpop.f32.mrf.mxu2 }
 0x521   : > { %5994 = vmatmul.msk.f32.vlgmr.msrb.gmra.mxu3 %vm476_vm1, %v877_v24 }
 0x528   : > { %v880_v25 = vpop.f32.mrf.mxu2 }
 0x529   : > { %5995 = vmatmul.msk.f32.gmra.mxu3 %vm476_vm1, %v880_v25 }
 0x530   : > { %v883_v37 = vpop.f32.mrf.mxu2 }
 0x531   : > { %5996 = vmatmul.msk.f32.gmra.mxu3 %vm476_vm1, %v883_v37  ;;  %v1109_v37 = vand.u32 2147483648, %v7339_v30 }
 0x532   : > { %v1317_v40 = vpop.xlane.xlu2 %1316 }
 0x533   : > { %6640 = vrcp.f32 %v1317_v40  ;;  %v1338_v14 = vand.u32 2147483648, %v1317_v40  ;;  %v1336_v12 = vand.u32 2147483647, %v1317_v40  ;;  %vm1332_vm14 = vweird.f32 %v1317_v40 }
 0x534   : > { %6642 = vrcp.f32 %v7345_v36  ;;  %v1110_v43 = vor.u32 1.1754944e-38, %v1109_v37 }
 0x535   : > { %6644 = vrcp.f32 %v7363_v59  ;;  %v1339_v20 = vor.u32 1.1754944e-38, %v1338_v14  ;;  %vm1337_vm4 = vcmp.eq.f32.partialorder %v1336_v12, 8.507059e+37 }
 0x539   : > { %v6641_v48 = vpop.eup %6640  ;;  %v886_v53 = vpop.f32.mrf.mxu2 }
 0x53a   : > { %v1328_v62 = vmul.f32 %v6641_v48, %v1317_v40  ;;  %5997 = vmatmul.msk.f32.gmra.mxu3 %vm476_vm1, %v886_v53  ;;  %v6381_v63 = vpop.permute.xlu2 %6380  ;;  %v7367_v0 = vpop.eup %6642  ;;  %vm1333_vm13 = vweird.f32 %v6641_v48  ;;  %v1350_v40 = vsel %vm1349_vm7, %v7347_v38, %v1346_v31  ;;  %v1368_v38 = vand.u32 2147483648, %v7345_v36 }
 0x53b   : > { %v6382_v1 = vunpack.i.l.bf16 %v6381_v63  ;;  %v6383_v15 = vunpack.i.h.bf16 %v6381_v63  ;;  %v1358_v61 = vmul.f32 %v7367_v0, %v7345_v36  ;;  %vm1334_vm2 = vmor %vm1332_vm14, %vm1333_vm13  ;;  %v6645_v56 = vpop.eup %6644  ;;  %v1355_v42 = vsel %vm1352_vm10, %v1354_v50, %v1350_v40 }
 0x53c   : > { %v1329_v17 = vsub.f32 1.0, %v1328_v62  ;;  %v1373_v39 = vmul.f32 %v6645_v56, %v7363_v59  ;;  %vm1363_vm12 = vweird.f32 %v7367_v0  ;;  %v1388_v10 = vmul.f32 %v7289_v60, %v1355_v42 }
 0x53d   : > { %1170 = vmatpush.msra.mxu2 %v6382_v1  ;;  %v1359_v16 = vsub.f32 1.0, %v1358_v61  ;;  %vm1362_vm13 = vweird.f32 %v7345_v36  ;;  %v1369_v54 = vor.u32 1.1754944e-38, %v1368_v38  ;;  %v1383_v60 = vand.u32 2147483648, %v7363_v59  ;;  %v278_v61 = vld [vmem:[%s8870_s2 + $0x38] sm:$0xff] }
 0x53e   : > { %v1330_v22 = vmul.f32 %v6641_v48, %v1329_v17  ;;  %v1374_v46 = vsub.f32 1.0, %v1373_v39  ;;  %vm1364_vm14 = vmor %vm1362_vm13, %vm1363_vm12  ;;  %v1381_v36 = vand.u32 2147483647, %v7363_v59 }
 0x53f   : > { %1171 = vmatpush.msra.mxu2 %v6383_v15  ;;  %v1360_v41 = vmul.f32 %v7367_v0, %v1359_v16  ;;  %v1384_v63 = vor.u32 1.1754944e-38, %v1383_v60 }
 0x540   : > { %v1331_v27 = vadd.f32 %v6641_v48, %v1330_v22  ;;  %6010 = vmatmul.msk.f32.vlgmr.msra.gmra.mxu2 %vm325_vm0, %v1128_v7  ;;  %vm1382_vm5 = vcmp.eq.f32.partialorder %v1381_v36, 8.507059e+37 }
 0x541   : > { %v1361_v47 = vadd.f32 %v7367_v0, %v1360_v41  ;;  %1471 = vmatpush.msrb.mxu2 %v278_v61 }
 0x542   : > { %v1335_v24 = vsel %vm1334_vm2, %v6641_v48, %v1331_v27  ;;  %v1375_v48 = vmul.f32 %v6645_v56, %v1374_v46  ;;  %vm1378_vm2 = vweird.f32 %v6645_v56 }
 0x543   : > { %v1340_v25 = vsel %vm1337_vm4, %v1339_v20, %v1335_v24  ;;  %v1365_v49 = vsel %vm1364_vm14, %v7367_v0, %v1361_v47  ;;  %vm1379_vm4 = vmor %vm1377_vm3, %vm1378_vm2 }
 0x544   : > { %v1387_v28 = vmul.f32 %v7313_v9, %v1340_v25  ;;  %v1107_v9 = vand.u32 2147483647, %v7339_v30  ;;  %v1370_v53 = vsel %vm1367_vm15, %v1369_v54, %v1365_v49  ;;  %v1376_v57 = vadd.f32 %v6645_v56, %v1375_v48  ;;  %v6825_v54 = vld [vmem:[%s7007_s28 + $0x10] sm:$0xff] }
 0x545   : > { %v1389_v62 = vmul.f32 %v7294_v18, %v1370_v53 }
 0x546   : > { %6026 = vmatmul.msk.f32.vlgmr.msrb.gmra.mxu1 %vm325_vm0, %v1387_v28  ;;  %vm1108_vm11 = vcmp.eq.f32.partialorder %v1107_v9, 8.507059e+37  ;;  %v6823_v9 = vld [vmem:[%s7007_s28] sm:$0xff] }
 0x547   : > { %v1111_v30 = vsel %vm1108_vm11, %v1110_v43, %v1106_v32 }
 0x548   : > { %6011 = vmatmul.msk.f32.gmra.mxu2 %vm325_vm0, %v1129_v2  ;;  %v1130_v45 = vmul.f32 %v7281_v44, %v1111_v30  ;;  %v1380_v44 = vsel %vm1379_vm4, %v6645_v56, %v1376_v57  ;;  %v1489_v2 = vperm.slane %v7442_v34, 1  ;;  %v6824_v30 = vld [vmem:[%s7007_s28 + $0x8] sm:$0xff] }
 0x549   : > { %v1385_v0 = vsel %vm1382_vm5, %v1384_v63, %v1380_v44 }
 0x54a   : > { %v1390_v1 = vmul.f32 %v7300_v35, %v1385_v0  ;;  %v6826_v0 = vld [vmem:[%s7007_s28 + $0x18] sm:$0xff] }
 0x54e   : > { %6027 = vmatmul.msk.f32.gmra.mxu1 %vm325_vm0, %v1388_v10 }
 0x550   : > { %6012 = vmatmul.msk.f32.gmra.mxu2 %vm325_vm0, %v1130_v45 }
 0x556   : > { %6028 = vmatmul.msk.f32.gmra.mxu1 %vm325_vm0, %v1389_v62 }
 0x55e   : > { %6029 = vmatmul.msk.f32.gmra.mxu1 %vm325_vm0, %v1390_v1 }
 0x573   : > { %v1067_v4 = vpop.xlane.xlu2 %1066 }
 0x574   : > { %6646 = vrcp.f32 %v1067_v4  ;;  %v1124_v6 = vand.u32 2147483648, %v1067_v4  ;;  %v1122_v59 = vand.u32 2147483647, %v1067_v4  ;;  %vm1118_vm7 = vweird.f32 %v1067_v4 }
 0x576   : > { %v1125_v13 = vor.u32 1.1754944e-38, %v1124_v6  ;;  %vm1123_vm9 = vcmp.eq.f32.partialorder %v1122_v59, 8.507059e+37 }
 0x57a   : > { %v6647_v3 = vpop.eup %6646 }
 0x57b   : > { %v1114_v5 = vmul.f32 %v6647_v3, %v1067_v4  ;;  %vm1119_vm6 = vweird.f32 %v6647_v3 }
 0x57c   : > { %vm1120_vm8 = vmor %vm1118_vm7, %vm1119_vm6 }
 0x57d   : > { %v1115_v18 = vsub.f32 1.0, %v1114_v5 }
 0x57f   : > { %v1116_v17 = vmul.f32 %v6647_v3, %v1115_v18 }
 0x581   : > { %v1117_v7 = vadd.f32 %v6647_v3, %v1116_v17 }
 0x583   : > { %v1121_v14 = vsel %vm1120_vm8, %v6647_v3, %v1117_v7  ;;  %v6899_v3 = vmov 32.0  }
 0x584   : > { %v1126_v15 = vsel %vm1123_vm9, %v1125_v13, %v1121_v14  ;;  %6648 = vrcp.f32 %v6899_v3  ;;  %vm1650_vm9 = vcmask 523264  }
 0x585   : > { %v1131_v35 = vmul.f32 %v7323_v21, %v1126_v15 }
 0x587   : > { %6013 = vmatmul.msk.f32.gmra.mxu2 %vm325_vm0, %v1131_v35 }
 0x58a   : > { %v6649_v5 = vpop.eup %6648 }
 0x58b   : > { %v1511_v18 = vmul.f32 32.0, %v6649_v5  ;;  %vm1515_vm10 = vweird.f32 %v6649_v5 }
 0x58d   : > { %v1512_v6 = vsub.f32 1.0, %v1511_v18 }
 0x58f   : > { %v1513_v17 = vmul.f32 %v6649_v5, %v1512_v6 }
 0x591   : > { %v1514_v59 = vadd.f32 %v6649_v5, %v1513_v17 }
 0x593   : > { %v7456_v7 = vsel %vm1515_vm10, %v6649_v5, %v1514_v59 }
 0x5a4   : > { %v918_v16 = vpop.f32.mrf.mxu3 }
 0x5a5   : > { %v960_v25 = vadd.f32 %v7218_v51, %v918_v16 }
 0x5ac   : > { %v921_v24 = vpop.f32.mrf.mxu3 }
 0x5ad   : > { %v963_v40 = vadd.f32 %v7220_v52, %v921_v24 }
 0x5b4   : > { %v924_v31 = vpop.f32.mrf.mxu3 }
 0x5b5   : > { %v966_v47 = vadd.f32 %v7226_v55, %v924_v31 }
 0x5bd   : > { %v927_v56 = vpop.f32.mrf.mxu3 }
 0x5be   : > { %v969_v60 = vadd.f32 %v7232_v58, %v927_v56 }
 0x5c3   : > { %v1173_v22 = vpop.f32.mrf.mxu2  ;;  %v1432_v12 = vpop.f32.mrf.mxu1 }
 0x5c4   : > { %6014 = vmatmul.msk.f32.vlgmr.msra.gmra.mxu3 %vm476_vm1, %v1173_v22  ;;  %6030 = vmatmul.msk.f32.vlgmr.msrb.gmra.mxu2 %vm476_vm1, %v1432_v12 }
 0x5cb   : > { %v1176_v19 = vpop.f32.mrf.mxu2  ;;  %v1435_v21 = vpop.f32.mrf.mxu1 }
 0x5cc   : > { %6015 = vmatmul.msk.f32.gmra.mxu3 %vm476_vm1, %v1176_v19  ;;  %6031 = vmatmul.msk.f32.gmra.mxu2 %vm476_vm1, %v1435_v21 }
 0x5d3   : > { %v1179_v27 = vpop.f32.mrf.mxu2  ;;  %v1438_v11 = vpop.f32.mrf.mxu1 }
 0x5d4   : > { %6016 = vmatmul.msk.f32.gmra.mxu3 %vm476_vm1, %v1179_v27  ;;  %6032 = vmatmul.msk.f32.gmra.mxu2 %vm476_vm1, %v1438_v11 }
 0x5db   : > { %v1441_v20 = vpop.f32.mrf.mxu1 }
 0x5dc   : > { %6033 = vmatmul.msk.f32.gmra.mxu2 %vm476_vm1, %v1441_v20 }
 0x60a   : > { %v1182_v23 = vpop.f32.mrf.mxu2 }
 0x60b   : > { %6017 = vmatmul.msk.f32.gmra.mxu3 %vm476_vm1, %v1182_v23 }
 0x647   : > { %v1214_v26 = vpop.f32.mrf.mxu3  ;;  %v1473_v28 = vpop.f32.mrf.mxu2 }
 0x648   : > { %v1226_v33 = vadd.f32 %v1214_v26, %v960_v25  ;;  %v282_v26 = vld [vmem:[%s8870_s2 + $0x58] sm:$0xff] }
 0x649   : > { %1628 = vmatpush.msrb.mxu3 %v282_v26 }
 0x64a   : > { %v1485_v37 = vadd.f32 %v1473_v28, %v1226_v33  ;;  %v281_v28 = vld [vmem:[%s8870_s2 + $0x50] sm:$0xff]  ;;  %v280_v33 = vld [vmem:[%s8870_s2 + $0x48] sm:$0xff] }
 0x64b   : > { %1629 = vmatpush.msrb.mxu3 %v281_v28 }
 0x64c   : > { %v1490_v39 = vadd.f32 %v1489_v2, %v1485_v37 }
 0x64d   : > { %1630 = vmatpush.msrb.mxu3 %v280_v33  ;;  %v285_v33 = vld [vmem:[%s8870_s2 + $0x70] sm:$0xff] }
 0x64e   : > { %v1494_v41 = vadd.f32 %v6823_v9, %v1490_v39 }
 0x64f   : > { %v1217_v50 = vpop.f32.mrf.mxu3  ;;  %v1476_v32 = vpop.f32.mrf.mxu2 }
 0x650   : > { %v1227_v51 = vadd.f32 %v1217_v50, %v963_v40  ;;  %v1498_v42 = vsel %vm325_vm0, %v1494_v41, 0.0 }
 0x651   : > { %1499 = vadd.xlane.f32.xlu0 %v1498_v42 }
 0x652   : > { %v1486_v43 = vadd.f32 %v1476_v32, %v1227_v51 }
 0x654   : > { %v1491_v46 = vadd.f32 %v1489_v2, %v1486_v43 }
 0x656   : > { %v1495_v38 = vadd.f32 %v6824_v30, %v1491_v46 }
 0x657   : > { %v1220_v10 = vpop.f32.mrf.mxu3  ;;  %v1479_v45 = vpop.f32.mrf.mxu2 }
 0x658   : > { %v1228_v29 = vadd.f32 %v1220_v10, %v966_v47  ;;  %v1501_v52 = vsel %vm325_vm0, %v1495_v38, 0.0 }
 0x659   : > { %1502 = vadd.xlane.f32.xlu1 %v1501_v52 }
 0x65a   : > { %v1487_v49 = vadd.f32 %v1479_v45, %v1228_v29  ;;  %v1593_v45 = vperm.slane %v7442_v34, 4 }
 0x65c   : > { %v1492_v48 = vadd.f32 %v1489_v2, %v1487_v49 }
 0x65e   : > { %v1496_v53 = vadd.f32 %v6825_v54, %v1492_v48 }
 0x65f   : > { %v1482_v36 = vpop.f32.mrf.mxu2 }
 0x660   : > { %v1504_v57 = vsel %vm325_vm0, %v1496_v53, 0.0 }
 0x661   : > { %1505 = vadd.xlane.f32.xlu1 %v1504_v57 }
 0x68e   : > { %v1223_v62 = vpop.f32.mrf.mxu3 }
 0x68f   : > { %v1229_v55 = vadd.f32 %v1223_v62, %v969_v60 }
 0x691   : > { %v1488_v44 = vadd.f32 %v1482_v36, %v1229_v55 }
 0x693   : > { %v1493_v63 = vadd.f32 %v1489_v2, %v1488_v44  ;;  %v279_v2 = vld [vmem:[%s8870_s2 + $0x40] sm:$0xff] }
 0x694   : > { %1631 = vmatpush.msrb.mxu3 %v279_v2  ;;  %v284_v2 = vld [vmem:[%s8870_s2 + $0x68] sm:$0xff] }
 0x695   : > { %v1497_v1 = vadd.f32 %v6826_v0, %v1493_v63 }
 0x697   : > { %v1507_v4 = vsel %vm325_vm0, %v1497_v1, 0.0 }
 0x698   : > { %1508 = vadd.xlane.f32.xlu2 %v1507_v4 }
 0x6c4   : > { %v1500_v58 = vpop.xlane.xlu0 %1499 }
 0x6c5   : > { %v1517_v13 = vmul.f32 %v7456_v7, %v1500_v58 }
 0x6c7   : > { %v1521_v14 = vsub.f32 %v1494_v41, %v1517_v13 }
 0x6c9   : > { %v1525_v15 = vmul.f32 %v1521_v14, %v1521_v14 }
 0x6cb   : > { %v1529_v35 = vsel %vm325_vm0, %v1525_v15, 0.0  ;;  %v290_v15 = vld [vmem:[%s8870_s2 + $0x98] sm:$0xff] }
 0x6cc   : > { %v1503_v8 = vpop.xlane.xlu1 %1502  ;;  %1530 = vadd.xlane.f32.xlu1 %v1529_v35  ;;  %v289_v35 = vld [vmem:[%s8870_s2 + $0x90] sm:$0xff]  ;;  %1671 = vmatpush.msra.mxu0 %v290_v15 }
 0x6cd   : > { %v1518_v61 = vmul.f32 %v7456_v7, %v1503_v8  ;;  %v288_v8 = vld [vmem:[%s8870_s2 + $0x88] sm:$0xff] }
 0x6ce   : > { %1672 = vmatpush.msra.mxu0 %v289_v35 }
 0x6cf   : > { %v7461_v22 = vsub.f32 %v1495_v38, %v1518_v61 }
 0x6d0   : > { %1673 = vmatpush.msra.mxu0 %v288_v8 }
 0x6d1   : > { %v1526_v12 = vmul.f32 %v7461_v22, %v7461_v22 }
 0x6d3   : > { %v1532_v19 = vsel %vm325_vm0, %v1526_v12, 0.0  ;;  %v287_v12 = vld [vmem:[%s8870_s2 + $0x80] sm:$0xff] }
 0x6d4   : > { %v1506_v21 = vpop.xlane.xlu1 %1505  ;;  %1533 = vadd.xlane.f32.xlu2 %v1532_v19  ;;  %1674 = vmatpush.msra.mxu0 %v287_v12 }
 0x6d5   : > { %v1519_v27 = vmul.f32 %v7456_v7, %v1506_v21  ;;  %v286_v21 = vld [vmem:[%s8870_s2 + $0x78] sm:$0xff] }
 0x6d6   : > { %1675 = vmatpush.msra.mxu0 %v286_v21 }
 0x6d7   : > { %v7467_v11 = vsub.f32 %v1496_v53, %v1519_v27  ;;  %v1598_v53 = vperm.slane %v7442_v34, 5 }
 0x6d8   : > { %1676 = vmatpush.msra.mxu0 %v285_v33 }
 0x6d9   : > { %v1527_v20 = vmul.f32 %v7467_v11, %v7467_v11 }
 0x6da   : > { %1677 = vmatpush.msra.mxu0 %v284_v2 }
 0x6db   : > { %v1535_v23 = vsel %vm325_vm0, %v1527_v20, 0.0 }
 0x6dc   : > { %1536 = vadd.xlane.f32.xlu1 %v1535_v23 }
 0x70b   : > { %v1509_v16 = vpop.xlane.xlu2 %1508 }
 0x70c   : > { %v1520_v24 = vmul.f32 %v7456_v7, %v1509_v16 }
 0x70e   : > { %v7473_v31 = vsub.f32 %v1497_v1, %v1520_v24 }
 0x710   : > { %v1528_v56 = vmul.f32 %v7473_v31, %v7473_v31 }
 0x712   : > { %v1538_v25 = vsel %vm325_vm0, %v1528_v56, 0.0 }
 0x713   : > { %1539 = vadd.xlane.f32.xlu2 %v1538_v25 }
 0x73f   : > { %v1531_v37 = vpop.xlane.xlu1 %1530 }
 0x740   : > { %v1541_v39 = vmul.f32 %v1531_v37, %v7456_v7  ;;  %v283_v37 = vld [vmem:[%s8870_s2 + $0x60] sm:$0xff] }
 0x741   : > { %1678 = vmatpush.msra.mxu0 %v283_v37 }
 0x742   : > { %v1545_v40 = vadd.f32 1e-05, %v1541_v39 }
 0x744   : > { %6650 = vrsqrt.f32 %v1545_v40  ;;  %vm1555_vm12 = vweird.f32 %v1545_v40 }
 0x747   : > { %v1534_v9 = vpop.xlane.xlu2 %1533 }
 0x748   : > { %v1542_v41 = vmul.f32 %v1534_v9, %v7456_v7 }
 0x74a   : > { %v6651_v50 = vpop.eup %6650  ;;  %v1546_v32 = vadd.f32 1e-05, %v1542_v41 }
 0x74b   : > { %v1550_v51 = vmul.f32 %v6651_v50, %v1545_v40  ;;  %vm1556_vm11 = vweird.f32 %v6651_v50 }
 0x74c   : > { %6652 = vrsqrt.f32 %v1546_v32  ;;  %vm1557_vm13 = vmor %vm1555_vm12, %vm1556_vm11  ;;  %vm1565_vm15 = vweird.f32 %v1546_v32 }
 0x74d   : > { %v1551_v42 = vmul.f32 %v6651_v50, %v1550_v51 }
 0x74f   : > { %v1552_v43 = vmul.f32 0.5, %v1551_v42  ;;  %v1537_v46 = vpop.xlane.xlu1 %1536 }
 0x750   : > { %v1543_v47 = vmul.f32 %v1537_v46, %v7456_v7 }
 0x751   : > { %v1553_v30 = vsub.f32 1.5, %v1552_v43 }
 0x752   : > { %v6653_v38 = vpop.eup %6652  ;;  %v1547_v10 = vadd.f32 1e-05, %v1543_v47 }
 0x753   : > { %v1554_v29 = vmul.f32 %v6651_v50, %v1553_v30  ;;  %v1560_v52 = vmul.f32 %v6653_v38, %v1546_v32  ;;  %vm1566_vm14 = vweird.f32 %v6653_v38 }
 0x754   : > { %6654 = vrsqrt.f32 %v1547_v10  ;;  %vm1567_vm2 = vmor %vm1565_vm15, %vm1566_vm14  ;;  %vm1575_vm4 = vweird.f32 %v1547_v10 }
 0x755   : > { %v1558_v49 = vsel %vm1557_vm13, %v6651_v50, %v1554_v29  ;;  %v1561_v48 = vmul.f32 %v6653_v38, %v1560_v52 }
 0x756   : > { %v1589_v54 = vmul.f32 %v1558_v49, %v1521_v14 }
 0x757   : > { %v1562_v57 = vmul.f32 0.5, %v1561_v48 }
 0x758   : > { %v1594_v60 = vmul.f32 %v1593_v45, %v1589_v54 }
 0x759   : > { %v1563_v62 = vsub.f32 1.5, %v1562_v57 }
 0x75a   : > { %v6655_v55 = vpop.eup %6654  ;;  %v7495_v36 = vadd.f32 %v1598_v53, %v1594_v60 }
 0x75b   : > { %v1564_v44 = vmul.f32 %v6653_v38, %v1563_v62  ;;  %v1570_v63 = vmul.f32 %v6655_v55, %v1547_v10  ;;  %vm1576_vm3 = vweird.f32 %v6655_v55 }
 0x75c   : > { %6034 = vmatmul.msk.f32.vlgmr.msrb.gmra.mxu3 %vm325_vm0, %v7495_v36  ;;  %vm1577_vm5 = vmor %vm1575_vm4, %vm1576_vm3 }
 0x75d   : > { %v1571_v0 = vmul.f32 %v6655_v55, %v1570_v63  ;;  %v1568_v1 = vsel %vm1567_vm2, %v6653_v38, %v1564_v44  ;;  %v1649_v38 = vperm.slane %v7442_v34, 3 }
 0x75e   : > { %v1590_v4 = vmul.f32 %v1568_v1, %v7461_v22  ;;  %v6045_v1 = vld [vmem:[%s8870_s2 + $0xb8] sm:$0xff] }
 0x75f   : > { %v1572_v3 = vmul.f32 0.5, %v1571_v0  ;;  %1874 = vmatpush.msra.mxu1 %v6045_v1 }
 0x760   : > { %v1595_v5 = vmul.f32 %v1593_v45, %v1590_v4  ;;  %v6044_v4 = vld [vmem:[%s8870_s2 + $0xb0] sm:$0xff] }
 0x761   : > { %v1573_v18 = vsub.f32 1.5, %v1572_v3  ;;  %1875 = vmatpush.msra.mxu1 %v6044_v4 }
 0x762   : > { %v7500_v6 = vadd.f32 %v1598_v53, %v1595_v5 }
 0x763   : > { %v1574_v17 = vmul.f32 %v6655_v55, %v1573_v18 }
 0x764   : > { %6035 = vmatmul.msk.f32.gmra.mxu3 %vm325_vm0, %v7500_v6 }
 0x765   : > { %v1578_v59 = vsel %vm1577_vm5, %v6655_v55, %v1574_v17 }
 0x766   : > { %v1591_v58 = vmul.f32 %v1578_v59, %v7467_v11  ;;  %v6042_v59 = vld [vmem:[%s8870_s2 + $0xa0] sm:$0xff] }
 0x768   : > { %v1596_v13 = vmul.f32 %v1593_v45, %v1591_v58 }
 0x76a   : > { %v7505_v14 = vadd.f32 %v1598_v53, %v1596_v13 }
 0x76c   : > { %6036 = vmatmul.msk.f32.gmra.mxu3 %vm325_vm0, %v7505_v14 }
 0x786   : > { %v1540_v61 = vpop.xlane.xlu2 %1539 }
 0x787   : > { %v1544_v22 = vmul.f32 %v1540_v61, %v7456_v7 }
 0x789   : > { %v1548_v19 = vadd.f32 1e-05, %v1544_v22 }
 0x78b   : > { %6656 = vrsqrt.f32 %v1548_v19  ;;  %vm1585_vm7 = vweird.f32 %v1548_v19 }
 0x791   : > { %v6657_v27 = vpop.eup %6656 }
 0x792   : > { %v1580_v11 = vmul.f32 %v6657_v27, %v1548_v19  ;;  %vm1586_vm6 = vweird.f32 %v6657_v27 }
 0x793   : > { %vm1587_vm8 = vmor %vm1585_vm7, %vm1586_vm6 }
 0x794   : > { %v1581_v20 = vmul.f32 %v6657_v27, %v1580_v11  ;;  %v6062_v11 = vld [vmem:[%s8871_s3 + $0x8] sm:$0xff] }
 0x796   : > { %v1582_v23 = vmul.f32 0.5, %v1581_v20  ;;  %v7579_v20 = vperm.slane %v6062_v11, 0 }
 0x798   : > { %v1583_v16 = vsub.f32 1.5, %v1582_v23 }
 0x79a   : > { %v1584_v24 = vmul.f32 %v6657_v27, %v1583_v16 }
 0x79c   : > { %v1588_v56 = vsel %vm1587_vm8, %v6657_v27, %v1584_v24  ;;  %v6394_v27 = vpack.i.bf16 %v6044_v4, %v6045_v1 }
 0x79d   : > { %v1592_v25 = vmul.f32 %v1588_v56, %v7473_v31  ;;  %v1603_v31 = vperm.slane %v7442_v34, 2 }
 0x79f   : > { %v1597_v26 = vmul.f32 %v1593_v45, %v1592_v25 }
 0x7a1   : > { %v1602_v28 = vadd.f32 %v1598_v53, %v1597_v26 }
 0x7a3   : > { %6037 = vmatmul.msk.f32.gmra.mxu3 %vm325_vm0, %v1602_v28 }
 0x7df   : > { %v1633_v39 = vpop.f32.mrf.mxu3 }
 0x7e0   : > { %v1634_v40 = vadd.f32 %v1633_v39, %v1603_v31 }
 0x7e2   : > { %v1645_v9 = vmax.f32 %v1634_v40, 0.0 }
 0x7e4   : > { %6038 = vmatmul.msk.f32.vlgmr.msra.gmra.mxu0 %vm1650_vm9, %v1645_v9 }
 0x7e7   : > { %v1636_v41 = vpop.f32.mrf.mxu3 }
 0x7e8   : > { %v1637_v50 = vadd.f32 %v1636_v41, %v1603_v31 }
 0x7ea   : > { %v1646_v32 = vmax.f32 %v1637_v50, 0.0 }
 0x7ec   : > { %6039 = vmatmul.msk.f32.gmra.mxu0 %vm1650_vm9, %v1646_v32 }
 0x7ef   : > { %v1639_v51 = vpop.f32.mrf.mxu3 }
 0x7f0   : > { %v1640_v42 = vadd.f32 %v1639_v51, %v1603_v31 }
 0x7f2   : > { %v1647_v43 = vmax.f32 %v1640_v42, 0.0 }
 0x7f4   : > { %6040 = vmatmul.msk.f32.gmra.mxu0 %vm1650_vm9, %v1647_v43 }
 0x826   : > { %v1642_v46 = vpop.f32.mrf.mxu3 }
 0x827   : > { %v1643_v47 = vadd.f32 %v1642_v46, %v1603_v31 }
 0x829   : > { %v1648_v30 = vmax.f32 %v1643_v47, 0.0 }
 0x82b   : > { %6041 = vmatmul.msk.f32.gmra.mxu0 %vm1650_vm9, %v1648_v30 }
 0x861   : > { %v1680_v10 = vpop.f32.mrf.mxu0 }
 0x862   : > { %v1681_v29 = vadd.f32 %v1680_v10, %v1649_v38 }
 0x864   : > { %v1692_v52 = vadd.f32 %v1681_v29, %v7495_v36 }
 0x866   : > { %v1696_v45 = vsel %vm325_vm0, %v1692_v52, 0.0 }
 0x867   : > { %1697 = vadd.xlane.f32.xlu1 %v1696_v45  ;;  %v7599_v45 = vperm.slane %v7442_v34, 7 }
 0x869   : > { %v1683_v49 = vpop.f32.mrf.mxu0 }
 0x86a   : > { %v1684_v48 = vadd.f32 %v1683_v49, %v1649_v38 }
 0x86c   : > { %v1693_v54 = vadd.f32 %v1684_v48, %v7500_v6  ;;  %v6043_v6 = vld [vmem:[%s8870_s2 + $0xa8] sm:$0xff] }
 0x86d   : > { %1876 = vmatpush.msra.mxu1 %v6043_v6  ;;  %v6399_v23 = vpack.i.bf16 %v6042_v59, %v6043_v6 }
 0x86e   : > { %v1699_v53 = vsel %vm325_vm0, %v1693_v54, 0.0 }
 0x86f   : > { %1700 = vadd.xlane.f32.xlu2 %v1699_v53  ;;  %1877 = vmatpush.msra.mxu1 %v6042_v59 }
 0x871   : > { %v1686_v57 = vpop.f32.mrf.mxu0 }
 0x872   : > { %v1687_v60 = vadd.f32 %v1686_v57, %v1649_v38 }
 0x874   : > { %v1694_v62 = vadd.f32 %v1687_v60, %v7505_v14 }
 0x876   : > { %v1702_v55 = vsel %vm325_vm0, %v1694_v62, 0.0 }
 0x877   : > { %1703 = vadd.xlane.f32.xlu0 %v1702_v55 }
 0x8a8   : > { %v1689_v44 = vpop.f32.mrf.mxu0 }
 0x8a9   : > { %v1690_v63 = vadd.f32 %v1689_v44, %v1649_v38  ;;  %v7596_v38 = vperm.slane %v7442_v34, 6 }
 0x8ab   : > { %v1695_v36 = vadd.f32 %v1690_v63, %v1602_v28 }
 0x8ad   : > { %v1705_v0 = vsel %vm325_vm0, %v1695_v36, 0.0 }
 0x8ae   : > { %1706 = vadd.xlane.f32.xlu1 %v1705_v0 }
 0x8da   : > { %v1698_v3 = vpop.xlane.xlu1 %1697 }
 0x8db   : > { %v1708_v5 = vmul.f32 %v1698_v3, %v7456_v7 }
 0x8dd   : > { %v1712_v18 = vsub.f32 %v1692_v52, %v1708_v5 }
 0x8df   : > { %v1716_v17 = vmul.f32 %v1712_v18, %v1712_v18 }
 0x8e1   : > { %v1720_v58 = vsel %vm325_vm0, %v1716_v17, 0.0 }
 0x8e2   : > { %1721 = vadd.xlane.f32.xlu2 %v1720_v58  ;;  %v1701_v13 = vpop.xlane.xlu2 %1700 }
 0x8e3   : > { %v1709_v14 = vmul.f32 %v1701_v13, %v7456_v7 }
 0x8e5   : > { %v7564_v15 = vsub.f32 %v1693_v54, %v1709_v14 }
 0x8e7   : > { %v1717_v35 = vmul.f32 %v7564_v15, %v7564_v15 }
 0x8e9   : > { %v1723_v8 = vsel %vm325_vm0, %v1717_v35, 0.0 }
 0x8ea   : > { %v1704_v61 = vpop.xlane.xlu0 %1703  ;;  %1724 = vadd.xlane.f32.xlu0 %v1723_v8 }
 0x8eb   : > { %v1710_v22 = vmul.f32 %v1704_v61, %v7456_v7 }
 0x8ed   : > { %v7570_v12 = vsub.f32 %v1694_v62, %v1710_v22 }
 0x8ef   : > { %v1718_v19 = vmul.f32 %v7570_v12, %v7570_v12 }
 0x8f1   : > { %v1726_v21 = vsel %vm325_vm0, %v1718_v19, 0.0 }
 0x8f2   : > { %1727 = vadd.xlane.f32.xlu1 %v1726_v21 }
 0x8fe   : > { %6395 = vrot.lane.b32.xlu0 %v6394_v27, %s6894_s14 }
 0x906   : > { %1912 = vrot.lane.b32.xlu0 %v7579_v20, %s6894_s14 }
 0x90b   : > { %6400 = vrot.lane.b32.xlu1 %v6399_v23, %s6894_s14 }
 0x90e   : > { %6410 = vrot.lane.b32.xlu0 %v6399_v23, %s6895_s10 }
 0x913   : > { %6405 = vrot.lane.b32.xlu1 %v6394_v27, %s6895_s10 }
 0x921   : > { %v1707_v16 = vpop.xlane.xlu1 %1706 }
 0x922   : > { %v1711_v24 = vmul.f32 %v1707_v16, %v7456_v7 }
 0x924   : > { %v7587_v56 = vsub.f32 %v1695_v36, %v1711_v24 }
 0x926   : > { %v1719_v25 = vmul.f32 %v7587_v56, %v7587_v56 }
 0x928   : > { %v1729_v26 = vsel %vm325_vm0, %v1719_v25, 0.0 }
 0x929   : > { %1730 = vadd.xlane.f32.xlu2 %v1729_v26 }
 0x955   : > { %v1722_v28 = vpop.xlane.xlu2 %1721 }
 0x956   : > { %v1732_v33 = vmul.f32 %v1722_v28, %v7456_v7 }
 0x958   : > { %v1736_v2 = vadd.f32 1e-05, %v1732_v33 }
 0x95a   : > { %6658 = vrsqrt.f32 %v1736_v2  ;;  %vm1746_vm11 = vweird.f32 %v1736_v2 }
 0x95d   : > { %v1725_v37 = vpop.xlane.xlu0 %1724 }
 0x95e   : > { %v1733_v31 = vmul.f32 %v1725_v37, %v7456_v7 }
 0x960   : > { %v6659_v39 = vpop.eup %6658  ;;  %v1737_v40 = vadd.f32 1e-05, %v1733_v31 }
 0x961   : > { %v1741_v9 = vmul.f32 %v6659_v39, %v1736_v2  ;;  %vm1747_vm10 = vweird.f32 %v6659_v39 }
 0x962   : > { %6660 = vrsqrt.f32 %v1737_v40  ;;  %vm1748_vm12 = vmor %vm1746_vm11, %vm1747_vm10  ;;  %vm1756_vm14 = vweird.f32 %v1737_v40 }
 0x963   : > { %v1742_v41 = vmul.f32 %v6659_v39, %v1741_v9 }
 0x965   : > { %v1743_v50 = vmul.f32 0.5, %v1742_v41  ;;  %v1728_v32 = vpop.xlane.xlu1 %1727 }
 0x966   : > { %v1734_v51 = vmul.f32 %v1728_v32, %v7456_v7 }
 0x967   : > { %v1744_v42 = vsub.f32 1.5, %v1743_v50 }
 0x968   : > { %v6661_v43 = vpop.eup %6660  ;;  %v1738_v46 = vadd.f32 1e-05, %v1734_v51 }
 0x969   : > { %v1745_v47 = vmul.f32 %v6659_v39, %v1744_v42  ;;  %v1751_v30 = vmul.f32 %v6661_v43, %v1737_v40  ;;  %vm1757_vm13 = vweird.f32 %v6661_v43 }
 0x96a   : > { %6662 = vrsqrt.f32 %v1738_v46  ;;  %vm1758_vm15 = vmor %vm1756_vm14, %vm1757_vm13  ;;  %vm1766_vm3 = vweird.f32 %v1738_v46 }
 0x96b   : > { %v1749_v10 = vsel %vm1748_vm12, %v6659_v39, %v1745_v47  ;;  %v1752_v29 = vmul.f32 %v6661_v43, %v1751_v30 }
 0x96c   : > { %v1780_v52 = vmul.f32 %v1749_v10, %v1712_v18 }
 0x96d   : > { %v1753_v49 = vmul.f32 0.5, %v1752_v29 }
 0x96e   : > { %v1785_v48 = vmul.f32 %v7596_v38, %v1780_v52 }
 0x96f   : > { %v1754_v54 = vsub.f32 1.5, %v1753_v49 }
 0x970   : > { %v6663_v53 = vpop.eup %6662  ;;  %v7603_v57 = vadd.f32 %v7599_v45, %v1785_v48  ;;  %v6396_v55 = vpop.permute.xlu0 %6395 }
 0x971   : > { %v1755_v60 = vmul.f32 %v6661_v43, %v1754_v54  ;;  %v1761_v62 = vmul.f32 %v6663_v53, %v1738_v46  ;;  %v6398_v34 = vunpack.i.h.bf16 %v6396_v55  ;;  %v6397_v44 = vunpack.i.l.bf16 %v6396_v55 }
 0x972   : > { %1817 = vxpose.xlu2.b32.start [1/4] (short) (narrow) %v7603_v57, 32  ;;  %6063 = vmatmul.msk.f32.vlgmr.msra.gmra.mxu1 %vm325_vm0, %v7603_v57  ;;  %vm1767_vm2 = vweird.f32 %v6663_v53 }
 0x973   : > { %v1759_v63 = vsel %vm1758_vm15, %v6661_v43, %v1755_v60  ;;  %v1762_v36 = vmul.f32 %v6663_v53, %v1761_v62  ;;  %1939 = vmatpush.msra.mxu2 %v6397_v44  ;;  %vm1768_vm4 = vmor %vm1766_vm3, %vm1767_vm2 }
 0x974   : > { %v1781_v0 = vmul.f32 %v1759_v63, %v7564_v15 }
 0x975   : > { %v1763_v1 = vmul.f32 0.5, %v1762_v36  ;;  %1940 = vmatpush.msra.mxu2 %v6398_v34 }
 0x976   : > { %v1786_v4 = vmul.f32 %v7596_v38, %v1781_v0 }
 0x977   : > { %v1764_v3 = vsub.f32 1.5, %v1763_v1 }
 0x978   : > { %v7611_v5 = vadd.f32 %v7599_v45, %v1786_v4  ;;  %v7616_v17 = vpop.permute.xlu0 %1912 }
 0x979   : > { %v1765_v18 = vmul.f32 %v6663_v53, %v1764_v3 }
 0x97a   : > { %1818 = vxpose.xlu2.b32.cont [2/4] (short) (narrow) %v7611_v5, 32  ;;  %6064 = vmatmul.msk.f32.gmra.mxu1 %vm325_vm0, %v7611_v5 }
 0x97b   : > { %v1769_v6 = vsel %vm1768_vm4, %v6663_v53, %v1765_v18 }
 0x97c   : > { %v1782_v59 = vmul.f32 %v1769_v6, %v7570_v12 }
 0x97d   : > { %v6401_v58 = vpop.permute.xlu1 %6400 }
 0x97e   : > { %v6402_v13 = vunpack.i.l.bf16 %v6401_v58  ;;  %v1787_v14 = vmul.f32 %v7596_v38, %v1782_v59  ;;  %v6403_v15 = vunpack.i.h.bf16 %v6401_v58 }
 0x980   : > { %v7621_v35 = vadd.f32 %v7599_v45, %v1787_v14  ;;  %1941 = vmatpush.msra.mxu2 %v6402_v13  ;;  %v6411_v61 = vpop.permute.xlu0 %6410 }
 0x981   : > { %v6412_v12 = vunpack.i.l.bf16 %v6411_v61  ;;  %v6413_v21 = vunpack.i.h.bf16 %v6411_v61 }
 0x982   : > { %1819 = vxpose.xlu2.b32.cont [3/4] (short) (narrow) %v7621_v35, 32  ;;  %6065 = vmatmul.msk.f32.gmra.mxu1 %vm325_vm0, %v7621_v35 }
 0x983   : > { %1942 = vmatpush.msra.mxu2 %v6403_v15 }
 0x985   : > { %v6406_v8 = vpop.permute.xlu1 %6405 }
 0x986   : > { %v6408_v22 = vunpack.i.h.bf16 %v6406_v8  ;;  %v6407_v19 = vunpack.i.l.bf16 %v6406_v8 }
 0x988   : > { %1983 = vmatpush.msra.mxu3 %v6407_v19 }
 0x98a   : > { %1984 = vmatpush.msra.mxu3 %v6408_v22 }
 0x98c   : > { %1985 = vmatpush.msra.mxu3 %v6412_v12 }
 0x98e   : > { %1986 = vmatpush.msra.mxu3 %v6413_v21 }
 0x98f   : > { %6071 = vmatmul.msk.f32.vlgmr.msra.gmra.mxu3 %vm325_vm0, %v7603_v57 }
 0x997   : > { %6072 = vmatmul.msk.f32.gmra.mxu3 %vm325_vm0, %v7611_v5 }
 0x99c   : > { %v1731_v27 = vpop.xlane.xlu2 %1730 }
 0x99d   : > { %v1735_v11 = vmul.f32 %v1731_v27, %v7456_v7 }
 0x99f   : > { %v1739_v23 = vadd.f32 1e-05, %v1735_v11  ;;  %6073 = vmatmul.msk.f32.gmra.mxu3 %vm325_vm0, %v7621_v35 }
 0x9a1   : > { %6664 = vrsqrt.f32 %v1739_v23  ;;  %vm1776_vm6 = vweird.f32 %v1739_v23 }
 0x9a7   : > { %v6665_v16 = vpop.eup %6664 }
 0x9a8   : > { %v1771_v24 = vmul.f32 %v6665_v16, %v1739_v23  ;;  %vm1777_vm5 = vweird.f32 %v6665_v16 }
 0x9a9   : > { %vm1778_vm7 = vmor %vm1776_vm6, %vm1777_vm5 }
 0x9aa   : > { %v1772_v25 = vmul.f32 %v6665_v16, %v1771_v24 }
 0x9ac   : > { %v1773_v26 = vmul.f32 0.5, %v1772_v25 }
 0x9ae   : > { %v1774_v28 = vsub.f32 1.5, %v1773_v26 }
 0x9b0   : > { %v1775_v33 = vmul.f32 %v6665_v16, %v1774_v28 }
 0x9b2   : > { %v1779_v2 = vsel %vm1778_vm7, %v6665_v16, %v1775_v33 }
 0x9b3   : > { %v1783_v37 = vmul.f32 %v1779_v2, %v7587_v56 }
 0x9b5   : > { %v1788_v31 = vmul.f32 %v7596_v38, %v1783_v37 }
 0x9b7   : > { %v7636_v39 = vadd.f32 %v7599_v45, %v1788_v31 }
 0x9b9   : > { %1820 = vxpose.xlu2.b32.end [4/4] (short) (narrow) %v7636_v39, 32  ;;  %6066 = vmatmul.msk.f32.gmra.mxu1 %vm325_vm0, %v7636_v39 }
 0x9ba   : > { %6074 = vmatmul.msk.f32.gmra.mxu3 %vm325_vm0, %v7636_v39 }
 0x9ef   : > { %v1879_v46 = vpop.f32.mrf.mxu1 }
 0x9f0   : > { %v1880_v38 = vadd.f32 %v1879_v46, %v7579_v20 }
 0x9f2   : > { %v7668_v52 = vmul.f32 0.35355338, %v1880_v38 }
 0x9f7   : > { %v1882_v29 = vpop.f32.mrf.mxu1 }
 0x9f8   : > { %v1883_v45 = vadd.f32 %v1882_v29, %v7579_v20 }
 0x9fa   : > { %v7673_v49 = vmul.f32 0.35355338, %v1883_v45 }
 0x9ff   : > { %v1885_v48 = vpop.f32.mrf.mxu1 }
 0xa00   : > { %v1886_v54 = vadd.f32 %v1885_v48, %v7579_v20 }
 0xa02   : > { %v7678_v53 = vmul.f32 0.35355338, %v1886_v54 }
 0xa36   : > { %v1888_v60 = vpop.f32.mrf.mxu1 }
 0xa37   : > { %v1889_v62 = vadd.f32 %v1888_v60, %v7579_v20 }
 0xa39   : > { %v7683_v55 = vmul.f32 0.35355338, %v1889_v62 }
 0xa3a   : > { %v1833_v40 = vpop.trf.xlu2 }
 0xa3b   : > { %6067 = vmatmul.msk.f32.vlgmr.msra.gmra.mxu2 %vm325_vm0, %v1833_v40 }
 0xa42   : > { %v1834_v9 = vpop.trf.xlu2 }
 0xa43   : > { %6068 = vmatmul.msk.f32.gmra.mxu2 %vm325_vm0, %v1834_v9 }
 0xa4a   : > { %v1835_v56 = vpop.trf.xlu2 }
 0xa4b   : > { %6069 = vmatmul.msk.f32.gmra.mxu2 %vm325_vm0, %v1835_v56 }
 0xa52   : > { %v1836_v41 = vpop.trf.xlu2 }
 0xa53   : > { %6070 = vmatmul.msk.f32.gmra.mxu2 %vm325_vm0, %v1836_v41 }
 0xabe   : > { %v1944_v50 = vpop.f32.mrf.mxu2 }
 0xabf   : > { %v7664_v10 = vadd.f32 %v1944_v50, %v7616_v17 }
 0xac6   : > { %v1947_v32 = vpop.f32.mrf.mxu2 }
 0xac7   : > { %v7658_v30 = vadd.f32 %v1947_v32, %v7616_v17 }
 0xace   : > { %v1950_v51 = vpop.f32.mrf.mxu2 }
 0xacf   : > { %v7653_v47 = vadd.f32 %v1950_v51, %v7616_v17 }
 0xad6   : > { %v1953_v42 = vpop.f32.mrf.mxu2 }
 0xad7   : > { %v7648_v43 = vadd.f32 %v1953_v42, %v7616_v17 }
 0xad9   : > { %6075 = vmatpush.xpose.msk.msrb.mxu0 %vm476_vm1, %v7648_v43 }
 0xadd   : > { %6076 = vmatpush.xpose.msk.msrb.mxu0 %vm476_vm1, %v7653_v47 }
 0xae1   : > { %6077 = vmatpush.xpose.msk.msrb.mxu0 %vm476_vm1, %v7658_v30 }
 0xae5   : > { %6078 = vmatpush.xpose.msk.msrb.mxu0 %vm476_vm1, %v7664_v10 }
 0xae8   : > { %6079 = vmatmul.msk.f32.vlgmr.msrb.gmra.mxu0 %vm476_vm1, %v7668_v52 }
 0xaf0   : > { %6080 = vmatmul.msk.f32.gmra.mxu0 %vm476_vm1, %v7673_v49 }
 0xaf8   : > { %6081 = vmatmul.msk.f32.gmra.mxu0 %vm476_vm1, %v7678_v53 }
 0xb00   : > { %6082 = vmatmul.msk.f32.gmra.mxu0 %vm476_vm1, %v7683_v55 }
 0xb65   : > { %v2041_v34 = vpop.f32.mrf.mxu0 }
 0xb66   : > { %v2053_v44 = vsel %vm325_vm0, %v2041_v34, -inf }
 0xb67   : > { %2054 = vmax.xlane.f32.xlu1 %v2053_v44 }
 0xb6d   : > { %v2044_v63 = vpop.f32.mrf.mxu0 }
 0xb6e   : > { %v2056_v36 = vsel %vm325_vm0, %v2044_v63, -inf }
 0xb6f   : > { %2057 = vmax.xlane.f32.xlu0 %v2056_v36 }
 0xb75   : > { %v2047_v0 = vpop.f32.mrf.mxu0 }
 0xb76   : > { %v2059_v1 = vsel %vm325_vm0, %v2047_v0, -inf }
 0xb77   : > { %2060 = vmax.xlane.f32.xlu2 %v2059_v1 }
 0xb7d   : > { %v2050_v4 = vpop.f32.mrf.mxu0 }
 0xb7e   : > { %v2062_v3 = vsel %vm325_vm0, %v2050_v4, -inf }
 0xb7f   : > { %2063 = vmax.xlane.f32.xlu1 %v2062_v3  ;;  %v6046_v3 = vld [vmem:[%s8870_s2 + $0xc0] sm:$0xff] }
 0xb8f   : > { %2755 = vrot.lane.b32.xlu2 %v7673_v49, %s6897_s12 }
 0xbda   : > { %v2055_v18 = vpop.xlane.xlu1 %2054 }
 0xbdb   : > { %v2065_v6 = vsub.f32 %v2041_v34, %v2055_v18 }
 0xbdd   : > { %v2069_v17 = vmul.f32 1.442695, %v2065_v6 }
 0xbdf   : > { %6666 = vpow2.f32 %v2069_v17 }
 0xbe2   : > { %v2058_v59 = vpop.xlane.xlu0 %2057 }
 0xbe3   : > { %v2066_v58 = vsub.f32 %v2044_v63, %v2058_v59 }
 0xbe5   : > { %v7693_v13 = vpop.eup %6666  ;;  %v2071_v14 = vmul.f32 1.442695, %v2066_v58 }
 0xbe6   : > { %v2077_v15 = vsel %vm325_vm0, %v7693_v13, 0.0 }
 0xbe7   : > { %6668 = vpow2.f32 %v2071_v14  ;;  %2078 = vadd.xlane.f32.xlu0 %v2077_v15 }
 0xbea   : > { %v2061_v8 = vpop.xlane.xlu2 %2060 }
 0xbeb   : > { %v2067_v61 = vsub.f32 %v2047_v0, %v2061_v8 }
 0xbed   : > { %v7697_v22 = vpop.eup %6668  ;;  %v2073_v19 = vmul.f32 1.442695, %v2067_v61 }
 0xbee   : > { %v2080_v12 = vsel %vm325_vm0, %v7697_v22, 0.0 }
 0xbef   : > { %6670 = vpow2.f32 %v2073_v19  ;;  %2081 = vadd.xlane.f32.xlu1 %v2080_v12 }
 0xbf2   : > { %v2064_v21 = vpop.xlane.xlu1 %2063 }
 0xbf3   : > { %v2068_v27 = vsub.f32 %v2050_v4, %v2064_v21 }
 0xbf5   : > { %v7701_v11 = vpop.eup %6670  ;;  %v2075_v23 = vmul.f32 1.442695, %v2068_v27 }
 0xbf6   : > { %v2083_v16 = vsel %vm325_vm0, %v7701_v11, 0.0 }
 0xbf7   : > { %6672 = vpow2.f32 %v2075_v23  ;;  %2084 = vadd.xlane.f32.xlu1 %v2083_v16 }
 0xbfb   : > { %1968 = vrot.lane.b32.xlu0 %v7579_v20, %s6895_s10  ;;  %v1988_v20 = vpop.f32.mrf.mxu3 }
 0xbfd   : > { %v7707_v24 = vpop.eup %6672 }
 0xbfe   : > { %v2086_v25 = vsel %vm325_vm0, %v7707_v24, 0.0 }
 0xbff   : > { %2087 = vadd.xlane.f32.xlu1 %v2086_v25 }
 0xc03   : > { %2208 = vrot.lane.b32.xlu0 %v7648_v43, %s6898_s15  ;;  %v1991_v28 = vpop.f32.mrf.mxu3 }
 0xc0b   : > { %2204 = vrot.lane.b32.xlu0 %v7658_v30, %s6898_s15  ;;  %v1994_v40 = vpop.f32.mrf.mxu3 }
 0xc13   : > { %2202 = vrot.lane.b32.xlu0 %v7664_v10, %s6898_s15 }
 0xc18   : > { %2206 = vrot.lane.b32.xlu1 %v7653_v47, %s6898_s15 }
 0xc1b   : > { %2194 = vrot.lane.b32.xlu0 %v7668_v52, %s6898_s15 }
 0xc20   : > { %2196 = vrot.lane.b32.xlu1 %v7673_v49, %s6898_s15 }
 0xc23   : > { %2767 = vrot.lane.b32.xlu0 %v7648_v43, %s6897_s12 }
 0xc28   : > { %2198 = vrot.lane.b32.xlu1 %v7678_v53, %s6898_s15 }
 0xc2b   : > { %2508 = vrot.lane.b32.xlu0 %v7648_v43, %s6896_s11  ;;  %v1997_v43 = vpop.f32.mrf.mxu3 }
 0xc30   : > { %2765 = vrot.lane.b32.xlu1 %v7653_v47, %s6897_s12 }
 0xc33   : > { %2506 = vrot.lane.b32.xlu0 %v7653_v47, %s6896_s11 }
 0xc38   : > { %2763 = vrot.lane.b32.xlu1 %v7658_v30, %s6897_s12 }
 0xc3b   : > { %2200 = vrot.lane.b32.xlu0 %v7683_v55, %s6898_s15 }
 0xc40   : > { %2504 = vrot.lane.b32.xlu1 %v7658_v30, %s6896_s11 }
 0xc43   : > { %2761 = vrot.lane.b32.xlu0 %v7664_v10, %s6897_s12 }
 0xc48   : > { %2502 = vrot.lane.b32.xlu1 %v7664_v10, %s6896_s11 }
 0xc4b   : > { %2753 = vrot.lane.b32.xlu0 %v7668_v52, %s6897_s12 }
 0xc50   : > { %2494 = vrot.lane.b32.xlu1 %v7668_v52, %s6896_s11 }
 0xc53   : > { %2496 = vrot.lane.b32.xlu0 %v7673_v49, %s6896_s11 }
 0xc58   : > { %2757 = vrot.lane.b32.xlu1 %v7678_v53, %s6897_s12 }
 0xc5a   : > { %v2079_v26 = vpop.xlane.xlu0 %2078 }
 0xc5b   : > { %6674 = vrcp.f32 %v2079_v26  ;;  %2498 = vrot.lane.b32.xlu0 %v7678_v53, %s6896_s11  ;;  %v2100_v51 = vand.u32 2147483648, %v2079_v26  ;;  %vm2094_vm10 = vweird.f32 %v2079_v26  ;;  %v2098_v46 = vand.u32 2147483647, %v2079_v26 }
 0xc5d   : > { %v2101_v49 = vor.u32 1.1754944e-38, %v2100_v51  ;;  %vm2099_vm12 = vcmp.eq.f32.partialorder %v2098_v46, 8.507059e+37 }
 0xc60   : > { %2759 = vrot.lane.b32.xlu1 %v7683_v55, %s6897_s12 }
 0xc61   : > { %v6675_v33 = vpop.eup %6674 }
 0xc62   : > { %v2090_v2 = vmul.f32 %v6675_v33, %v2079_v26  ;;  %v2082_v37 = vpop.xlane.xlu1 %2081  ;;  %vm2095_vm8 = vweird.f32 %v6675_v33 }
 0xc63   : > { %6676 = vrcp.f32 %v2082_v37  ;;  %2500 = vrot.lane.b32.xlu0 %v7683_v55, %s6896_s11  ;;  %vm7760_vm11 = vmor %vm2094_vm10, %vm2095_vm8  ;;  %v2115_v36 = vand.u32 2147483648, %v2082_v37  ;;  %vm2109_vm14 = vweird.f32 %v2082_v37  ;;  %v2113_v4 = vand.u32 2147483647, %v2082_v37 }
 0xc64   : > { %v2091_v31 = vsub.f32 1.0, %v2090_v2 }
 0xc65   : > { %v2116_v17 = vor.u32 1.1754944e-38, %v2115_v36  ;;  %vm2114_vm2 = vcmp.eq.f32.partialorder %v2113_v4, 8.507059e+37 }
 0xc66   : > { %v2092_v9 = vmul.f32 %v6675_v33, %v2091_v31 }
 0xc68   : > { %v2093_v32 = vadd.f32 %v6675_v33, %v2092_v9 }
 0xc69   : > { %v6677_v56 = vpop.eup %6676 }
 0xc6a   : > { %v2105_v41 = vmul.f32 %v6677_v56, %v2082_v37  ;;  %v7757_v50 = vpop.xlane.xlu1 %2084  ;;  %v2097_v45 = vsel %vm7760_vm11, %v6675_v33, %v2093_v32  ;;  %vm2110_vm13 = vweird.f32 %v6677_v56 }
 0xc6b   : > { %6678 = vrcp.f32 %v7757_v50  ;;  %v2102_v34 = vsel %vm2099_vm12, %v2101_v49, %v2097_v45  ;;  %vm2111_vm15 = vmor %vm2109_vm14, %vm2110_vm13  ;;  %v2130_v8 = vand.u32 2147483648, %v7757_v50  ;;  %vm2124_vm4 = vweird.f32 %v7757_v50 }
 0xc6c   : > { %v2106_v42 = vsub.f32 1.0, %v2105_v41  ;;  %v2149_v1 = vmul.f32 %v7693_v13, %v2102_v34  ;;  %v2128_v12 = vand.u32 2147483647, %v7757_v50  ;;  %v2756_v34 = vpop.permute.xlu2 %2755 }
 0xc6d   : > { %v1969_v47 = vpop.permute.xlu0 %1968  ;;  %v2131_v23 = vor.u32 1.1754944e-38, %v2130_v8 }
 0xc6e   : > { %v1998_v38 = vadd.f32 %v1997_v43, %v1969_v47  ;;  %v1995_v10 = vadd.f32 %v1994_v40, %v1969_v47  ;;  %v1992_v29 = vadd.f32 %v1991_v28, %v1969_v47  ;;  %v1989_v52 = vadd.f32 %v1988_v20, %v1969_v47 }
 0xc6f   : > { %v2107_v48 = vmul.f32 %v6677_v56, %v2106_v42  ;;  %vm2129_vm6 = vcmp.eq.f32.partialorder %v2128_v12, 8.507059e+37 }
 0xc70   : > { %2177 = vmatpush.msrb.mxu1 %v1998_v38  ;;  %v7766_v54 = vpack.i.bf16 %v1995_v10, %v1998_v38  ;;  %v7768_v53 = vpack.i.bf16 %v1989_v52, %v1992_v29 }
 0xc71   : > { %v6679_v60 = vpop.eup %6678  ;;  %v2108_v44 = vadd.f32 %v6677_v56, %v2107_v48 }
 0xc72   : > { %v2120_v62 = vmul.f32 %v6679_v60, %v7757_v50  ;;  %2178 = vmatpush.msrb.mxu1 %v1995_v10  ;;  %v2088_v55 = vpop.xlane.xlu1 %2087  ;;  %vm2125_vm3 = vweird.f32 %v6679_v60 }
 0xc73   : > { %6680 = vrcp.f32 %v2088_v55  ;;  %v2112_v18 = vsel %vm2111_vm15, %v6677_v56, %v2108_v44  ;;  %vm2126_vm5 = vmor %vm2124_vm4, %vm2125_vm3  ;;  %v2145_v20 = vand.u32 2147483648, %v2088_v55  ;;  %vm2139_vm8 = vweird.f32 %v2088_v55 }
 0xc74   : > { %v2121_v63 = vsub.f32 1.0, %v2120_v62  ;;  %2179 = vmatpush.msrb.mxu1 %v1992_v29  ;;  %v2117_v13 = vsel %vm2114_vm2, %v2116_v17, %v2112_v18 }
 0xc75   : > { %v2209_v0 = vpop.permute.xlu0 %2208  ;;  %v2150_v19 = vmul.f32 %v7697_v22, %v2117_v13  ;;  %v2143_v22 = vand.u32 2147483647, %v2088_v55  ;;  %v2146_v2 = vor.u32 1.1754944e-38, %v2145_v20 }
 0xc76   : > { %2180 = vmatpush.msrb.mxu1 %v1989_v52  ;;  %6087 = vmatpush.xpose.msk.msrb.mxu2 %vm476_vm1, %v2209_v0  ;;  %v2122_v6 = vmul.f32 %v6679_v60, %v2121_v63 }
 0xc77   : > { %6083 = vmatmul.msk.f32.vlgmr.msrb.gmra.mxu1 %vm325_vm0, %v2149_v1  ;;  %vm2144_vm11 = vcmp.eq.f32.partialorder %v2143_v22, 8.507059e+37 }
 0xc78   : > { %2480 = vmatpush.msra.mxu1 %v6046_v3  ;;  %v2123_v14 = vadd.f32 %v6679_v60, %v2122_v6 }
 0xc79   : > { %v6681_v59 = vpop.eup %6680 }
 0xc7a   : > { %v2135_v58 = vmul.f32 %v6681_v59, %v2088_v55  ;;  %v2127_v21 = vsel %vm2126_vm5, %v6679_v60, %v2123_v14  ;;  %vm2140_vm7 = vweird.f32 %v6681_v59 }
 0xc7b   : > { %v2132_v16 = vsel %vm2129_vm6, %v2131_v23, %v2127_v21  ;;  %vm2141_vm10 = vmor %vm2139_vm8, %vm2140_vm7 }
 0xc7c   : > { %v2136_v15 = vsub.f32 1.0, %v2135_v58  ;;  %v2151_v28 = vmul.f32 %v7701_v11, %v2132_v16 }
 0xc7d   : > { %v2205_v61 = vpop.permute.xlu0 %2204 }
 0xc7e   : > { %v2137_v27 = vmul.f32 %v6681_v59, %v2136_v15 }
 0xc7f   : > { %6084 = vmatmul.msk.f32.gmra.mxu1 %vm325_vm0, %v2150_v19 }
 0xc80   : > { %v2138_v25 = vadd.f32 %v6681_v59, %v2137_v27 }
 0xc82   : > { %v2142_v33 = vsel %vm2141_vm10, %v6681_v59, %v2138_v25 }
 0xc83   : > { %v2147_v31 = vsel %vm2144_vm11, %v2146_v2, %v2142_v33 }
 0xc84   : > { %v2152_v9 = vmul.f32 %v7707_v24, %v2147_v31 }
 0xc85   : > { %v2203_v26 = vpop.permute.xlu0 %2202 }
 0xc87   : > { %6085 = vmatmul.msk.f32.gmra.mxu1 %vm325_vm0, %v2151_v28 }
 0xc8a   : > { %v2207_v37 = vpop.permute.xlu1 %2206 }
 0xc8b   : > { %6088 = vmatpush.xpose.msk.msrb.mxu2 %vm476_vm1, %v2207_v37 }
 0xc8d   : > { %v2195_v40 = vpop.permute.xlu0 %2194 }
 0xc8f   : > { %6086 = vmatmul.msk.f32.gmra.mxu1 %vm325_vm0, %v2152_v9  ;;  %6089 = vmatpush.xpose.msk.msrb.mxu2 %vm476_vm1, %v2205_v61 }
 0xc92   : > { %v2197_v11 = vpop.permute.xlu1 %2196 }
 0xc93   : > { %6090 = vmatpush.xpose.msk.msrb.mxu2 %vm476_vm1, %v2203_v26 }
 0xc95   : > { %v2768_v56 = vpop.permute.xlu0 %2767 }
 0xc96   : > { %6091 = vmatmul.msk.f32.vlgmr.msrb.gmra.mxu2 %vm476_vm1, %v2195_v40  ;;  %6123 = vmatpush.xpose.msk.msrb.mxu1 %vm476_vm1, %v2768_v56 }
 0xc9a   : > { %v2199_v41 = vpop.permute.xlu1 %2198 }
 0xc9d   : > { %v2509_v50 = vpop.permute.xlu0 %2508 }
 0xc9e   : > { %6092 = vmatmul.msk.f32.gmra.mxu2 %vm476_vm1, %v2197_v11 }
 0xc9f   : > { %6107 = vmatpush.xpose.msk.msra.mxu2 %vm476_vm1, %v2509_v50 }
 0xca2   : > { %v2766_v32 = vpop.permute.xlu1 %2765 }
 0xca3   : > { %6124 = vmatpush.xpose.msk.msrb.mxu1 %vm476_vm1, %v2766_v32 }
 0xca5   : > { %v2507_v24 = vpop.permute.xlu0 %2506 }
 0xca6   : > { %6093 = vmatmul.msk.f32.gmra.mxu2 %vm476_vm1, %v2199_v41 }
 0xca7   : > { %6108 = vmatpush.xpose.msk.msra.mxu2 %vm476_vm1, %v2507_v24 }
 0xcaa   : > { %v2764_v51 = vpop.permute.xlu1 %2763 }
 0xcab   : > { %6125 = vmatpush.xpose.msk.msrb.mxu1 %vm476_vm1, %v2764_v51 }
 0xcad   : > { %v2201_v42 = vpop.permute.xlu0 %2200 }
 0xcae   : > { %6094 = vmatmul.msk.f32.gmra.mxu2 %vm476_vm1, %v2201_v42 }
 0xcb2   : > { %v2505_v43 = vpop.permute.xlu1 %2504 }
 0xcb3   : > { %6109 = vmatpush.xpose.msk.msra.mxu2 %vm476_vm1, %v2505_v43 }
 0xcb5   : > { %v2762_v46 = vpop.permute.xlu0 %2761 }
 0xcb6   : > { %6126 = vmatpush.xpose.msk.msrb.mxu1 %vm476_vm1, %v2762_v46 }
 0xcba   : > { %v2503_v47 = vpop.permute.xlu1 %2502 }
 0xcbb   : > { %6110 = vmatpush.xpose.msk.msra.mxu2 %vm476_vm1, %v2503_v47 }
 0xcbd   : > { %v2754_v30 = vpop.permute.xlu0 %2753 }
 0xcc2   : > { %v2495_v38 = vpop.permute.xlu1 %2494 }
 0xcc3   : > { %6111 = vmatmul.msk.f32.vlgmr.msra.gmra.mxu2 %vm476_vm1, %v2495_v38 }
 0xcc5   : > { %v2497_v10 = vpop.permute.xlu0 %2496 }
 0xcca   : > { %v2758_v63 = vpop.permute.xlu1 %2757 }
 0xccb   : > { %6112 = vmatmul.msk.f32.gmra.mxu2 %vm476_vm1, %v2497_v10 }
 0xccd   : > { %v2499_v29 = vpop.permute.xlu0 %2498 }
 0xcd2   : > { %v2760_v4 = vpop.permute.xlu1 %2759 }
 0xcd3   : > { %6113 = vmatmul.msk.f32.gmra.mxu2 %vm476_vm1, %v2499_v29 }
 0xcd5   : > { %v2501_v52 = vpop.permute.xlu0 %2500 }
 0xcdb   : > { %6114 = vmatmul.msk.f32.gmra.mxu2 %vm476_vm1, %v2501_v52 }
 0xcf4   : > { %v2182_v45 = vpop.f32.mrf.mxu1 }
 0xcf5   : > { %6103 = vmatmul.msk.f32.vlgmr.msra.gmra.mxu1 %vm476_vm1, %v2182_v45 }
 0xcfc   : > { %v2185_v49 = vpop.f32.mrf.mxu1 }
 0xcfd   : > { %6104 = vmatmul.msk.f32.gmra.mxu1 %vm476_vm1, %v2185_v49 }
 0xd04   : > { %v2188_v48 = vpop.f32.mrf.mxu1 }
 0xd05   : > { %6105 = vmatmul.msk.f32.gmra.mxu1 %vm476_vm1, %v2188_v48 }
 0xd0c   : > { %v2191_v60 = vpop.f32.mrf.mxu1 }
 0xd0d   : > { %6106 = vmatmul.msk.f32.gmra.mxu1 %vm476_vm1, %v2191_v60 }
 0xd15   : > { %6127 = vmatmul.msk.f32.vlgmr.msrb.gmra.mxu1 %vm476_vm1, %v2754_v30 }
 0xd19   : > { %v2243_v62 = vpop.f32.mrf.mxu2 }
 0xd1a   : > { %v2255_v55 = vsel %vm325_vm0, %v2243_v62, -inf }
 0xd1b   : > { %2256 = vmax.xlane.f32.xlu1 %v2255_v55 }
 0xd1d   : > { %6128 = vmatmul.msk.f32.gmra.mxu1 %vm476_vm1, %v2756_v34 }
 0xd21   : > { %v2246_v44 = vpop.f32.mrf.mxu2 }
 0xd22   : > { %v2258_v36 = vsel %vm325_vm0, %v2246_v44, -inf }
 0xd23   : > { %2259 = vmax.xlane.f32.xlu2 %v2258_v36 }
 0xd25   : > { %6129 = vmatmul.msk.f32.gmra.mxu1 %vm476_vm1, %v2758_v63 }
 0xd29   : > { %v2249_v0 = vpop.f32.mrf.mxu2 }
 0xd2a   : > { %v2261_v1 = vsel %vm325_vm0, %v2249_v0, -inf }
 0xd2b   : > { %2262 = vmax.xlane.f32.xlu0 %v2261_v1 }
 0xd2d   : > { %6130 = vmatmul.msk.f32.gmra.mxu1 %vm476_vm1, %v2760_v4 }
 0xd31   : > { %v2252_v3 = vpop.f32.mrf.mxu2 }
 0xd32   : > { %v2264_v18 = vsel %vm325_vm0, %v2252_v3, -inf }
 0xd33   : > { %2265 = vmax.xlane.f32.xlu2 %v2264_v18 }
 0xd46   : > { %v2543_v6 = vpop.f32.mrf.mxu2 }
 0xd47   : > { %v2555_v17 = vsel %vm325_vm0, %v2543_v6, -inf }
 0xd48   : > { %2556 = vmax.xlane.f32.xlu1 %v2555_v17 }
 0xd4e   : > { %v7818_v59 = vpop.f32.mrf.mxu2 }
 0xd4f   : > { %v2558_v58 = vsel %vm325_vm0, %v7818_v59, -inf }
 0xd50   : > { %2559 = vmax.xlane.f32.xlu0 %v2558_v58 }
 0xd56   : > { %v7822_v13 = vpop.f32.mrf.mxu2 }
 0xd57   : > { %v2561_v14 = vsel %vm325_vm0, %v7822_v13, -inf }
 0xd58   : > { %2562 = vmax.xlane.f32.xlu2 %v2561_v14 }
 0xd5e   : > { %v7826_v15 = vpop.f32.mrf.mxu2 }
 0xd5f   : > { %v2564_v8 = vsel %vm325_vm0, %v7826_v15, -inf }
 0xd60   : > { %2565 = vmax.xlane.f32.xlu1 %v2564_v8 }
 0xd72   : > { %v7830_v61 = vpop.f32.mrf.mxu1 }
 0xd7a   : > { %v7832_v19 = vpop.f32.mrf.mxu1 }
 0xd82   : > { %v7834_v12 = vpop.f32.mrf.mxu1 }
 0xd8a   : > { %v7836_v21 = vpop.f32.mrf.mxu1 }
 0xd8e   : > { %v2257_v27 = vpop.xlane.xlu1 %2256 }
 0xd8f   : > { %v2267_v23 = vsub.f32 %v2243_v62, %v2257_v27 }
 0xd91   : > { %v2271_v16 = vmul.f32 1.442695, %v2267_v23 }
 0xd92   : > { %v2802_v25 = vpop.f32.mrf.mxu1 }
 0xd93   : > { %6682 = vpow2.f32 %v2271_v16  ;;  %v2814_v20 = vsel %vm325_vm0, %v2802_v25, -inf }
 0xd94   : > { %2815 = vmax.xlane.f32.xlu1 %v2814_v20 }
 0xd96   : > { %v2260_v26 = vpop.xlane.xlu2 %2259 }
 0xd97   : > { %v2268_v28 = vsub.f32 %v2246_v44, %v2260_v26 }
 0xd99   : > { %v7839_v22 = vpop.eup %6682  ;;  %v2273_v33 = vmul.f32 1.442695, %v2268_v28 }
 0xd9a   : > { %v2279_v2 = vsel %vm325_vm0, %v7839_v22, 0.0  ;;  %v2805_v31 = vpop.f32.mrf.mxu1 }
 0xd9b   : > { %6684 = vpow2.f32 %v2273_v33  ;;  %2280 = vadd.xlane.f32.xlu0 %v2279_v2  ;;  %v2817_v41 = vsel %vm325_vm0, %v2805_v31, -inf }
 0xd9e   : > { %v2263_v37 = vpop.xlane.xlu0 %2262 }
 0xd9f   : > { %v2269_v40 = vsub.f32 %v2249_v0, %v2263_v37 }
 0xda1   : > { %v7843_v9 = vpop.eup %6684  ;;  %v2275_v11 = vmul.f32 1.442695, %v2269_v40 }
 0xda2   : > { %v2282_v56 = vsel %vm325_vm0, %v7843_v9, 0.0  ;;  %v7856_v43 = vpop.f32.mrf.mxu1 }
 0xda3   : > { %6686 = vpow2.f32 %v2275_v11  ;;  %2283 = vadd.xlane.f32.xlu2 %v2282_v56  ;;  %2818 = vmax.xlane.f32.xlu0 %v2817_v41  ;;  %v2820_v48 = vsel %vm325_vm0, %v7856_v43, -inf }
 0xda6   : > { %v2266_v30 = vpop.xlane.xlu2 %2265 }
 0xda7   : > { %v2270_v10 = vsub.f32 %v2252_v3, %v2266_v30 }
 0xda9   : > { %v7848_v50 = vpop.eup %6686  ;;  %v2277_v52 = vmul.f32 1.442695, %v2270_v10 }
 0xdaa   : > { %v2285_v32 = vsel %vm325_vm0, %v7848_v50, 0.0  ;;  %v7862_v38 = vpop.f32.mrf.mxu1 }
 0xdab   : > { %2286 = vadd.xlane.f32.xlu1 %v2285_v32  ;;  %v2823_v29 = vsel %vm325_vm0, %v7862_v38, -inf }
 0xdb7   : > { %6415 = vrot.lane.b32.xlu0 %v7766_v54, %s6898_s15 }
 0xdbb   : > { %6420 = vrot.lane.b32.xlu2 %v7768_v53, %s6898_s15  ;;  %v2557_v24 = vpop.xlane.xlu1 %2556 }
 0xdbc   : > { %v2567_v51 = vsub.f32 %v2543_v6, %v2557_v24 }
 0xdbe   : > { %v2571_v42 = vmul.f32 1.442695, %v2567_v51 }
 0xdc0   : > { %6688 = vpow2.f32 %v2571_v42 }
 0xdc1   : > { %6690 = vpow2.f32 %v2277_v52 }
 0xdc3   : > { %v2560_v62 = vpop.xlane.xlu0 %2559 }
 0xdc4   : > { %v2568_v0 = vsub.f32 %v7818_v59, %v2560_v62 }
 0xdc6   : > { %v7858_v46 = vpop.eup %6688 }
 0xdc7   : > { %v2579_v47 = vsel %vm325_vm0, %v7858_v46, 0.0  ;;  %v7866_v45 = vpop.eup %6690 }
 0xdc8   : > { %2580 = vadd.xlane.f32.xlu1 %v2579_v47  ;;  %v2288_v49 = vsel %vm325_vm0, %v7866_v45, 0.0 }
 0xdcb   : > { %v2563_v36 = vpop.xlane.xlu2 %2562 }
 0xdcc   : > { %v2569_v58 = vsub.f32 %v7822_v13, %v2563_v36 }
 0xdce   : > { %v2575_v8 = vmul.f32 1.442695, %v2569_v58 }
 0xdd0   : > { %2824 = vmax.xlane.f32.xlu1 %v2823_v29 }
 0xdd3   : > { %v2566_v60 = vpop.xlane.xlu1 %2565 }
 0xdd4   : > { %v2570_v26 = vsub.f32 %v7826_v15, %v2566_v60 }
 0xdd6   : > { %v2577_v2 = vmul.f32 1.442695, %v2570_v26 }
 0xde1   : > { %2289 = vadd.xlane.f32.xlu0 %v2288_v49 }
 0xde4   : > { %2821 = vmax.xlane.f32.xlu2 %v2820_v48 }
 0xde9   : > { %6430 = vrot.lane.b32.xlu1 %v7768_v53, %s6897_s12 }
 0xdf5   : > { %6435 = vrot.lane.b32.xlu0 %v7766_v54, %s6896_s11 }
 0xdfc   : > { %6425 = vrot.lane.b32.xlu2 %v7766_v54, %s6897_s12  ;;  %v2573_v54 = vmul.f32 1.442695, %v2568_v0 }
 0xdfd   : > { %6440 = vrot.lane.b32.xlu0 %v7768_v53, %s6896_s11 }
 0xe07   : > { %v2816_v55 = vpop.xlane.xlu1 %2815 }
 0xe08   : > { %v2826_v34 = vsub.f32 %v2802_v25, %v2816_v55 }
 0xe0a   : > { %v2830_v44 = vmul.f32 1.442695, %v2826_v34 }
 0xe0c   : > { %6692 = vpow2.f32 %v2830_v44 }
 0xe0e   : > { %v2281_v63 = vpop.xlane.xlu0 %2280 }
 0xe0f   : > { %6694 = vrcp.f32 %v2281_v63  ;;  %v2302_v11 = vand.u32 2147483648, %v2281_v63  ;;  %vm2296_vm13 = vweird.f32 %v2281_v63  ;;  %v2300_v41 = vand.u32 2147483647, %v2281_v63 }
 0xe10   : > { %6696 = vpow2.f32 %v2573_v54 }
 0xe11   : > { %v2303_v10 = vor.u32 1.1754944e-38, %v2302_v11  ;;  %vm2301_vm15 = vcmp.eq.f32.partialorder %v2300_v41, 8.507059e+37 }
 0xe12   : > { %v7881_v1 = vpop.eup %6692 }
 0xe13   : > { %v2838_v4 = vsel %vm325_vm0, %v7881_v1, 0.0 }
 0xe14   : > { %2839 = vadd.xlane.f32.xlu1 %v2838_v4 }
 0xe15   : > { %v6695_v6 = vpop.eup %6694 }
 0xe16   : > { %v2819_v3 = vpop.xlane.xlu0 %2818  ;;  %v7885_v53 = vpop.xlane.xlu2 %2283  ;;  %v2292_v59 = vmul.f32 %v6695_v6, %v2281_v63  ;;  %vm2297_vm12 = vweird.f32 %v6695_v6 }
 0xe17   : > { %v2827_v18 = vsub.f32 %v2805_v31, %v2819_v3  ;;  %6698 = vrcp.f32 %v7885_v53  ;;  %v7889_v14 = vpop.eup %6696  ;;  %vm7904_vm14 = vmor %vm2296_vm13, %vm2297_vm12  ;;  %v2317_v34 = vand.u32 2147483648, %v7885_v53  ;;  %vm2311_vm3 = vweird.f32 %v7885_v53 }
 0xe18   : > { %v2293_v27 = vsub.f32 1.0, %v2292_v59  ;;  %v2582_v33 = vsel %vm325_vm0, %v7889_v14, 0.0  ;;  %v2315_v36 = vand.u32 2147483647, %v7885_v53 }
 0xe19   : > { %v2832_v17 = vmul.f32 1.442695, %v2827_v18  ;;  %v2318_v3 = vor.u32 1.1754944e-38, %v2317_v34 }
 0xe1a   : > { %v2294_v13 = vmul.f32 %v6695_v6, %v2293_v27  ;;  %vm2316_vm5 = vcmp.eq.f32.partialorder %v2315_v36, 8.507059e+37 }
 0xe1b   : > { %6700 = vpow2.f32 %v2832_v17 }
 0xe1c   : > { %v2295_v37 = vadd.f32 %v6695_v6, %v2294_v13 }
 0xe1d   : > { %v6699_v16 = vpop.eup %6698 }
 0xe1e   : > { %v7891_v23 = vpop.xlane.xlu1 %2286  ;;  %v2307_v28 = vmul.f32 %v6699_v16, %v7885_v53  ;;  %v2299_v51 = vsel %vm7904_vm14, %v6695_v6, %v2295_v37  ;;  %v6421_v42 = vpop.permute.xlu2 %6420  ;;  %vm2312_vm2 = vweird.f32 %v6699_v16 }
 0xe1f   : > { %6702 = vrcp.f32 %v7891_v23  ;;  %v6422_v49 = vunpack.i.l.bf16 %v6421_v42  ;;  %v2304_v48 = vsel %vm2301_vm15, %v2303_v10, %v2299_v51  ;;  %v6423_v55 = vunpack.i.h.bf16 %v6421_v42  ;;  %vm2313_vm4 = vmor %vm2311_vm3, %vm2312_vm2 }
 0xe20   : > { %6704 = vpow2.f32 %v2575_v8  ;;  %v2308_v31 = vsub.f32 1.0, %v2307_v28  ;;  %v2351_v63 = vmul.f32 %v7839_v22, %v2304_v48  ;;  %v2332_v22 = vand.u32 2147483648, %v7891_v23 }
 0xe21   : > { %v7893_v25 = vpop.eup %6700  ;;  %6706 = vpow2.f32 %v2577_v2  ;;  %vm2326_vm7 = vweird.f32 %v7891_v23  ;;  %v2330_v53 = vand.u32 2147483647, %v7891_v23 }
 0xe22   : > { %v2841_v20 = vsel %vm325_vm0, %v7893_v25, 0.0  ;;  %v2309_v30 = vmul.f32 %v6699_v16, %v2308_v31  ;;  %v2333_v59 = vor.u32 1.1754944e-38, %v2332_v22 }
 0xe23   : > { %2842 = vadd.xlane.f32.xlu1 %v2841_v20  ;;  %vm2331_vm10 = vcmp.eq.f32.partialorder %v2330_v53, 8.507059e+37  ;;  %v3313_v20 = vld [vmem:[%s8872_s4 + $0x18] sm:$0xff] }
 0xe24   : > { %v2310_v62 = vadd.f32 %v6699_v16, %v2309_v30 }
 0xe25   : > { %2583 = vadd.xlane.f32.xlu2 %v2582_v33  ;;  %v6703_v40 = vpop.eup %6702 }
 0xe26   : > { %v7902_v56 = vpop.eup %6704  ;;  %v2322_v47 = vmul.f32 %v6703_v40, %v7891_v23  ;;  %v2314_v0 = vsel %vm2313_vm4, %v6699_v16, %v2310_v62  ;;  %vm2327_vm6 = vweird.f32 %v6703_v40  ;;  %v3312_v23 = vld [vmem:[%s8872_s4 + $0x10] sm:$0xff] }
 0xe27   : > { %v2585_v52 = vsel %vm325_vm0, %v7902_v56, 0.0  ;;  %v7914_v44 = vpop.eup %6706  ;;  %v2319_v18 = vsel %vm2316_vm5, %v2318_v3, %v2314_v0  ;;  %vm2328_vm8 = vmor %vm2326_vm7, %vm2327_vm6  ;;  %v7938_v26 = vpack.i.bf16 %v3312_v23, %v3313_v20 }
 0xe28   : > { %v2323_v60 = vsub.f32 1.0, %v2322_v47  ;;  %v2588_v54 = vsel %vm325_vm0, %v7914_v44, 0.0  ;;  %v2352_v17 = vmul.f32 %v7843_v9, %v2319_v18 }
 0xe29   : > { %v6416_v32 = vpop.permute.xlu0 %6415  ;;  %6445 = vrot.lane.b32.xlu0 %v7938_v26, %s6894_s14 }
 0xe2a   : > { %v6417_v24 = vunpack.i.l.bf16 %v6416_v32  ;;  %v6418_v29 = vunpack.i.h.bf16 %v6416_v32  ;;  %v2324_v4 = vmul.f32 %v6703_v40, %v2323_v60 }
 0xe2c   : > { %2395 = vmatpush.msrb.mxu3 %v6417_v24  ;;  %v2325_v6 = vadd.f32 %v6703_v40, %v2324_v4 }
 0xe2d   : > { %2586 = vadd.xlane.f32.xlu2 %v2585_v52 }
 0xe2e   : > { %2396 = vmatpush.msrb.mxu3 %v6418_v29  ;;  %v2329_v58 = vsel %vm2328_vm8, %v6703_v40, %v2325_v6 }
 0xe2f   : > { %v2334_v8 = vsel %vm2331_vm10, %v2333_v59, %v2329_v58 }
 0xe30   : > { %2397 = vmatpush.msrb.mxu3 %v6422_v49  ;;  %v2353_v27 = vmul.f32 %v7848_v50, %v2334_v8 }
 0xe32   : > { %2398 = vmatpush.msrb.mxu3 %v6423_v55 }
 0xe33   : > { %6095 = vmatmul.msk.f32.vlgmr.msrb.gmra.mxu3 %vm325_vm0, %v2351_v63 }
 0xe35   : > { %2589 = vadd.xlane.f32.xlu2 %v2588_v54 }
 0xe3b   : > { %6096 = vmatmul.msk.f32.gmra.mxu3 %vm325_vm0, %v2352_v17  ;;  %v7929_v16 = vpop.xlane.xlu1 %2580 }
 0xe3c   : > { %6708 = vrcp.f32 %v7929_v16  ;;  %v2602_v3 = vand.u32 2147483648, %v7929_v16  ;;  %vm2596_vm2 = vweird.f32 %v7929_v16  ;;  %v2600_v6 = vand.u32 2147483647, %v7929_v16 }
 0xe3e   : > { %v2603_v17 = vor.u32 1.1754944e-38, %v2602_v3  ;;  %vm2601_vm4 = vcmp.eq.f32.partialorder %v2600_v6, 8.507059e+37 }
 0xe42   : > { %v6709_v33 = vpop.eup %6708 }
 0xe43   : > { %6097 = vmatmul.msk.f32.gmra.mxu3 %vm325_vm0, %v2353_v27  ;;  %v2825_v13 = vpop.xlane.xlu1 %2824  ;;  %v2592_v11 = vmul.f32 %v6709_v33, %v7929_v16  ;;  %vm2597_vm15 = vweird.f32 %v6709_v33  ;;  %v3310_v16 = vld [vmem:[%s8872_s4] sm:$0xff] }
 0xe44   : > { %v2829_v2 = vsub.f32 %v7862_v38, %v2825_v13  ;;  %vm2598_vm3 = vmor %vm2596_vm2, %vm2597_vm15 }
 0xe45   : > { %v2593_v47 = vsub.f32 1.0, %v2592_v11  ;;  %v6047_v11 = vld [vmem:[%s8870_s2 + $0xc8] sm:$0xff] }
 0xe46   : > { %v2836_v41 = vmul.f32 1.442695, %v2829_v2  ;;  %2439 = vmatpush.msra.mxu0 %v6047_v11 }
 0xe47   : > { %v2594_v62 = vmul.f32 %v6709_v33, %v2593_v47 }
 0xe49   : > { %v2595_v54 = vadd.f32 %v6709_v33, %v2594_v62 }
 0xe4b   : > { %v2599_v22 = vsel %vm2598_vm3, %v6709_v33, %v2595_v54 }
 0xe4c   : > { %v2604_v58 = vsel %vm2601_vm4, %v2603_v17, %v2599_v22 }
 0xe4d   : > { %v2651_v27 = vmul.f32 %v7858_v46, %v2604_v58 }
 0xe54   : > { %v2290_v9 = vpop.xlane.xlu0 %2289 }
 0xe55   : > { %6710 = vrcp.f32 %v2290_v9  ;;  %v2347_v24 = vand.u32 2147483648, %v2290_v9  ;;  %vm2341_vm12 = vweird.f32 %v2290_v9 }
 0xe57   : > { %v2822_v50 = vpop.xlane.xlu2 %2821  ;;  %v2348_v49 = vor.u32 1.1754944e-38, %v2347_v24 }
 0xe58   : > { %v2828_v28 = vsub.f32 %v7856_v43, %v2822_v50  ;;  %v2345_v43 = vand.u32 2147483647, %v2290_v9 }
 0xe5a   : > { %v2834_v37 = vmul.f32 1.442695, %v2828_v28  ;;  %vm2346_vm14 = vcmp.eq.f32.partialorder %v2345_v43, 8.507059e+37 }
 0xe5b   : > { %v6711_v31 = vpop.eup %6710  ;;  %v6431_v30 = vpop.permute.xlu1 %6430 }
 0xe5c   : > { %v2337_v40 = vmul.f32 %v6711_v31, %v2290_v9  ;;  %6712 = vpow2.f32 %v2834_v37  ;;  %vm2342_vm11 = vweird.f32 %v6711_v31  ;;  %v6432_v48 = vunpack.i.l.bf16 %v6431_v30  ;;  %v3311_v9 = vld [vmem:[%s8872_s4 + $0x8] sm:$0xff] }
 0xe5d   : > { %6714 = vpow2.f32 %v2836_v41  ;;  %vm2343_vm13 = vmor %vm2341_vm12, %vm2342_vm11  ;;  %v6433_v34 = vunpack.i.h.bf16 %v6431_v30 }
 0xe5e   : > { %v2338_v32 = vsub.f32 1.0, %v2337_v40 }
 0xe5f   : > { %v6426_v15 = vpop.permute.xlu2 %6425 }
 0xe60   : > { %v6427_v51 = vunpack.i.l.bf16 %v6426_v15  ;;  %v2339_v42 = vmul.f32 %v6711_v31, %v2338_v32  ;;  %v6428_v38 = vunpack.i.h.bf16 %v6426_v15 }
 0xe62   : > { %v7945_v10 = vpop.eup %6712  ;;  %2950 = vmatpush.msrb.mxu2 %v6427_v51  ;;  %v2340_v29 = vadd.f32 %v6711_v31, %v2339_v42 }
 0xe63   : > { %v2844_v52 = vsel %vm325_vm0, %v7945_v10, 0.0  ;;  %v7950_v0 = vpop.eup %6714 }
 0xe64   : > { %2951 = vmatpush.msrb.mxu2 %v6428_v38  ;;  %2845 = vadd.xlane.f32.xlu1 %v2844_v52  ;;  %v2344_v60 = vsel %vm2343_vm13, %v6711_v31, %v2340_v29 }
 0xe65   : > { %v2349_v55 = vsel %vm2346_vm14, %v2348_v49, %v2344_v60 }
 0xe66   : > { %2952 = vmatpush.msrb.mxu2 %v6432_v48  ;;  %v2354_v63 = vmul.f32 %v7866_v45, %v2349_v55  ;;  %v2847_v45 = vsel %vm325_vm0, %v7950_v0, 0.0 }
 0xe67   : > { %v6436_v36 = vpop.permute.xlu0 %6435 }
 0xe68   : > { %v6437_v4 = vunpack.i.l.bf16 %v6436_v36  ;;  %6098 = vmatmul.msk.f32.gmra.mxu3 %vm325_vm0, %v2354_v63  ;;  %2953 = vmatpush.msrb.mxu2 %v6433_v34  ;;  %v6438_v18 = vunpack.i.h.bf16 %v6436_v36 }
 0xe6a   : > { %3356 = vmatpush.msra.mxu2 %v3313_v20  ;;  %2691 = vmatpush.msra.mxu3 %v6437_v4 }
 0xe6c   : > { %3357 = vmatpush.msra.mxu2 %v3312_v23  ;;  %2692 = vmatpush.msra.mxu3 %v6438_v18  ;;  %v7966_v23 = vpack.i.bf16 %v3310_v16, %v3311_v9 }
 0xe6d   : > { %2848 = vadd.xlane.f32.xlu1 %v2847_v45 }
 0xe6e   : > { %3358 = vmatpush.msra.mxu2 %v3311_v9  ;;  %6450 = vrot.lane.b32.xlu2 %v7966_v23, %s6894_s14 }
 0xe6f   : > { %v6441_v53 = vpop.permute.xlu0 %6440 }
 0xe70   : > { %v6442_v59 = vunpack.i.l.bf16 %v6441_v53  ;;  %v6443_v8 = vunpack.i.h.bf16 %v6441_v53  ;;  %3359 = vmatpush.msra.mxu2 %v3310_v16 }
 0xe72   : > { %2693 = vmatpush.msra.mxu3 %v6442_v59 }
 0xe74   : > { %2694 = vmatpush.msra.mxu3 %v6443_v8 }
 0xe75   : > { %6115 = vmatmul.msk.f32.vlgmr.msra.gmra.mxu3 %vm325_vm0, %v2651_v27 }
 0xe86   : > { %6460 = vrot.lane.b32.xlu1 %v7966_v23, %s6895_s10 }
 0xe87   : > { %v2840_v20 = vpop.xlane.xlu1 %2839 }
 0xe88   : > { %6716 = vrcp.f32 %v2840_v20  ;;  %v2861_v28 = vand.u32 2147483648, %v2840_v20  ;;  %v2859_v2 = vand.u32 2147483647, %v2840_v20  ;;  %vm2855_vm6 = vweird.f32 %v2840_v20 }
 0xe8a   : > { %v2862_v31 = vor.u32 1.1754944e-38, %v2861_v28  ;;  %vm2860_vm8 = vcmp.eq.f32.partialorder %v2859_v2, 8.507059e+37 }
 0xe8e   : > { %v6717_v46 = vpop.eup %6716 }
 0xe8f   : > { %v2851_v13 = vmul.f32 %v6717_v46, %v2840_v20  ;;  %vm2856_vm5 = vweird.f32 %v6717_v46 }
 0xe90   : > { %vm2857_vm7 = vmor %vm2855_vm6, %vm2856_vm5 }
 0xe91   : > { %v2852_v50 = vsub.f32 1.0, %v2851_v13 }
 0xe93   : > { %v2853_v33 = vmul.f32 %v6717_v46, %v2852_v50 }
 0xe95   : > { %v2854_v37 = vadd.f32 %v6717_v46, %v2853_v33 }
 0xe96   : > { %v2843_v40 = vpop.xlane.xlu1 %2842 }
 0xe97   : > { %v2858_v41 = vsel %vm2857_vm7, %v6717_v46, %v2854_v37  ;;  %6718 = vrcp.f32 %v2843_v40  ;;  %v2876_v29 = vand.u32 2147483648, %v2843_v40  ;;  %v2874_v48 = vand.u32 2147483647, %v2843_v40 }
 0xe98   : > { %v2863_v32 = vsel %vm2860_vm8, %v2862_v31, %v2858_v41  ;;  %v2584_v15 = vpop.xlane.xlu2 %2583  ;;  %vm2870_vm11 = vweird.f32 %v2843_v40 }
 0xe99   : > { %v2910_v24 = vmul.f32 %v7881_v1, %v2863_v32  ;;  %6720 = vrcp.f32 %v2584_v15  ;;  %v2617_v62 = vand.u32 2147483648, %v2584_v15  ;;  %v2877_v55 = vor.u32 1.1754944e-38, %v2876_v29 }
 0xe9a   : > { %v2615_v34 = vand.u32 2147483647, %v2584_v15  ;;  %vm2611_vm14 = vweird.f32 %v2584_v15  ;;  %vm2875_vm15 = vcmp.eq.f32.partialorder %v2874_v48, 8.507059e+37 }
 0xe9b   : > { %6131 = vmatmul.msk.f32.vlgmr.msrb.gmra.mxu2 %vm325_vm0, %v2910_v24  ;;  %v2618_v3 = vor.u32 1.1754944e-38, %v2617_v62  ;;  %v6446_v24 = vpop.permute.xlu0 %6445 }
 0xe9c   : > { %vm2616_vm3 = vcmp.eq.f32.partialorder %v2615_v34, 8.507059e+37 }
 0xe9d   : > { %v6719_v51 = vpop.eup %6718 }
 0xe9e   : > { %v2866_v42 = vmul.f32 %v6719_v51, %v2843_v40  ;;  %vm2871_vm10 = vweird.f32 %v6719_v51 }
 0xe9f   : > { %v6721_v43 = vpop.eup %6720  ;;  %vm2872_vm13 = vmor %vm2870_vm11, %vm2871_vm10 }
 0xea0   : > { %v2867_v47 = vsub.f32 1.0, %v2866_v42  ;;  %v2607_v30 = vmul.f32 %v6721_v43, %v2584_v15  ;;  %v2587_v38 = vpop.xlane.xlu2 %2586  ;;  %vm2612_vm12 = vweird.f32 %v6721_v43  ;;  %v6447_v42 = vunpack.i.l.bf16 %v6446_v24 }
 0xea1   : > { %6722 = vrcp.f32 %v2587_v38  ;;  %vm2613_vm2 = vmor %vm2611_vm14, %vm2612_vm12  ;;  %v2632_v58 = vand.u32 2147483648, %v2587_v38  ;;  %v2630_v27 = vand.u32 2147483647, %v2587_v38  ;;  %vm2626_vm5 = vweird.f32 %v2587_v38 }
 0xea2   : > { %v2868_v52 = vmul.f32 %v6719_v51, %v2867_v47  ;;  %v2608_v49 = vsub.f32 1.0, %v2607_v30  ;;  %3397 = vmatpush.msrb.mxu2 %v6447_v42  ;;  %v6048_v47 = vld [vmem:[%s8870_s2 + $0xd0] sm:$0xff] }
 0xea3   : > { %vm2631_vm7 = vcmp.eq.f32.partialorder %v2630_v27, 8.507059e+37  ;;  %2735 = vmatpush.msrb.mxu0 %v6048_v47 }
 0xea4   : > { %v2609_v60 = vmul.f32 %v6721_v43, %v2608_v49  ;;  %v2869_v1 = vadd.f32 %v6719_v51, %v2868_v52 }
 0xea6   : > { %v2610_v63 = vadd.f32 %v6721_v43, %v2609_v60  ;;  %v2873_v36 = vsel %vm2872_vm13, %v6719_v51, %v2869_v1  ;;  %v6448_v51 = vunpack.i.h.bf16 %v6446_v24 }
 0xea7   : > { %v6723_v4 = vpop.eup %6722  ;;  %v2878_v54 = vsel %vm2875_vm15, %v2877_v55, %v2873_v36  ;;  %v7992_v55 = vld [vmem:[%s8873_s5] sm:$0xff] }
 0xea8   : > { %v2622_v18 = vmul.f32 %v6723_v4, %v2587_v38  ;;  %v2590_v6 = vpop.xlane.xlu2 %2589  ;;  %v2911_v45 = vmul.f32 %v7893_v25, %v2878_v54  ;;  %v2614_v22 = vsel %vm2613_vm2, %v6721_v43, %v2610_v63  ;;  %vm2627_vm4 = vweird.f32 %v6723_v4  ;;  %3398 = vmatpush.msrb.mxu2 %v6448_v51 }
 0xea9   : > { %6724 = vrcp.f32 %v2590_v6  ;;  %v2619_v53 = vsel %vm2616_vm3, %v2618_v3, %v2614_v22  ;;  %vm2628_vm6 = vmor %vm2626_vm5, %vm2627_vm4  ;;  %v2633_v25 = vor.u32 1.1754944e-38, %v2632_v58  ;;  %v2647_v33 = vand.u32 2147483648, %v2590_v6 }
 0xeaa   : > { %v2623_v17 = vsub.f32 1.0, %v2622_v18  ;;  %6132 = vmatmul.msk.f32.gmra.mxu2 %vm325_vm0, %v2911_v45  ;;  %v2652_v59 = vmul.f32 %v7889_v14, %v2619_v53  ;;  %v2645_v14 = vand.u32 2147483647, %v2590_v6  ;;  %vm2641_vm10 = vweird.f32 %v2590_v6 }
 0xeab   : > { %v2648_v40 = vor.u32 1.1754944e-38, %v2647_v33  ;;  %v7995_v34 = vperm.slane %v7992_v55, 0 }
 0xeac   : > { %v2624_v8 = vmul.f32 %v6723_v4, %v2623_v17  ;;  %6116 = vmatmul.msk.f32.gmra.mxu3 %vm325_vm0, %v2652_v59  ;;  %vm2646_vm12 = vcmp.eq.f32.partialorder %v2645_v14, 8.507059e+37 }
 0xead   : > { %3382 = vrot.lane.b32.xlu0 %v7995_v34, %s6894_s14 }
 0xeae   : > { %v2625_v16 = vadd.f32 %v6723_v4, %v2624_v8 }
 0xeaf   : > { %v6725_v9 = vpop.eup %6724 }
 0xeb0   : > { %v2637_v20 = vmul.f32 %v6725_v9, %v2590_v6  ;;  %v2629_v46 = vsel %vm2628_vm6, %v6723_v4, %v2625_v16  ;;  %vm2642_vm8 = vweird.f32 %v6725_v9 }
 0xeb1   : > { %v2634_v13 = vsel %vm2631_vm7, %v2633_v25, %v2629_v46  ;;  %vm2643_vm11 = vmor %vm2641_vm10, %vm2642_vm8  ;;  %v8008_v25 = vld [vmem:[%s266_s17] sm:$0xff]  ;;  %s6294_s17 = sshll.u32 %s6956_s25, 3  ;;  %s5864_s25 = scalar_lea.sflag [#allocation3], %s255_s9 }
 0xeb2   : > { %v2638_v50 = vsub.f32 1.0, %v2637_v20  ;;  %v2653_v28 = vmul.f32 %v7902_v56, %v2634_v13  ;;  %v6049_v20 = vld [vmem:[%s8870_s2 + $0xd8] sm:$0xff]  ;;  %s5874_s13 = scalar_lea.hbm %s8874_s6, %s6294_s17 }
 0xeb3   : > { %2994 = vmatpush.msrb.mxu3 %v6049_v20  ;;  %s5878_s26 = sshll.u32 %s5874_s13, 4  ;;  %s5879_s26 = int_to_ptr.hbm [resolvable:$true] %s5878_s26 }
 0xeb4   : > { %v2639_v2 = vmul.f32 %v6725_v9, %v2638_v50  ;;  %6117 = vmatmul.msk.f32.gmra.mxu3 %vm325_vm0, %v2653_v28 }
 0xeb5   : > { %6455 = vrot.lane.b32.xlu0 %v7938_v26, %s6895_s10 }
 0xeb6   : > { %v2640_v37 = vadd.f32 %v6725_v9, %v2639_v2  ;;  %v2400_v31 = vpop.f32.mrf.mxu3 }
 0xeb7   : > { %6099 = vmatmul.msk.f32.vlgmr.msra.gmra.mxu0 %vm476_vm1, %v2400_v31 }
 0xeb8   : > { %v2644_v11 = vsel %vm2643_vm11, %v6725_v9, %v2640_v37 }
 0xeb9   : > { %v2649_v41 = vsel %vm2646_vm12, %v2648_v40, %v2644_v11 }
 0xeba   : > { %v2654_v32 = vmul.f32 %v7914_v44, %v2649_v41 }
 0xebc   : > { %6118 = vmatmul.msk.f32.gmra.mxu3 %vm325_vm0, %v2654_v32 }
 0xebe   : > { %v2403_v56 = vpop.f32.mrf.mxu3 }
 0xebf   : > { %6100 = vmatmul.msk.f32.gmra.mxu0 %vm476_vm1, %v2403_v56 }
 0xec6   : > { %v2406_v15 = vpop.f32.mrf.mxu3 }
 0xec7   : > { %6101 = vmatmul.msk.f32.gmra.mxu0 %vm476_vm1, %v2406_v15 }
 0xec8   : > { %v6451_v44 = vpop.permute.xlu2 %6450 }
 0xec9   : > { %v6453_v38 = vunpack.i.h.bf16 %v6451_v44  ;;  %v6452_v29 = vunpack.i.l.bf16 %v6451_v44 }
 0xecb   : > { %3399 = vmatpush.msrb.mxu2 %v6452_v29 }
 0xecd   : > { %3400 = vmatpush.msrb.mxu2 %v6453_v38 }
 0xed7   : > { %v2846_v43 = vpop.xlane.xlu1 %2845 }
 0xed8   : > { %6726 = vrcp.f32 %v2846_v43  ;;  %v2891_v60 = vand.u32 2147483648, %v2846_v43  ;;  %v2889_v1 = vand.u32 2147483647, %v2846_v43  ;;  %vm2885_vm14 = vweird.f32 %v2846_v43 }
 0xeda   : > { %v2892_v4 = vor.u32 1.1754944e-38, %v2891_v60  ;;  %vm2890_vm2 = vcmp.eq.f32.partialorder %v2889_v1, 8.507059e+37 }
 0xede   : > { %v6727_v30 = vpop.eup %6726 }
 0xedf   : > { %v2881_v52 = vmul.f32 %v6727_v30, %v2846_v43  ;;  %vm2886_vm13 = vweird.f32 %v6727_v30  ;;  %v8040_v43 = vld [vmem:[%s8871_s3 + $0x8] sm:$0xff] }
 0xee0   : > { %v2849_v49 = vpop.xlane.xlu1 %2848  ;;  %vm2887_vm15 = vmor %vm2885_vm14, %vm2886_vm13  ;;  %v3012_v47 = vperm.slane %v8040_v43, 1 }
 0xee1   : > { %6728 = vrcp.f32 %v2849_v49  ;;  %v2882_v48 = vsub.f32 1.0, %v2881_v52  ;;  %v2906_v22 = vand.u32 2147483648, %v2849_v49  ;;  %v2904_v53 = vand.u32 2147483647, %v2849_v49 }
 0xee2   : > { %vm2900_vm4 = vweird.f32 %v2849_v49 }
 0xee3   : > { %v2883_v62 = vmul.f32 %v6727_v30, %v2882_v48  ;;  %v2907_v8 = vor.u32 1.1754944e-38, %v2906_v22  ;;  %vm2905_vm6 = vcmp.eq.f32.partialorder %v2904_v53, 8.507059e+37 }
 0xee5   : > { %v2884_v63 = vadd.f32 %v6727_v30, %v2883_v62 }
 0xee7   : > { %v6729_v36 = vpop.eup %6728  ;;  %v2888_v3 = vsel %vm2887_vm15, %v6727_v30, %v2884_v63 }
 0xee8   : > { %v2896_v54 = vmul.f32 %v6729_v36, %v2849_v49  ;;  %v2893_v18 = vsel %vm2890_vm2, %v2892_v4, %v2888_v3  ;;  %vm2901_vm3 = vweird.f32 %v6729_v36 }
 0xee9   : > { %v2912_v45 = vmul.f32 %v7945_v10, %v2893_v18  ;;  %vm2902_vm5 = vmor %vm2900_vm4, %vm2901_vm3 }
 0xeea   : > { %v2897_v6 = vsub.f32 1.0, %v2896_v54 }
 0xeeb   : > { %v2409_v58 = vpop.f32.mrf.mxu3  ;;  %6133 = vmatmul.msk.f32.gmra.mxu2 %vm325_vm0, %v2912_v45 }
 0xeec   : > { %v2898_v17 = vmul.f32 %v6729_v36, %v2897_v6  ;;  %6102 = vmatmul.msk.f32.gmra.mxu0 %vm476_vm1, %v2409_v58 }
 0xeee   : > { %v2899_v59 = vadd.f32 %v6729_v36, %v2898_v17 }
 0xef0   : > { %v2903_v27 = vsel %vm2902_vm5, %v6729_v36, %v2899_v59 }
 0xef1   : > { %v2908_v16 = vsel %vm2905_vm6, %v2907_v8, %v2903_v27 }
 0xef2   : > { %v2913_v9 = vmul.f32 %v7950_v0, %v2908_v16 }
 0xef4   : > { %6134 = vmatmul.msk.f32.gmra.mxu2 %vm325_vm0, %v2913_v9 }
 0xef8   : > { %v2696_v10 = vpop.f32.mrf.mxu3  ;;  %v6461_v20 = vpop.permute.xlu1 %6460 }
 0xef9   : > { %6119 = vmatmul.msk.f32.vlgmr.msrb.gmra.mxu0 %vm476_vm1, %v2696_v10 }
 0xefc   : > { %6147 = vmatmul.msk.f32.vlgmr.msra.gmra.mxu2 %vm325_vm0, %v8008_v25 }
 0xf04   : > { %6148 = vmatmul.msk.f32.vlgmr.msrb.gmra.mxu2 %vm325_vm0, %v8008_v25 }
 0xf1e   : > { %v2955_v0 = vpop.f32.mrf.mxu2 }
 0xf1f   : > { %6135 = vmatmul.msk.f32.vlgmr.msrb.gmra.mxu3 %vm476_vm1, %v2955_v0  ;;  %v3383_v40 = vpop.permute.xlu0 %3382  ;;  %v6462_v0 = vunpack.i.l.bf16 %v6461_v20 }
 0xf2d   : > { %v2958_v46 = vpop.f32.mrf.mxu2 }
 0xf2e   : > { %6136 = vmatmul.msk.f32.gmra.mxu3 %vm476_vm1, %v2958_v46 }
 0xf2f   : > { %v2699_v13 = vpop.f32.mrf.mxu3 }
 0xf30   : > { %6120 = vmatmul.msk.f32.gmra.mxu0 %vm476_vm1, %v2699_v13 }
 0xf34   : > { %v2441_v14 = vpop.f32.mrf.mxu0 }
 0xf35   : > { %v2483_v51 = vadd.f32 %v7830_v61, %v2441_v14 }
 0xf37   : > { %v2702_v50 = vpop.f32.mrf.mxu3 }
 0xf38   : > { %6121 = vmatmul.msk.f32.gmra.mxu0 %vm476_vm1, %v2702_v50 }
 0xf3c   : > { %v2444_v31 = vpop.f32.mrf.mxu0 }
 0xf3d   : > { %v2486_v61 = vadd.f32 %v7832_v19, %v2444_v31 }
 0xf3f   : > { %v2705_v28 = vpop.f32.mrf.mxu3 }
 0xf40   : > { %6122 = vmatmul.msk.f32.gmra.mxu0 %vm476_vm1, %v2705_v28 }
 0xf44   : > { %v2447_v26 = vpop.f32.mrf.mxu0 }
 0xf45   : > { %v2489_v4 = vadd.f32 %v7834_v12, %v2447_v26 }
 0xf69   : > { %v2450_v15 = vpop.f32.mrf.mxu0 }
 0xf6a   : > { %v2492_v17 = vadd.f32 %v7836_v21, %v2450_v15  ;;  %v6463_v21 = vunpack.i.h.bf16 %v6461_v20 }
 0xf6e   : > { %v2961_v33 = vpop.f32.mrf.mxu2 }
 0xf6f   : > { %6137 = vmatmul.msk.f32.gmra.mxu3 %vm476_vm1, %v2961_v33 }
 0xf76   : > { %v2737_v24 = vpop.f32.mrf.mxu0 }
 0xf77   : > { %v2964_v2 = vpop.f32.mrf.mxu2  ;;  %v2749_v42 = vadd.f32 %v2737_v24, %v2483_v51 }
 0xf78   : > { %6138 = vmatmul.msk.f32.gmra.mxu3 %vm476_vm1, %v2964_v2 }
 0xf7f   : > { %v3361_v37 = vpop.f32.mrf.mxu2 }
 0xf80   : > { %v3362_v11 = vadd.f32 %v3361_v37, %v7995_v34 }
 0xf82   : > { %v8032_v56 = vmul.f32 0.35355338, %v3362_v11 }
 0xf87   : > { %v3402_v41 = vpop.f32.mrf.mxu2 }
 0xf88   : > { %v8028_v32 = vadd.f32 %v3402_v41, %v3383_v40 }
 0xf8a   : > { %6150 = vmatpush.xpose.msk.msra.mxu2 %vm476_vm1, %v8028_v32 }
 0xf8d   : > { %6151 = vmatmul.msk.f32.vlgmr.msra.gmra.mxu2 %vm476_vm1, %v8032_v56 }
 0xfa2   : > { %v2996_v44 = vpop.f32.mrf.mxu3 }
 0xfa3   : > { %v3008_v30 = vadd.f32 %v2996_v44, %v2749_v42 }
 0xfa5   : > { %v3013_v38 = vadd.f32 %v3012_v47, %v3008_v30 }
 0xfa7   : > { %v3017_v29 = vadd.f32 %v3013_v38, %v7603_v57  ;;  %v6456_v57 = vpop.permute.xlu0 %6455 }
 0xfa8   : > { %v6458_v18 = vunpack.i.h.bf16 %v6456_v57  ;;  %v6457_v6 = vunpack.i.l.bf16 %v6456_v57 }
 0xfa9   : > { %v3021_v52 = vsel %vm325_vm0, %v3017_v29, 0.0 }
 0xfaa   : > { %3022 = vadd.xlane.f32.xlu0 %v3021_v52  ;;  %3432 = vmatpush.msra.mxu3 %v6457_v6  ;;  %v6053_v52 = vld [vmem:[%s8870_s2 + $0xf8] sm:$0xff] }
 0xfab   : > { %3144 = vmatpush.msra.mxu0 %v6053_v52 }
 0xfac   : > { %3433 = vmatpush.msra.mxu3 %v6458_v18 }
 0xfad   : > { %v2740_v49 = vpop.f32.mrf.mxu0 }
 0xfae   : > { %v2750_v48 = vadd.f32 %v2740_v49, %v2486_v61  ;;  %3434 = vmatpush.msra.mxu3 %v6462_v0  ;;  %v6052_v49 = vld [vmem:[%s8870_s2 + $0xf0] sm:$0xff] }
 0xfaf   : > { %3145 = vmatpush.msra.mxu0 %v6052_v49 }
 0xfb0   : > { %3435 = vmatpush.msra.mxu3 %v6463_v21 }
 0xfb1   : > { %v2999_v60 = vpop.f32.mrf.mxu3  ;;  %6149 = vmatmul.msk.f32.vlgmr.msra.gmra.mxu3 %vm325_vm0, %v8008_v25 }
 0xfb2   : > { %v3009_v62 = vadd.f32 %v2999_v60, %v2750_v48  ;;  %v6050_v48 = vld [vmem:[%s8870_s2 + $0xe0] sm:$0xff] }
 0xfb4   : > { %v3014_v1 = vadd.f32 %v3012_v47, %v3009_v62 }
 0xfb5   : > { %v2743_v23 = vpop.f32.mrf.mxu0 }
 0xfb6   : > { %v3018_v63 = vadd.f32 %v3014_v1, %v7611_v5  ;;  %v2751_v54 = vadd.f32 %v2743_v23, %v2489_v4 }
 0xfb8   : > { %v3024_v36 = vsel %vm325_vm0, %v3018_v63, 0.0 }
 0xfb9   : > { %3025 = vadd.xlane.f32.xlu2 %v3024_v36 }
 0xfbd   : > { %v2746_v22 = vpop.f32.mrf.mxu0 }
 0xfbe   : > { %v2752_v53 = vadd.f32 %v2746_v22, %v2492_v17 }
 0xff2   : > { %v3002_v3 = vpop.f32.mrf.mxu3 }
 0xff3   : > { %v3010_v45 = vadd.f32 %v3002_v3, %v2751_v54 }
 0xff5   : > { %v3015_v19 = vadd.f32 %v3012_v47, %v3010_v45 }
 0xff7   : > { %v3019_v5 = vadd.f32 %v3015_v19, %v7621_v35  ;;  %v8117_v19 = vperm.slane %v8040_v43, 5 }
 0xff9   : > { %v3027_v58 = vsel %vm325_vm0, %v3019_v5, 0.0 }
 0xffa   : > { %3028 = vadd.xlane.f32.xlu1 %v3027_v58 }
 0xffb   : > { %v3005_v59 = vpop.f32.mrf.mxu3 }
 0xffc   : > { %v3011_v12 = vadd.f32 %v3005_v59, %v2752_v53 }
 0xffe   : > { %v3016_v8 = vadd.f32 %v3012_v47, %v3011_v12 }
0x1000   : > { %v3020_v27 = vadd.f32 %v3016_v8, %v7636_v39 }
0x1002   : > { %v3030_v16 = vsel %vm325_vm0, %v3020_v27, 0.0 }
0x1003   : > { %3031 = vadd.xlane.f32.xlu0 %v3030_v16 }
0x1010   : > { %v3463_v9 = vpop.f32.mrf.mxu2 }
0x1011   : > { %v3466_v10 = vsel %vm476_vm1, %v3463_v9, -inf }
0x1012   : > { %3467 = vmax.xlane.f32.xlu2 %v3466_v10 }
0x101d   : > { %v3023_v35 = vpop.xlane.xlu0 %3022 }
0x101e   : > { %v3033_v46 = vmul.f32 %v3023_v35, %v7456_v7 }
0x1020   : > { %v8060_v13 = vsub.f32 %v3017_v29, %v3033_v46 }
0x1022   : > { %v3041_v39 = vmul.f32 %v8060_v13, %v8060_v13 }
0x1024   : > { %v3045_v50 = vsel %vm325_vm0, %v3041_v39, 0.0 }
0x1025   : > { %3046 = vadd.xlane.f32.xlu0 %v3045_v50 }
0x102c   : > { %v3026_v28 = vpop.xlane.xlu2 %3025 }
0x102d   : > { %v3034_v33 = vmul.f32 %v3026_v28, %v7456_v7 }
0x102f   : > { %v8066_v2 = vsub.f32 %v3018_v63, %v3034_v33 }
0x1031   : > { %v3042_v14 = vmul.f32 %v8066_v2, %v8066_v2 }
0x1033   : > { %v3048_v37 = vsel %vm325_vm0, %v3042_v14, 0.0 }
0x1034   : > { %3049 = vadd.xlane.f32.xlu2 %v3048_v37  ;;  %v3437_v14 = vpop.f32.mrf.mxu3 }
0x106d   : > { %v3029_v31 = vpop.xlane.xlu1 %3028 }
0x106e   : > { %v3035_v40 = vmul.f32 %v3029_v31, %v7456_v7 }
0x1070   : > { %v8072_v11 = vsub.f32 %v3019_v5, %v3035_v40 }
0x1072   : > { %v3043_v41 = vmul.f32 %v8072_v11, %v8072_v11 }
0x1074   : > { %v3051_v26 = vsel %vm325_vm0, %v3043_v41, 0.0 }
0x1075   : > { %3052 = vadd.xlane.f32.xlu0 %v3051_v26 }
0x1076   : > { %v3032_v15 = vpop.xlane.xlu0 %3031 }
0x1077   : > { %v3036_v24 = vmul.f32 %v3032_v15, %v7456_v7 }
0x1079   : > { %v8078_v51 = vsub.f32 %v3020_v27, %v3036_v24 }
0x107b   : > { %v3044_v42 = vmul.f32 %v8078_v51, %v8078_v51 }
0x107d   : > { %v3054_v47 = vsel %vm325_vm0, %v3044_v42, 0.0 }
0x107e   : > { %3055 = vadd.xlane.f32.xlu2 %v3054_v47 }
0x1085   : > { %v3468_v44 = vpop.xlane.xlu2 %3467 }
0x1086   : > { %v3469_v30 = vsub.f32 %v3463_v9, %v3468_v44 }
0x1088   : > { %v3470_v38 = vmul.f32 1.442695, %v3469_v30 }
0x1089   : > { %3417 = vrot.lane.b32.xlu0 %v7995_v34, %s6895_s10  ;;  %v6051_v34 = vld [vmem:[%s8870_s2 + $0xe8] sm:$0xff] }
0x108a   : > { %6730 = vpow2.f32 %v3470_v38  ;;  %3146 = vmatpush.msra.mxu0 %v6051_v34 }
0x108c   : > { %3147 = vmatpush.msra.mxu0 %v6050_v48  ;;  %v6060_v48 = vld [vmem:[%s8870_s2 + $0x130] sm:$0xff] }
0x1090   : > { %v8085_v29 = vpop.eup %6730 }
0x1091   : > { %v3472_v61 = vsel %vm476_vm1, %v8085_v29, 0.0  ;;  %3642 = vrot.lane.b32.xlu0 %v8028_v32, %s6896_s11 }
0x1092   : > { %3473 = vadd.xlane.f32.xlu1 %v3472_v61 }
0x1096   : > { %3516 = vrot.lane.b32.xlu2 %v8028_v32, %s6898_s15 }
0x1098   : > { %v3047_v60 = vpop.xlane.xlu0 %3046 }
0x1099   : > { %v3057_v62 = vmul.f32 %v3047_v60, %v7456_v7  ;;  %3745 = vrot.lane.b32.xlu0 %v8028_v32, %s6897_s12  ;;  %v8114_v32 = vperm.slane %v8040_v43, 4 }
0x109b   : > { %v3061_v1 = vadd.f32 1e-05, %v3057_v62 }
0x109d   : > { %6732 = vrsqrt.f32 %v3061_v1  ;;  %vm3071_vm8 = vweird.f32 %v3061_v1 }
0x109e   : > { %3640 = vrot.lane.b32.xlu2 %v8032_v56, %s6896_s11 }
0x10a3   : > { %v6733_v63 = vpop.eup %6732 }
0x10a4   : > { %v3066_v36 = vmul.f32 %v6733_v63, %v3061_v1  ;;  %vm3072_vm7 = vweird.f32 %v6733_v63  ;;  %v6059_v1 = vld [vmem:[%s8870_s2 + $0x128] sm:$0xff] }
0x10a5   : > { %vm3073_vm10 = vmor %vm3071_vm8, %vm3072_vm7 }
0x10a6   : > { %v3067_v23 = vmul.f32 %v6733_v63, %v3066_v36  ;;  %v6058_v36 = vld [vmem:[%s8870_s2 + $0x120] sm:$0xff] }
0x10a7   : > { %v3050_v4 = vpop.xlane.xlu2 %3049 }
0x10a8   : > { %v3068_v54 = vmul.f32 0.5, %v3067_v23  ;;  %v3058_v57 = vmul.f32 %v3050_v4, %v7456_v7 }
0x10aa   : > { %v3069_v3 = vsub.f32 1.5, %v3068_v54  ;;  %v3062_v18 = vadd.f32 1e-05, %v3058_v57  ;;  %v6056_v57 = vld [vmem:[%s8870_s2 + $0x110] sm:$0xff] }
0x10ab   : > { %3514 = vrot.lane.b32.xlu1 %v8032_v56, %s6898_s15 }
0x10ac   : > { %v3070_v6 = vmul.f32 %v6733_v63, %v3069_v3  ;;  %6734 = vrsqrt.f32 %v3062_v18  ;;  %vm3081_vm12 = vweird.f32 %v3062_v18 }
0x10ae   : > { %v3074_v45 = vsel %vm3073_vm10, %v6733_v63, %v3070_v6 }
0x10af   : > { %v3105_v22 = vmul.f32 %v3074_v45, %v8060_v13 }
0x10b1   : > { %v3110_v17 = vmul.f32 %v8114_v32, %v3105_v22 }
0x10b2   : > { %v6735_v5 = vpop.eup %6734 }
0x10b3   : > { %3743 = vrot.lane.b32.xlu1 %v8032_v56, %s6897_s12  ;;  %v8124_v53 = vadd.f32 %v8117_v19, %v3110_v17  ;;  %v3076_v58 = vmul.f32 %v6735_v5, %v3062_v18  ;;  %vm3082_vm11 = vweird.f32 %v6735_v5  ;;  %v6055_v17 = vld [vmem:[%s8870_s2 + $0x108] sm:$0xff] }
0x10b4   : > { %vm3083_vm13 = vmor %vm3081_vm12, %vm3082_vm11 }
0x10b5   : > { %v3077_v59 = vmul.f32 %v6735_v5, %v3076_v58  ;;  %6139 = vmatmul.msk.f32.vlgmr.msra.gmra.mxu0 %vm325_vm0, %v8124_v53  ;;  %v6054_v58 = vld [vmem:[%s8870_s2 + $0x100] sm:$0xff] }
0x10b7   : > { %v3078_v12 = vmul.f32 0.5, %v3077_v59  ;;  %v3314_v59 = vld [vmem:[%s8872_s4 + $0x20] sm:$0xff] }
0x10b9   : > { %v3079_v8 = vsub.f32 1.5, %v3078_v12 }
0x10bb   : > { %v3080_v27 = vmul.f32 %v6735_v5, %v3079_v8 }
0x10bd   : > { %v3084_v16 = vsel %vm3083_vm13, %v6735_v5, %v3080_v27 }
0x10be   : > { %v3106_v9 = vmul.f32 %v3084_v16, %v8066_v2  ;;  %v3119_v16 = vperm.slane %v8040_v43, 2 }
0x10c0   : > { %v3111_v10 = vmul.f32 %v8114_v32, %v3106_v9 }
0x10c2   : > { %v8131_v56 = vadd.f32 %v8117_v19, %v3111_v10 }
0x10c4   : > { %6140 = vmatmul.msk.f32.gmra.mxu0 %vm325_vm0, %v8131_v56 }
0x10e8   : > { %v3053_v20 = vpop.xlane.xlu0 %3052 }
0x10e9   : > { %v3059_v21 = vmul.f32 %v3053_v20, %v7456_v7 }
0x10eb   : > { %v3063_v0 = vadd.f32 1e-05, %v3059_v21 }
0x10ed   : > { %6736 = vrsqrt.f32 %v3063_v0  ;;  %vm3091_vm15 = vweird.f32 %v3063_v0 }
0x10f1   : > { %v3056_v35 = vpop.xlane.xlu2 %3055 }
0x10f2   : > { %v3060_v46 = vmul.f32 %v3056_v35, %v7456_v7 }
0x10f3   : > { %v6737_v13 = vpop.eup %6736 }
0x10f4   : > { %v3064_v39 = vadd.f32 1e-05, %v3060_v46  ;;  %v3086_v50 = vmul.f32 %v6737_v13, %v3063_v0  ;;  %vm3092_vm14 = vweird.f32 %v6737_v13 }
0x10f5   : > { %vm3093_vm2 = vmor %vm3091_vm15, %vm3092_vm14 }
0x10f6   : > { %6738 = vrsqrt.f32 %v3064_v39  ;;  %v3087_v28 = vmul.f32 %v6737_v13, %v3086_v50  ;;  %vm3101_vm4 = vweird.f32 %v3064_v39 }
0x10f8   : > { %v3088_v33 = vmul.f32 0.5, %v3087_v28 }
0x10f9   : > { %v3517_v2 = vpop.permute.xlu2 %3516 }
0x10fa   : > { %6153 = vmatpush.xpose.msk.msrb.mxu2 %vm476_vm1, %v3517_v2  ;;  %v3089_v37 = vsub.f32 1.5, %v3088_v33 }
0x10fb   : > { %v3418_v40 = vpop.permute.xlu0 %3417 }
0x10fc   : > { %v6739_v31 = vpop.eup %6738  ;;  %v3090_v41 = vmul.f32 %v6737_v13, %v3089_v37  ;;  %v8138_v15 = vadd.f32 %v3437_v14, %v3418_v40 }
0x10fd   : > { %v3096_v26 = vmul.f32 %v6739_v31, %v3064_v39  ;;  %vm3102_vm3 = vweird.f32 %v6739_v31 }
0x10fe   : > { %v3094_v24 = vsel %vm3093_vm2, %v6737_v13, %v3090_v41  ;;  %3509 = vmatpush.msrb.mxu3 %v8138_v15  ;;  %vm3103_vm5 = vmor %vm3101_vm4, %vm3102_vm3 }
0x10ff   : > { %v3097_v42 = vmul.f32 %v6739_v31, %v3096_v26  ;;  %v3107_v47 = vmul.f32 %v3094_v24, %v8072_v11  ;;  %v6061_v11 = vld [vmem:[%s8870_s2 + $0x138] sm:$0xff] }
0x1100   : > { %3186 = vmatpush.msra.mxu1 %v6061_v11 }
0x1101   : > { %v3098_v44 = vmul.f32 0.5, %v3097_v42  ;;  %v3112_v30 = vmul.f32 %v8114_v32, %v3107_v47  ;;  %v3641_v27 = vpop.permute.xlu2 %3640 }
0x1102   : > { %3187 = vmatpush.msra.mxu1 %v6060_v48 }
0x1103   : > { %v3099_v38 = vsub.f32 1.5, %v3098_v44  ;;  %v3643_v52 = vpop.permute.xlu0 %3642  ;;  %v8144_v61 = vadd.f32 %v8117_v19, %v3112_v30 }
0x1104   : > { %6158 = vmatpush.xpose.msk.msra.mxu2 %vm476_vm1, %v3643_v52  ;;  %3188 = vmatpush.msra.mxu1 %v6059_v1 }
0x1105   : > { %v3100_v49 = vmul.f32 %v6739_v31, %v3099_v38  ;;  %v3474_v34 = vpop.xlane.xlu1 %3473  ;;  %6141 = vmatmul.msk.f32.gmra.mxu0 %vm325_vm0, %v8144_v61 }
0x1106   : > { %6740 = vrcp.f32 %v3474_v34  ;;  %3189 = vmatpush.msra.mxu1 %v6058_v36  ;;  %v3486_v18 = vand.u32 2147483648, %v3474_v34  ;;  %vm3480_vm7 = vweird.f32 %v3474_v34 }
0x1107   : > { %v3104_v60 = vsel %vm3103_vm5, %v6739_v31, %v3100_v49 }
0x1108   : > { %v3108_v62 = vmul.f32 %v3104_v60, %v8078_v51  ;;  %v6057_v51 = vld [vmem:[%s8870_s2 + $0x118] sm:$0xff] }
0x1109   : > { %3190 = vmatpush.msra.mxu1 %v6057_v51 }
0x110a   : > { %v3113_v63 = vmul.f32 %v8114_v32, %v3108_v62  ;;  %v3484_v32 = vand.u32 2147483647, %v3474_v34 }
0x110b   : > { %3191 = vmatpush.msra.mxu1 %v6056_v57  ;;  %v3746_v21 = vpop.permute.xlu0 %3745 }
0x110c   : > { %v6741_v23 = vpop.eup %6740  ;;  %v8164_v4 = vadd.f32 %v8117_v19, %v3113_v63  ;;  %v3487_v19 = vor.u32 1.1754944e-38, %v3486_v18  ;;  %vm3485_vm10 = vcmp.eq.f32.partialorder %v3484_v32, 8.507059e+37 }
0x110d   : > { %v3476_v54 = vmul.f32 %v6741_v23, %v3474_v34  ;;  %vm3481_vm6 = vweird.f32 %v6741_v23  ;;  %3192 = vmatpush.msra.mxu1 %v6055_v17 }
0x110e   : > { %6142 = vmatmul.msk.f32.gmra.mxu0 %vm325_vm0, %v8164_v4  ;;  %vm3482_vm8 = vmor %vm3480_vm7, %vm3481_vm6 }
0x110f   : > { %v3477_v3 = vsub.f32 1.0, %v3476_v54  ;;  %3193 = vmatpush.msra.mxu1 %v6054_v58 }
0x1111   : > { %v3478_v6 = vmul.f32 %v6741_v23, %v3477_v3  ;;  %3635 = vmatpush.msrb.mxu1 %v3314_v59 }
0x1113   : > { %v3479_v45 = vadd.f32 %v6741_v23, %v3478_v6 }
0x1115   : > { %v3483_v22 = vsel %vm3482_vm8, %v6741_v23, %v3479_v45  ;;  %v3165_v23 = vperm.slane %v8040_v43, 3 }
0x1116   : > { %v3488_v5 = vsel %vm3485_vm10, %v3487_v19, %v3483_v22 }
0x1117   : > { %v3490_v12 = vmul.f32 %v8085_v29, %v3488_v5 }
0x1119   : > { %6152 = vmatmul.msk.f32.vlgmr.msrb.gmra.mxu3 %vm476_vm1, %v3490_v12 }
0x111d   : > { %v3515_v8 = vpop.permute.xlu1 %3514 }
0x111e   : > { %6154 = vmatmul.msk.f32.vlgmr.msrb.gmra.mxu2 %vm476_vm1, %v3515_v8 }
0x1125   : > { %v3744_v31 = vpop.permute.xlu1 %3743 }
0x1126   : > { %6159 = vmatmul.msk.f32.vlgmr.msra.gmra.mxu2 %vm476_vm1, %v3641_v27 }
0x1132   : > { %v3149_v9 = vpop.f32.mrf.mxu0 }
0x1133   : > { %v3150_v10 = vadd.f32 %v3149_v9, %v3119_v16 }
0x1135   : > { %v3161_v20 = vmax.f32 %v3150_v10, 0.0 }
0x1137   : > { %6143 = vmatmul.msk.f32.vlgmr.msra.gmra.mxu1 %vm1650_vm9, %v3161_v20 }
0x1138   : > { %6162 = vmatpush.xpose.msk.msra.mxu1 %vm476_vm1, %v3746_v21 }
0x1141   : > { %v3152_v29 = vpop.f32.mrf.mxu0 }
0x1142   : > { %v3153_v0 = vadd.f32 %v3152_v29, %v3119_v16 }
0x1144   : > { %v3162_v35 = vmax.f32 %v3153_v0, 0.0 }
0x1146   : > { %6144 = vmatmul.msk.f32.gmra.mxu1 %vm1650_vm9, %v3162_v35 }
0x1182   : > { %v3155_v46 = vpop.f32.mrf.mxu0 }
0x1183   : > { %v3156_v13 = vadd.f32 %v3155_v46, %v3119_v16 }
0x1185   : > { %v3163_v39 = vmax.f32 %v3156_v13, 0.0 }
0x1187   : > { %6145 = vmatmul.msk.f32.gmra.mxu1 %vm1650_vm9, %v3163_v39 }
0x118b   : > { %v3158_v50 = vpop.f32.mrf.mxu0 }
0x118c   : > { %v3159_v28 = vadd.f32 %v3158_v50, %v3119_v16 }
0x118e   : > { %v3164_v33 = vmax.f32 %v3159_v28, 0.0 }
0x1190   : > { %6146 = vmatmul.msk.f32.gmra.mxu1 %vm1650_vm9, %v3164_v33 }
0x119c   : > { %v3511_v2 = vpop.f32.mrf.mxu3 }
0x119d   : > { %6157 = vmatmul.msk.f32.vlgmr.msrb.gmra.mxu1 %vm476_vm1, %v3511_v2 }
0x11a1   : > { %v3539_v14 = vpop.f32.mrf.mxu2 }
0x11a2   : > { %v3542_v37 = vsel %vm476_vm1, %v3539_v14, -inf }
0x11a3   : > { %3543 = vmax.xlane.f32.xlu0 %v3542_v37 }
0x11a5   : > { %6163 = vmatmul.msk.f32.vlgmr.msra.gmra.mxu1 %vm476_vm1, %v3744_v31 }
0x11a9   : > { %v3665_v40 = vpop.f32.mrf.mxu2 }
0x11aa   : > { %v3668_v41 = vsel %vm476_vm1, %v3665_v40, -inf }
0x11ab   : > { %3669 = vmax.xlane.f32.xlu1 %v3668_v41 }
0x11b4   : > { %v8197_v26 = vpop.f32.mrf.mxu1 }
0x11c3   : > { %v3198_v24 = vpop.f32.mrf.mxu1 }
0x11c4   : > { %v3199_v51 = vadd.f32 %v3198_v24, %v3165_v23 }
0x11c6   : > { %v8212_v57 = vadd.f32 %v3199_v51, %v8131_v56 }
0x11c8   : > { %v3214_v18 = vsel %vm325_vm0, %v8212_v57, 0.0 }
0x1204   : > { %v3201_v42 = vpop.f32.mrf.mxu1 }
0x1205   : > { %v3202_v54 = vadd.f32 %v3201_v42, %v3165_v23 }
0x1207   : > { %v8215_v3 = vadd.f32 %v3202_v54, %v8144_v61 }
0x1209   : > { %v3217_v6 = vsel %vm325_vm0, %v8215_v3, 0.0 }
0x120d   : > { %v8199_v47 = vpop.f32.mrf.mxu1 }
0x120e   : > { %v3205_v42 = vadd.f32 %v8199_v47, %v3165_v23 }
0x1216   : > { %v3544_v44 = vpop.xlane.xlu0 %3543 }
0x1217   : > { %v3545_v30 = vsub.f32 %v3539_v14, %v3544_v44 }
0x1219   : > { %v3546_v52 = vmul.f32 1.442695, %v3545_v30 }
0x121a   : > { %v8201_v38 = vpop.f32.mrf.mxu1 }
0x121b   : > { %6742 = vpow2.f32 %v3546_v52 }
0x121e   : > { %v3670_v49 = vpop.xlane.xlu1 %3669 }
0x121f   : > { %v3671_v34 = vsub.f32 %v3665_v40, %v3670_v49  ;;  %v3196_v40 = vadd.f32 %v8197_v26, %v3165_v23  ;;  %v3210_v26 = vadd.f32 %v3205_v42, %v8164_v4 }
0x1221   : > { %v3672_v11 = vmul.f32 1.442695, %v3671_v34  ;;  %v6743_v62 = vpop.eup %6742  ;;  %v3207_v41 = vadd.f32 %v3196_v40, %v8124_v53 }
0x1222   : > { %v3768_v48 = vpop.f32.mrf.mxu1  ;;  %v3548_v36 = vsel %vm476_vm1, %v6743_v62, 0.0 }
0x1223   : > { %6744 = vpow2.f32 %v3672_v11  ;;  %v3771_v60 = vsel %vm476_vm1, %v3768_v48, -inf  ;;  %v3211_v52 = vsel %vm325_vm0, %v3207_v41, 0.0 }
0x1224   : > { %3772 = vmax.xlane.f32.xlu2 %v3771_v60  ;;  %v3220_v60 = vsel %vm325_vm0, %v3210_v26, 0.0 }
0x1229   : > { %v6745_v1 = vpop.eup %6744 }
0x122a   : > { %v3674_v63 = vsel %vm476_vm1, %v6745_v1, 0.0 }
0x122b   : > { %3675 = vadd.xlane.f32.xlu1 %v3674_v63  ;;  %v3316_v63 = vld [vmem:[%s8872_s4 + $0x30] sm:$0xff] }
0x122c   : > { %3549 = vadd.xlane.f32.xlu2 %v3548_v36 }
0x1244   : > { %3693 = vrot.lane.b32.xlu1 %v8138_v15, %s6896_s11  ;;  %3568 = vrot.lane.b32.xlu2 %v8138_v15, %s6898_s15 }
0x126d   : > { %3215 = vadd.xlane.f32.xlu2 %v3214_v18 }
0x126e   : > { %3218 = vadd.xlane.f32.xlu1 %v3217_v6 }
0x1297   : > { %v3773_v32 = vpop.xlane.xlu2 %3772 }
0x1298   : > { %v3774_v45 = vsub.f32 %v3768_v48, %v3773_v32 }
0x129a   : > { %v3775_v19 = vmul.f32 1.442695, %v3774_v45 }
0x129c   : > { %6746 = vpow2.f32 %v3775_v19 }
0x129e   : > { %v3676_v22 = vpop.xlane.xlu1 %3675 }
0x129f   : > { %6748 = vrcp.f32 %v3676_v22  ;;  %v3550_v17 = vpop.xlane.xlu2 %3549  ;;  %v3688_v13 = vand.u32 2147483648, %v3676_v22  ;;  %vm3682_vm2 = vweird.f32 %v3676_v22  ;;  %v3686_v50 = vand.u32 2147483647, %v3676_v22 }
0x12a0   : > { %6750 = vrcp.f32 %v3550_v17  ;;  %v3562_v9 = vand.u32 2147483648, %v3550_v17  ;;  %v3560_v21 = vand.u32 2147483647, %v3550_v17  ;;  %vm3556_vm12 = vweird.f32 %v3550_v17 }
0x12a1   : > { %v3689_v2 = vor.u32 1.1754944e-38, %v3688_v13  ;;  %vm3687_vm4 = vcmp.eq.f32.partialorder %v3686_v50, 8.507059e+37 }
0x12a2   : > { %v8221_v56 = vpop.eup %6746  ;;  %v3563_v0 = vor.u32 1.1754944e-38, %v3562_v9  ;;  %vm3561_vm15 = vcmp.eq.f32.partialorder %v3560_v21, 8.507059e+37  ;;  %v3320_v21 = vld [vmem:[%s8872_s4 + $0x50] sm:$0xff] }
0x12a3   : > { %v3777_v61 = vsel %vm476_vm1, %v8221_v56, 0.0 }
0x12a4   : > { %3778 = vadd.xlane.f32.xlu0 %v3777_v61 }
0x12a5   : > { %v6749_v5 = vpop.eup %6748 }
0x12a6   : > { %v6751_v58 = vpop.eup %6750  ;;  %v3678_v59 = vmul.f32 %v6749_v5, %v3676_v22  ;;  %vm3683_vm14 = vweird.f32 %v6749_v5 }
0x12a7   : > { %v3552_v12 = vmul.f32 %v6751_v58, %v3550_v17  ;;  %v3569_v8 = vpop.permute.xlu2 %3568  ;;  %vm3557_vm11 = vweird.f32 %v6751_v58  ;;  %vm3684_vm3 = vmor %vm3682_vm2, %vm3683_vm14 }
0x12a8   : > { %v3679_v27 = vsub.f32 1.0, %v3678_v59  ;;  %3589 = vmatpush.msra.mxu3 %v3569_v8  ;;  %vm3558_vm13 = vmor %vm3556_vm12, %vm3557_vm11 }
0x12a9   : > { %v3553_v16 = vsub.f32 1.0, %v3552_v12 }
0x12aa   : > { %v3680_v10 = vmul.f32 %v6749_v5, %v3679_v27 }
0x12ab   : > { %v3554_v20 = vmul.f32 %v6751_v58, %v3553_v16 }
0x12ac   : > { %v3681_v35 = vadd.f32 %v6749_v5, %v3680_v10  ;;  %v3317_v10 = vld [vmem:[%s8872_s4 + $0x38] sm:$0xff] }
0x12ad   : > { %v3555_v29 = vadd.f32 %v6751_v58, %v3554_v20 }
0x12ae   : > { %v3685_v33 = vsel %vm3684_vm3, %v6749_v5, %v3681_v35  ;;  %v3319_v35 = vld [vmem:[%s8872_s4 + $0x48] sm:$0xff] }
0x12af   : > { %v3559_v46 = vsel %vm3558_vm13, %v6751_v58, %v3555_v29  ;;  %v3690_v14 = vsel %vm3687_vm4, %v3689_v2, %v3685_v33  ;;  %v3321_v29 = vld [vmem:[%s8872_s4 + $0x58] sm:$0xff]  ;;  %v3846_v33 = vperm.slane %v7992_v55, 1 }
0x12b0   : > { %v3564_v39 = vsel %vm3561_vm15, %v3563_v0, %v3559_v46  ;;  %v3692_v31 = vmul.f32 %v6745_v1, %v3690_v14  ;;  %v6464_v0 = vpack.i.bf16 %v3320_v21, %v3321_v29  ;;  %v3318_v46 = vld [vmem:[%s8872_s4 + $0x40] sm:$0xff] }
0x12b1   : > { %v3566_v28 = vmul.f32 %v6743_v62, %v3564_v39  ;;  %v3315_v62 = vld [vmem:[%s8872_s4 + $0x28] sm:$0xff] }
0x12b2   : > { %3612 = vmatpush.msrb.mxu0 %v3315_v62 }
0x12b3   : > { %6155 = vmatmul.msk.f32.vlgmr.msra.gmra.mxu3 %vm476_vm1, %v3566_v28 }
0x12b4   : > { %3737 = vmatpush.msra.mxu0 %v3316_v63 }
0x12b6   : > { %v3694_v37 = vpop.permute.xlu1 %3693 }
0x12b7   : > { %3714 = vmatpush.msrb.mxu3 %v3694_v37 }
0x12b8   : > { %3796 = vrot.lane.b32.xlu0 %v8138_v15, %s6897_s12 }
0x12b9   : > { %3840 = vmatpush.msra.mxu3 %v3317_v10 }
0x12bb   : > { %6160 = vmatmul.msk.f32.vlgmr.msrb.gmra.mxu3 %vm476_vm1, %v3692_v31 }
0x12e0   : > { %v3216_v24 = vpop.xlane.xlu2 %3215 }
0x12e1   : > { %v3224_v44 = vmul.f32 %v3216_v24, %v7456_v7  ;;  %v3219_v30 = vpop.xlane.xlu1 %3218 }
0x12e2   : > { %v3225_v49 = vmul.f32 %v3219_v30, %v7456_v7  ;;  %3212 = vadd.xlane.f32.xlu0 %v3211_v52 }
0x12e3   : > { %v8236_v15 = vsub.f32 %v8212_v57, %v3224_v44 }
0x12e4   : > { %v8239_v34 = vsub.f32 %v8215_v3, %v3225_v49 }
0x12e5   : > { %v3232_v53 = vmul.f32 %v8236_v15, %v8236_v15 }
0x12e6   : > { %v3233_v47 = vmul.f32 %v8239_v34, %v8239_v34 }
0x12e7   : > { %v3238_v11 = vsel %vm325_vm0, %v3232_v53, 0.0 }
0x12e8   : > { %3239 = vadd.xlane.f32.xlu1 %v3238_v11  ;;  %v3241_v48 = vsel %vm325_vm0, %v3233_v47, 0.0 }
0x12e9   : > { %3242 = vadd.xlane.f32.xlu2 %v3241_v48 }
0x12ea   : > { %3221 = vadd.xlane.f32.xlu0 %v3220_v60 }
0x1317   : > { %v3779_v4 = vpop.xlane.xlu0 %3778 }
0x1318   : > { %6752 = vrcp.f32 %v3779_v4  ;;  %v3791_v51 = vand.u32 2147483648, %v3779_v4  ;;  %v3789_v57 = vand.u32 2147483647, %v3779_v4  ;;  %vm3785_vm6 = vweird.f32 %v3779_v4 }
0x131a   : > { %v3792_v18 = vor.u32 1.1754944e-38, %v3791_v51  ;;  %vm3790_vm8 = vcmp.eq.f32.partialorder %v3789_v57, 8.507059e+37 }
0x131e   : > { %v6753_v1 = vpop.eup %6752 }
0x131f   : > { %v3781_v36 = vmul.f32 %v6753_v1, %v3779_v4  ;;  %vm3786_vm5 = vweird.f32 %v6753_v1 }
0x1320   : > { %vm3787_vm7 = vmor %vm3785_vm6, %vm3786_vm5 }
0x1321   : > { %v3782_v23 = vsub.f32 1.0, %v3781_v36 }
0x1323   : > { %v3783_v54 = vmul.f32 %v6753_v1, %v3782_v23 }
0x1325   : > { %v3784_v3 = vadd.f32 %v6753_v1, %v3783_v54 }
0x1327   : > { %v3788_v6 = vsel %vm3787_vm7, %v6753_v1, %v3784_v3 }
0x1328   : > { %v3793_v32 = vsel %vm3790_vm8, %v3792_v18, %v3788_v6 }
0x1329   : > { %v3795_v45 = vmul.f32 %v8221_v56, %v3793_v32 }
0x132a   : > { %v3797_v19 = vpop.permute.xlu0 %3796 }
0x132b   : > { %3817 = vmatpush.msrb.mxu2 %v3797_v19 }
0x132c   : > { %6164 = vmatmul.msk.f32.vlgmr.msrb.gmra.mxu2 %vm476_vm1, %v3795_v45 }
0x1336   : > { %v3591_v22 = vpop.f32.mrf.mxu3 }
0x1337   : > { %6156 = vmatmul.msk.f32.vlgmr.msrb.gmra.mxu0 %vm476_vm1, %v3591_v22 }
0x1338   : > { %3891 = vmatpush.msrb.mxu0 %v3321_v29 }
0x133a   : > { %3892 = vmatpush.msrb.mxu0 %v3320_v21  ;;  %v3299_v21 = vperm.slane %v8040_v43, 6 }
0x133c   : > { %3893 = vmatpush.msrb.mxu0 %v3319_v35 }
0x133e   : > { %v3716_v17 = vpop.f32.mrf.mxu3  ;;  %3894 = vmatpush.msrb.mxu0 %v3318_v46 }
0x133f   : > { %6161 = vmatmul.msk.f32.vlgmr.msra.gmra.mxu0 %vm476_vm1, %v3716_v17 }
0x1355   : > { %v3213_v61 = vpop.xlane.xlu0 %3212 }
0x1356   : > { %v3223_v5 = vmul.f32 %v3213_v61, %v7456_v7 }
0x1358   : > { %v8260_v58 = vsub.f32 %v3207_v41, %v3223_v5  ;;  %v6469_v41 = vpack.i.bf16 %v3318_v46, %v3319_v35 }
0x135a   : > { %v3231_v59 = vmul.f32 %v8260_v58, %v8260_v58 }
0x135b   : > { %v3240_v44 = vpop.xlane.xlu1 %3239 }
0x135c   : > { %v3235_v56 = vsel %vm325_vm0, %v3231_v59, 0.0  ;;  %v3248_v55 = vmul.f32 %v3240_v44, %v7456_v7 }
0x135d   : > { %3236 = vadd.xlane.f32.xlu0 %v3235_v56  ;;  %v3222_v12 = vpop.xlane.xlu0 %3221 }
0x135e   : > { %v3226_v8 = vmul.f32 %v3222_v12, %v7456_v7 }
0x1360   : > { %v8266_v27 = vsub.f32 %v3210_v26, %v3226_v8  ;;  %v3243_v26 = vpop.xlane.xlu2 %3242 }
0x1361   : > { %v3249_v47 = vmul.f32 %v3243_v26, %v7456_v7 }
0x1362   : > { %v3234_v16 = vmul.f32 %v8266_v27, %v8266_v27 }
0x1363   : > { %v3253_v4 = vadd.f32 1e-05, %v3249_v47 }
0x1364   : > { %v3244_v9 = vsel %vm325_vm0, %v3234_v16, 0.0 }
0x1365   : > { %3245 = vadd.xlane.f32.xlu1 %v3244_v9  ;;  %vm3281_vm3 = vweird.f32 %v3253_v4 }
0x1371   : > { %6465 = vrot.lane.b32.xlu0 %v6464_v0, %s6894_s14 }
0x1379   : > { %6475 = vrot.lane.b32.xlu0 %v6464_v0, %s6895_s10 }
0x13af   : > { %v3819_v20 = vpop.f32.mrf.mxu2 }
0x13b0   : > { %6165 = vmatmul.msk.f32.vlgmr.msra.gmra.mxu3 %vm476_vm1, %v3819_v20 }
0x13b4   : > { %v3614_v13 = vpop.f32.mrf.mxu0 }
0x13b5   : > { %v3638_v50 = vadd.f32 %v8201_v38, %v3614_v13 }
0x13bc   : > { %v3739_v39 = vpop.f32.mrf.mxu0 }
0x13bd   : > { %v3742_v28 = vadd.f32 %v3739_v39, %v3638_v50 }
0x13d0   : > { %v3237_v24 = vpop.xlane.xlu0 %3236 }
0x13d1   : > { %v3247_v42 = vmul.f32 %v3237_v24, %v7456_v7 }
0x13d3   : > { %v3251_v38 = vadd.f32 1e-05, %v3247_v42 }
0x13d5   : > { %6754 = vrsqrt.f32 %v3251_v38  ;;  %vm3261_vm11 = vweird.f32 %v3251_v38 }
0x13d8   : > { %v3246_v63 = vpop.xlane.xlu1 %3245 }
0x13d9   : > { %v3250_v23 = vmul.f32 %v3246_v63, %v7456_v7 }
0x13db   : > { %v6755_v53 = vpop.eup %6754  ;;  %v3254_v57 = vadd.f32 1e-05, %v3250_v23 }
0x13dc   : > { %v3256_v62 = vmul.f32 %v6755_v53, %v3251_v38  ;;  %vm3262_vm10 = vweird.f32 %v6755_v53 }
0x13dd   : > { %vm3263_vm12 = vmor %vm3261_vm11, %vm3262_vm10  ;;  %vm3291_vm6 = vweird.f32 %v3254_v57 }
0x13de   : > { %v3257_v1 = vmul.f32 %v6755_v53, %v3256_v62 }
0x13e0   : > { %v3258_v54 = vmul.f32 0.5, %v3257_v1 }
0x13e2   : > { %v3259_v6 = vsub.f32 1.5, %v3258_v54 }
0x13e3   : > { %v6466_v30 = vpop.permute.xlu0 %6465 }
0x13e4   : > { %v6468_v52 = vunpack.i.h.bf16 %v6466_v30  ;;  %v6467_v49 = vunpack.i.l.bf16 %v6466_v30  ;;  %v3260_v19 = vmul.f32 %v6755_v53, %v3259_v6 }
0x13e6   : > { %3944 = vmatpush.msrb.mxu1 %v6467_v49  ;;  %v3264_v5 = vsel %vm3263_vm12, %v6755_v53, %v3260_v19 }
0x13e7   : > { %v3295_v16 = vmul.f32 %v3264_v5, %v8260_v58 }
0x13e8   : > { %3945 = vmatpush.msrb.mxu1 %v6468_v52 }
0x13e9   : > { %v3300_v35 = vmul.f32 %v3299_v21, %v3295_v16 }
0x13eb   : > { %v6476_v11 = vpop.permute.xlu0 %6475 }
0x13ec   : > { %v6478_v48 = vunpack.i.h.bf16 %v6476_v11  ;;  %v6477_v60 = vunpack.i.l.bf16 %v6476_v11 }
0x13ee   : > { %3988 = vmatpush.msra.mxu2 %v6477_v60 }
0x13f0   : > { %3989 = vmatpush.msra.mxu2 %v6478_v48 }
0x1433   : > { %v3842_v2 = vpop.f32.mrf.mxu3 }
0x1434   : > { %v3845_v14 = vadd.f32 %v3842_v2, %v3742_v28  ;;  %v3304_v28 = vperm.slane %v8040_v43, 7 }
0x1436   : > { %v3847_v37 = vadd.f32 %v3846_v33, %v3845_v14  ;;  %v8309_v2 = vadd.f32 %v3304_v28, %v3300_v35 }
0x1438   : > { %v3848_v31 = vadd.f32 %v3847_v37, %v8008_v25  ;;  %v3252_v25 = vadd.f32 1e-05, %v3248_v55 }
0x143a   : > { %v3849_v40 = vsel %vm325_vm0, %v3848_v31, 0.0  ;;  %6756 = vrsqrt.f32 %v3252_v25  ;;  %vm3271_vm14 = vweird.f32 %v3252_v25 }
0x143b   : > { %3850 = vadd.xlane.f32.xlu2 %v3849_v40  ;;  %6758 = vrsqrt.f32 %v3253_v4 }
0x143c   : > { %6760 = vrsqrt.f32 %v3254_v57 }
0x1440   : > { %v6757_v36 = vpop.eup %6756 }
0x1441   : > { %v3266_v51 = vmul.f32 %v6757_v36, %v3252_v25  ;;  %v6759_v3 = vpop.eup %6758  ;;  %vm3272_vm13 = vweird.f32 %v6757_v36 }
0x1442   : > { %v3276_v32 = vmul.f32 %v6759_v3, %v3253_v4  ;;  %v6761_v56 = vpop.eup %6760  ;;  %vm3273_vm15 = vmor %vm3271_vm14, %vm3272_vm13  ;;  %vm3282_vm2 = vweird.f32 %v6759_v3 }
0x1443   : > { %v3267_v18 = vmul.f32 %v6757_v36, %v3266_v51  ;;  %v3286_v10 = vmul.f32 %v6761_v56, %v3254_v57  ;;  %vm3283_vm4 = vmor %vm3281_vm3, %vm3282_vm2  ;;  %vm3292_vm5 = vweird.f32 %v6761_v56 }
0x1444   : > { %v3277_v22 = vmul.f32 %v6759_v3, %v3276_v32  ;;  %vm3293_vm7 = vmor %vm3291_vm6, %vm3292_vm5 }
0x1445   : > { %v3268_v45 = vmul.f32 0.5, %v3267_v18  ;;  %v3287_v39 = vmul.f32 %v6761_v56, %v3286_v10 }
0x1446   : > { %v3278_v8 = vmul.f32 0.5, %v3277_v22 }
0x1447   : > { %v3269_v61 = vsub.f32 1.5, %v3268_v45  ;;  %v3288_v37 = vmul.f32 0.5, %v3287_v39 }
0x1448   : > { %v3279_v0 = vsub.f32 1.5, %v3278_v8 }
0x1449   : > { %v3270_v9 = vmul.f32 %v6757_v36, %v3269_v61  ;;  %v3289_v24 = vsub.f32 1.5, %v3288_v37 }
0x144a   : > { %v3280_v14 = vmul.f32 %v6759_v3, %v3279_v0 }
0x144b   : > { %v3274_v13 = vsel %vm3273_vm15, %v6757_v36, %v3270_v9  ;;  %v3290_v44 = vmul.f32 %v6761_v56, %v3289_v24 }
0x144c   : > { %v3296_v33 = vmul.f32 %v3274_v13, %v8236_v15 }
0x144d   : > { %v3294_v55 = vsel %vm3293_vm7, %v6761_v56, %v3290_v44 }
0x144e   : > { %v3301_v40 = vmul.f32 %v3299_v21, %v3296_v33  ;;  %v3298_v52 = vmul.f32 %v3294_v55, %v8266_v27 }
0x1450   : > { %v8314_v38 = vadd.f32 %v3304_v28, %v3301_v40  ;;  %v3303_v26 = vmul.f32 %v3299_v21, %v3298_v52 }
0x1452   : > { %v8337_v27 = vadd.f32 %v3304_v28, %v3303_v26 }
0x1453   : > { %6470 = vrot.lane.b32.xlu2 %v6469_v41, %s6894_s14 }
0x145b   : > { %6480 = vrot.lane.b32.xlu2 %v6469_v41, %s6895_s10  ;;  %v3284_v41 = vsel %vm3283_vm4, %v6759_v3, %v3280_v14 }
0x145c   : > { %v3297_v15 = vmul.f32 %v3284_v41, %v8239_v34  ;;  %v8326_v34 = vld [vmem:[%s8873_s5] sm:$0xff] }
0x145d   : > { %v8329_v25 = vperm.slane %v8326_v34, 2  ;;  %v3871_v23 = vperm.slane %v8326_v34, 6  ;;  %v3873_v54 = vperm.slane %v8326_v34, 7 }
0x145e   : > { %v3302_v30 = vmul.f32 %v3299_v21, %v3297_v15 }
0x1460   : > { %v8321_v49 = vadd.f32 %v3304_v28, %v3302_v30 }
0x14ae   : > { %v3851_v17 = vpop.xlane.xlu2 %3850 }
0x14af   : > { %v3852_v59 = vmul.f32 %v3851_v17, %v7456_v7 }
0x14b1   : > { %v8300_v12 = vsub.f32 %v3848_v31, %v3852_v59 }
0x14b3   : > { %v3854_v20 = vmul.f32 %v8300_v12, %v8300_v12 }
0x14b5   : > { %v3855_v29 = vsel %vm325_vm0, %v3854_v20, 0.0 }
0x14b6   : > { %v6471_v46 = vpop.permute.xlu2 %6470  ;;  %3856 = vadd.xlane.f32.xlu1 %v3855_v29 }
0x14b7   : > { %v6473_v50 = vunpack.i.h.bf16 %v6471_v46  ;;  %v6472_v58 = vunpack.i.l.bf16 %v6471_v46 }
0x14b9   : > { %3946 = vmatpush.msrb.mxu1 %v6472_v58 }
0x14bb   : > { %3947 = vmatpush.msrb.mxu1 %v6473_v50 }
0x14bc   : > { %6167 = vmatmul.msk.f32.vlgmr.msrb.gmra.mxu1 %vm325_vm0, %v8309_v2 }
0x14be   : > { %v6481_v31 = vpop.permute.xlu2 %6480 }
0x14bf   : > { %v6483_v42 = vunpack.i.h.bf16 %v6481_v31  ;;  %v6482_v43 = vunpack.i.l.bf16 %v6481_v31 }
0x14c1   : > { %3990 = vmatpush.msra.mxu2 %v6482_v43 }
0x14c3   : > { %3991 = vmatpush.msra.mxu2 %v6483_v42 }
0x14c4   : > { %6168 = vmatmul.msk.f32.gmra.mxu1 %vm325_vm0, %v8314_v38  ;;  %6171 = vmatmul.msk.f32.vlgmr.msra.gmra.mxu2 %vm325_vm0, %v8309_v2 }
0x14cc   : > { %6169 = vmatmul.msk.f32.gmra.mxu1 %vm325_vm0, %v8321_v49  ;;  %6172 = vmatmul.msk.f32.gmra.mxu2 %vm325_vm0, %v8314_v38 }
0x14cf   : > { %3917 = vrot.lane.b32.xlu1 %v8329_v25, %s6894_s14 }
0x14d4   : > { %6170 = vmatmul.msk.f32.gmra.mxu1 %vm325_vm0, %v8337_v27  ;;  %6173 = vmatmul.msk.f32.gmra.mxu2 %vm325_vm0, %v8321_v49 }
0x14d7   : > { %3973 = vrot.lane.b32.xlu1 %v8329_v25, %s6895_s10 }
0x14dc   : > { %6174 = vmatmul.msk.f32.gmra.mxu2 %vm325_vm0, %v8337_v27 }
0x1529   : > { %v3857_v53 = vpop.xlane.xlu1 %3856 }
0x152a   : > { %v3858_v47 = vmul.f32 %v3857_v53, %v7456_v7 }
0x152c   : > { %v3859_v11 = vadd.f32 1e-05, %v3858_v47 }
0x152e   : > { %6762 = vrsqrt.f32 %v3859_v11  ;;  %vm3866_vm10 = vweird.f32 %v3859_v11 }
0x1534   : > { %v6763_v48 = vpop.eup %6762 }
0x1535   : > { %v3861_v60 = vmul.f32 %v6763_v48, %v3859_v11  ;;  %vm3867_vm8 = vweird.f32 %v6763_v48 }
0x1536   : > { %vm3868_vm11 = vmor %vm3866_vm10, %vm3867_vm8 }
0x1537   : > { %v3862_v62 = vmul.f32 %v6763_v48, %v3861_v60 }
0x1539   : > { %v3863_v4 = vmul.f32 0.5, %v3862_v62  ;;  %v3949_v1 = vpop.f32.mrf.mxu1 }
0x153b   : > { %v3864_v63 = vsub.f32 1.5, %v3863_v4 }
0x153d   : > { %v3865_v36 = vmul.f32 %v6763_v48, %v3864_v63  ;;  %v3322_v63 = vld [vmem:[%s8872_s4 + $0x60] sm:$0xff] }
0x153f   : > { %v3869_v51 = vsel %vm3868_vm11, %v6763_v48, %v3865_v36 }
0x1540   : > { %v3870_v57 = vmul.f32 %v3869_v51, %v8300_v12 }
0x1541   : > { %v3952_v3 = vpop.f32.mrf.mxu1  ;;  %v3918_v6 = vpop.permute.xlu1 %3917 }
0x1542   : > { %v3872_v18 = vmul.f32 %v3871_v23, %v3870_v57  ;;  %v3953_v9 = vadd.f32 %v3952_v3, %v3918_v6  ;;  %v3950_v10 = vadd.f32 %v3949_v1, %v3918_v6 }
0x1544   : > { %v8351_v32 = vadd.f32 %v3873_v54, %v3872_v18 }
0x1546   : > { %6166 = vmatmul.msk.f32.vlgmr.msrb.gmra.mxu0 %vm325_vm0, %v8351_v32 }
0x1547   : > { %v3993_v45 = vpop.f32.mrf.mxu2 }
0x1549   : > { %v3955_v19 = vpop.f32.mrf.mxu1  ;;  %v3974_v22 = vpop.permute.xlu1 %3973 }
0x154a   : > { %v3994_v61 = vadd.f32 %v3993_v45, %v3974_v22  ;;  %v3956_v12 = vadd.f32 %v3955_v19, %v3918_v6 }
0x154f   : > { %v3996_v17 = vpop.f32.mrf.mxu2 }
0x1550   : > { %v3997_v5 = vadd.f32 %v3996_v17, %v3974_v22 }
0x1551   : > { %v3958_v59 = vpop.f32.mrf.mxu1 }
0x1552   : > { %v3959_v56 = vadd.f32 %v3958_v59, %v3918_v6  ;;  %v8355_v8 = vpack.i.bf16 %v3994_v61, %v3997_v5 }
0x1554   : > { %4096 = vrot.lane.b32.xlu1 %v3959_v56, %s6898_s15  ;;  %6175 = vmatpush.xpose.msk.msrb.mxu3 %vm476_vm1, %v3959_v56 }
0x1557   : > { %v3999_v16 = vpop.f32.mrf.mxu2 }
0x1558   : > { %6176 = vmatpush.xpose.msk.msrb.mxu3 %vm476_vm1, %v3956_v12  ;;  %v4000_v21 = vadd.f32 %v3999_v16, %v3974_v22 }
0x155c   : > { %4094 = vrot.lane.b32.xlu1 %v3956_v12, %s6898_s15  ;;  %6177 = vmatpush.xpose.msk.msrb.mxu3 %vm476_vm1, %v3953_v9 }
0x155f   : > { %v4002_v20 = vpop.f32.mrf.mxu2 }
0x1560   : > { %v4003_v29 = vadd.f32 %v4002_v20, %v3974_v22  ;;  %6178 = vmatpush.xpose.msk.msrb.mxu3 %vm476_vm1, %v3950_v10 }
0x1562   : > { %4080 = vmatpush.msra.mxu0 %v4003_v29  ;;  %v8363_v0 = vpack.i.bf16 %v4000_v21, %v4003_v29 }
0x1564   : > { %4081 = vmatpush.msra.mxu0 %v4000_v21  ;;  %4092 = vrot.lane.b32.xlu1 %v3953_v9, %s6898_s15 }
0x1566   : > { %4082 = vmatpush.msra.mxu0 %v3997_v5 }
0x1568   : > { %4083 = vmatpush.msra.mxu0 %v3994_v61 }
0x156c   : > { %4090 = vrot.lane.b32.xlu1 %v3950_v10, %s6898_s15 }
0x15c3   : > { %v3896_v35 = vpop.f32.mrf.mxu0 }
0x15c4   : > { %v3897_v46 = vadd.f32 %v3896_v35, %v8329_v25 }
0x15c6   : > { %v3899_v13 = vmul.f32 0.35355338, %v3897_v46  ;;  %v4097_v39 = vpop.permute.xlu1 %4096 }
0x15c7   : > { %6181 = vmatpush.xpose.msk.msrb.mxu0 %vm476_vm1, %v4097_v39 }
0x15c8   : > { %4088 = vrot.lane.b32.xlu1 %v3899_v13, %s6898_s15  ;;  %6179 = vmatmul.msk.f32.vlgmr.msrb.gmra.mxu3 %vm476_vm1, %v3899_v13 }
0x15ce   : > { %v4095_v50 = vpop.permute.xlu1 %4094 }
0x15cf   : > { %6182 = vmatpush.xpose.msk.msrb.mxu0 %vm476_vm1, %v4095_v50 }
0x15d0   : > { %4242 = vrot.lane.b32.xlu1 %v3953_v9, %s6896_s11 }
0x15d6   : > { %v4093_v58 = vpop.permute.xlu1 %4092 }
0x15d7   : > { %6183 = vmatpush.xpose.msk.msrb.mxu0 %vm476_vm1, %v4093_v58 }
0x15d8   : > { %4240 = vrot.lane.b32.xlu1 %v3950_v10, %s6896_s11 }
0x15de   : > { %v4091_v28 = vpop.permute.xlu1 %4090 }
0x15df   : > { %6184 = vmatpush.xpose.msk.msrb.mxu0 %vm476_vm1, %v4091_v28 }
0x15e0   : > { %4366 = vrot.lane.b32.xlu1 %v3953_v9, %s6897_s12 }
0x163a   : > { %v4089_v43 = vpop.permute.xlu1 %4088 }
0x1642   : > { %v4243_v44 = vpop.permute.xlu1 %4242 }
0x164a   : > { %v4241_v60 = vpop.permute.xlu1 %4240 }
0x164b   : > { %v4037_v33 = vpop.f32.mrf.mxu3 }
0x164c   : > { %v4040_v14 = vsel %vm325_vm0, %v4037_v33, -inf }
0x164d   : > { %4041 = vmax.xlane.f32.xlu0 %v4040_v14 }
0x1652   : > { %v4367_v54 = vpop.permute.xlu1 %4366 }
0x1661   : > { %4246 = vrot.lane.b32.xlu0 %v3959_v56, %s6896_s11 }
0x1669   : > { %4370 = vrot.lane.b32.xlu0 %v3959_v56, %s6897_s12 }
0x1671   : > { %4368 = vrot.lane.b32.xlu0 %v3956_v12, %s6897_s12 }
0x1679   : > { %4364 = vrot.lane.b32.xlu0 %v3950_v10, %s6897_s12 }
0x16c0   : > { %v4042_v37 = vpop.xlane.xlu0 %4041 }
0x16c1   : > { %v4043_v31 = vsub.f32 %v4037_v33, %v4042_v37 }
0x16c3   : > { %v4044_v40 = vmul.f32 1.442695, %v4043_v31 }
0x16c5   : > { %6764 = vpow2.f32 %v4044_v40 }
0x16cb   : > { %v6765_v41 = vpop.eup %6764 }
0x16cc   : > { %v4046_v24 = vsel %vm325_vm0, %v6765_v41, 0.0 }
0x16cd   : > { %4047 = vadd.xlane.f32.xlu2 %v4046_v24 }
0x16d3   : > { %v4247_v42 = vpop.permute.xlu0 %4246 }
0x16d4   : > { %6189 = vmatpush.xpose.msk.msra.mxu1 %vm476_vm1, %v4247_v42 }
0x16db   : > { %v4371_v23 = vpop.permute.xlu0 %4370 }
0x16e3   : > { %v4369_v51 = vpop.permute.xlu0 %4368 }
0x16e5   : > { %4244 = vrot.lane.b32.xlu2 %v3956_v12, %s6896_s11 }
0x16eb   : > { %v4365_v57 = vpop.permute.xlu0 %4364 }
0x16ed   : > { %4238 = vrot.lane.b32.xlu2 %v3899_v13, %s6896_s11 }
0x16f5   : > { %4362 = vrot.lane.b32.xlu2 %v3899_v13, %s6897_s12 }
0x1740   : > { %v4048_v15 = vpop.xlane.xlu2 %4047 }
0x1741   : > { %6766 = vrcp.f32 %v4048_v15  ;;  %v4060_v26 = vand.u32 2147483648, %v4048_v15  ;;  %v4058_v47 = vand.u32 2147483647, %v4048_v15  ;;  %vm4054_vm13 = vweird.f32 %v4048_v15 }
0x1743   : > { %v4061_v48 = vor.u32 1.1754944e-38, %v4060_v26  ;;  %vm4059_vm15 = vcmp.eq.f32.partialorder %v4058_v47, 8.507059e+37 }
0x1747   : > { %v6767_v30 = vpop.eup %6766 }
0x1748   : > { %v4050_v55 = vmul.f32 %v6767_v30, %v4048_v15  ;;  %v4245_v52 = vpop.permute.xlu2 %4244  ;;  %vm4055_vm12 = vweird.f32 %v6767_v30 }
0x1749   : > { %6190 = vmatpush.xpose.msk.msra.mxu1 %vm476_vm1, %v4245_v52  ;;  %vm4056_vm14 = vmor %vm4054_vm13, %vm4055_vm12 }
0x174a   : > { %v4051_v25 = vsub.f32 1.0, %v4050_v55 }
0x174c   : > { %v4052_v53 = vmul.f32 %v6767_v30, %v4051_v25 }
0x174d   : > { %6191 = vmatpush.xpose.msk.msra.mxu1 %vm476_vm1, %v4243_v44 }
0x174e   : > { %v4053_v11 = vadd.f32 %v6767_v30, %v4052_v53 }
0x1750   : > { %v4057_v62 = vsel %vm4056_vm14, %v6767_v30, %v4053_v11  ;;  %v4239_v36 = vpop.permute.xlu2 %4238 }
0x1751   : > { %v4062_v4 = vsel %vm4059_vm15, %v4061_v48, %v4057_v62  ;;  %6192 = vmatpush.xpose.msk.msra.mxu1 %vm476_vm1, %v4241_v60 }
0x1752   : > { %v4064_v1 = vmul.f32 %v6765_v41, %v4062_v4 }
0x1754   : > { %6180 = vmatmul.msk.f32.vlgmr.msra.gmra.mxu0 %vm325_vm0, %v4064_v1  ;;  %6193 = vmatmul.msk.f32.vlgmr.msra.gmra.mxu1 %vm476_vm1, %v4239_v36 }
0x1755   : > { %4233 = vmatpush.msra.mxu0 %v3322_v63  ;;  %v3323_v63 = vld [vmem:[%s8872_s4 + $0x68] sm:$0xff] }
0x1758   : > { %v4363_v45 = vpop.permute.xlu2 %4362 }
0x175c   : > { %6185 = vmatmul.msk.f32.vlgmr.msrb.gmra.mxu0 %vm476_vm1, %v4089_v43 }
0x175d   : > { %6196 = vmatpush.xpose.msk.msrb.mxu0 %vm476_vm1, %v4371_v23 }
0x1761   : > { %6197 = vmatpush.xpose.msk.msrb.mxu0 %vm476_vm1, %v4369_v51 }
0x1765   : > { %6198 = vmatpush.xpose.msk.msrb.mxu0 %vm476_vm1, %v4367_v54 }
0x1769   : > { %6199 = vmatpush.xpose.msk.msrb.mxu0 %vm476_vm1, %v4365_v57 }
0x17d1   : > { %v4085_v3 = vpop.f32.mrf.mxu0  ;;  %v4275_v18 = vpop.f32.mrf.mxu1 }
0x17d2   : > { %6188 = vmatmul.msk.f32.vlgmr.msra.gmra.mxu0 %vm476_vm1, %v4085_v3  ;;  %v4278_v6 = vsel %vm325_vm0, %v4275_v18, -inf }
0x17d3   : > { %4279 = vmax.xlane.f32.xlu0 %v4278_v6 }
0x17d9   : > { %v4125_v19 = vpop.f32.mrf.mxu0 }
0x17da   : > { %6200 = vmatmul.msk.f32.vlgmr.msrb.gmra.mxu0 %vm476_vm1, %v4363_v45  ;;  %v4128_v22 = vsel %vm325_vm0, %v4125_v19, -inf }
0x17db   : > { %4129 = vmax.xlane.f32.xlu1 %v4128_v22 }
0x1846   : > { %v4280_v17 = vpop.xlane.xlu0 %4279 }
0x1847   : > { %v4281_v61 = vsub.f32 %v4275_v18, %v4280_v17 }
0x1849   : > { %v4282_v5 = vmul.f32 1.442695, %v4281_v61 }
0x184b   : > { %6768 = vpow2.f32 %v4282_v5 }
0x184e   : > { %v4130_v59 = vpop.xlane.xlu1 %4129 }
0x184f   : > { %v4131_v56 = vsub.f32 %v4125_v19, %v4130_v59  ;;  %v8404_v12 = vpop.f32.mrf.mxu0 }
0x1851   : > { %v8406_v16 = vpop.eup %6768  ;;  %v4132_v9 = vmul.f32 1.442695, %v4131_v56 }
0x1852   : > { %v4284_v10 = vsel %vm325_vm0, %v8406_v16, 0.0 }
0x1853   : > { %6770 = vpow2.f32 %v4132_v9  ;;  %4285 = vadd.xlane.f32.xlu0 %v4284_v10 }
0x1857   : > { %v4399_v20 = vpop.f32.mrf.mxu0 }
0x1858   : > { %v4402_v21 = vsel %vm325_vm0, %v4399_v20, -inf }
0x1859   : > { %v6771_v29 = vpop.eup %6770  ;;  %4403 = vmax.xlane.f32.xlu2 %v4402_v21 }
0x185a   : > { %v4134_v35 = vsel %vm325_vm0, %v6771_v29, 0.0 }
0x185b   : > { %4135 = vadd.xlane.f32.xlu1 %v4134_v35 }
0x1867   : > { %6490 = vrot.lane.b32.xlu0 %v8355_v8, %s6898_s15 }
0x186f   : > { %6505 = vrot.lane.b32.xlu0 %v8363_v0, %s6897_s12 }
0x1871   : > { %6485 = vrot.lane.b32.xlu2 %v8363_v0, %s6898_s15 }
0x1879   : > { %6500 = vrot.lane.b32.xlu2 %v8355_v8, %s6896_s11 }
0x1881   : > { %6510 = vrot.lane.b32.xlu2 %v8355_v8, %s6897_s12 }
0x18c6   : > { %v8422_v58 = vpop.xlane.xlu0 %4285 }
0x18c7   : > { %v4298_v9 = vand.u32 2147483648, %v8422_v58  ;;  %vm4292_vm12 = vweird.f32 %v8422_v58  ;;  %v4296_v10 = vand.u32 2147483647, %v8422_v58 }
0x18c9   : > { %vm4297_vm14 = vcmp.eq.f32.partialorder %v4296_v10, 8.507059e+37  ;;  %v4515_v10 = vperm.slane %v8326_v34, 4 }
0x18cc   : > { %v4404_v46 = vpop.xlane.xlu2 %4403 }
0x18cd   : > { %v4405_v13 = vsub.f32 %v4399_v20, %v4404_v46  ;;  %v4299_v46 = vor.u32 1.1754944e-38, %v4298_v9  ;;  %v3330_v9 = vld [vmem:[%s8872_s4 + $0xa0] sm:$0xff] }
0x18ce   : > { %v4136_v39 = vpop.xlane.xlu1 %4135 }
0x18cf   : > { %v4406_v50 = vmul.f32 1.442695, %v4405_v13  ;;  %6772 = vrcp.f32 %v4136_v39  ;;  %v4148_v42 = vand.u32 2147483648, %v4136_v39  ;;  %v4146_v15 = vand.u32 2147483647, %v4136_v39 }
0x18d0   : > { %vm4142_vm3 = vweird.f32 %v4136_v39 }
0x18d1   : > { %6774 = vpow2.f32 %v4406_v50  ;;  %v4149_v25 = vor.u32 1.1754944e-38, %v4148_v42  ;;  %vm4147_vm5 = vcmp.eq.f32.partialorder %v4146_v15, 8.507059e+37  ;;  %v4486_v42 = vperm.slane %v8326_v34, 3 }
0x18d2   : > { %6776 = vrcp.f32 %v8422_v58 }
0x18d4   : > { %v6486_v28 = vpop.permute.xlu2 %6485 }
0x18d5   : > { %v6773_v33 = vpop.eup %6772  ;;  %v6487_v14 = vunpack.i.l.bf16 %v6486_v28  ;;  %v6488_v40 = vunpack.i.h.bf16 %v6486_v28 }
0x18d6   : > { %v4138_v37 = vmul.f32 %v6773_v33, %v4136_v39  ;;  %vm4143_vm2 = vweird.f32 %v6773_v33 }
0x18d7   : > { %v6775_v31 = vpop.eup %6774  ;;  %4184 = vmatpush.msra.mxu3 %v6487_v14  ;;  %vm4144_vm4 = vmor %vm4142_vm3, %vm4143_vm2  ;;  %v3324_v14 = vld [vmem:[%s8872_s4 + $0x70] sm:$0xff] }
0x18d8   : > { %v4139_v41 = vsub.f32 1.0, %v4138_v37  ;;  %v4408_v24 = vsel %vm325_vm0, %v6775_v31, 0.0  ;;  %v6777_v23 = vpop.eup %6776 }
0x18d9   : > { %4409 = vadd.xlane.f32.xlu1 %v4408_v24  ;;  %4185 = vmatpush.msra.mxu3 %v6488_v40  ;;  %v6491_v8 = vpop.permute.xlu0 %6490  ;;  %v4288_v57 = vmul.f32 %v6777_v23, %v8422_v58  ;;  %vm4293_vm11 = vweird.f32 %v6777_v23 }
0x18da   : > { %v4140_v43 = vmul.f32 %v6773_v33, %v4139_v41  ;;  %v6492_v44 = vunpack.i.l.bf16 %v6491_v8  ;;  %v6493_v55 = vunpack.i.h.bf16 %v6491_v8  ;;  %vm4294_vm13 = vmor %vm4292_vm12, %vm4293_vm11 }
0x18dc   : > { %v4141_v30 = vadd.f32 %v6773_v33, %v4140_v43  ;;  %v8425_v52 = vpop.permute.xlu2 %6500  ;;  %4186 = vmatpush.msra.mxu3 %v6492_v44 }
0x18dd   : > { %v6502_v50 = vunpack.i.l.bf16 %v8425_v52  ;;  %v6503_v28 = vunpack.i.h.bf16 %v8425_v52 }
0x18de   : > { %v4145_v26 = vsel %vm4144_vm4, %v6773_v33, %v4141_v30  ;;  %4187 = vmatpush.msra.mxu3 %v6493_v55  ;;  %v3325_v33 = vld [vmem:[%s8872_s4 + $0x78] sm:$0xff] }
0x18df   : > { %v4150_v53 = vsel %vm4147_vm5, %v4149_v25, %v4145_v26 }
0x18e0   : > { %v4152_v47 = vmul.f32 %v6771_v29, %v4150_v53  ;;  %4210 = vmatpush.msrb.mxu3 %v3323_v63  ;;  %v3334_v63 = vld [vmem:[%s8872_s4 + $0xc0] sm:$0xff] }
0x18e1   : > { %v6506_v11 = vpop.permute.xlu0 %6505 }
0x18e2   : > { %v6507_v48 = vunpack.i.l.bf16 %v6506_v11  ;;  %6186 = vmatmul.msk.f32.vlgmr.msra.gmra.mxu3 %vm325_vm0, %v4152_v47  ;;  %v6508_v60 = vunpack.i.h.bf16 %v6506_v11  ;;  %v3327_v47 = vld [vmem:[%s8872_s4 + $0x88] sm:$0xff]  ;;  %v3326_v11 = vld [vmem:[%s8872_s4 + $0x80] sm:$0xff] }
0x18e3   : > { %4356 = vmatpush.msra.mxu3 %v3324_v14 }
0x18e4   : > { %v6511_v62 = vpop.permute.xlu2 %6510  ;;  %4454 = vmatpush.msrb.mxu1 %v6507_v48  ;;  %v3337_v48 = vld [vmem:[%s8872_s4 + $0xd8] sm:$0xff] }
0x18e5   : > { %v6512_v4 = vunpack.i.l.bf16 %v6511_v62  ;;  %v6513_v1 = vunpack.i.h.bf16 %v6511_v62  ;;  %v3335_v62 = vld [vmem:[%s8872_s4 + $0xc8] sm:$0xff] }
0x18e6   : > { %4455 = vmatpush.msrb.mxu1 %v6508_v60  ;;  %v3336_v60 = vld [vmem:[%s8872_s4 + $0xd0] sm:$0xff] }
0x18e8   : > { %4456 = vmatpush.msrb.mxu1 %v6512_v4 }
0x18ea   : > { %4457 = vmatpush.msrb.mxu1 %v6513_v1 }
0x18ec   : > { %4552 = vmatpush.msra.mxu1 %v3337_v48 }
0x18ee   : > { %4553 = vmatpush.msra.mxu1 %v3336_v60 }
0x18f0   : > { %4554 = vmatpush.msra.mxu1 %v3335_v62 }
0x18f2   : > { %6495 = vrot.lane.b32.xlu1 %v8363_v0, %s6896_s11  ;;  %v4289_v0 = vsub.f32 1.0, %v4288_v57  ;;  %4555 = vmatpush.msra.mxu1 %v3334_v63 }
0x18f4   : > { %v4290_v5 = vmul.f32 %v6777_v23, %v4289_v0 }
0x18f6   : > { %v4291_v56 = vadd.f32 %v6777_v23, %v4290_v5 }
0x18f8   : > { %v4295_v35 = vsel %vm4294_vm13, %v6777_v23, %v4291_v56  ;;  %v3333_v23 = vld [vmem:[%s8872_s4 + $0xb8] sm:$0xff]  ;;  %v3331_v56 = vld [vmem:[%s8872_s4 + $0xa8] sm:$0xff] }
0x18f9   : > { %v4300_v39 = vsel %vm4297_vm14, %v4299_v46, %v4295_v35  ;;  %4556 = vmatpush.msra.mxu1 %v3333_v23  ;;  %v4540_v35 = vperm.slane %v8326_v34, 5 }
0x18fa   : > { %v4302_v58 = vmul.f32 %v8406_v16, %v4300_v39 }
0x194c   : > { %v4410_v36 = vpop.xlane.xlu1 %4409 }
0x194d   : > { %6778 = vrcp.f32 %v4410_v36  ;;  %v4422_v18 = vand.u32 2147483648, %v4410_v36  ;;  %v4420_v45 = vand.u32 2147483647, %v4410_v36  ;;  %vm4416_vm7 = vweird.f32 %v4410_v36 }
0x194f   : > { %v4423_v22 = vor.u32 1.1754944e-38, %v4422_v18  ;;  %vm4421_vm10 = vcmp.eq.f32.partialorder %v4420_v45, 8.507059e+37  ;;  %v8489_v18 = vld [vmem:[%s8873_s5 + $0x8] sm:$0xff] }
0x1950   : > { %v4511_v0 = vperm.slane %v8489_v18, 0 }
0x1953   : > { %v6779_v51 = vpop.eup %6778 }
0x1954   : > { %v4412_v54 = vmul.f32 %v6779_v51, %v4410_v36  ;;  %vm4417_vm6 = vweird.f32 %v6779_v51 }
0x1955   : > { %vm4418_vm8 = vmor %vm4416_vm7, %vm4417_vm6 }
0x1956   : > { %v4413_v3 = vsub.f32 1.0, %v4412_v54 }
0x1958   : > { %v4414_v6 = vmul.f32 %v6779_v51, %v4413_v3 }
0x195a   : > { %v4415_v19 = vadd.f32 %v6779_v51, %v4414_v6 }
0x195c   : > { %v4419_v17 = vsel %vm4418_vm8, %v6779_v51, %v4415_v19 }
0x195d   : > { %v4424_v61 = vsel %vm4421_vm10, %v4423_v22, %v4419_v17  ;;  %v4513_v22 = vperm.slane %v8489_v18, 1 }
0x195e   : > { %v4426_v59 = vmul.f32 %v6775_v31, %v4424_v61 }
0x1960   : > { %6201 = vmatmul.msk.f32.vlgmr.msrb.gmra.mxu1 %vm325_vm0, %v4426_v59  ;;  %v3332_v59 = vld [vmem:[%s8872_s4 + $0xb0] sm:$0xff] }
0x1961   : > { %4557 = vmatpush.msra.mxu1 %v3332_v59 }
0x1963   : > { %4558 = vmatpush.msra.mxu1 %v3331_v56 }
0x1964   : > { %v6496_v20 = vpop.permute.xlu1 %6495 }
0x1965   : > { %v6497_v21 = vunpack.i.l.bf16 %v6496_v20  ;;  %v4189_v29 = vpop.f32.mrf.mxu3  ;;  %v6498_v13 = vunpack.i.h.bf16 %v6496_v20  ;;  %4559 = vmatpush.msra.mxu1 %v3330_v9 }
0x1966   : > { %6187 = vmatmul.msk.f32.vlgmr.msrb.gmra.mxu3 %vm476_vm1, %v4189_v29 }
0x1967   : > { %4330 = vmatpush.msrb.mxu2 %v6497_v21 }
0x1969   : > { %4331 = vmatpush.msrb.mxu2 %v6498_v13 }
0x196b   : > { %4332 = vmatpush.msrb.mxu2 %v6502_v50 }
0x196d   : > { %4333 = vmatpush.msrb.mxu2 %v6503_v28  ;;  %v6205_v28 = vld [vmem:[%s8872_s4 + $0xe0] sm:$0xff] }
0x196e   : > { %6194 = vmatmul.msk.f32.vlgmr.msrb.gmra.mxu2 %vm325_vm0, %v4302_v58  ;;  %v6206_v58 = vld [vmem:[%s8872_s4 + $0xe8] sm:$0xff] }
0x196f   : > { %4480 = vmatpush.msra.mxu2 %v3325_v33  ;;  %v6519_v33 = vpack.i.bf16 %v6205_v28, %v6206_v58 }
0x19dd   : > { %v4459_v37 = vpop.f32.mrf.mxu1 }
0x19de   : > { %6202 = vmatmul.msk.f32.vlgmr.msra.gmra.mxu2 %vm476_vm1, %v4459_v37 }
0x19e9   : > { %v4212_v16 = vpop.f32.mrf.mxu3 }
0x19ea   : > { %v4236_v40 = vadd.f32 %v8404_v12, %v4212_v16  ;;  %v3329_v12 = vld [vmem:[%s8872_s4 + $0x98] sm:$0xff] }
0x19eb   : > { %4531 = vmatpush.msrb.mxu3 %v3329_v12  ;;  %v6208_v16 = vld [vmem:[%s8872_s4 + $0xf8] sm:$0xff] }
0x19ec   : > { %4639 = vmatpush.msrb.mxu2 %v6208_v16 }
0x19f1   : > { %v4335_v31 = vpop.f32.mrf.mxu2 }
0x19f2   : > { %6195 = vmatmul.msk.f32.vlgmr.msra.gmra.mxu3 %vm476_vm1, %v4335_v31  ;;  %v6207_v31 = vld [vmem:[%s8872_s4 + $0xf0] sm:$0xff] }
0x19f3   : > { %4640 = vmatpush.msrb.mxu2 %v6207_v31 }
0x19f5   : > { %4641 = vmatpush.msrb.mxu2 %v6206_v58 }
0x19f7   : > { %4642 = vmatpush.msrb.mxu2 %v6205_v28 }
0x1a61   : > { %v4482_v8 = vpop.f32.mrf.mxu2 }
0x1a75   : > { %v4358_v41 = vpop.f32.mrf.mxu3 }
0x1a76   : > { %v4361_v24 = vadd.f32 %v4358_v41, %v4236_v40  ;;  %v6514_v41 = vpack.i.bf16 %v6207_v31, %v6208_v16 }
0x1a78   : > { %v4485_v43 = vadd.f32 %v4482_v8, %v4361_v24 }
0x1a7a   : > { %v4487_v15 = vadd.f32 %v4486_v42, %v4485_v43  ;;  %v8527_v42 = vld [vmem:[%s8873_s5 + $0x10] sm:$0xff] }
0x1a7b   : > { %v4623_v8 = vperm.slane %v8527_v42, 0 }
0x1a7c   : > { %v4488_v44 = vadd.f32 %v4487_v15, %v8351_v32  ;;  %v3328_v32 = vld [vmem:[%s8872_s4 + $0x90] sm:$0xff] }
0x1a7d   : > { %4532 = vmatpush.msrb.mxu3 %v3328_v32 }
0x1a7e   : > { %v4489_v30 = vsel %vm325_vm0, %v4488_v44, 0.0 }
0x1a7f   : > { %4490 = vadd.xlane.f32.xlu0 %v4489_v30  ;;  %4533 = vmatpush.msrb.mxu3 %v3327_v47 }
0x1a81   : > { %4534 = vmatpush.msrb.mxu3 %v3326_v11 }
0x1af2   : > { %v4491_v55 = vpop.xlane.xlu0 %4490 }
0x1af3   : > { %v4492_v52 = vmul.f32 %v4491_v55, %v7456_v7 }
0x1af5   : > { %v4493_v25 = vsub.f32 %v4488_v44, %v4492_v52 }
0x1af7   : > { %v4494_v26 = vmul.f32 %v4493_v25, %v4493_v25 }
0x1af9   : > { %v4495_v53 = vsel %vm325_vm0, %v4494_v26, 0.0 }
0x1afa   : > { %4496 = vadd.xlane.f32.xlu1 %v4495_v53 }
0x1b13   : > { %6520 = vrot.lane.b32.xlu1 %v6519_v33, %s6894_s14 }
0x1b6d   : > { %v4497_v4 = vpop.xlane.xlu1 %4496 }
0x1b6e   : > { %v4498_v1 = vmul.f32 %v4497_v4, %v7456_v7 }
0x1b70   : > { %v4499_v36 = vadd.f32 1e-05, %v4498_v1 }
0x1b72   : > { %6780 = vrsqrt.f32 %v4499_v36  ;;  %vm4506_vm2 = vweird.f32 %v4499_v36 }
0x1b78   : > { %v6781_v51 = vpop.eup %6780 }
0x1b79   : > { %v4501_v54 = vmul.f32 %v6781_v51, %v4499_v36  ;;  %vm4507_vm15 = vweird.f32 %v6781_v51  ;;  %v4587_v36 = vperm.slane %v8489_v18, 2 }
0x1b7a   : > { %vm4508_vm3 = vmor %vm4506_vm2, %vm4507_vm15 }
0x1b7b   : > { %v4502_v57 = vmul.f32 %v6781_v51, %v4501_v54 }
0x1b7d   : > { %v4503_v3 = vmul.f32 0.5, %v4502_v57 }
0x1b7f   : > { %v4504_v6 = vsub.f32 1.5, %v4503_v3 }
0x1b81   : > { %v4505_v45 = vmul.f32 %v6781_v51, %v4504_v6 }
0x1b83   : > { %v4509_v19 = vsel %vm4508_vm3, %v6781_v51, %v4505_v45  ;;  %v4589_v51 = vperm.slane %v8489_v18, 3 }
0x1b84   : > { %v4510_v17 = vmul.f32 %v4509_v19, %v4493_v25 }
0x1b85   : > { %v6521_v30 = vpop.permute.xlu1 %6520 }
0x1b86   : > { %v4512_v61 = vmul.f32 %v4511_v0, %v4510_v17  ;;  %v6522_v55 = vunpack.i.l.bf16 %v6521_v30  ;;  %v6523_v26 = vunpack.i.h.bf16 %v6521_v30 }
0x1b88   : > { %v4514_v5 = vadd.f32 %v4513_v22, %v4512_v61 }
0x1b8a   : > { %6203 = vmatmul.msk.f32.vlgmr.msrb.gmra.mxu3 %vm325_vm0, %v4514_v5 }
0x1c0d   : > { %v4536_v20 = vpop.f32.mrf.mxu3 }
0x1c0e   : > { %v4537_v21 = vadd.f32 %v4536_v20, %v4515_v10 }
0x1c10   : > { %v4539_v29 = vmax.f32 %v4537_v21, 0.0 }
0x1c12   : > { %6204 = vmatmul.msk.f32.vlgmr.msra.gmra.mxu1 %vm1650_vm9, %v4539_v29 }
0x1c8f   : > { %v4561_v46 = vpop.f32.mrf.mxu1 }
0x1c90   : > { %v4562_v13 = vadd.f32 %v4561_v46, %v4540_v35 }
0x1c92   : > { %v4564_v39 = vadd.f32 %v4562_v13, %v4514_v5 }
0x1c94   : > { %v4565_v50 = vsel %vm325_vm0, %v4564_v39, 0.0 }
0x1c95   : > { %4566 = vadd.xlane.f32.xlu2 %v4565_v50 }
0x1cad   : > { %6515 = vrot.lane.b32.xlu2 %v6514_v41, %s6894_s14 }
0x1cb5   : > { %6525 = vrot.lane.b32.xlu2 %v6514_v41, %s6895_s10 }
0x1d08   : > { %v4567_v14 = vpop.xlane.xlu2 %4566 }
0x1d09   : > { %v4568_v34 = vmul.f32 %v4567_v14, %v7456_v7  ;;  %v6209_v14 = vld [vmem:[%s8872_s4 + $0x100] sm:$0xff] }
0x1d0b   : > { %v4569_v37 = vsub.f32 %v4564_v39, %v4568_v34 }
0x1d0d   : > { %v4570_v40 = vmul.f32 %v4569_v37, %v4569_v37 }
0x1d0f   : > { %v4571_v24 = vsel %vm325_vm0, %v4570_v40, 0.0 }
0x1d10   : > { %4572 = vadd.xlane.f32.xlu0 %v4571_v24  ;;  %v6516_v43 = vpop.permute.xlu2 %6515 }
0x1d11   : > { %v6517_v15 = vunpack.i.l.bf16 %v6516_v43  ;;  %v6518_v44 = vunpack.i.h.bf16 %v6516_v43 }
0x1d13   : > { %4680 = vmatpush.msra.mxu3 %v6517_v15 }
0x1d15   : > { %4681 = vmatpush.msra.mxu3 %v6518_v44 }
0x1d17   : > { %4682 = vmatpush.msra.mxu3 %v6522_v55 }
0x1d18   : > { %v6526_v52 = vpop.permute.xlu2 %6525 }
0x1d19   : > { %v6527_v25 = vunpack.i.l.bf16 %v6526_v52  ;;  %v6528_v53 = vunpack.i.h.bf16 %v6526_v52  ;;  %4683 = vmatpush.msra.mxu3 %v6523_v26 }
0x1d1b   : > { %4715 = vmatpush.msra.mxu0 %v6527_v25 }
0x1d1d   : > { %4716 = vmatpush.msra.mxu0 %v6528_v53 }
0x1d24   : > { %4665 = vrot.lane.b32.xlu0 %v4623_v8, %s6894_s14 }
0x1d2c   : > { %6530 = vrot.lane.b32.xlu0 %v6519_v33, %s6895_s10 }
0x1d34   : > { %4700 = vrot.lane.b32.xlu0 %v4623_v8, %s6895_s10 }
0x1d83   : > { %v4573_v12 = vpop.xlane.xlu0 %4572 }
0x1d84   : > { %v4574_v32 = vmul.f32 %v4573_v12, %v7456_v7 }
0x1d86   : > { %v4575_v47 = vadd.f32 1e-05, %v4574_v32 }
0x1d88   : > { %6782 = vrsqrt.f32 %v4575_v47  ;;  %vm4582_vm5 = vweird.f32 %v4575_v47 }
0x1d8e   : > { %v6783_v11 = vpop.eup %6782 }
0x1d8f   : > { %v4577_v48 = vmul.f32 %v6783_v11, %v4575_v47  ;;  %vm4583_vm4 = vweird.f32 %v6783_v11 }
0x1d90   : > { %vm4584_vm6 = vmor %vm4582_vm5, %vm4583_vm4 }
0x1d91   : > { %v4578_v60 = vmul.f32 %v6783_v11, %v4577_v48 }
0x1d93   : > { %v4579_v62 = vmul.f32 0.5, %v4578_v60 }
0x1d95   : > { %v4580_v4 = vsub.f32 1.5, %v4579_v62 }
0x1d96   : > { %v4666_v1 = vpop.permute.xlu0 %4665 }
0x1d97   : > { %v4581_v63 = vmul.f32 %v6783_v11, %v4580_v4 }
0x1d99   : > { %v4585_v23 = vsel %vm4584_vm6, %v6783_v11, %v4581_v63 }
0x1d9a   : > { %v4586_v54 = vmul.f32 %v4585_v23, %v4569_v37 }
0x1d9c   : > { %v4588_v57 = vmul.f32 %v4587_v36, %v4586_v54 }
0x1d9e   : > { %v8536_v3 = vadd.f32 %v4589_v51, %v4588_v57  ;;  %v6531_v6 = vpop.permute.xlu0 %6530 }
0x1d9f   : > { %v6533_v45 = vunpack.i.h.bf16 %v6531_v6  ;;  %v6532_v0 = vunpack.i.l.bf16 %v6531_v6 }
0x1da0   : > { %6235 = vmatmul.msk.f32.vlgmr.msrb.gmra.mxu2 %vm325_vm0, %v8536_v3  ;;  %6236 = vmatmul.msk.f32.vlgmr.msra.gmra.mxu3 %vm325_vm0, %v8536_v3 }
0x1da1   : > { %4717 = vmatpush.msra.mxu0 %v6532_v0  ;;  %v8582_v0 = vld [vmem:[%s8872_s4 + $0x120] sm:$0xff] }
0x1da3   : > { %4718 = vmatpush.msra.mxu0 %v6533_v45 }
0x1da4   : > { %6237 = vmatmul.msk.f32.vlgmr.msra.gmra.mxu0 %vm325_vm0, %v8536_v3 }
0x1da6   : > { %v4701_v19 = vpop.permute.xlu0 %4700 }
0x1e21   : > { %v4720_v18 = vpop.f32.mrf.mxu0 }
0x1e22   : > { %v8544_v22 = vadd.f32 %v4720_v18, %v4701_v19  ;;  %v8587_v19 = vld [vmem:[%s8872_s4 + $0x128] sm:$0xff] }
0x1e23   : > { %v4644_v17 = vpop.f32.mrf.mxu2  ;;  %v4685_v61 = vpop.f32.mrf.mxu3  ;;  %v8591_v18 = vpack.i.bf16 %v8582_v0, %v8587_v19 }
0x1e24   : > { %v4645_v5 = vadd.f32 %v4644_v17, %v4623_v8  ;;  %v4686_v59 = vadd.f32 %v4685_v61, %v4666_v1  ;;  %4792 = vmatpush.msrb.mxu3 %v8544_v22 }
0x1e26   : > { %v4647_v56 = vmul.f32 0.35355338, %v4645_v5  ;;  %4799 = vrot.lane.b32.xlu0 %v4686_v59, %s6898_s15  ;;  %6238 = vmatpush.xpose.msk.msra.mxu2 %vm476_vm1, %v4686_v59 }
0x1e27   : > { %4918 = vmatpush.msra.mxu3 %v6209_v14 }
0x1e29   : > { %6239 = vmatmul.msk.f32.vlgmr.msra.gmra.mxu2 %vm476_vm1, %v4647_v56 }
0x1e2e   : > { %4797 = vrot.lane.b32.xlu0 %v4647_v56, %s6898_s15 }
0x1e36   : > { %4925 = vrot.lane.b32.xlu0 %v4686_v59, %s6896_s11 }
0x1e3e   : > { %5028 = vrot.lane.b32.xlu0 %v4686_v59, %s6897_s12 }
0x1e46   : > { %5026 = vrot.lane.b32.xlu0 %v4647_v56, %s6897_s12 }
0x1e98   : > { %v4800_v9 = vpop.permute.xlu0 %4799 }
0x1e99   : > { %6241 = vmatpush.xpose.msk.msrb.mxu0 %vm476_vm1, %v4800_v9 }
0x1ea0   : > { %v4798_v10 = vpop.permute.xlu0 %4797 }
0x1ea1   : > { %6242 = vmatmul.msk.f32.vlgmr.msrb.gmra.mxu0 %vm476_vm1, %v4798_v10 }
0x1ea8   : > { %v4926_v20 = vpop.permute.xlu0 %4925 }
0x1ea9   : > { %6246 = vmatpush.xpose.msk.msra.mxu0 %vm476_vm1, %v4926_v20 }
0x1eac   : > { %v4746_v21 = vpop.f32.mrf.mxu2 }
0x1ead   : > { %v4749_v29 = vsel %vm476_vm1, %v4746_v21, -inf }
0x1eae   : > { %4750 = vmax.xlane.f32.xlu1 %v4749_v29 }
0x1eb0   : > { %v5029_v53 = vpop.permute.xlu0 %5028 }
0x1eb8   : > { %v5027_v11 = vpop.permute.xlu0 %5026 }
0x1ec7   : > { %4923 = vrot.lane.b32.xlu1 %v4647_v56, %s6896_s11 }
0x1f1e   : > { %v4822_v28 = vpop.f32.mrf.mxu0 }
0x1f1f   : > { %v4825_v58 = vsel %vm476_vm1, %v4822_v28, -inf }
0x1f21   : > { %v4751_v35 = vpop.xlane.xlu1 %4750 }
0x1f22   : > { %v4752_v46 = vsub.f32 %v4746_v21, %v4751_v35 }
0x1f24   : > { %v4753_v13 = vmul.f32 1.442695, %v4752_v46 }
0x1f26   : > { %6784 = vpow2.f32 %v4753_v13 }
0x1f2c   : > { %v6785_v39 = vpop.eup %6784 }
0x1f2d   : > { %v4755_v50 = vsel %vm476_vm1, %v6785_v39, 0.0 }
0x1f2e   : > { %4756 = vadd.xlane.f32.xlu2 %v4755_v50 }
0x1f36   : > { %4826 = vmax.xlane.f32.xlu2 %v4825_v58 }
0x1f39   : > { %v4924_v33 = vpop.permute.xlu1 %4923 }
0x1f3a   : > { %6247 = vmatmul.msk.f32.vlgmr.msra.gmra.mxu0 %vm476_vm1, %v4924_v33 }
0x1fa1   : > { %v4757_v34 = vpop.xlane.xlu2 %4756 }
0x1fa2   : > { %6786 = vrcp.f32 %v4757_v34  ;;  %v4769_v24 = vand.u32 2147483648, %v4757_v34  ;;  %v4767_v15 = vand.u32 2147483647, %v4757_v34  ;;  %vm4763_vm8 = vweird.f32 %v4757_v34 }
0x1fa4   : > { %v4770_v30 = vor.u32 1.1754944e-38, %v4769_v24  ;;  %vm4768_vm11 = vcmp.eq.f32.partialorder %v4767_v15, 8.507059e+37  ;;  %v6216_v15 = vld [vmem:[%s8872_s4 + $0x138] sm:$0xff] }
0x1fa8   : > { %v6787_v37 = vpop.eup %6786 }
0x1fa9   : > { %v4759_v31 = vmul.f32 %v6787_v37, %v4757_v34  ;;  %v4827_v16 = vpop.xlane.xlu2 %4826  ;;  %vm4764_vm7 = vweird.f32 %v6787_v37 }
0x1faa   : > { %v4828_v40 = vsub.f32 %v4822_v28, %v4827_v16  ;;  %vm4765_vm10 = vmor %vm4763_vm8, %vm4764_vm7 }
0x1fab   : > { %v4760_v41 = vsub.f32 1.0, %v4759_v31 }
0x1fac   : > { %v4829_v8 = vmul.f32 1.442695, %v4828_v40 }
0x1fad   : > { %v4761_v43 = vmul.f32 %v6787_v37, %v4760_v41 }
0x1fae   : > { %6788 = vpow2.f32 %v4829_v8 }
0x1faf   : > { %v4762_v44 = vadd.f32 %v6787_v37, %v4761_v43  ;;  %v6215_v43 = vld [vmem:[%s8872_s4 + $0x130] sm:$0xff] }
0x1fb1   : > { %v4766_v55 = vsel %vm4765_vm10, %v6787_v37, %v4762_v44  ;;  %v8606_v44 = vpack.i.bf16 %v6215_v43, %v6216_v15 }
0x1fb2   : > { %v4771_v52 = vsel %vm4768_vm11, %v4770_v30, %v4766_v55  ;;  %v6210_v30 = vld [vmem:[%s8872_s4 + $0x108] sm:$0xff] }
0x1fb3   : > { %v4773_v25 = vmul.f32 %v6785_v39, %v4771_v52  ;;  %4895 = vmatpush.msrb.mxu2 %v6210_v30 }
0x1fb4   : > { %v6789_v26 = vpop.eup %6788 }
0x1fb5   : > { %6240 = vmatmul.msk.f32.vlgmr.msrb.gmra.mxu3 %vm476_vm1, %v4773_v25  ;;  %v4831_v12 = vsel %vm476_vm1, %v6789_v26, 0.0 }
0x1fb6   : > { %6250 = vmatpush.xpose.msk.msrb.mxu3 %vm476_vm1, %v5029_v53  ;;  %4832 = vadd.xlane.f32.xlu2 %v4831_v12 }
0x1fb7   : > { %v4948_v32 = vpop.f32.mrf.mxu0 }
0x1fb8   : > { %v4951_v47 = vsel %vm476_vm1, %v4948_v32, -inf }
0x1fb9   : > { %4952 = vmax.xlane.f32.xlu0 %v4951_v47 }
0x1fcd   : > { %4976 = vrot.lane.b32.xlu0 %v8544_v22, %s6896_s11 }
0x1fd5   : > { %6540 = vrot.lane.b32.xlu0 %v8591_v18, %s6894_s14 }
0x1fdd   : > { %6545 = vrot.lane.b32.xlu0 %v8606_v44, %s6895_s10 }
0x2029   : > { %v4833_v54 = vpop.xlane.xlu2 %4832 }
0x202a   : > { %v4845_v10 = vand.u32 2147483648, %v4833_v54  ;;  %vm4839_vm13 = vweird.f32 %v4833_v54  ;;  %v4843_v20 = vand.u32 2147483647, %v4833_v54 }
0x202c   : > { %v4953_v48 = vpop.xlane.xlu0 %4952  ;;  %v4846_v13 = vor.u32 1.1754944e-38, %v4845_v10  ;;  %vm4844_vm15 = vcmp.eq.f32.partialorder %v4843_v20, 8.507059e+37 }
0x202d   : > { %v4954_v60 = vsub.f32 %v4948_v32, %v4953_v48 }
0x202f   : > { %v4955_v62 = vmul.f32 1.442695, %v4954_v60 }
0x2031   : > { %6790 = vpow2.f32 %v4955_v62 }
0x2032   : > { %6792 = vrcp.f32 %v4833_v54 }
0x2037   : > { %v6791_v4 = vpop.eup %6790 }
0x2038   : > { %v4794_v1 = vpop.f32.mrf.mxu3  ;;  %v4957_v63 = vsel %vm476_vm1, %v6791_v4, 0.0  ;;  %v6793_v6 = vpop.eup %6792 }
0x2039   : > { %6245 = vmatmul.msk.f32.vlgmr.msra.gmra.mxu3 %vm476_vm1, %v4794_v1  ;;  %4958 = vadd.xlane.f32.xlu1 %v4957_v63  ;;  %v4835_v45 = vmul.f32 %v6793_v6, %v4833_v54  ;;  %vm4840_vm12 = vweird.f32 %v6793_v6 }
0x203a   : > { %vm4841_vm14 = vmor %vm4839_vm13, %vm4840_vm12 }
0x203b   : > { %v4836_v17 = vsub.f32 1.0, %v4835_v45 }
0x203d   : > { %v4837_v5 = vmul.f32 %v6793_v6, %v4836_v17 }
0x203f   : > { %v4838_v56 = vadd.f32 %v6793_v6, %v4837_v5  ;;  %v4977_v37 = vpop.permute.xlu0 %4976 }
0x2041   : > { %6251 = vmatmul.msk.f32.vlgmr.msrb.gmra.mxu3 %vm476_vm1, %v5027_v11  ;;  %v4842_v35 = vsel %vm4841_vm14, %v6793_v6, %v4838_v56  ;;  %v8621_v6 = vperm.slane %v8527_v42, 2 }
0x2042   : > { %v4847_v50 = vsel %vm4844_vm15, %v4846_v13, %v4842_v35 }
0x2043   : > { %v4849_v33 = vmul.f32 %v6789_v26, %v4847_v50  ;;  %v5129_v50 = vperm.slane %v8527_v42, 1 }
0x2047   : > { %v6541_v63 = vpop.permute.xlu0 %6540 }
0x2048   : > { %v6542_v45 = vunpack.i.l.bf16 %v6541_v63 }
0x20ac   : > { %v4959_v57 = vpop.xlane.xlu1 %4958 }
0x20ad   : > { %6794 = vrcp.f32 %v4959_v57  ;;  %v4971_v58 = vand.u32 2147483648, %v4959_v57  ;;  %vm4965_vm3 = vweird.f32 %v4959_v57  ;;  %v4969_v14 = vand.u32 2147483647, %v4959_v57 }
0x20af   : > { %v4972_v40 = vor.u32 1.1754944e-38, %v4971_v58  ;;  %vm4970_vm5 = vcmp.eq.f32.partialorder %v4969_v14, 8.507059e+37 }
0x20b3   : > { %v6795_v61 = vpop.eup %6794 }
0x20b4   : > { %v4961_v59 = vmul.f32 %v6795_v61, %v4959_v57  ;;  %vm4966_vm2 = vweird.f32 %v6795_v61 }
0x20b5   : > { %vm4967_vm4 = vmor %vm4965_vm3, %vm4966_vm2 }
0x20b6   : > { %v4962_v9 = vsub.f32 1.0, %v4961_v59 }
0x20b8   : > { %v4963_v46 = vmul.f32 %v6795_v61, %v4962_v9 }
0x20ba   : > { %v4964_v28 = vadd.f32 %v6795_v61, %v4963_v46 }
0x20bc   : > { %v8574_v36 = vpop.f32.mrf.mxu3  ;;  %v4968_v31 = vsel %vm4967_vm4, %v6795_v61, %v4964_v28 }
0x20bd   : > { %v4973_v24 = vsel %vm4970_vm5, %v4972_v40, %v4968_v31 }
0x20be   : > { %v4975_v8 = vmul.f32 %v6791_v4, %v4973_v24 }
0x20c4   : > { %v5051_v23 = vpop.f32.mrf.mxu3 }
0x20c5   : > { %v5054_v51 = vsel %vm476_vm1, %v5051_v23, -inf }
0x20c6   : > { %5055 = vmax.xlane.f32.xlu2 %v5054_v51 }
0x20de   : > { %4851 = vrot.lane.b32.xlu2 %v8544_v22, %s6898_s15 }
0x2139   : > { %v5056_v21 = vpop.xlane.xlu2 %5055 }
0x213a   : > { %v5057_v29 = vsub.f32 %v5051_v23, %v5056_v21 }
0x213c   : > { %v5058_v39 = vmul.f32 1.442695, %v5057_v29 }
0x213e   : > { %6796 = vpow2.f32 %v5058_v39 }
0x2141   : > { %v4852_v34 = vpop.permute.xlu2 %4851 }
0x2142   : > { %4872 = vmatpush.msrb.mxu1 %v4852_v34 }
0x2143   : > { %6243 = vmatmul.msk.f32.vlgmr.msrb.gmra.mxu1 %vm476_vm1, %v4849_v33 }
0x2144   : > { %v6797_v16 = vpop.eup %6796  ;;  %4997 = vmatpush.msra.mxu1 %v4977_v37 }
0x2145   : > { %v5060_v41 = vsel %vm476_vm1, %v6797_v16, 0.0 }
0x2146   : > { %5061 = vadd.xlane.f32.xlu2 %v5060_v41 }
0x214b   : > { %6248 = vmatmul.msk.f32.vlgmr.msra.gmra.mxu1 %vm476_vm1, %v4975_v8 }
0x215e   : > { %5079 = vrot.lane.b32.xlu2 %v8544_v22, %s6897_s12  ;;  %v6211_v22 = vld [vmem:[%s8872_s4 + $0x110] sm:$0xff] }
0x215f   : > { %5020 = vmatpush.msra.mxu2 %v6211_v22 }
0x2166   : > { %6535 = vrot.lane.b32.xlu2 %v8606_v44, %s6894_s14 }
0x216e   : > { %5200 = vrot.lane.b32.xlu2 %v8621_v6, %s6894_s14  ;;  %s6844_s14 = sshra.s32 %s5879_s26, 4  ;;  %s6845_s14 = int_to_ptr.hbm [resolvable:$true] %s6844_s14 }
0x216f   : > { %p6851_p0 = scmp.lt.s32.totalorder %s6845_s14, %s8874_s6 }
0x21b9   : > { %v5062_v55 = vpop.xlane.xlu2 %5061 }
0x21ba   : > { %6798 = vrcp.f32 %v5062_v55  ;;  %v5074_v32 = vand.u32 2147483648, %v5062_v55  ;;  %v5072_v11 = vand.u32 2147483647, %v5062_v55  ;;  %vm5068_vm7 = vweird.f32 %v5062_v55 }
0x21bc   : > { %v5075_v60 = vor.u32 1.1754944e-38, %v5074_v32  ;;  %vm5073_vm10 = vcmp.eq.f32.partialorder %v5072_v11, 8.507059e+37 }
0x21c0   : > { %v6799_v52 = vpop.eup %6798  ;;  %v4874_v25 = vpop.f32.mrf.mxu1 }
0x21c1   : > { %v5064_v26 = vmul.f32 %v6799_v52, %v5062_v55  ;;  %6244 = vmatmul.msk.f32.vlgmr.msrb.gmra.mxu2 %vm476_vm1, %v4874_v25  ;;  %v5080_v53 = vpop.permute.xlu2 %5079  ;;  %vm5069_vm6 = vweird.f32 %v6799_v52  ;;  %v5154_v25 = vperm.slane %v8527_v42, 6 }
0x21c2   : > { %5100 = vmatpush.msrb.mxu0 %v5080_v53  ;;  %5174 = vmatpush.msrb.mxu2 %v6216_v15  ;;  %vm5070_vm8 = vmor %vm5068_vm7, %vm5069_vm6  ;;  %v5156_v53 = vperm.slane %v8527_v42, 7 }
0x21c3   : > { %v5065_v12 = vsub.f32 1.0, %v5064_v26 }
0x21c4   : > { %5175 = vmatpush.msrb.mxu2 %v6215_v43 }
0x21c5   : > { %v5066_v47 = vmul.f32 %v6799_v52, %v5065_v12 }
0x21c6   : > { %5176 = vmatpush.msrb.mxu2 %v8587_v19  ;;  %v6212_v19 = vld [vmem:[%s8872_s4 + $0x118] sm:$0xff] }
0x21c7   : > { %v5067_v48 = vadd.f32 %v6799_v52, %v5066_v47  ;;  %5123 = vmatpush.msrb.mxu1 %v6212_v19 }
0x21c8   : > { %v4999_v62 = vpop.f32.mrf.mxu1  ;;  %5177 = vmatpush.msrb.mxu2 %v8582_v0  ;;  %v6543_v0 = vunpack.i.h.bf16 %v6541_v63 }
0x21c9   : > { %v5071_v4 = vsel %vm5070_vm8, %v6799_v52, %v5067_v48  ;;  %v6536_v1 = vpop.permute.xlu2 %6535  ;;  %6249 = vmatmul.msk.f32.vlgmr.msra.gmra.mxu2 %vm476_vm1, %v4999_v62 }
0x21ca   : > { %v5076_v23 = vsel %vm5073_vm10, %v5075_v60, %v5071_v4  ;;  %v6538_v51 = vunpack.i.h.bf16 %v6536_v1  ;;  %v6537_v54 = vunpack.i.l.bf16 %v6536_v1 }
0x21cb   : > { %v5078_v57 = vmul.f32 %v6797_v16, %v5076_v23 }
0x21cc   : > { %5215 = vmatpush.msra.mxu3 %v6537_v54 }
0x21cd   : > { %6252 = vmatmul.msk.f32.vlgmr.msrb.gmra.mxu0 %vm476_vm1, %v5078_v57 }
0x21ce   : > { %5216 = vmatpush.msra.mxu3 %v6538_v51 }
0x21d0   : > { %5217 = vmatpush.msra.mxu3 %v6542_v45 }
0x21d1   : > { %v5201_v56 = vpop.permute.xlu2 %5200 }
0x21d2   : > { %5218 = vmatpush.msra.mxu3 %v6543_v0 }
0x21d3   : > { %6255 = vmatmul.msk.f32.vlgmr.msra.gmra.mxu3 %vm325_vm0, %v8309_v2 }
0x21db   : > { %6256 = vmatmul.msk.f32.gmra.mxu3 %vm325_vm0, %v8314_v38 }
0x21e3   : > { %6257 = vmatmul.msk.f32.gmra.mxu3 %vm325_vm0, %v8321_v49 }
0x21eb   : > { %6258 = vmatmul.msk.f32.gmra.mxu3 %vm325_vm0, %v8337_v27 }
0x2244   : > { %v4897_v35 = vpop.f32.mrf.mxu2 }
0x2245   : > { %v4921_v13 = vadd.f32 %v8574_v36, %v4897_v35 }
0x224a   : > { %v5102_v17 = vpop.f32.mrf.mxu0 }
0x224b   : > { %6253 = vmatmul.msk.f32.vlgmr.msrb.gmra.mxu1 %vm476_vm1, %v5102_v17 }
0x224c   : > { %v5022_v46 = vpop.f32.mrf.mxu2 }
0x224d   : > { %v5025_v39 = vadd.f32 %v5022_v46, %v4921_v13 }
0x2256   : > { %v5220_v61 = vpop.f32.mrf.mxu3 }
0x2257   : > { %v8647_v29 = vadd.f32 %v5220_v61, %v5201_v56 }
0x225e   : > { %v5223_v5 = vpop.f32.mrf.mxu3 }
0x225f   : > { %v8643_v21 = vadd.f32 %v5223_v5, %v5201_v56 }
0x2266   : > { %v5226_v59 = vpop.f32.mrf.mxu3 }
0x2267   : > { %v8639_v20 = vadd.f32 %v5226_v59, %v5201_v56 }
0x226e   : > { %v5229_v9 = vpop.f32.mrf.mxu3 }
0x226f   : > { %v5230_v10 = vadd.f32 %v5229_v9, %v5201_v56 }
0x2271   : > { %6263 = vmatpush.xpose.msk.msra.mxu1 %vm476_vm1, %v5230_v10 }
0x2275   : > { %6264 = vmatpush.xpose.msk.msra.mxu1 %vm476_vm1, %v8639_v20 }
0x2279   : > { %6265 = vmatpush.xpose.msk.msra.mxu1 %vm476_vm1, %v8643_v21 }
0x227d   : > { %6266 = vmatpush.xpose.msk.msra.mxu1 %vm476_vm1, %v8647_v29 }
0x22c8   : > { %v5125_v28 = vpop.f32.mrf.mxu1 }
0x22c9   : > { %v5128_v58 = vadd.f32 %v5125_v28, %v5025_v39 }
0x22cb   : > { %v5130_v33 = vadd.f32 %v5129_v50, %v5128_v58 }
0x22cd   : > { %v5131_v14 = vadd.f32 %v5130_v33, %v8536_v3  ;;  %v6546_v3 = vpop.permute.xlu0 %6545 }
0x22ce   : > { %v6548_v41 = vunpack.i.h.bf16 %v6546_v3 }
0x22cf   : > { %v5132_v34 = vsel %vm325_vm0, %v5131_v14, 0.0 }
0x22d0   : > { %5133 = vadd.xlane.f32.xlu1 %v5132_v34 }
0x2343   : > { %v5134_v37 = vpop.xlane.xlu1 %5133 }
0x2344   : > { %v5135_v31 = vmul.f32 %v5134_v37, %v7456_v7 }
0x2346   : > { %v5136_v16 = vsub.f32 %v5131_v14, %v5135_v31 }
0x2348   : > { %v5137_v40 = vmul.f32 %v5136_v16, %v5136_v16 }
0x234a   : > { %v5138_v36 = vsel %vm325_vm0, %v5137_v40, 0.0  ;;  %v6217_v40 = vld [vmem:[%s8872_s4 + $0x140] sm:$0xff] }
0x234b   : > { %5139 = vadd.xlane.f32.xlu1 %v5138_v36 }
0x2364   : > { %6550 = vrot.lane.b32.xlu1 %v8591_v18, %s6895_s10  ;;  %v6547_v18 = vunpack.i.l.bf16 %v6546_v3 }
0x2366   : > { %5259 = vmatpush.msra.mxu0 %v6547_v18 }
0x2368   : > { %5260 = vmatpush.msra.mxu0 %v6548_v41 }
0x236c   : > { %5244 = vrot.lane.b32.xlu1 %v8621_v6, %s6895_s10  ;;  %s6846_s10 = scalar_lea.hbm %s6845_s14, 8 }
0x236d   : > { %p6847_p11 = scmp.ne.s32.totalorder %s6845_s14, %s6846_s10 }
0x236f   : > { %p6848_p12 = pnand %p6847_p11, %p6973_p5 }
0x2371   : > { %p6849_p13 = pneg %p6848_p12 }
0x2374   : > { %5367 = vrot.lane.b32.xlu1 %v5230_v10, %s6898_s15 }
0x237c   : > { %5365 = vrot.lane.b32.xlu1 %v8639_v20, %s6898_s15 }
0x2384   : > { %5361 = vrot.lane.b32.xlu1 %v8647_v29, %s6898_s15 }
0x238c   : > { %5641 = vrot.lane.b32.xlu1 %v5230_v10, %s6897_s12 }
0x2394   : > { %5517 = vrot.lane.b32.xlu1 %v5230_v10, %s6896_s11 }
0x239c   : > { %5637 = vrot.lane.b32.xlu1 %v8643_v21, %s6897_s12 }
0x23be   : > { %v5140_v24 = vpop.xlane.xlu1 %5139 }
0x23bf   : > { %v5141_v8 = vmul.f32 %v5140_v24, %v7456_v7 }
0x23c1   : > { %v5142_v43 = vadd.f32 1e-05, %v5141_v8 }
0x23c3   : > { %6800 = vrsqrt.f32 %v5142_v43  ;;  %vm5149_vm12 = vweird.f32 %v5142_v43 }
0x23c9   : > { %v6801_v15 = vpop.eup %6800 }
0x23ca   : > { %v5144_v44 = vmul.f32 %v6801_v15, %v5142_v43  ;;  %vm5150_vm11 = vweird.f32 %v6801_v15 }
0x23cb   : > { %vm5151_vm13 = vmor %vm5149_vm12, %vm5150_vm11 }
0x23cc   : > { %v5145_v30 = vmul.f32 %v6801_v15, %v5144_v44 }
0x23ce   : > { %v5146_v22 = vmul.f32 0.5, %v5145_v30 }
0x23d0   : > { %v5147_v55 = vsub.f32 1.5, %v5146_v22 }
0x23d2   : > { %v5148_v52 = vmul.f32 %v6801_v15, %v5147_v55 }
0x23d4   : > { %v5152_v26 = vsel %vm5151_vm13, %v6801_v15, %v5148_v52 }
0x23d5   : > { %v5153_v12 = vmul.f32 %v5152_v26, %v5136_v16 }
0x23d6   : > { %v6551_v32 = vpop.permute.xlu1 %6550 }
0x23d7   : > { %v5155_v47 = vmul.f32 %v5154_v25, %v5153_v12  ;;  %v6553_v11 = vunpack.i.h.bf16 %v6551_v32  ;;  %v6552_v48 = vunpack.i.l.bf16 %v6551_v32 }
0x23d9   : > { %v8675_v60 = vadd.f32 %v5156_v53, %v5155_v47  ;;  %5261 = vmatpush.msra.mxu0 %v6552_v48 }
0x23db   : > { %6254 = vmatmul.msk.f32.vlgmr.msrb.gmra.mxu2 %vm325_vm0, %v8675_v60  ;;  %5262 = vmatpush.msra.mxu0 %v6553_v11 }
0x23dc   : > { %6259 = vmatmul.msk.f32.vlgmr.msra.gmra.mxu0 %vm325_vm0, %v8309_v2 }
0x23de   : > { %v5245_v62 = vpop.permute.xlu1 %5244 }
0x23e4   : > { %6260 = vmatmul.msk.f32.gmra.mxu0 %vm325_vm0, %v8314_v38 }
0x23e6   : > { %v5368_v42 = vpop.permute.xlu1 %5367 }
0x23ec   : > { %6261 = vmatmul.msk.f32.gmra.mxu0 %vm325_vm0, %v8321_v49 }
0x23ee   : > { %v5366_v4 = vpop.permute.xlu1 %5365 }
0x23f4   : > { %6262 = vmatmul.msk.f32.gmra.mxu0 %vm325_vm0, %v8337_v27 }
0x23f6   : > { %v5362_v1 = vpop.permute.xlu1 %5361 }
0x23fe   : > { %v8687_v63 = vpop.permute.xlu1 %5641 }
0x2406   : > { %v5518_v23 = vpop.permute.xlu1 %5517 }
0x2407   : > { %6277 = vmatpush.xpose.msk.msrb.mxu3 %vm476_vm1, %v5518_v23 }
0x240e   : > { %v5638_v8 = vpop.permute.xlu1 %5637 }
0x2459   : > { %v5264_v51 = vpop.f32.mrf.mxu0 }
0x245a   : > { %v5265_v45 = vadd.f32 %v5264_v51, %v5245_v62 }
0x245e   : > { %v5179_v2 = vpop.f32.mrf.mxu2 }
0x245f   : > { %v5180_v54 = vadd.f32 %v5179_v2, %v8621_v6 }
0x2461   : > { %v5182_v57 = vmul.f32 0.35355338, %v5180_v54  ;;  %v5267_v38 = vpop.f32.mrf.mxu0 }
0x2462   : > { %v5268_v0 = vadd.f32 %v5267_v38, %v5245_v62 }
0x2463   : > { %5633 = vrot.lane.b32.xlu1 %v5182_v57, %s6897_s12  ;;  %6267 = vmatmul.msk.f32.vlgmr.msra.gmra.mxu1 %vm476_vm1, %v5182_v57 }
0x2464   : > { %v8693_v49 = vpack.i.bf16 %v5265_v45, %v5268_v0 }
0x2469   : > { %v5270_v27 = vpop.f32.mrf.mxu0 }
0x246a   : > { %v5271_v17 = vadd.f32 %v5270_v27, %v5245_v62 }
0x2471   : > { %v5273_v19 = vpop.f32.mrf.mxu0 }
0x2472   : > { %v5274_v61 = vadd.f32 %v5273_v19, %v5245_v62 }
0x2474   : > { %5351 = vmatpush.msra.mxu2 %v5274_v61  ;;  %v8695_v5 = vpack.i.bf16 %v5271_v17, %v5274_v61 }
0x2476   : > { %5352 = vmatpush.msra.mxu2 %v5271_v17 }
0x2478   : > { %5353 = vmatpush.msra.mxu2 %v5268_v0 }
0x247a   : > { %5354 = vmatpush.msra.mxu2 %v5265_v45 }
0x247c   : > { %6269 = vmatpush.xpose.msk.msrb.mxu2 %vm476_vm1, %v5368_v42 }
0x2480   : > { %6270 = vmatpush.xpose.msk.msrb.mxu2 %vm476_vm1, %v5366_v4 }
0x24d5   : > { %v5634_v44 = vpop.permute.xlu1 %5633 }
0x24e0   : > { %v5308_v6 = vpop.f32.mrf.mxu1 }
0x24e1   : > { %v5311_v59 = vsel %vm325_vm0, %v5308_v6, -inf }
0x24e2   : > { %5312 = vmax.xlane.f32.xlu2 %v5311_v59 }
0x24fa   : > { %5363 = vrot.lane.b32.xlu2 %v8643_v21, %s6898_s15 }
0x2502   : > { %5639 = vrot.lane.b32.xlu2 %v8639_v20, %s6897_s12 }
0x250a   : > { %5513 = vrot.lane.b32.xlu2 %v8643_v21, %s6896_s11 }
0x2512   : > { %5511 = vrot.lane.b32.xlu2 %v8647_v29, %s6896_s11 }
0x2555   : > { %v5313_v56 = vpop.xlane.xlu2 %5312 }
0x2556   : > { %v5314_v9 = vsub.f32 %v5308_v6, %v5313_v56 }
0x2558   : > { %v5315_v10 = vmul.f32 1.442695, %v5314_v9 }
0x255a   : > { %6802 = vpow2.f32 %v5315_v10 }
0x255d   : > { %v5364_v35 = vpop.permute.xlu2 %5363 }
0x255e   : > { %6271 = vmatpush.xpose.msk.msrb.mxu2 %vm476_vm1, %v5364_v35 }
0x2560   : > { %v6803_v46 = vpop.eup %6802 }
0x2561   : > { %v5317_v13 = vsel %vm325_vm0, %v6803_v46, 0.0 }
0x2562   : > { %5318 = vadd.xlane.f32.xlu0 %v5317_v13  ;;  %6272 = vmatpush.xpose.msk.msrb.mxu2 %vm476_vm1, %v5362_v1 }
0x2565   : > { %v5640_v37 = vpop.permute.xlu2 %5639 }
0x256d   : > { %v5514_v3 = vpop.permute.xlu2 %5513 }
0x2575   : > { %v5512_v41 = vpop.permute.xlu2 %5511 }
0x2576   : > { %5359 = vrot.lane.b32.xlu0 %v5182_v57, %s6898_s15 }
0x257e   : > { %5515 = vrot.lane.b32.xlu0 %v8639_v20, %s6896_s11 }
0x2586   : > { %5635 = vrot.lane.b32.xlu0 %v8647_v29, %s6897_s12 }
0x258e   : > { %5509 = vrot.lane.b32.xlu0 %v5182_v57, %s6896_s11 }
0x25d5   : > { %v5319_v21 = vpop.xlane.xlu0 %5318 }
0x25d6   : > { %6804 = vrcp.f32 %v5319_v21  ;;  %v5331_v58 = vand.u32 2147483648, %v5319_v21  ;;  %v5329_v14 = vand.u32 2147483647, %v5319_v21  ;;  %vm5325_vm15 = vweird.f32 %v5319_v21 }
0x25d8   : > { %v5332_v31 = vor.u32 1.1754944e-38, %v5331_v58  ;;  %vm5330_vm3 = vcmp.eq.f32.partialorder %v5329_v14, 8.507059e+37 }
0x25dc   : > { %v6805_v39 = vpop.eup %6804 }
0x25dd   : > { %v5321_v50 = vmul.f32 %v6805_v39, %v5319_v21  ;;  %vm5326_vm14 = vweird.f32 %v6805_v39 }
0x25de   : > { %vm5327_vm2 = vmor %vm5325_vm15, %vm5326_vm14 }
0x25df   : > { %v5322_v28 = vsub.f32 1.0, %v5321_v50 }
0x25e1   : > { %v5323_v33 = vmul.f32 %v6805_v39, %v5322_v28 }
0x25e3   : > { %v5324_v34 = vadd.f32 %v6805_v39, %v5323_v33 }
0x25e5   : > { %v5328_v20 = vsel %vm5327_vm2, %v6805_v39, %v5324_v34 }
0x25e6   : > { %v5333_v16 = vsel %vm5330_vm3, %v5332_v31, %v5328_v20 }
0x25e7   : > { %v5335_v29 = vmul.f32 %v6803_v46, %v5333_v16 }
0x25e8   : > { %v5360_v36 = vpop.permute.xlu0 %5359 }
0x25e9   : > { %6268 = vmatmul.msk.f32.vlgmr.msra.gmra.mxu2 %vm325_vm0, %v5335_v29  ;;  %v6218_v29 = vld [vmem:[%s8872_s4 + $0x148] sm:$0xff] }
0x25ea   : > { %5504 = vmatpush.msra.mxu2 %v6217_v40 }
0x25f0   : > { %v5516_v18 = vpop.permute.xlu0 %5515 }
0x25f1   : > { %6273 = vmatmul.msk.f32.vlgmr.msrb.gmra.mxu2 %vm476_vm1, %v5360_v36  ;;  %6278 = vmatpush.xpose.msk.msrb.mxu3 %vm476_vm1, %v5516_v18 }
0x25f2   : > { %6284 = vmatpush.xpose.msk.msrb.mxu2 %vm476_vm1, %v8687_v63 }
0x25f5   : > { %6279 = vmatpush.xpose.msk.msrb.mxu3 %vm476_vm1, %v5514_v3 }
0x25f6   : > { %6285 = vmatpush.xpose.msk.msrb.mxu2 %vm476_vm1, %v5640_v37 }
0x25f8   : > { %v5636_v24 = vpop.permute.xlu0 %5635 }
0x25f9   : > { %6280 = vmatpush.xpose.msk.msrb.mxu3 %vm476_vm1, %v5512_v41 }
0x25fa   : > { %6286 = vmatpush.xpose.msk.msrb.mxu2 %vm476_vm1, %v5638_v8 }
0x25fe   : > { %6287 = vmatpush.xpose.msk.msrb.mxu2 %vm476_vm1, %v5636_v24 }
0x2600   : > { %v5510_v43 = vpop.permute.xlu0 %5509 }
0x2601   : > { %6281 = vmatmul.msk.f32.vlgmr.msrb.gmra.mxu3 %vm476_vm1, %v5510_v43 }
0x266c   : > { %v5356_v15 = vpop.f32.mrf.mxu2 }
0x266d   : > { %6276 = vmatmul.msk.f32.vlgmr.msra.gmra.mxu2 %vm476_vm1, %v5356_v15 }
0x2674   : > { %v5396_v30 = vpop.f32.mrf.mxu2 }
0x2675   : > { %6288 = vmatmul.msk.f32.vlgmr.msrb.gmra.mxu2 %vm476_vm1, %v5634_v44  ;;  %v5399_v22 = vsel %vm325_vm0, %v5396_v30, -inf }
0x2676   : > { %5400 = vmax.xlane.f32.xlu1 %v5399_v22 }
0x2684   : > { %v5546_v55 = vpop.f32.mrf.mxu3 }
0x2685   : > { %v5549_v52 = vsel %vm325_vm0, %v5546_v55, -inf }
0x2686   : > { %5550 = vmax.xlane.f32.xlu0 %v5549_v52 }
0x268f   : > { %6555 = vrot.lane.b32.xlu1 %v8695_v5, %s6898_s15 }
0x26e9   : > { %v5401_v25 = vpop.xlane.xlu1 %5400 }
0x26ea   : > { %v5402_v26 = vsub.f32 %v5396_v30, %v5401_v25 }
0x26ec   : > { %v5403_v53 = vmul.f32 1.442695, %v5402_v26 }
0x26ee   : > { %6806 = vpow2.f32 %v5403_v53 }
0x26f0   : > { %v8737_v12 = vpop.f32.mrf.mxu2 }
0x26f4   : > { %v6807_v32 = vpop.eup %6806 }
0x26f5   : > { %v5405_v47 = vsel %vm325_vm0, %v6807_v32, 0.0 }
0x26f6   : > { %5406 = vadd.xlane.f32.xlu1 %v5405_v47 }
0x26f8   : > { %v5670_v11 = vpop.f32.mrf.mxu2 }
0x26f9   : > { %v5673_v48 = vsel %vm325_vm0, %v5670_v11, -inf  ;;  %v5551_v62 = vpop.xlane.xlu0 %5550 }
0x26fa   : > { %v5552_v42 = vsub.f32 %v5546_v55, %v5551_v62  ;;  %5674 = vmax.xlane.f32.xlu2 %v5673_v48 }
0x26fc   : > { %v5553_v4 = vmul.f32 1.442695, %v5552_v42 }
0x26fe   : > { %6808 = vpow2.f32 %v5553_v4 }
0x2701   : > { %v6556_v1 = vpop.permute.xlu1 %6555 }
0x2702   : > { %v6557_v63 = vunpack.i.l.bf16 %v6556_v1  ;;  %v6558_v51 = vunpack.i.h.bf16 %v6556_v1 }
0x2704   : > { %v8741_v23 = vpop.eup %6808  ;;  %5455 = vmatpush.msrb.mxu1 %v6557_v63 }
0x2705   : > { %v5555_v2 = vsel %vm325_vm0, %v8741_v23, 0.0 }
0x2706   : > { %5456 = vmatpush.msrb.mxu1 %v6558_v51  ;;  %5556 = vadd.xlane.f32.xlu0 %v5555_v2  ;;  %v6220_v51 = vld [vmem:[%s8872_s4 + $0x158] sm:$0xff] }
0x270f   : > { %6575 = vrot.lane.b32.xlu1 %v8693_v49, %s6897_s12 }
0x2712   : > { %6560 = vrot.lane.b32.xlu2 %v8693_v49, %s6898_s15 }
0x271a   : > { %6565 = vrot.lane.b32.xlu0 %v8695_v5, %s6897_s12 }
0x2722   : > { %6570 = vrot.lane.b32.xlu0 %v8695_v5, %s6896_s11 }
0x2769   : > { %v5407_v54 = vpop.xlane.xlu1 %5406 }
0x276a   : > { %6810 = vrcp.f32 %v5407_v54  ;;  %v5419_v17 = vand.u32 2147483648, %v5407_v54  ;;  %v5417_v6 = vand.u32 2147483647, %v5407_v54  ;;  %vm5413_vm5 = vweird.f32 %v5407_v54 }
0x276c   : > { %v5420_v5 = vor.u32 1.1754944e-38, %v5419_v17  ;;  %vm5418_vm7 = vcmp.eq.f32.partialorder %v5417_v6, 8.507059e+37 }
0x276d   : > { %v5675_v57 = vpop.xlane.xlu2 %5674 }
0x276e   : > { %v5676_v38 = vsub.f32 %v5670_v11, %v5675_v57 }
0x2770   : > { %v6811_v45 = vpop.eup %6810  ;;  %v5677_v0 = vmul.f32 1.442695, %v5676_v38 }
0x2771   : > { %v5409_v27 = vmul.f32 %v6811_v45, %v5407_v54  ;;  %vm5414_vm4 = vweird.f32 %v6811_v45 }
0x2772   : > { %6812 = vpow2.f32 %v5677_v0  ;;  %vm5415_vm6 = vmor %vm5413_vm5, %vm5414_vm4 }
0x2773   : > { %v5410_v19 = vsub.f32 1.0, %v5409_v27  ;;  %v8780_v27 = vld [vmem:[%s8873_s5 + $0x10] sm:$0xff] }
0x2775   : > { %v5411_v61 = vmul.f32 %v6811_v45, %v5410_v19  ;;  %v6561_v59 = vpop.permute.xlu2 %6560  ;;  %v5757_v19 = vperm.slane %v8780_v27, 3 }
0x2776   : > { %v6562_v56 = vunpack.i.l.bf16 %v6561_v59  ;;  %v6563_v35 = vunpack.i.h.bf16 %v6561_v59 }
0x2777   : > { %v5412_v9 = vadd.f32 %v6811_v45, %v5411_v61 }
0x2778   : > { %v8753_v10 = vpop.eup %6812  ;;  %5457 = vmatpush.msrb.mxu1 %v6562_v56 }
0x2779   : > { %v5416_v46 = vsel %vm5415_vm6, %v6811_v45, %v5412_v9  ;;  %v5679_v13 = vsel %vm325_vm0, %v8753_v10, 0.0  ;;  %v5557_v50 = vpop.xlane.xlu0 %5556 }
0x277a   : > { %v5421_v21 = vsel %vm5418_vm7, %v5420_v5, %v5416_v46  ;;  %5680 = vadd.xlane.f32.xlu2 %v5679_v13  ;;  %5458 = vmatpush.msrb.mxu1 %v6563_v35  ;;  %6814 = vrcp.f32 %v5557_v50  ;;  %v5569_v24 = vand.u32 2147483648, %v5557_v50  ;;  %vm5563_vm10 = vweird.f32 %v5557_v50  ;;  %v6224_v46 = vld [vmem:[%s8872_s4 + $0x178] sm:$0xff]  ;;  %v6222_v13 = vld [vmem:[%s8872_s4 + $0x168] sm:$0xff] }
0x277b   : > { %v5423_v39 = vmul.f32 %v6807_v32, %v5421_v21  ;;  %v5567_v8 = vand.u32 2147483647, %v5557_v50  ;;  %v6221_v21 = vld [vmem:[%s8872_s4 + $0x160] sm:$0xff] }
0x277c   : > { %5481 = vmatpush.msra.mxu1 %v6218_v29  ;;  %v5570_v44 = vor.u32 1.1754944e-38, %v5569_v24 }
0x277d   : > { %6274 = vmatmul.msk.f32.vlgmr.msrb.gmra.mxu1 %vm325_vm0, %v5423_v39  ;;  %vm5568_vm12 = vcmp.eq.f32.partialorder %v5567_v8, 8.507059e+37  ;;  %v6232_v39 = vld [vmem:[%s8872_s4 + $0x1b8] sm:$0xff] }
0x2780   : > { %v6815_v40 = vpop.eup %6814 }
0x2781   : > { %v6576_v33 = vpop.permute.xlu1 %6575  ;;  %v5559_v36 = vmul.f32 %v6815_v40, %v5557_v50  ;;  %vm5564_vm8 = vweird.f32 %v6815_v40  ;;  %v6231_v50 = vld [vmem:[%s8872_s4 + $0x1b0] sm:$0xff] }
0x2782   : > { %v6577_v34 = vunpack.i.l.bf16 %v6576_v33  ;;  %v6578_v37 = vunpack.i.h.bf16 %v6576_v33  ;;  %vm5565_vm11 = vmor %vm5563_vm10, %vm5564_vm8 }
0x2783   : > { %v5560_v3 = vsub.f32 1.0, %v5559_v36 }
0x2785   : > { %v5561_v18 = vmul.f32 %v6815_v40, %v5560_v3 }
0x278c   : > { %v6566_v28 = vpop.permute.xlu0 %6565 }
0x278d   : > { %v6567_v58 = vunpack.i.l.bf16 %v6566_v28  ;;  %v6568_v14 = vunpack.i.h.bf16 %v6566_v28  ;;  %v6230_v28 = vld [vmem:[%s8872_s4 + $0x1a8] sm:$0xff] }
0x278f   : > { %5725 = vmatpush.msra.mxu3 %v6567_v58 }
0x2791   : > { %5726 = vmatpush.msra.mxu3 %v6568_v14  ;;  %v6229_v14 = vld [vmem:[%s8872_s4 + $0x1a0] sm:$0xff] }
0x2792   : > { %6580 = vrot.lane.b32.xlu2 %v8693_v49, %s6896_s11  ;;  %v5562_v49 = vadd.f32 %v6815_v40, %v5561_v18  ;;  %s6850_s11 = scalar_lea.hbm %s8874_s6, 16 }
0x2793   : > { %5727 = vmatpush.msra.mxu3 %v6577_v34  ;;  %p6852_p1 = scmp.lt.s32.totalorder %s6850_s11, %s6846_s10 }
0x2794   : > { %v6571_v31 = vpop.permute.xlu0 %6570  ;;  %v5566_v43 = vsel %vm5565_vm11, %v6815_v40, %v5562_v49  ;;  %v6234_v40 = vld [vmem:[%s8873_s5 + $0x18] sm:$0xff] }
0x2795   : > { %v6572_v20 = vunpack.i.l.bf16 %v6571_v31  ;;  %5728 = vmatpush.msra.mxu3 %v6578_v37  ;;  %v6573_v16 = vunpack.i.h.bf16 %v6571_v31  ;;  %v5571_v55 = vsel %vm5568_vm12, %v5570_v44, %v5566_v43  ;;  %v6228_v37 = vld [vmem:[%s8872_s4 + $0x198] sm:$0xff]  ;;  %v5782_v18 = vperm.slane %v6234_v40, 0  ;;  %v6226_v44 = vld [vmem:[%s8872_s4 + $0x188] sm:$0xff]  ;;  %p6853_p2 = por %p6852_p1, %p6851_p0 }
0x2796   : > { %v5573_v32 = vmul.f32 %v8741_v23, %v5571_v55  ;;  %v6219_v23 = vld [vmem:[%s8872_s4 + $0x150] sm:$0xff]  ;;  %v5784_v49 = vperm.slane %v6234_v40, 1 }
0x2797   : > { %5601 = vmatpush.msrb.mxu0 %v6572_v20  ;;  %5627 = vmatpush.msrb.mxu1 %v6219_v23  ;;  %p6854_p3 = pnand %p6853_p2, %p6849_p13 }
0x2798   : > { %5823 = vmatpush.msrb.mxu3 %v6232_v39 }
0x2799   : > { %5602 = vmatpush.msrb.mxu0 %v6573_v16 }
0x279a   : > { %5824 = vmatpush.msrb.mxu3 %v6231_v50 }
0x279c   : > { %5825 = vmatpush.msrb.mxu3 %v6230_v28 }
0x279e   : > { %5826 = vmatpush.msrb.mxu3 %v6229_v14 }
0x27a0   : > { %5827 = vmatpush.msrb.mxu3 %v6228_v37 }
0x27ed   : > { %v5681_v41 = vpop.xlane.xlu2 %5680 }
0x27ee   : > { %6816 = vrcp.f32 %v5681_v41  ;;  %v5693_v26 = vand.u32 2147483648, %v5681_v41  ;;  %v5691_v11 = vand.u32 2147483647, %v5681_v41  ;;  %vm5687_vm14 = vweird.f32 %v5681_v41 }
0x27f0   : > { %v5694_v42 = vor.u32 1.1754944e-38, %v5693_v26  ;;  %vm5692_vm2 = vcmp.eq.f32.partialorder %v5691_v11, 8.507059e+37  ;;  %v5811_v26 = vperm.slane %v8780_v27, 5 }
0x27f4   : > { %v6817_v15 = vpop.eup %6816 }
0x27f5   : > { %v5683_v30 = vmul.f32 %v6817_v15, %v5681_v41  ;;  %v6581_v22 = vpop.permute.xlu2 %6580  ;;  %vm5688_vm13 = vweird.f32 %v6817_v15 }
0x27f6   : > { %v6582_v52 = vunpack.i.l.bf16 %v6581_v22  ;;  %v6583_v53 = vunpack.i.h.bf16 %v6581_v22  ;;  %vm5689_vm15 = vmor %vm5687_vm14, %vm5688_vm13  ;;  %v5786_v22 = vperm.slane %v8780_v27, 4  ;;  %v5858_v27 = vperm.slane %v6234_v40, 2 }
0x27f7   : > { %v5684_v25 = vsub.f32 1.0, %v5683_v30  ;;  %v6225_v30 = vld [vmem:[%s8872_s4 + $0x180] sm:$0xff] }
0x27f8   : > { %5603 = vmatpush.msrb.mxu0 %v6582_v52 }
0x27f9   : > { %v5685_v47 = vmul.f32 %v6817_v15, %v5684_v25 }
0x27fa   : > { %v5460_v48 = vpop.f32.mrf.mxu1  ;;  %5604 = vmatpush.msrb.mxu0 %v6583_v53 }
0x27fb   : > { %v5686_v62 = vadd.f32 %v6817_v15, %v5685_v47  ;;  %6275 = vmatmul.msk.f32.vlgmr.msra.gmra.mxu1 %vm476_vm1, %v5460_v48  ;;  %6282 = vmatmul.msk.f32.vlgmr.msrb.gmra.mxu0 %vm325_vm0, %v5573_v32 }
0x27fc   : > { %5751 = vmatpush.msra.mxu0 %v6220_v51  ;;  %5802 = vmatpush.msra.mxu1 %v6224_v46 }
0x27fd   : > { %v5690_v4 = vsel %vm5689_vm15, %v6817_v15, %v5686_v62  ;;  %v6227_v15 = vld [vmem:[%s8872_s4 + $0x190] sm:$0xff] }
0x27fe   : > { %v5695_v1 = vsel %vm5692_vm2, %v5694_v42, %v5690_v4  ;;  %5828 = vmatpush.msrb.mxu3 %v6227_v15 }
0x27ff   : > { %v5697_v63 = vmul.f32 %v8753_v10, %v5695_v1 }
0x2800   : > { %5829 = vmatpush.msrb.mxu3 %v6226_v44 }
0x2801   : > { %6289 = vmatmul.msk.f32.vlgmr.msra.gmra.mxu3 %vm325_vm0, %v5697_v63 }
0x2802   : > { %5830 = vmatpush.msrb.mxu3 %v6225_v30 }
0x2878   : > { %v5606_v2 = vpop.f32.mrf.mxu0  ;;  %v5483_v57 = vpop.f32.mrf.mxu1 }
0x2879   : > { %6283 = vmatmul.msk.f32.vlgmr.msrb.gmra.mxu1 %vm476_vm1, %v5606_v2  ;;  %v5507_v45 = vadd.f32 %v8737_v12, %v5483_v57 }
0x2884   : > { %v5730_v54 = vpop.f32.mrf.mxu3 }
0x2885   : > { %6290 = vmatmul.msk.f32.vlgmr.msra.gmra.mxu0 %vm476_vm1, %v5730_v54 }
0x28f6   : > { %v5629_v38 = vpop.f32.mrf.mxu1 }
0x28f7   : > { %v5632_v0 = vadd.f32 %v5629_v38, %v5507_v45 }
0x2902   : > { %v5753_v17 = vpop.f32.mrf.mxu0 }
0x2903   : > { %v5756_v61 = vadd.f32 %v5753_v17, %v5632_v0  ;;  %v5860_v17 = vperm.slane %v6234_v40, 3 }
0x2905   : > { %v5758_v6 = vadd.f32 %v5757_v19, %v5756_v61 }
0x2907   : > { %v5759_v59 = vadd.f32 %v5758_v6, %v8675_v60  ;;  %v6223_v60 = vld [vmem:[%s8872_s4 + $0x170] sm:$0xff] }
0x2908   : > { %5803 = vmatpush.msra.mxu1 %v6223_v60 }
0x2909   : > { %v5760_v56 = vsel %vm325_vm0, %v5759_v59, 0.0 }
0x290a   : > { %5761 = vadd.xlane.f32.xlu0 %v5760_v56  ;;  %5804 = vmatpush.msra.mxu1 %v6222_v13 }
0x290c   : > { %5805 = vmatpush.msra.mxu1 %v6221_v21 }
0x297d   : > { %v5762_v9 = vpop.xlane.xlu0 %5761 }
0x297e   : > { %v5763_v10 = vmul.f32 %v5762_v9, %v7456_v7 }
0x2980   : > { %v5764_v12 = vsub.f32 %v5759_v59, %v5763_v10 }
0x2982   : > { %v5765_v5 = vmul.f32 %v5764_v12, %v5764_v12 }
0x2984   : > { %v5766_v35 = vsel %vm325_vm0, %v5765_v5, 0.0 }
0x2985   : > { %5767 = vadd.xlane.f32.xlu1 %v5766_v35 }
0x29f8   : > { %v5768_v58 = vpop.xlane.xlu1 %5767 }
0x29f9   : > { %v5769_v33 = vmul.f32 %v5768_v58, %v7456_v7 }
0x29fb   : > { %v5770_v34 = vadd.f32 1e-05, %v5769_v33 }
0x29fd   : > { %6818 = vrsqrt.f32 %v5770_v34  ;;  %vm5777_vm3 = vweird.f32 %v5770_v34 }
0x2a03   : > { %v6819_v31 = vpop.eup %6818 }
0x2a04   : > { %v5772_v20 = vmul.f32 %v6819_v31, %v5770_v34  ;;  %vm5778_vm1 = vweird.f32 %v6819_v31 }
0x2a05   : > { %vm5779_vm4 = vmor %vm5777_vm3, %vm5778_vm1 }
0x2a06   : > { %v5773_v16 = vmul.f32 %v6819_v31, %v5772_v20 }
0x2a08   : > { %v5774_v29 = vmul.f32 0.5, %v5773_v16 }
0x2a0a   : > { %v5775_v36 = vsub.f32 1.5, %v5774_v29 }
0x2a0c   : > { %v5776_v3 = vmul.f32 %v6819_v31, %v5775_v36 }
0x2a0e   : > { %v5780_v41 = vsel %vm5779_vm4, %v6819_v31, %v5776_v3 }
0x2a0f   : > { %v5781_v24 = vmul.f32 %v5780_v41, %v5764_v12 }
0x2a11   : > { %v5783_v8 = vmul.f32 %v5782_v18, %v5781_v24 }
0x2a13   : > { %v5785_v43 = vadd.f32 %v5784_v49, %v5783_v8 }
0x2a15   : > { %6291 = vmatmul.msk.f32.vlgmr.msra.gmra.mxu1 %vm325_vm0, %v5785_v43 }
0x2a92   : > { %v5807_v55 = vpop.f32.mrf.mxu1 }
0x2a93   : > { %v5808_v52 = vadd.f32 %v5807_v55, %v5786_v22 }
0x2a95   : > { %v5810_v25 = vmax.f32 %v5808_v52, 0.0 }
0x2a97   : > { %6292 = vmatmul.msk.f32.vlgmr.msrb.gmra.mxu3 %vm1650_vm9, %v5810_v25 }
0x2b1a   : > { %v5832_v53 = vpop.f32.mrf.mxu3 }
0x2b1b   : > { %v5833_v32 = vadd.f32 %v5832_v53, %v5811_v26 }
0x2b1d   : > { %v5835_v47 = vadd.f32 %v5833_v32, %v5785_v43 }
0x2b1f   : > { %v5836_v11 = vsel %vm325_vm0, %v5835_v47, 0.0 }
0x2b20   : > { %5837 = vadd.xlane.f32.xlu2 %v5836_v11 }
0x2b93   : > { %v5838_v48 = vpop.xlane.xlu2 %5837 }
0x2b94   : > { %v5839_v62 = vmul.f32 %v5838_v48, %v7456_v7 }
0x2b96   : > { %v5840_v42 = vsub.f32 %v5835_v47, %v5839_v62 }
0x2b98   : > { %v5841_v4 = vmul.f32 %v5840_v42, %v5840_v42 }
0x2b9a   : > { %v5842_v1 = vsel %vm325_vm0, %v5841_v4, 0.0 }
0x2b9b   : > { %5843 = vadd.xlane.f32.xlu2 %v5842_v1 }
0x2c0e   : > { %v5844_v63 = vpop.xlane.xlu2 %5843 }
0x2c0f   : > { %v5845_v23 = vmul.f32 %v5844_v63, %v7456_v7 }
0x2c11   : > { %v5846_v51 = vadd.f32 1e-05, %v5845_v23 }
0x2c13   : > { %6820 = vrsqrt.f32 %v5846_v51  ;;  %vm5853_vm5 = vweird.f32 %v5846_v51 }
0x2c19   : > { %v6821_v2 = vpop.eup %6820 }
0x2c1a   : > { %v5848_v54 = vmul.f32 %v6821_v2, %v5846_v51  ;;  %vm5854_vm9 = vweird.f32 %v6821_v2 }
0x2c1b   : > { %vm5855_vm6 = vmor %vm5853_vm5, %vm5854_vm9 }
0x2c1c   : > { %v5849_v57 = vmul.f32 %v6821_v2, %v5848_v54 }
0x2c1e   : > { %v5850_v38 = vmul.f32 0.5, %v5849_v57 }
0x2c20   : > { %v5851_v45 = vsub.f32 1.5, %v5850_v38 }
0x2c22   : > { %v5852_v0 = vmul.f32 %v6821_v2, %v5851_v45 }
0x2c24   : > { %v5856_v7 = vsel %vm5855_vm6, %v6821_v2, %v5852_v0 }
0x2c25   : > { %v5857_v19 = vmul.f32 %v5856_v7, %v5840_v42 }
0x2c27   : > { %v5859_v61 = vmul.f32 %v5858_v27, %v5857_v19 }
0x2c29   : > { %v5861_v6 = vadd.f32 %v5860_v17, %v5859_v61 }
0x2c2b   : > { %5862 = vst.msk [vmem:[%s257_s19] sm:$0xff] %vm325_vm0, %v5861_v6 }
0x2c2c   : > { %6857 = shalt.err (!%p6854_p3)
}
0x2c2d   : > { %6298 = dma.vmem_to_hbm [thread:$0]  (%p6973_p5), %s5877_s20, 128, %s5879_s26, %s5864_s25  }
0x2c2e PF: > { %p6304_p4 = scmp.ge.s32.totalorder %s6892_s24, 2  ;;  %s5890_s9 = sand.u32 1, %s6880_s21  }
0x2c2f   : > { %s5891_s17 = scalar_lea.sflag [#allocation3], %s5890_s9 }
0x2c30   : > { %p6301_p7 = pnand %p6304_p4, %p6977_p6 }
0x2c32   : > { %p6302_p8 = pneg %p6301_p7 }
0x2c34   : > { %6875 = dma.done.wait (%p6302_p8), %s5891_s17, 128  }
0x2c35   : > { %6877 = vsyncadd (%p6302_p8), %s5891_s17, 4294967168  ;;  %p16_p9 = scmp.ge.s32.totalorder %s6960_s27, 4   ;;  %s8883_s21 = smov %s6884_s22 }
0x2c36   : > { %s8884_s22 = smov %s6888_s23  ;;  %s8885_s23 = smov %s6971_s30 }
0x2c37   : > { %s8886_s24 = smov %s6960_s27  ;;  %18 = sbr.rel (!%p16_p9) target bundleno = 3 (0x3), region = 86 }
0x2c3c   :  { %5897 = vsyncpa [#allocation3], 1 }
0x2c3d   :  { %5899 = vsyncpa [#allocation3 + $0x1], 1 }

</bundles_post_ra>
